<compile_context>
chip_gen: v7x
topology: tpu7x:2x2x1
jax: 0.10.0
libtpu: 0.0.40
codegen_flags: <defaults>
</compile_context>

<pallas_src>
import math
from functools import partial

import jax
import jax.numpy as jnp
from jax.experimental import pallas as pl
from jax.experimental.pallas import tpu as pltpu

BF16 = jnp.bfloat16
F32 = jnp.float32


# --------------------------------------------------------------------------
# helpers
# --------------------------------------------------------------------------
def _half_block(n):
    """Largest block giving at most a 2-step 'parallel' grid over a batch axis."""
    return n // 2 if (n % 2 == 0 and n > 1) else n


def _rep_spec(shape):
    """BlockSpec for a grid-replicated (broadcast) operand (weights/biases)."""
    zeros = (0,) * len(shape)
    return pl.BlockSpec(shape, lambda i: zeros)


def _layer_norm(x, g, b, eps):
    mu = jnp.mean(x, axis=-1, keepdims=True)
    xc = x - mu
    var = jnp.mean(xc * xc, axis=-1, keepdims=True)
    return xc * jax.lax.rsqrt(var + eps) * g + b


# --------------------------------------------------------------------------
# Kernel 1: DP-mask high-pass folded into the ViT patch embedding
# --------------------------------------------------------------------------
def _patch_embed_kernel(p_ref, f_ref, w_ref, whpc_ref, b_ref, o_ref):
    p = p_ref[...]                                   # (bt, Np, C*ph*pw) f32
    bt, n_patch, kp = p.shape
    frames = f_ref[...]                              # (bt, C, H*W) f32
    # Per-frame per-channel spatial mean (the high-pass subtraction term).
    cm = jnp.mean(frames, axis=-1)                   # (bt, C)
    # corr = cm @ column-sums(W_hp); C is tiny, use broadcast-multiply-reduce.
    corr = jnp.sum(cm[:, :, None] * whpc_ref[...][None, :, :], axis=1)   # (bt, E)
    tok = jnp.dot(p.reshape(bt * n_patch, kp).astype(BF16), w_ref[...],
                  preferred_element_type=F32)        # (bt*Np, E)
    e = tok.shape[1]
    o_ref[...] = tok.reshape(bt, n_patch, e) + b_ref[...] - corr[:, None, :]


def patch_embed(patches, frames_cflat, w_eff, whp_csum, bias):
    bt, n_patch, kp = patches.shape
    c, hw = frames_cflat.shape[1], frames_cflat.shape[2]
    e = w_eff.shape[1]
    bb = _half_block(bt)
    return pl.pallas_call(
        _patch_embed_kernel,
        out_shape=jax.ShapeDtypeStruct((bt, n_patch, e), F32),
        grid=(bt // bb,),
        in_specs=[
            pl.BlockSpec((bb, n_patch, kp), lambda i: (i, 0, 0)),
            pl.BlockSpec((bb, c, hw), lambda i: (i, 0, 0)),
            _rep_spec((kp, e)),
            _rep_spec((c, e)),
            _rep_spec((1, e)),
        ],
        out_specs=pl.BlockSpec((bb, n_patch, e), lambda i: (i, 0, 0)),
        compiler_params=pltpu.CompilerParams(dimension_semantics=("parallel",)),
    )(patches, frames_cflat, w_eff.astype(BF16), whp_csum, bias.reshape(1, e))


# --------------------------------------------------------------------------
# Kernel 2: fused pre-LN transformer encoder layer
#   LN1 -> QKV(merged) -> multi-head attention (batched) -> out-proj ->
#   residual -> LN2 -> MLP(w1+GELU+w2) -> residual -> [pool | heads] tail
# --------------------------------------------------------------------------
def _encoder_kernel(x_ref, ln1g_ref, ln1b_ref, wqkv_ref, bqkv_ref,
                    wo_ref, bo_ref, ln2g_ref, ln2b_ref,
                    w1_ref, b1_ref, w2_ref, b2_ref, *rest,
                    num_heads, mode, eps):
    if mode == "heads":
        wh_ref, bh_ref, oseq_ref, opool_ref = rest
    else:
        (o_ref,) = rest

    x3 = x_ref[...]                                  # (bb, S, D) f32
    bb, s, d = x3.shape
    m = bb * s
    x = x3.reshape(m, d)
    dh = d // num_heads
    scale = 1.0 / math.sqrt(dh)

    # ---- attention block (pre-LN) ----
    h = _layer_norm(x, ln1g_ref[...], ln1b_ref[...], eps)
    qkv = jnp.dot(h.astype(BF16), wqkv_ref[...],
                  preferred_element_type=F32) + bqkv_ref[...]        # (m, 3D)
    q = qkv[:, 0:d].reshape(bb, s, d)
    k = qkv[:, d:2 * d].reshape(bb, s, d)
    v = qkv[:, 2 * d:3 * d].reshape(bb, s, d)

    head_outs = []
    for hd in range(num_heads):                      # static, tiny (H=2)
        sl = slice(hd * dh, (hd + 1) * dh)
        qh, kh, vh = q[:, :, sl], k[:, :, sl], v[:, :, sl]
        scores = jnp.einsum("bqd,bkd->bqk", qh.astype(BF16), kh.astype(BF16),
                            preferred_element_type=F32) * scale      # (bb,S,S)
        smax = jnp.max(scores, axis=-1, keepdims=True)
        p = jnp.exp(scores - smax)
        p = p * pl.reciprocal(jnp.sum(p, axis=-1, keepdims=True), approx=True)
        head_outs.append(
            jnp.einsum("bqk,bkd->bqd", p.astype(BF16), vh.astype(BF16),
                       preferred_element_type=F32))                  # (bb,S,Dh)
    attn = head_outs[0] if num_heads == 1 else jnp.concatenate(head_outs, axis=-1)
    attn = attn.reshape(m, d)
    x = x + jnp.dot(attn.astype(BF16), wo_ref[...],
                    preferred_element_type=F32) + bo_ref[...]

    # ---- MLP block (pre-LN, fused w1 + GELU + w2) ----
    h2 = _layer_norm(x, ln2g_ref[...], ln2b_ref[...], eps)
    m1 = jnp.dot(h2.astype(BF16), w1_ref[...],
                 preferred_element_type=F32) + b1_ref[...]
    # NOTE: tanh-approximate GELU (PyTorch nn.GELU default is exact erf).
    m1 = jax.nn.gelu(m1)
    x = x + jnp.dot(m1.astype(BF16), w2_ref[...],
                    preferred_element_type=F32) + b2_ref[...]

    # ---- fused tails ----
    if mode == "seq":
        o_ref[...] = x.reshape(bb, s, d)
    elif mode == "pool":
        o_ref[...] = jnp.mean(x.reshape(bb, s, d), axis=1, keepdims=True)
    else:  # "heads": fused cls / seg / fairness heads + temporal pooling
        y = jnp.dot(x.astype(BF16), wh_ref[...],
                    preferred_element_type=F32) + bh_ref[...]        # (m, Hn)
        y3 = y.reshape(bb, s, y.shape[1])
        oseq_ref[...] = y3
        opool_ref[...] = jnp.mean(y3, axis=1, keepdims=True)


def encoder_layer(x, p, num_heads, *, mode="seq", heads_w=None, heads_b=None,
                  eps=1e-5):
    """Fused encoder layer.

    mode="seq"  -> (Bq, S, D)
    mode="pool" -> (Bq, 1, D)                       (mean over S fused in)
    mode="heads"-> ((Bq, S, Hn), (Bq, 1, Hn))       (fused head matmul + pool)
    """
    bq, s, d = x.shape
    dm = p["w1"].shape[1]
    bb = _half_block(bq)

    in_specs = [
        pl.BlockSpec((bb, s, d), lambda i: (i, 0, 0)),
        _rep_spec((1, d)), _rep_spec((1, d)),
        _rep_spec((d, 3 * d)), _rep_spec((1, 3 * d)),
        _rep_spec((d, d)), _rep_spec((1, d)),
        _rep_spec((1, d)), _rep_spec((1, d)),
        _rep_spec((d, dm)), _rep_spec((1, dm)),
        _rep_spec((dm, d)), _rep_spec((1, d)),
    ]
    args = [
        x,
        p["ln1_g"], p["ln1_b"],
        p["wqkv"].astype(BF16), p["bqkv"].reshape(1, 3 * d),
        p["wo"].astype(BF16), p["bo"].reshape(1, d),
        p["ln2_g"], p["ln2_b"],
        p["w1"].astype(BF16), p["b1"].reshape(1, dm),
        p["w2"].astype(BF16), p["b2"].reshape(1, d),
    ]

    if mode == "heads":
        hn = heads_w.shape[1]
        in_specs += [_rep_spec((d, hn)), _rep_spec((1, hn))]
        args += [heads_w.astype(BF16), heads_b.reshape(1, hn)]
        out_shape = (jax.ShapeDtypeStruct((bq, s, hn), F32),
                     jax.ShapeDtypeStruct((bq, 1, hn), F32))
        out_specs = (pl.BlockSpec((bb, s, hn), lambda i: (i, 0, 0)),
                     pl.BlockSpec((bb, 1, hn), lambda i: (i, 0, 0)))
    elif mode == "pool":
        out_shape = jax.ShapeDtypeStruct((bq, 1, d), F32)
        out_specs = pl.BlockSpec((bb, 1, d), lambda i: (i, 0, 0))
    else:
        out_shape = jax.ShapeDtypeStruct((bq, s, d), F32)
        out_specs = pl.BlockSpec((bb, s, d), lambda i: (i, 0, 0))

    return pl.pallas_call(
        partial(_encoder_kernel, num_heads=num_heads, mode=mode, eps=eps),
        out_shape=out_shape,
        grid=(bq // bb,),
        in_specs=in_specs,
        out_specs=out_specs,
        compiler_params=pltpu.CompilerParams(dimension_semantics=("parallel",)),
    )(*args)


# --------------------------------------------------------------------------
# Kernel 3: audio encoder stand-in + both modality projections (fused)
# --------------------------------------------------------------------------
def _fuse_kernel(vf_ref, af_ref, aw_ref, ab_ref, vw_ref, vb_ref,
                 faw_ref, fab_ref, o_ref):
    vf = vf_ref[...]                                 # (B, T, Dv)
    af = af_ref[...]                                 # (B, nf, Fa)
    b, t, dv = vf.shape
    nf, fa_dim = af.shape[1], af.shape[2]

    # Audio encoder stand-in: framed linear + mean over audio frames.
    atok = jnp.dot(af.reshape(b * nf, fa_dim).astype(BF16), aw_ref[...],
                   preferred_element_type=F32) + ab_ref[...]         # (B*nf, Da)
    aemb = jnp.mean(atok.reshape(b, nf, atok.shape[1]), axis=1)      # (B, Da)

    fa = jnp.dot(aemb.astype(BF16), faw_ref[...],
                 preferred_element_type=F32) + fab_ref[...]          # (B, Df)
    fv = jnp.dot(vf.reshape(b * t, dv).astype(BF16), vw_ref[...],
                 preferred_element_type=F32) + vb_ref[...]           # (B*T, Df)
    o_ref[...] = fv.reshape(b, t, fv.shape[1]) + fa[:, None, :]


def fuse_inputs(visual_feat, audio_frames, params):
    b, t, dv = visual_feat.shape
    nf, fa_dim = audio_frames.shape[1], audio_frames.shape[2]
    da = params["audio_w"].shape[1]
    df = params["fuse_v_w"].shape[1]
    return pl.pallas_call(
        _fuse_kernel,
        out_shape=jax.ShapeDtypeStruct((b, t, df), F32),
        grid=(1,),
        in_specs=[
            pl.BlockSpec((b, t, dv), lambda i: (0, 0, 0)),
            pl.BlockSpec((b, nf, fa_dim), lambda i: (0, 0, 0)),
            _rep_spec((fa_dim, da)), _rep_spec((1, da)),
            _rep_spec((dv, df)), _rep_spec((1, df)),
            _rep_spec((da, df)), _rep_spec((1, df)),
        ],
        out_specs=pl.BlockSpec((b, t, df), lambda i: (0, 0, 0)),
    )(visual_feat, audio_frames,
      params["audio_w"].astype(BF16), params["audio_b"].reshape(1, da),
      params["fuse_v_w"].astype(BF16), params["fuse_v_b"].reshape(1, df),
      params["fuse_a_w"].astype(BF16), params["fuse_a_b"].reshape(1, df))


# --------------------------------------------------------------------------
# Parameter construction (deterministic, in-script)
# --------------------------------------------------------------------------
def _init_linear(key, fan_in, fan_out, scale=0.02):
    w = jax.random.normal(key, (fan_in, fan_out), F32) * scale
    b = jnp.zeros((fan_out,), F32)
    return w, b


def _init_encoder_layer(key, dim, mlp_dim):
    ks = jax.random.split(key, 4)
    p = {
        "ln1_g": jnp.ones((1, dim), F32), "ln1_b": jnp.zeros((1, dim), F32),
        "ln2_g": jnp.ones((1, dim), F32), "ln2_b": jnp.zeros((1, dim), F32),
    }
    p["wqkv"], p["bqkv"] = _init_linear(ks[0], dim, 3 * dim)   # merged Q/K/V
    p["wo"], p["bo"] = _init_linear(ks[1], dim, dim)
    p["w1"], p["b1"] = _init_linear(ks[2], dim, mlp_dim)
    p["w2"], p["b2"] = _init_linear(ks[3], mlp_dim, dim)
    return p


def init_m3tnet_params(key, *, patch=16, in_ch=6, embed_dim=128, audio_dim=384,
                       fusion_dim=256, audio_frame=128):
    ks = jax.random.split(key, 10)
    params = {}
    params["patch_w"], params["patch_b"] = _init_linear(
        ks[0], in_ch * patch * patch, embed_dim)
    params["visual_layer"] = _init_encoder_layer(ks[1], embed_dim, 2 * embed_dim)
    params["audio_w"], params["audio_b"] = _init_linear(ks[2], audio_frame, audio_dim)
    params["fuse_v_w"], params["fuse_v_b"] = _init_linear(ks[3], embed_dim, fusion_dim)
    params["fuse_a_w"], params["fuse_a_b"] = _init_linear(ks[4], audio_dim, fusion_dim)
    params["fusion_layer"] = _init_encoder_layer(ks[5], fusion_dim, 2 * fusion_dim)
    params["temporal_layer"] = _init_encoder_layer(ks[6], fusion_dim, 2 * fusion_dim)
    params["cls_w"], params["cls_b"] = _init_linear(ks[7], fusion_dim, 1)
    params["seg_w"], params["seg_b"] = _init_linear(ks[8], fusion_dim, 1)
    params["fair_w"], params["fair_b"] = _init_linear(ks[9], fusion_dim, 1)
    return params


# --------------------------------------------------------------------------
# M3TNet forward
# --------------------------------------------------------------------------
def m3tnet_forward(params, frames, audio, *, patch=16, num_heads=2,
                   audio_frame=128):
    B, T, C, H, W = frames.shape
    BT = B * T
    frames_bt = frames.reshape(BT, C, H, W).astype(F32)

    # ---- DP-mask + patch embed (fused): the 6-channel [rgb, high-pass] conv
    # is folded algebraically, so the high-pass stream never touches HBM.
    # TODO(synk): original DPMask internals are not in the provided source; a
    # spatial high-pass residual stream is used as the second input modality.
    gh, gw = H // patch, W // patch
    n_patch = gh * gw
    kp = C * patch * patch
    rgb_patches = (
        frames_bt.reshape(BT, C, gh, patch, gw, patch)
        .transpose(0, 2, 4, 1, 3, 5)                 # (BT, gh, gw, C, ph, pw)
        .reshape(BT, n_patch, kp)
    )
    frames_cflat = frames_bt.reshape(BT, C, H * W)
    pw = params["patch_w"]                           # rows: (rgb chans, hp chans)
    w_eff = pw[:kp] + pw[kp:]
    whp_csum = pw[kp:].reshape(C, patch * patch, -1).sum(axis=1)     # (C, E)
    tok = patch_embed(rgb_patches, frames_cflat, w_eff, whp_csum,
                      params["patch_b"])             # (BT, Np, 128)

    # ---- M2TR visual stream: fused encoder layer with patch-mean pooling.
    visual = encoder_layer(tok, params["visual_layer"], num_heads, mode="pool")
    visual_feat = visual.reshape(B, T, visual.shape[-1])             # (B, T, 128)

    # ---- Audio encoder + fusion projections (single fused kernel).
    # TODO(synk): pretrained 'openai/whisper-tiny' cannot be reproduced
    # in-script; a deterministic framed-linear encoder with the same 384-dim
    # output is used instead.
    n_frames = audio.shape[1] // audio_frame
    audio_frames = audio.astype(F32).reshape(B, n_frames, audio_frame)
    fused = fuse_inputs(visual_feat, audio_frames, params)           # (B, T, 256)

    # ---- Fusion transformer.
    fused = encoder_layer(fused, params["fusion_layer"], num_heads, mode="seq")

    # ---- Temporal transformer with fused cls / seg / fairness heads.
    heads_w = jnp.concatenate(
        [params["cls_w"], params["seg_w"], params["fair_w"]], axis=1)    # (256, 3)
    heads_b = jnp.concatenate(
        [params["cls_b"], params["seg_b"], params["fair_b"]])            # (3,)
    heads_seq, heads_pool = encoder_layer(
        fused, params["temporal_layer"], num_heads,
        mode="heads", heads_w=heads_w, heads_b=heads_b)

    class_out = heads_pool[:, 0, 0:1]                # (B, 1)
    seg_out = heads_seq[:, :, 1:2]                   # (B, T, 1)
    fairness_out = heads_pool[:, 0, 2:3]             # (B, 1)
    return class_out, seg_out, fairness_out


# --------------------------------------------------------------------------
if __name__ == "__main__":
    key = jax.random.PRNGKey(0)
    k_param, k_frames, k_audio = jax.random.split(key, 3)

    B, T, C, H, W = 2, 4, 3, 32, 32       # 2x2 grid of 16x16 patches per frame
    T_audio = 1024                        # 8 frames of 128 samples

    params = init_m3tnet_params(k_param)
    frames = jax.random.normal(k_frames, (B, T, C, H, W), jnp.float32)
    audio = jax.random.normal(k_audio, (B, T_audio), jnp.float32)

    fwd = jax.jit(m3tnet_forward)
    class_out, seg_out, fairness_out = fwd(params, frames, audio)
    jax.block_until_ready((class_out, seg_out, fairness_out))

    assert class_out.shape == (B, 1)
    assert seg_out.shape == (B, T, 1)
    assert fairness_out.shape == (B, 1)
    print("KERNEL_OK")
</pallas_src>

<mosaic_0001>
module attributes {stable_mosaic.version = 11 : i64} {
  func.func @_patch_embed_kernel(%arg0: i32, %arg1: memref<4x4x768xf32, #tpu.memory_space<vmem>>, %arg2: memref<4x3x1024xf32, #tpu.memory_space<vmem>>, %arg3: memref<768x128xbf16, #tpu.memory_space<vmem>>, %arg4: memref<3x128xf32, #tpu.memory_space<vmem>>, %arg5: memref<1x128xf32, #tpu.memory_space<vmem>>, %arg6: memref<4x4x128xf32, #tpu.memory_space<vmem>>) attributes {dimension_semantics = [#tpu.dimension_semantics<parallel>], iteration_bounds = array<i64: 2>, scalar_prefetch = 0 : i64, scratch_operands = 0 : i64, tpu.core_type = #tpu.core_type<tc>, window_params = [{transform_indices = @transform_0, window_bounds = array<i64: 4, 4, 768>}, {transform_indices = @transform_1, window_bounds = array<i64: 4, 3, 1024>}, {pipeline_mode = #tpu.pipeline_mode<synchronous>, transform_indices = @transform_2, window_bounds = array<i64: 768, 128>}, {pipeline_mode = #tpu.pipeline_mode<synchronous>, transform_indices = @transform_3, window_bounds = array<i64: 3, 128>}, {pipeline_mode = #tpu.pipeline_mode<synchronous>, transform_indices = @transform_4, window_bounds = array<i64: 1, 128>}, {transform_indices = @transform_5, window_bounds = array<i64: 4, 4, 128>}]} {
    %c0 = arith.constant 0 : index
    %c0_0 = arith.constant 0 : index
    %c0_1 = arith.constant 0 : index
    %0 = vector.load %arg1[%c0, %c0_0, %c0_1] : memref<4x4x768xf32, #tpu.memory_space<vmem>>, vector<4x4x768xf32>
    %c0_2 = arith.constant 0 : index
    %c0_3 = arith.constant 0 : index
    %c0_4 = arith.constant 0 : index
    %1 = vector.load %arg2[%c0_2, %c0_3, %c0_4] : memref<4x3x1024xf32, #tpu.memory_space<vmem>>, vector<4x3x1024xf32>
    %cst = arith.constant dense<0.000000e+00> : vector<4x3xf32>
    %2 = vector.multi_reduction <add>, %1, %cst [2] : vector<4x3x1024xf32> to vector<4x3xf32>
    %cst_5 = arith.constant 1.024000e+03 : f32
    %3 = vector.broadcast %cst_5 : f32 to vector<4x3xf32>
    %4 = arith.divf %2, %3 : vector<4x3xf32>
    %5 = vector.shape_cast %4 : vector<4x3xf32> to vector<4x3x1xf32>
    %c0_6 = arith.constant 0 : index
    %c0_7 = arith.constant 0 : index
    %6 = vector.load %arg4[%c0_6, %c0_7] : memref<3x128xf32, #tpu.memory_space<vmem>>, vector<3x128xf32>
    %7 = vector.shape_cast %6 : vector<3x128xf32> to vector<1x3x128xf32>
    %8 = vector.broadcast %5 : vector<4x3x1xf32> to vector<4x3x128xf32>
    %9 = vector.broadcast %7 : vector<1x3x128xf32> to vector<4x3x128xf32>
    %10 = arith.mulf %8, %9 : vector<4x3x128xf32>
    %cst_8 = arith.constant dense<0.000000e+00> : vector<4x128xf32>
    %11 = vector.multi_reduction <add>, %10, %cst_8 [1] : vector<4x3x128xf32> to vector<4x128xf32>
    %12 = vector.shape_cast %0 : vector<4x4x768xf32> to vector<16x768xf32>
    %13 = arith.truncf %12 : vector<16x768xf32> to vector<16x768xbf16>
    %c0_9 = arith.constant 0 : index
    %c0_10 = arith.constant 0 : index
    %14 = vector.load %arg3[%c0_9, %c0_10] : memref<768x128xbf16, #tpu.memory_space<vmem>>, vector<768x128xbf16>
    %cst_11 = arith.constant dense<0.000000e+00> : vector<16x128xf32>
    %15 = tpu.matmul %13, %14, %cst_11 {dimension_numbers = #tpu.dot_dimension_numbers<[1], [0], [0], [1], [0, 0, 1, 1], [], []>} : vector<16x768xbf16>, vector<768x128xbf16>, vector<16x128xf32> -> vector<16x128xf32>
    %16 = vector.shape_cast %15 : vector<16x128xf32> to vector<4x4x128xf32>
    %c0_12 = arith.constant 0 : index
    %c0_13 = arith.constant 0 : index
    %17 = vector.load %arg5[%c0_12, %c0_13] : memref<1x128xf32, #tpu.memory_space<vmem>>, vector<1x128xf32>
    %18 = vector.shape_cast %17 : vector<1x128xf32> to vector<1x1x128xf32>
    %19 = vector.broadcast %18 : vector<1x1x128xf32> to vector<4x4x128xf32>
    %20 = arith.addf %16, %19 : vector<4x4x128xf32>
    %21 = vector.shape_cast %11 : vector<4x128xf32> to vector<4x1x128xf32>
    %22 = vector.broadcast %21 : vector<4x1x128xf32> to vector<4x4x128xf32>
    %23 = arith.subf %20, %22 : vector<4x4x128xf32>
    %c0_14 = arith.constant 0 : index
    %c0_15 = arith.constant 0 : index
    %c0_16 = arith.constant 0 : index
    %24 = vector.load %arg6[%c0_14, %c0_15, %c0_16] : memref<4x4x128xf32, #tpu.memory_space<vmem>>, vector<4x4x128xf32>
    tpu.vector_store %arg6[%c0_14, %c0_15, %c0_16], %23 {strides = array<i32>} : memref<4x4x128xf32, #tpu.memory_space<vmem>>, vector<4x4x128xf32>,
    return
  }
  func.func @transform_0(%arg0: i32) -> (i32, i32, i32) {
    %c0_i32 = arith.constant 0 : i32
    %c0_i32_0 = arith.constant 0 : i32
    %c0_i32_1 = arith.constant 0 : i32
    return %arg0, %c0_i32, %c0_i32_0 : i32, i32, i32
  }
  func.func @transform_1(%arg0: i32) -> (i32, i32, i32) {
    %c0_i32 = arith.constant 0 : i32
    %c0_i32_0 = arith.constant 0 : i32
    %c0_i32_1 = arith.constant 0 : i32
    return %arg0, %c0_i32, %c0_i32_0 : i32, i32, i32
  }
  func.func @transform_2(%arg0: i32) -> (i32, i32) {
    %c0_i32 = arith.constant 0 : i32
    %c0_i32_0 = arith.constant 0 : i32
    %c0_i32_1 = arith.constant 0 : i32
    return %c0_i32, %c0_i32_0 : i32, i32
  }
  func.func @transform_3(%arg0: i32) -> (i32, i32) {
    %c0_i32 = arith.constant 0 : i32
    %c0_i32_0 = arith.constant 0 : i32
    %c0_i32_1 = arith.constant 0 : i32
    return %c0_i32, %c0_i32_0 : i32, i32
  }
  func.func @transform_4(%arg0: i32) -> (i32, i32) {
    %c0_i32 = arith.constant 0 : i32
    %c0_i32_0 = arith.constant 0 : i32
    %c0_i32_1 = arith.constant 0 : i32
    return %c0_i32, %c0_i32_0 : i32, i32
  }
  func.func @transform_5(%arg0: i32) -> (i32, i32, i32) {
    %c0_i32 = arith.constant 0 : i32
    %c0_i32_0 = arith.constant 0 : i32
    %c0_i32_1 = arith.constant 0 : i32
    return %arg0, %c0_i32, %c0_i32_0 : i32, i32, i32
  }
}

module attributes {stable_mosaic.version = 11 : i64} {
  func.func @_encoder_kernel(%arg0: i32, %arg1: memref<4x4x128xf32, #tpu.memory_space<vmem>>, %arg2: memref<1x128xf32, #tpu.memory_space<vmem>>, %arg3: memref<1x128xf32, #tpu.memory_space<vmem>>, %arg4: memref<128x384xbf16, #tpu.memory_space<vmem>>, %arg5: memref<1x384xf32, #tpu.memory_space<vmem>>, %arg6: memref<128x128xbf16, #tpu.memory_space<vmem>>, %arg7: memref<1x128xf32, #tpu.memory_space<vmem>>, %arg8: memref<1x128xf32, #tpu.memory_space<vmem>>, %arg9: memref<1x128xf32, #tpu.memory_space<vmem>>, %arg10: memref<128x256xbf16, #tpu.memory_space<vmem>>, %arg11: memref<1x256xf32, #tpu.memory_space<vmem>>, %arg12: memref<256x128xbf16, #tpu.memory_space<vmem>>, %arg13: memref<1x128xf32, #tpu.memory_space<vmem>>, %arg14: memref<4x1x128xf32, #tpu.memory_space<vmem>>) attributes {dimension_semantics = [#tpu.dimension_semantics<parallel>], iteration_bounds = array<i64: 2>, scalar_prefetch = 0 : i64, scratch_operands = 0 : i64, tpu.core_type = #tpu.core_type<tc>, window_params = [{transform_indices = @transform_0, window_bounds = array<i64: 4, 4, 128>}, {pipeline_mode = #tpu.pipeline_mode<synchronous>, transform_indices = @transform_1, window_bounds = array<i64: 1, 128>}, {pipeline_mode = #tpu.pipeline_mode<synchronous>, transform_indices = @transform_2, window_bounds = array<i64: 1, 128>}, {pipeline_mode = #tpu.pipeline_mode<synchronous>, transform_indices = @transform_3, window_bounds = array<i64: 128, 384>}, {pipeline_mode = #tpu.pipeline_mode<synchronous>, transform_indices = @transform_4, window_bounds = array<i64: 1, 384>}, {pipeline_mode = #tpu.pipeline_mode<synchronous>, transform_indices = @transform_5, window_bounds = array<i64: 128, 128>}, {pipeline_mode = #tpu.pipeline_mode<synchronous>, transform_indices = @transform_6, window_bounds = array<i64: 1, 128>}, {pipeline_mode = #tpu.pipeline_mode<synchronous>, transform_indices = @transform_7, window_bounds = array<i64: 1, 128>}, {pipeline_mode = #tpu.pipeline_mode<synchronous>, transform_indices = @transform_8, window_bounds = array<i64: 1, 128>}, {pipeline_mode = #tpu.pipeline_mode<synchronous>, transform_indices = @transform_9, window_bounds = array<i64: 128, 256>}, {pipeline_mode = #tpu.pipeline_mode<synchronous>, transform_indices = @transform_10, window_bounds = array<i64: 1, 256>}, {pipeline_mode = #tpu.pipeline_mode<synchronous>, transform_indices = @transform_11, window_bounds = array<i64: 256, 128>}, {pipeline_mode = #tpu.pipeline_mode<synchronous>, transform_indices = @transform_12, window_bounds = array<i64: 1, 128>}, {transform_indices = @transform_13, window_bounds = array<i64: 4, 1, 128>}]} {
    %c0 = arith.constant 0 : index
    %c0_0 = arith.constant 0 : index
    %c0_1 = arith.constant 0 : index
    %0 = vector.load %arg1[%c0, %c0_0, %c0_1] : memref<4x4x128xf32, #tpu.memory_space<vmem>>, vector<4x4x128xf32>
    %1 = vector.shape_cast %0 : vector<4x4x128xf32> to vector<16x128xf32>
    %c0_2 = arith.constant 0 : index
    %c0_3 = arith.constant 0 : index
    %2 = vector.load %arg2[%c0_2, %c0_3] : memref<1x128xf32, #tpu.memory_space<vmem>>, vector<1x128xf32>
    %c0_4 = arith.constant 0 : index
    %c0_5 = arith.constant 0 : index
    %3 = vector.load %arg3[%c0_4, %c0_5] : memref<1x128xf32, #tpu.memory_space<vmem>>, vector<1x128xf32>
    %cst = arith.constant dense<0.000000e+00> : vector<16xf32>
    %4 = vector.multi_reduction <add>, %1, %cst [1] : vector<16x128xf32> to vector<16xf32>
    %5 = vector.shape_cast %4 : vector<16xf32> to vector<16x1xf32>
    %cst_6 = arith.constant 1.280000e+02 : f32
    %6 = vector.broadcast %cst_6 : f32 to vector<16x1xf32>
    %7 = arith.divf %5, %6 : vector<16x1xf32>
    %8 = vector.broadcast %7 : vector<16x1xf32> to vector<16x128xf32>
    %9 = arith.subf %1, %8 : vector<16x128xf32>
    %10 = arith.mulf %9, %9 : vector<16x128xf32>
    %cst_7 = arith.constant dense<0.000000e+00> : vector<16xf32>
    %11 = vector.multi_reduction <add>, %10, %cst_7 [1] : vector<16x128xf32> to vector<16xf32>
    %12 = vector.shape_cast %11 : vector<16xf32> to vector<16x1xf32>
    %cst_8 = arith.constant 1.280000e+02 : f32
    %13 = vector.broadcast %cst_8 : f32 to vector<16x1xf32>
    %14 = arith.divf %12, %13 : vector<16x1xf32>
    %cst_9 = arith.constant 9.99999974E-6 : f32
    %15 = vector.broadcast %cst_9 : f32 to vector<16x1xf32>
    %16 = arith.addf %14, %15 : vector<16x1xf32>
    %17 = math.rsqrt %16 : vector<16x1xf32>
    %18 = vector.broadcast %17 : vector<16x1xf32> to vector<16x128xf32>
    %19 = arith.mulf %9, %18 : vector<16x128xf32>
    %20 = vector.broadcast %2 : vector<1x128xf32> to vector<16x128xf32>
    %21 = arith.mulf %19, %20 : vector<16x128xf32>
    %22 = vector.broadcast %3 : vector<1x128xf32> to vector<16x128xf32>
    %23 = arith.addf %21, %22 : vector<16x128xf32>
    %24 = arith.truncf %23 : vector<16x128xf32> to vector<16x128xbf16>
    %c0_10 = arith.constant 0 : index
    %c0_11 = arith.constant 0 : index
    %25 = vector.load %arg4[%c0_10, %c0_11] : memref<128x384xbf16, #tpu.memory_space<vmem>>, vector<128x384xbf16>
    %cst_12 = arith.constant dense<0.000000e+00> : vector<16x384xf32>
    %26 = tpu.matmul %24, %25, %cst_12 {dimension_numbers = #tpu.dot_dimension_numbers<[1], [0], [0], [1], [0, 0, 1, 1], [], []>} : vector<16x128xbf16>, vector<128x384xbf16>, vector<16x384xf32> -> vector<16x384xf32>
    %c0_13 = arith.constant 0 : index
    %c0_14 = arith.constant 0 : index
    %27 = vector.load %arg5[%c0_13, %c0_14] : memref<1x384xf32, #tpu.memory_space<vmem>>, vector<1x384xf32>
    %28 = vector.broadcast %27 : vector<1x384xf32> to vector<16x384xf32>
    %29 = arith.addf %26, %28 : vector<16x384xf32>
    %30 = vector.extract_strided_slice %29 {offsets = [0, 0], sizes = [16, 128], strides = [1, 1]} : vector<16x384xf32> to vector<16x128xf32>
    %31 = vector.shape_cast %30 : vector<16x128xf32> to vector<4x4x128xf32>
    %32 = vector.extract_strided_slice %29 {offsets = [0, 128], sizes = [16, 128], strides = [1, 1]} : vector<16x384xf32> to vector<16x128xf32>
    %33 = vector.shape_cast %32 : vector<16x128xf32> to vector<4x4x128xf32>
    %34 = vector.extract_strided_slice %29 {offsets = [0, 256], sizes = [16, 128], strides = [1, 1]} : vector<16x384xf32> to vector<16x128xf32>
    %35 = vector.shape_cast %34 : vector<16x128xf32> to vector<4x4x128xf32>
    %36 = vector.extract_strided_slice %31 {offsets = [0, 0, 0], sizes = [4, 4, 64], strides = [1, 1, 1]} : vector<4x4x128xf32> to vector<4x4x64xf32>
    %37 = vector.extract_strided_slice %33 {offsets = [0, 0, 0], sizes = [4, 4, 64], strides = [1, 1, 1]} : vector<4x4x128xf32> to vector<4x4x64xf32>
    %38 = vector.extract_strided_slice %35 {offsets = [0, 0, 0], sizes = [4, 4, 64], strides = [1, 1, 1]} : vector<4x4x128xf32> to vector<4x4x64xf32>
    %39 = arith.truncf %36 : vector<4x4x64xf32> to vector<4x4x64xbf16>
    %40 = arith.truncf %37 : vector<4x4x64xf32> to vector<4x4x64xbf16>
    "tpu.trace_start"() <{level = 10 : i32, message = "bqd,bkd->bqk"}> : () -> ()
    %cst_15 = arith.constant dense<0.000000e+00> : vector<4x4x4xf32>
    %41 = tpu.matmul %39, %40, %cst_15 {dimension_numbers = #tpu.dot_dimension_numbers<[2], [2], [1], [1], [0, 0, 0, 1, 1, 1], [0], [0]>} : vector<4x4x64xbf16>, vector<4x4x64xbf16>, vector<4x4x4xf32> -> vector<4x4x4xf32>
    "tpu.trace_stop"() : () -> ()
    %cst_16 = arith.constant 1.250000e-01 : f32
    %42 = vector.broadcast %cst_16 : f32 to vector<4x4x4xf32>
    %43 = arith.mulf %41, %42 : vector<4x4x4xf32>
    %cst_17 = arith.constant dense<0xFF800000> : vector<4x4xf32>
    %44 = vector.multi_reduction <maximumf>, %43, %cst_17 [2] : vector<4x4x4xf32> to vector<4x4xf32>
    %45 = vector.shape_cast %44 : vector<4x4xf32> to vector<4x4x1xf32>
    %46 = vector.broadcast %45 : vector<4x4x1xf32> to vector<4x4x4xf32>
    %47 = arith.subf %43, %46 : vector<4x4x4xf32>
    %48 = math.exp %47 : vector<4x4x4xf32>
    %cst_18 = arith.constant dense<0.000000e+00> : vector<4x4xf32>
    %49 = vector.multi_reduction <add>, %48, %cst_18 [2] : vector<4x4x4xf32> to vector<4x4xf32>
    %50 = vector.shape_cast %49 : vector<4x4xf32> to vector<4x4x1xf32>
    %51 = tpu.reciprocal %50 {approx = true} : vector<4x4x1xf32> -> vector<4x4x1xf32>
    %52 = vector.broadcast %51 : vector<4x4x1xf32> to vector<4x4x4xf32>
    %53 = arith.mulf %48, %52 : vector<4x4x4xf32>
    %54 = arith.truncf %53 : vector<4x4x4xf32> to vector<4x4x4xbf16>
    %55 = arith.truncf %38 : vector<4x4x64xf32> to vector<4x4x64xbf16>
    "tpu.trace_start"() <{level = 10 : i32, message = "bqk,bkd->bqd"}> : () -> ()
    %cst_19 = arith.constant dense<0.000000e+00> : vector<4x4x64xf32>
    %56 = tpu.matmul %54, %55, %cst_19 {dimension_numbers = #tpu.dot_dimension_numbers<[2], [1], [1], [2], [0, 0, 0, 1, 1, 2], [0], [0]>} : vector<4x4x4xbf16>, vector<4x4x64xbf16>, vector<4x4x64xf32> -> vector<4x4x64xf32>
    "tpu.trace_stop"() : () -> ()
    %57 = vector.extract_strided_slice %31 {offsets = [0, 0, 64], sizes = [4, 4, 64], strides = [1, 1, 1]} : vector<4x4x128xf32> to vector<4x4x64xf32>
    %58 = vector.extract_strided_slice %33 {offsets = [0, 0, 64], sizes = [4, 4, 64], strides = [1, 1, 1]} : vector<4x4x128xf32> to vector<4x4x64xf32>
    %59 = vector.extract_strided_slice %35 {offsets = [0, 0, 64], sizes = [4, 4, 64], strides = [1, 1, 1]} : vector<4x4x128xf32> to vector<4x4x64xf32>
    %60 = arith.truncf %57 : vector<4x4x64xf32> to vector<4x4x64xbf16>
    %61 = arith.truncf %58 : vector<4x4x64xf32> to vector<4x4x64xbf16>
    "tpu.trace_start"() <{level = 10 : i32, message = "bqd,bkd->bqk"}> : () -> ()
    %cst_20 = arith.constant dense<0.000000e+00> : vector<4x4x4xf32>
    %62 = tpu.matmul %60, %61, %cst_20 {dimension_numbers = #tpu.dot_dimension_numbers<[2], [2], [1], [1], [0, 0, 0, 1, 1, 1], [0], [0]>} : vector<4x4x64xbf16>, vector<4x4x64xbf16>, vector<4x4x4xf32> -> vector<4x4x4xf32>
    "tpu.trace_stop"() : () -> ()
    %cst_21 = arith.constant 1.250000e-01 : f32
    %63 = vector.broadcast %cst_21 : f32 to vector<4x4x4xf32>
    %64 = arith.mulf %62, %63 : vector<4x4x4xf32>
    %cst_22 = arith.constant dense<0xFF800000> : vector<4x4xf32>
    %65 = vector.multi_reduction <maximumf>, %64, %cst_22 [2] : vector<4x4x4xf32> to vector<4x4xf32>
    %66 = vector.shape_cast %65 : vector<4x4xf32> to vector<4x4x1xf32>
    %67 = vector.broadcast %66 : vector<4x4x1xf32> to vector<4x4x4xf32>
    %68 = arith.subf %64, %67 : vector<4x4x4xf32>
    %69 = math.exp %68 : vector<4x4x4xf32>
    %cst_23 = arith.constant dense<0.000000e+00> : vector<4x4xf32>
    %70 = vector.multi_reduction <add>, %69, %cst_23 [2] : vector<4x4x4xf32> to vector<4x4xf32>
    %71 = vector.shape_cast %70 : vector<4x4xf32> to vector<4x4x1xf32>
    %72 = tpu.reciprocal %71 {approx = true} : vector<4x4x1xf32> -> vector<4x4x1xf32>
    %73 = vector.broadcast %72 : vector<4x4x1xf32> to vector<4x4x4xf32>
    %74 = arith.mulf %69, %73 : vector<4x4x4xf32>
    %75 = arith.truncf %74 : vector<4x4x4xf32> to vector<4x4x4xbf16>
    %76 = arith.truncf %59 : vector<4x4x64xf32> to vector<4x4x64xbf16>
    "tpu.trace_start"() <{level = 10 : i32, message = "bqk,bkd->bqd"}> : () -> ()
    %cst_24 = arith.constant dense<0.000000e+00> : vector<4x4x64xf32>
    %77 = tpu.matmul %75, %76, %cst_24 {dimension_numbers = #tpu.dot_dimension_numbers<[2], [1], [1], [2], [0, 0, 0, 1, 1, 2], [0], [0]>} : vector<4x4x4xbf16>, vector<4x4x64xbf16>, vector<4x4x64xf32> -> vector<4x4x64xf32>
    "tpu.trace_stop"() : () -> ()
    %78 = tpu.concatenate %56, %77 in 2 : vector<4x4x64xf32>, vector<4x4x64xf32> -> vector<4x4x128xf32>
    %79 = vector.shape_cast %78 : vector<4x4x128xf32> to vector<16x128xf32>
    %80 = arith.truncf %79 : vector<16x128xf32> to vector<16x128xbf16>
    %c0_25 = arith.constant 0 : index
    %c0_26 = arith.constant 0 : index
    %81 = vector.load %arg6[%c0_25, %c0_26] : memref<128x128xbf16, #tpu.memory_space<vmem>>, vector<128x128xbf16>
    %cst_27 = arith.constant dense<0.000000e+00> : vector<16x128xf32>
    %82 = tpu.matmul %80, %81, %cst_27 {dimension_numbers = #tpu.dot_dimension_numbers<[1], [0], [0], [1], [0, 0, 1, 1], [], []>} : vector<16x128xbf16>, vector<128x128xbf16>, vector<16x128xf32> -> vector<16x128xf32>
    %83 = arith.addf %1, %82 : vector<16x128xf32>
    %c0_28 = arith.constant 0 : index
    %c0_29 = arith.constant 0 : index
    %84 = vector.load %arg7[%c0_28, %c0_29] : memref<1x128xf32, #tpu.memory_space<vmem>>, vector<1x128xf32>
    %85 = vector.broadcast %84 : vector<1x128xf32> to vector<16x128xf32>
    %86 = arith.addf %83, %85 : vector<16x128xf32>
    %c0_30 = arith.constant 0 : index
    %c0_31 = arith.constant 0 : index
    %87 = vector.load %arg8[%c0_30, %c0_31] : memref<1x128xf32, #tpu.memory_space<vmem>>, vector<1x128xf32>
    %c0_32 = arith.constant 0 : index
    %c0_33 = arith.constant 0 : index
    %88 = vector.load %arg9[%c0_32, %c0_33] : memref<1x128xf32, #tpu.memory_space<vmem>>, vector<1x128xf32>
    %cst_34 = arith.constant dense<0.000000e+00> : vector<16xf32>
    %89 = vector.multi_reduction <add>, %86, %cst_34 [1] : vector<16x128xf32> to vector<16xf32>
    %90 = vector.shape_cast %89 : vector<16xf32> to vector<16x1xf32>
    %cst_35 = arith.constant 1.280000e+02 : f32
    %91 = vector.broadcast %cst_35 : f32 to vector<16x1xf32>
    %92 = arith.divf %90, %91 : vector<16x1xf32>
    %93 = vector.broadcast %92 : vector<16x1xf32> to vector<16x128xf32>
    %94 = arith.subf %86, %93 : vector<16x128xf32>
    %95 = arith.mulf %94, %94 : vector<16x128xf32>
    %cst_36 = arith.constant dense<0.000000e+00> : vector<16xf32>
    %96 = vector.multi_reduction <add>, %95, %cst_36 [1] : vector<16x128xf32> to vector<16xf32>
    %97 = vector.shape_cast %96 : vector<16xf32> to vector<16x1xf32>
    %cst_37 = arith.constant 1.280000e+02 : f32
    %98 = vector.broadcast %cst_37 : f32 to vector<16x1xf32>
    %99 = arith.divf %97, %98 : vector<16x1xf32>
    %cst_38 = arith.constant 9.99999974E-6 : f32
    %100 = vector.broadcast %cst_38 : f32 to vector<16x1xf32>
    %101 = arith.addf %99, %100 : vector<16x1xf32>
    %102 = math.rsqrt %101 : vector<16x1xf32>
    %103 = vector.broadcast %102 : vector<16x1xf32> to vector<16x128xf32>
    %104 = arith.mulf %94, %103 : vector<16x128xf32>
    %105 = vector.broadcast %87 : vector<1x128xf32> to vector<16x128xf32>
    %106 = arith.mulf %104, %105 : vector<16x128xf32>
    %107 = vector.broadcast %88 : vector<1x128xf32> to vector<16x128xf32>
    %108 = arith.addf %106, %107 : vector<16x128xf32>
    %109 = arith.truncf %108 : vector<16x128xf32> to vector<16x128xbf16>
    %c0_39 = arith.constant 0 : index
    %c0_40 = arith.constant 0 : index
    %110 = vector.load %arg10[%c0_39, %c0_40] : memref<128x256xbf16, #tpu.memory_space<vmem>>, vector<128x256xbf16>
    %cst_41 = arith.constant dense<0.000000e+00> : vector<16x256xf32>
    %111 = tpu.matmul %109, %110, %cst_41 {dimension_numbers = #tpu.dot_dimension_numbers<[1], [0], [0], [1], [0, 0, 1, 1], [], []>} : vector<16x128xbf16>, vector<128x256xbf16>, vector<16x256xf32> -> vector<16x256xf32>
    %c0_42 = arith.constant 0 : index
    %c0_43 = arith.constant 0 : index
    %112 = vector.load %arg11[%c0_42, %c0_43] : memref<1x256xf32, #tpu.memory_space<vmem>>, vector<1x256xf32>
    %113 = vector.broadcast %112 : vector<1x256xf32> to vector<16x256xf32>
    %114 = arith.addf %111, %113 : vector<16x256xf32>
    %115 = arith.mulf %114, %114 : vector<16x256xf32>
    %116 = arith.mulf %114, %115 : vector<16x256xf32>
    %cst_44 = arith.constant 4.471500e-02 : f32
    %117 = vector.broadcast %cst_44 : f32 to vector<16x256xf32>
    %118 = arith.mulf %117, %116 : vector<16x256xf32>
    %119 = arith.addf %114, %118 : vector<16x256xf32>
    %cst_45 = arith.constant 0.797884583 : f32
    %120 = vector.broadcast %cst_45 : f32 to vector<16x256xf32>
    %121 = arith.mulf %120, %119 : vector<16x256xf32>
    %122 = math.tanh %121 : vector<16x256xf32>
    %cst_46 = arith.constant 1.000000e+00 : f32
    %123 = vector.broadcast %cst_46 : f32 to vector<16x256xf32>
    %124 = arith.addf %123, %122 : vector<16x256xf32>
    %cst_47 = arith.constant 5.000000e-01 : f32
    %125 = vector.broadcast %cst_47 : f32 to vector<16x256xf32>
    %126 = arith.mulf %125, %124 : vector<16x256xf32>
    %127 = arith.mulf %114, %126 : vector<16x256xf32>
    %128 = arith.truncf %127 : vector<16x256xf32> to vector<16x256xbf16>
    %c0_48 = arith.constant 0 : index
    %c0_49 = arith.constant 0 : index
    %129 = vector.load %arg12[%c0_48, %c0_49] : memref<256x128xbf16, #tpu.memory_space<vmem>>, vector<256x128xbf16>
    %cst_50 = arith.constant dense<0.000000e+00> : vector<16x128xf32>
    %130 = tpu.matmul %128, %129, %cst_50 {dimension_numbers = #tpu.dot_dimension_numbers<[1], [0], [0], [1], [0, 0, 1, 1], [], []>} : vector<16x256xbf16>, vector<256x128xbf16>, vector<16x128xf32> -> vector<16x128xf32>
    %131 = arith.addf %86, %130 : vector<16x128xf32>
    %c0_51 = arith.constant 0 : index
    %c0_52 = arith.constant 0 : index
    %132 = vector.load %arg13[%c0_51, %c0_52] : memref<1x128xf32, #tpu.memory_space<vmem>>, vector<1x128xf32>
    %133 = vector.broadcast %132 : vector<1x128xf32> to vector<16x128xf32>
    %134 = arith.addf %131, %133 : vector<16x128xf32>
    %135 = vector.shape_cast %134 : vector<16x128xf32> to vector<4x4x128xf32>
    %cst_53 = arith.constant dense<0.000000e+00> : vector<4x128xf32>
    %136 = vector.multi_reduction <add>, %135, %cst_53 [1] : vector<4x4x128xf32> to vector<4x128xf32>
    %137 = vector.shape_cast %136 : vector<4x128xf32> to vector<4x1x128xf32>
    %cst_54 = arith.constant 4.000000e+00 : f32
    %138 = vector.broadcast %cst_54 : f32 to vector<4x1x128xf32>
    %139 = arith.divf %137, %138 : vector<4x1x128xf32>
    %c0_55 = arith.constant 0 : index
    %c0_56 = arith.constant 0 : index
    %c0_57 = arith.constant 0 : index
    %140 = vector.load %arg14[%c0_55, %c0_56, %c0_57] : memref<4x1x128xf32, #tpu.memory_space<vmem>>, vector<4x1x128xf32>
    tpu.vector_store %arg14[%c0_55, %c0_56, %c0_57], %139 {strides = array<i32>} : memref<4x1x128xf32, #tpu.memory_space<vmem>>, vector<4x1x128xf32>,
    return
  }
  func.func @transform_0(%arg0: i32) -> (i32, i32, i32) {
    %c0_i32 = arith.constant 0 : i32
    %c0_i32_0 = arith.constant 0 : i32
    %c0_i32_1 = arith.constant 0 : i32
    return %arg0, %c0_i32, %c0_i32_0 : i32, i32, i32
  }
  func.func @transform_1(%arg0: i32) -> (i32, i32) {
    %c0_i32 = arith.constant 0 : i32
    %c0_i32_0 = arith.constant 0 : i32
    %c0_i32_1 = arith.constant 0 : i32
    return %c0_i32, %c0_i32_0 : i32, i32
  }
  func.func @transform_2(%arg0: i32) -> (i32, i32) {
    %c0_i32 = arith.constant 0 : i32
    %c0_i32_0 = arith.constant 0 : i32
    %c0_i32_1 = arith.constant 0 : i32
    return %c0_i32, %c0_i32_0 : i32, i32
  }
  func.func @transform_3(%arg0: i32) -> (i32, i32) {
    %c0_i32 = arith.constant 0 : i32
    %c0_i32_0 = arith.constant 0 : i32
    %c0_i32_1 = arith.constant 0 : i32
    return %c0_i32, %c0_i32_0 : i32, i32
  }
  func.func @transform_4(%arg0: i32) -> (i32, i32) {
    %c0_i32 = arith.constant 0 : i32
    %c0_i32_0 = arith.constant 0 : i32
    %c0_i32_1 = arith.constant 0 : i32
    return %c0_i32, %c0_i32_0 : i32, i32
  }
  func.func @transform_5(%arg0: i32) -> (i32, i32) {
    %c0_i32 = arith.constant 0 : i32
    %c0_i32_0 = arith.constant 0 : i32
    %c0_i32_1 = arith.constant 0 : i32
    return %c0_i32, %c0_i32_0 : i32, i32
  }
  func.func @transform_6(%arg0: i32) -> (i32, i32) {
    %c0_i32 = arith.constant 0 : i32
    %c0_i32_0 = arith.constant 0 : i32
    %c0_i32_1 = arith.constant 0 : i32
    return %c0_i32, %c0_i32_0 : i32, i32
  }
  func.func @transform_7(%arg0: i32) -> (i32, i32) {
    %c0_i32 = arith.constant 0 : i32
    %c0_i32_0 = arith.constant 0 : i32
    %c0_i32_1 = arith.constant 0 : i32
    return %c0_i32, %c0_i32_0 : i32, i32
  }
  func.func @transform_8(%arg0: i32) -> (i32, i32) {
    %c0_i32 = arith.constant 0 : i32
    %c0_i32_0 = arith.constant 0 : i32
    %c0_i32_1 = arith.constant 0 : i32
    return %c0_i32, %c0_i32_0 : i32, i32
  }
  func.func @transform_9(%arg0: i32) -> (i32, i32) {
    %c0_i32 = arith.constant 0 : i32
    %c0_i32_0 = arith.constant 0 : i32
    %c0_i32_1 = arith.constant 0 : i32
    return %c0_i32, %c0_i32_0 : i32, i32
  }
  func.func @transform_10(%arg0: i32) -> (i32, i32) {
    %c0_i32 = arith.constant 0 : i32
    %c0_i32_0 = arith.constant 0 : i32
    %c0_i32_1 = arith.constant 0 : i32
    return %c0_i32, %c0_i32_0 : i32, i32
  }
  func.func @transform_11(%arg0: i32) -> (i32, i32) {
    %c0_i32 = arith.constant 0 : i32
    %c0_i32_0 = arith.constant 0 : i32
    %c0_i32_1 = arith.constant 0 : i32
    return %c0_i32, %c0_i32_0 : i32, i32
  }
  func.func @transform_12(%arg0: i32) -> (i32, i32) {
    %c0_i32 = arith.constant 0 : i32
    %c0_i32_0 = arith.constant 0 : i32
    %c0_i32_1 = arith.constant 0 : i32
    return %c0_i32, %c0_i32_0 : i32, i32
  }
  func.func @transform_13(%arg0: i32) -> (i32, i32, i32) {
    %c0_i32 = arith.constant 0 : i32
    %c0_i32_0 = arith.constant 0 : i32
    %c0_i32_1 = arith.constant 0 : i32
    return %arg0, %c0_i32, %c0_i32_0 : i32, i32, i32
  }
}

module attributes {stable_mosaic.version = 11 : i64} {
  func.func @_fuse_kernel(%arg0: i32, %arg1: memref<2x4x128xf32, #tpu.memory_space<vmem>>, %arg2: memref<2x8x128xf32, #tpu.memory_space<vmem>>, %arg3: memref<128x384xbf16, #tpu.memory_space<vmem>>, %arg4: memref<1x384xf32, #tpu.memory_space<vmem>>, %arg5: memref<128x256xbf16, #tpu.memory_space<vmem>>, %arg6: memref<1x256xf32, #tpu.memory_space<vmem>>, %arg7: memref<384x256xbf16, #tpu.memory_space<vmem>>, %arg8: memref<1x256xf32, #tpu.memory_space<vmem>>, %arg9: memref<2x4x256xf32, #tpu.memory_space<vmem>>) attributes {dimension_semantics = [#tpu.dimension_semantics<arbitrary>], iteration_bounds = array<i64: 1>, scalar_prefetch = 0 : i64, scratch_operands = 0 : i64, tpu.core_type = #tpu.core_type<tc>, window_params = [{pipeline_mode = #tpu.pipeline_mode<synchronous>, transform_indices = @transform_0, window_bounds = array<i64: 2, 4, 128>}, {pipeline_mode = #tpu.pipeline_mode<synchronous>, transform_indices = @transform_1, window_bounds = array<i64: 2, 8, 128>}, {pipeline_mode = #tpu.pipeline_mode<synchronous>, transform_indices = @transform_2, window_bounds = array<i64: 128, 384>}, {pipeline_mode = #tpu.pipeline_mode<synchronous>, transform_indices = @transform_3, window_bounds = array<i64: 1, 384>}, {pipeline_mode = #tpu.pipeline_mode<synchronous>, transform_indices = @transform_4, window_bounds = array<i64: 128, 256>}, {pipeline_mode = #tpu.pipeline_mode<synchronous>, transform_indices = @transform_5, window_bounds = array<i64: 1, 256>}, {pipeline_mode = #tpu.pipeline_mode<synchronous>, transform_indices = @transform_6, window_bounds = array<i64: 384, 256>}, {pipeline_mode = #tpu.pipeline_mode<synchronous>, transform_indices = @transform_7, window_bounds = array<i64: 1, 256>}, {pipeline_mode = #tpu.pipeline_mode<synchronous>, transform_indices = @transform_8, window_bounds = array<i64: 2, 4, 256>}]} {
    %c0 = arith.constant 0 : index
    %c0_0 = arith.constant 0 : index
    %c0_1 = arith.constant 0 : index
    %0 = vector.load %arg1[%c0, %c0_0, %c0_1] : memref<2x4x128xf32, #tpu.memory_space<vmem>>, vector<2x4x128xf32>
    %c0_2 = arith.constant 0 : index
    %c0_3 = arith.constant 0 : index
    %c0_4 = arith.constant 0 : index
    %1 = vector.load %arg2[%c0_2, %c0_3, %c0_4] : memref<2x8x128xf32, #tpu.memory_space<vmem>>, vector<2x8x128xf32>
    %2 = vector.shape_cast %1 : vector<2x8x128xf32> to vector<16x128xf32>
    %3 = arith.truncf %2 : vector<16x128xf32> to vector<16x128xbf16>
    %c0_5 = arith.constant 0 : index
    %c0_6 = arith.constant 0 : index
    %4 = vector.load %arg3[%c0_5, %c0_6] : memref<128x384xbf16, #tpu.memory_space<vmem>>, vector<128x384xbf16>
    %cst = arith.constant dense<0.000000e+00> : vector<16x384xf32>
    %5 = tpu.matmul %3, %4, %cst {dimension_numbers = #tpu.dot_dimension_numbers<[1], [0], [0], [1], [0, 0, 1, 1], [], []>} : vector<16x128xbf16>, vector<128x384xbf16>, vector<16x384xf32> -> vector<16x384xf32>
    %c0_7 = arith.constant 0 : index
    %c0_8 = arith.constant 0 : index
    %6 = vector.load %arg4[%c0_7, %c0_8] : memref<1x384xf32, #tpu.memory_space<vmem>>, vector<1x384xf32>
    %7 = vector.broadcast %6 : vector<1x384xf32> to vector<16x384xf32>
    %8 = arith.addf %5, %7 : vector<16x384xf32>
    %9 = vector.shape_cast %8 : vector<16x384xf32> to vector<2x8x384xf32>
    %cst_9 = arith.constant dense<0.000000e+00> : vector<2x384xf32>
    %10 = vector.multi_reduction <add>, %9, %cst_9 [1] : vector<2x8x384xf32> to vector<2x384xf32>
    %cst_10 = arith.constant 8.000000e+00 : f32
    %11 = vector.broadcast %cst_10 : f32 to vector<2x384xf32>
    %12 = arith.divf %10, %11 : vector<2x384xf32>
    %13 = arith.truncf %12 : vector<2x384xf32> to vector<2x384xbf16>
    %c0_11 = arith.constant 0 : index
    %c0_12 = arith.constant 0 : index
    %14 = vector.load %arg7[%c0_11, %c0_12] : memref<384x256xbf16, #tpu.memory_space<vmem>>, vector<384x256xbf16>
    %cst_13 = arith.constant dense<0.000000e+00> : vector<2x256xf32>
    %15 = tpu.matmul %13, %14, %cst_13 {dimension_numbers = #tpu.dot_dimension_numbers<[1], [0], [0], [1], [0, 0, 1, 1], [], []>} : vector<2x384xbf16>, vector<384x256xbf16>, vector<2x256xf32> -> vector<2x256xf32>
    %c0_14 = arith.constant 0 : index
    %c0_15 = arith.constant 0 : index
    %16 = vector.load %arg8[%c0_14, %c0_15] : memref<1x256xf32, #tpu.memory_space<vmem>>, vector<1x256xf32>
    %17 = vector.broadcast %16 : vector<1x256xf32> to vector<2x256xf32>
    %18 = arith.addf %15, %17 : vector<2x256xf32>
    %19 = vector.shape_cast %0 : vector<2x4x128xf32> to vector<8x128xf32>
    %20 = arith.truncf %19 : vector<8x128xf32> to vector<8x128xbf16>
    %c0_16 = arith.constant 0 : index
    %c0_17 = arith.constant 0 : index
    %21 = vector.load %arg5[%c0_16, %c0_17] : memref<128x256xbf16, #tpu.memory_space<vmem>>, vector<128x256xbf16>
    %cst_18 = arith.constant dense<0.000000e+00> : vector<8x256xf32>
    %22 = tpu.matmul %20, %21, %cst_18 {dimension_numbers = #tpu.dot_dimension_numbers<[1], [0], [0], [1], [0, 0, 1, 1], [], []>} : vector<8x128xbf16>, vector<128x256xbf16>, vector<8x256xf32> -> vector<8x256xf32>
    %c0_19 = arith.constant 0 : index
    %c0_20 = arith.constant 0 : index
    %23 = vector.load %arg6[%c0_19, %c0_20] : memref<1x256xf32, #tpu.memory_space<vmem>>, vector<1x256xf32>
    %24 = vector.broadcast %23 : vector<1x256xf32> to vector<8x256xf32>
    %25 = arith.addf %22, %24 : vector<8x256xf32>
    %26 = vector.shape_cast %25 : vector<8x256xf32> to vector<2x4x256xf32>
    %27 = vector.shape_cast %18 : vector<2x256xf32> to vector<2x1x256xf32>
    %28 = vector.broadcast %27 : vector<2x1x256xf32> to vector<2x4x256xf32>
    %29 = arith.addf %26, %28 : vector<2x4x256xf32>
    %c0_21 = arith.constant 0 : index
    %c0_22 = arith.constant 0 : index
    %c0_23 = arith.constant 0 : index
    %30 = vector.load %arg9[%c0_21, %c0_22, %c0_23] : memref<2x4x256xf32, #tpu.memory_space<vmem>>, vector<2x4x256xf32>
    tpu.vector_store %arg9[%c0_21, %c0_22, %c0_23], %29 {strides = array<i32>} : memref<2x4x256xf32, #tpu.memory_space<vmem>>, vector<2x4x256xf32>,
    return
  }
  func.func @transform_0(%arg0: i32) -> (i32, i32, i32) {
    %c0_i32 = arith.constant 0 : i32
    %c0_i32_0 = arith.constant 0 : i32
    %c0_i32_1 = arith.constant 0 : i32
    %c0_i32_2 = arith.constant 0 : i32
    return %c0_i32, %c0_i32_0, %c0_i32_1 : i32, i32, i32
  }
  func.func @transform_1(%arg0: i32) -> (i32, i32, i32) {
    %c0_i32 = arith.constant 0 : i32
    %c0_i32_0 = arith.constant 0 : i32
    %c0_i32_1 = arith.constant 0 : i32
    %c0_i32_2 = arith.constant 0 : i32
    return %c0_i32, %c0_i32_0, %c0_i32_1 : i32, i32, i32
  }
  func.func @transform_2(%arg0: i32) -> (i32, i32) {
    %c0_i32 = arith.constant 0 : i32
    %c0_i32_0 = arith.constant 0 : i32
    %c0_i32_1 = arith.constant 0 : i32
    return %c0_i32, %c0_i32_0 : i32, i32
  }
  func.func @transform_3(%arg0: i32) -> (i32, i32) {
    %c0_i32 = arith.constant 0 : i32
    %c0_i32_0 = arith.constant 0 : i32
    %c0_i32_1 = arith.constant 0 : i32
    return %c0_i32, %c0_i32_0 : i32, i32
  }
  func.func @transform_4(%arg0: i32) -> (i32, i32) {
    %c0_i32 = arith.constant 0 : i32
    %c0_i32_0 = arith.constant 0 : i32
    %c0_i32_1 = arith.constant 0 : i32
    return %c0_i32, %c0_i32_0 : i32, i32
  }
  func.func @transform_5(%arg0: i32) -> (i32, i32) {
    %c0_i32 = arith.constant 0 : i32
    %c0_i32_0 = arith.constant 0 : i32
    %c0_i32_1 = arith.constant 0 : i32
    return %c0_i32, %c0_i32_0 : i32, i32
  }
  func.func @transform_6(%arg0: i32) -> (i32, i32) {
    %c0_i32 = arith.constant 0 : i32
    %c0_i32_0 = arith.constant 0 : i32
    %c0_i32_1 = arith.constant 0 : i32
    return %c0_i32, %c0_i32_0 : i32, i32
  }
  func.func @transform_7(%arg0: i32) -> (i32, i32) {
    %c0_i32 = arith.constant 0 : i32
    %c0_i32_0 = arith.constant 0 : i32
    %c0_i32_1 = arith.constant 0 : i32
    return %c0_i32, %c0_i32_0 : i32, i32
  }
  func.func @transform_8(%arg0: i32) -> (i32, i32, i32) {
    %c0_i32 = arith.constant 0 : i32
    %c0_i32_0 = arith.constant 0 : i32
    %c0_i32_1 = arith.constant 0 : i32
    %c0_i32_2 = arith.constant 0 : i32
    return %c0_i32, %c0_i32_0, %c0_i32_1 : i32, i32, i32
  }
}

module attributes {stable_mosaic.version = 11 : i64} {
  func.func @_encoder_kernel(%arg0: i32, %arg1: memref<1x4x256xf32, #tpu.memory_space<vmem>>, %arg2: memref<1x256xf32, #tpu.memory_space<vmem>>, %arg3: memref<1x256xf32, #tpu.memory_space<vmem>>, %arg4: memref<256x768xbf16, #tpu.memory_space<vmem>>, %arg5: memref<1x768xf32, #tpu.memory_space<vmem>>, %arg6: memref<256x256xbf16, #tpu.memory_space<vmem>>, %arg7: memref<1x256xf32, #tpu.memory_space<vmem>>, %arg8: memref<1x256xf32, #tpu.memory_space<vmem>>, %arg9: memref<1x256xf32, #tpu.memory_space<vmem>>, %arg10: memref<256x512xbf16, #tpu.memory_space<vmem>>, %arg11: memref<1x512xf32, #tpu.memory_space<vmem>>, %arg12: memref<512x256xbf16, #tpu.memory_space<vmem>>, %arg13: memref<1x256xf32, #tpu.memory_space<vmem>>, %arg14: memref<1x4x256xf32, #tpu.memory_space<vmem>>) attributes {dimension_semantics = [#tpu.dimension_semantics<parallel>], iteration_bounds = array<i64: 2>, scalar_prefetch = 0 : i64, scratch_operands = 0 : i64, tpu.core_type = #tpu.core_type<tc>, window_params = [{transform_indices = @transform_0, window_bounds = array<i64: 1, 4, 256>}, {pipeline_mode = #tpu.pipeline_mode<synchronous>, transform_indices = @transform_1, window_bounds = array<i64: 1, 256>}, {pipeline_mode = #tpu.pipeline_mode<synchronous>, transform_indices = @transform_2, window_bounds = array<i64: 1, 256>}, {pipeline_mode = #tpu.pipeline_mode<synchronous>, transform_indices = @transform_3, window_bounds = array<i64: 256, 768>}, {pipeline_mode = #tpu.pipeline_mode<synchronous>, transform_indices = @transform_4, window_bounds = array<i64: 1, 768>}, {pipeline_mode = #tpu.pipeline_mode<synchronous>, transform_indices = @transform_5, window_bounds = array<i64: 256, 256>}, {pipeline_mode = #tpu.pipeline_mode<synchronous>, transform_indices = @transform_6, window_bounds = array<i64: 1, 256>}, {pipeline_mode = #tpu.pipeline_mode<synchronous>, transform_indices = @transform_7, window_bounds = array<i64: 1, 256>}, {pipeline_mode = #tpu.pipeline_mode<synchronous>, transform_indices = @transform_8, window_bounds = array<i64: 1, 256>}, {pipeline_mode = #tpu.pipeline_mode<synchronous>, transform_indices = @transform_9, window_bounds = array<i64: 256, 512>}, {pipeline_mode = #tpu.pipeline_mode<synchronous>, transform_indices = @transform_10, window_bounds = array<i64: 1, 512>}, {pipeline_mode = #tpu.pipeline_mode<synchronous>, transform_indices = @transform_11, window_bounds = array<i64: 512, 256>}, {pipeline_mode = #tpu.pipeline_mode<synchronous>, transform_indices = @transform_12, window_bounds = array<i64: 1, 256>}, {transform_indices = @transform_13, window_bounds = array<i64: 1, 4, 256>}]} {
    %c0 = arith.constant 0 : index
    %c0_0 = arith.constant 0 : index
    %c0_1 = arith.constant 0 : index
    %0 = vector.load %arg1[%c0, %c0_0, %c0_1] : memref<1x4x256xf32, #tpu.memory_space<vmem>>, vector<1x4x256xf32>
    %1 = vector.shape_cast %0 : vector<1x4x256xf32> to vector<4x256xf32>
    %c0_2 = arith.constant 0 : index
    %c0_3 = arith.constant 0 : index
    %2 = vector.load %arg2[%c0_2, %c0_3] : memref<1x256xf32, #tpu.memory_space<vmem>>, vector<1x256xf32>
    %c0_4 = arith.constant 0 : index
    %c0_5 = arith.constant 0 : index
    %3 = vector.load %arg3[%c0_4, %c0_5] : memref<1x256xf32, #tpu.memory_space<vmem>>, vector<1x256xf32>
    %cst = arith.constant dense<0.000000e+00> : vector<4xf32>
    %4 = vector.multi_reduction <add>, %1, %cst [1] : vector<4x256xf32> to vector<4xf32>
    %5 = vector.shape_cast %4 : vector<4xf32> to vector<4x1xf32>
    %cst_6 = arith.constant 2.560000e+02 : f32
    %6 = vector.broadcast %cst_6 : f32 to vector<4x1xf32>
    %7 = arith.divf %5, %6 : vector<4x1xf32>
    %8 = vector.broadcast %7 : vector<4x1xf32> to vector<4x256xf32>
    %9 = arith.subf %1, %8 : vector<4x256xf32>
    %10 = arith.mulf %9, %9 : vector<4x256xf32>
    %cst_7 = arith.constant dense<0.000000e+00> : vector<4xf32>
    %11 = vector.multi_reduction <add>, %10, %cst_7 [1] : vector<4x256xf32> to vector<4xf32>
    %12 = vector.shape_cast %11 : vector<4xf32> to vector<4x1xf32>
    %cst_8 = arith.constant 2.560000e+02 : f32
    %13 = vector.broadcast %cst_8 : f32 to vector<4x1xf32>
    %14 = arith.divf %12, %13 : vector<4x1xf32>
    %cst_9 = arith.constant 9.99999974E-6 : f32
    %15 = vector.broadcast %cst_9 : f32 to vector<4x1xf32>
    %16 = arith.addf %14, %15 : vector<4x1xf32>
    %17 = math.rsqrt %16 : vector<4x1xf32>
    %18 = vector.broadcast %17 : vector<4x1xf32> to vector<4x256xf32>
    %19 = arith.mulf %9, %18 : vector<4x256xf32>
    %20 = vector.broadcast %2 : vector<1x256xf32> to vector<4x256xf32>
    %21 = arith.mulf %19, %20 : vector<4x256xf32>
    %22 = vector.broadcast %3 : vector<1x256xf32> to vector<4x256xf32>
    %23 = arith.addf %21, %22 : vector<4x256xf32>
    %24 = arith.truncf %23 : vector<4x256xf32> to vector<4x256xbf16>
    %c0_10 = arith.constant 0 : index
    %c0_11 = arith.constant 0 : index
    %25 = vector.load %arg4[%c0_10, %c0_11] : memref<256x768xbf16, #tpu.memory_space<vmem>>, vector<256x768xbf16>
    %cst_12 = arith.constant dense<0.000000e+00> : vector<4x768xf32>
    %26 = tpu.matmul %24, %25, %cst_12 {dimension_numbers = #tpu.dot_dimension_numbers<[1], [0], [0], [1], [0, 0, 1, 1], [], []>} : vector<4x256xbf16>, vector<256x768xbf16>, vector<4x768xf32> -> vector<4x768xf32>
    %c0_13 = arith.constant 0 : index
    %c0_14 = arith.constant 0 : index
    %27 = vector.load %arg5[%c0_13, %c0_14] : memref<1x768xf32, #tpu.memory_space<vmem>>, vector<1x768xf32>
    %28 = vector.broadcast %27 : vector<1x768xf32> to vector<4x768xf32>
    %29 = arith.addf %26, %28 : vector<4x768xf32>
    %30 = vector.extract_strided_slice %29 {offsets = [0, 0], sizes = [4, 256], strides = [1, 1]} : vector<4x768xf32> to vector<4x256xf32>
    %31 = vector.shape_cast %30 : vector<4x256xf32> to vector<1x4x256xf32>
    %32 = vector.extract_strided_slice %29 {offsets = [0, 256], sizes = [4, 256], strides = [1, 1]} : vector<4x768xf32> to vector<4x256xf32>
    %33 = vector.shape_cast %32 : vector<4x256xf32> to vector<1x4x256xf32>
    %34 = vector.extract_strided_slice %29 {offsets = [0, 512], sizes = [4, 256], strides = [1, 1]} : vector<4x768xf32> to vector<4x256xf32>
    %35 = vector.shape_cast %34 : vector<4x256xf32> to vector<1x4x256xf32>
    %36 = vector.extract_strided_slice %31 {offsets = [0, 0, 0], sizes = [1, 4, 128], strides = [1, 1, 1]} : vector<1x4x256xf32> to vector<1x4x128xf32>
    %37 = vector.extract_strided_slice %33 {offsets = [0, 0, 0], sizes = [1, 4, 128], strides = [1, 1, 1]} : vector<1x4x256xf32> to vector<1x4x128xf32>
    %38 = vector.extract_strided_slice %35 {offsets = [0, 0, 0], sizes = [1, 4, 128], strides = [1, 1, 1]} : vector<1x4x256xf32> to vector<1x4x128xf32>
    %39 = arith.truncf %36 : vector<1x4x128xf32> to vector<1x4x128xbf16>
    %40 = arith.truncf %37 : vector<1x4x128xf32> to vector<1x4x128xbf16>
    "tpu.trace_start"() <{level = 10 : i32, message = "bqd,bkd->bqk"}> : () -> ()
    %cst_15 = arith.constant dense<0.000000e+00> : vector<1x4x4xf32>
    %41 = tpu.matmul %39, %40, %cst_15 {dimension_numbers = #tpu.dot_dimension_numbers<[2], [2], [1], [1], [0, 0, 0, 1, 1, 1], [0], [0]>} : vector<1x4x128xbf16>, vector<1x4x128xbf16>, vector<1x4x4xf32> -> vector<1x4x4xf32>
    "tpu.trace_stop"() : () -> ()
    %cst_16 = arith.constant 0.0883883461 : f32
    %42 = vector.broadcast %cst_16 : f32 to vector<1x4x4xf32>
    %43 = arith.mulf %41, %42 : vector<1x4x4xf32>
    %cst_17 = arith.constant dense<0xFF800000> : vector<1x4xf32>
    %44 = vector.multi_reduction <maximumf>, %43, %cst_17 [2] : vector<1x4x4xf32> to vector<1x4xf32>
    %45 = vector.shape_cast %44 : vector<1x4xf32> to vector<1x4x1xf32>
    %46 = vector.broadcast %45 : vector<1x4x1xf32> to vector<1x4x4xf32>
    %47 = arith.subf %43, %46 : vector<1x4x4xf32>
    %48 = math.exp %47 : vector<1x4x4xf32>
    %cst_18 = arith.constant dense<0.000000e+00> : vector<1x4xf32>
    %49 = vector.multi_reduction <add>, %48, %cst_18 [2] : vector<1x4x4xf32> to vector<1x4xf32>
    %50 = vector.shape_cast %49 : vector<1x4xf32> to vector<1x4x1xf32>
    %51 = tpu.reciprocal %50 {approx = true} : vector<1x4x1xf32> -> vector<1x4x1xf32>
    %52 = vector.broadcast %51 : vector<1x4x1xf32> to vector<1x4x4xf32>
    %53 = arith.mulf %48, %52 : vector<1x4x4xf32>
    %54 = arith.truncf %53 : vector<1x4x4xf32> to vector<1x4x4xbf16>
    %55 = arith.truncf %38 : vector<1x4x128xf32> to vector<1x4x128xbf16>
    "tpu.trace_start"() <{level = 10 : i32, message = "bqk,bkd->bqd"}> : () -> ()
    %cst_19 = arith.constant dense<0.000000e+00> : vector<1x4x128xf32>
    %56 = tpu.matmul %54, %55, %cst_19 {dimension_numbers = #tpu.dot_dimension_numbers<[2], [1], [1], [2], [0, 0, 0, 1, 1, 2], [0], [0]>} : vector<1x4x4xbf16>, vector<1x4x128xbf16>, vector<1x4x128xf32> -> vector<1x4x128xf32>
    "tpu.trace_stop"() : () -> ()
    %57 = vector.extract_strided_slice %31 {offsets = [0, 0, 128], sizes = [1, 4, 128], strides = [1, 1, 1]} : vector<1x4x256xf32> to vector<1x4x128xf32>
    %58 = vector.extract_strided_slice %33 {offsets = [0, 0, 128], sizes = [1, 4, 128], strides = [1, 1, 1]} : vector<1x4x256xf32> to vector<1x4x128xf32>
    %59 = vector.extract_strided_slice %35 {offsets = [0, 0, 128], sizes = [1, 4, 128], strides = [1, 1, 1]} : vector<1x4x256xf32> to vector<1x4x128xf32>
    %60 = arith.truncf %57 : vector<1x4x128xf32> to vector<1x4x128xbf16>
    %61 = arith.truncf %58 : vector<1x4x128xf32> to vector<1x4x128xbf16>
    "tpu.trace_start"() <{level = 10 : i32, message = "bqd,bkd->bqk"}> : () -> ()
    %cst_20 = arith.constant dense<0.000000e+00> : vector<1x4x4xf32>
    %62 = tpu.matmul %60, %61, %cst_20 {dimension_numbers = #tpu.dot_dimension_numbers<[2], [2], [1], [1], [0, 0, 0, 1, 1, 1], [0], [0]>} : vector<1x4x128xbf16>, vector<1x4x128xbf16>, vector<1x4x4xf32> -> vector<1x4x4xf32>
    "tpu.trace_stop"() : () -> ()
    %cst_21 = arith.constant 0.0883883461 : f32
    %63 = vector.broadcast %cst_21 : f32 to vector<1x4x4xf32>
    %64 = arith.mulf %62, %63 : vector<1x4x4xf32>
    %cst_22 = arith.constant dense<0xFF800000> : vector<1x4xf32>
    %65 = vector.multi_reduction <maximumf>, %64, %cst_22 [2] : vector<1x4x4xf32> to vector<1x4xf32>
    %66 = vector.shape_cast %65 : vector<1x4xf32> to vector<1x4x1xf32>
    %67 = vector.broadcast %66 : vector<1x4x1xf32> to vector<1x4x4xf32>
    %68 = arith.subf %64, %67 : vector<1x4x4xf32>
    %69 = math.exp %68 : vector<1x4x4xf32>
    %cst_23 = arith.constant dense<0.000000e+00> : vector<1x4xf32>
    %70 = vector.multi_reduction <add>, %69, %cst_23 [2] : vector<1x4x4xf32> to vector<1x4xf32>
    %71 = vector.shape_cast %70 : vector<1x4xf32> to vector<1x4x1xf32>
    %72 = tpu.reciprocal %71 {approx = true} : vector<1x4x1xf32> -> vector<1x4x1xf32>
    %73 = vector.broadcast %72 : vector<1x4x1xf32> to vector<1x4x4xf32>
    %74 = arith.mulf %69, %73 : vector<1x4x4xf32>
    %75 = arith.truncf %74 : vector<1x4x4xf32> to vector<1x4x4xbf16>
    %76 = arith.truncf %59 : vector<1x4x128xf32> to vector<1x4x128xbf16>
    "tpu.trace_start"() <{level = 10 : i32, message = "bqk,bkd->bqd"}> : () -> ()
    %cst_24 = arith.constant dense<0.000000e+00> : vector<1x4x128xf32>
    %77 = tpu.matmul %75, %76, %cst_24 {dimension_numbers = #tpu.dot_dimension_numbers<[2], [1], [1], [2], [0, 0, 0, 1, 1, 2], [0], [0]>} : vector<1x4x4xbf16>, vector<1x4x128xbf16>, vector<1x4x128xf32> -> vector<1x4x128xf32>
    "tpu.trace_stop"() : () -> ()
    %78 = tpu.concatenate %56, %77 in 2 : vector<1x4x128xf32>, vector<1x4x128xf32> -> vector<1x4x256xf32>
    %79 = vector.shape_cast %78 : vector<1x4x256xf32> to vector<4x256xf32>
    %80 = arith.truncf %79 : vector<4x256xf32> to vector<4x256xbf16>
    %c0_25 = arith.constant 0 : index
    %c0_26 = arith.constant 0 : index
    %81 = vector.load %arg6[%c0_25, %c0_26] : memref<256x256xbf16, #tpu.memory_space<vmem>>, vector<256x256xbf16>
    %cst_27 = arith.constant dense<0.000000e+00> : vector<4x256xf32>
    %82 = tpu.matmul %80, %81, %cst_27 {dimension_numbers = #tpu.dot_dimension_numbers<[1], [0], [0], [1], [0, 0, 1, 1], [], []>} : vector<4x256xbf16>, vector<256x256xbf16>, vector<4x256xf32> -> vector<4x256xf32>
    %83 = arith.addf %1, %82 : vector<4x256xf32>
    %c0_28 = arith.constant 0 : index
    %c0_29 = arith.constant 0 : index
    %84 = vector.load %arg7[%c0_28, %c0_29] : memref<1x256xf32, #tpu.memory_space<vmem>>, vector<1x256xf32>
    %85 = vector.broadcast %84 : vector<1x256xf32> to vector<4x256xf32>
    %86 = arith.addf %83, %85 : vector<4x256xf32>
    %c0_30 = arith.constant 0 : index
    %c0_31 = arith.constant 0 : index
    %87 = vector.load %arg8[%c0_30, %c0_31] : memref<1x256xf32, #tpu.memory_space<vmem>>, vector<1x256xf32>
    %c0_32 = arith.constant 0 : index
    %c0_33 = arith.constant 0 : index
    %88 = vector.load %arg9[%c0_32, %c0_33] : memref<1x256xf32, #tpu.memory_space<vmem>>, vector<1x256xf32>
    %cst_34 = arith.constant dense<0.000000e+00> : vector<4xf32>
    %89 = vector.multi_reduction <add>, %86, %cst_34 [1] : vector<4x256xf32> to vector<4xf32>
    %90 = vector.shape_cast %89 : vector<4xf32> to vector<4x1xf32>
    %cst_35 = arith.constant 2.560000e+02 : f32
    %91 = vector.broadcast %cst_35 : f32 to vector<4x1xf32>
    %92 = arith.divf %90, %91 : vector<4x1xf32>
    %93 = vector.broadcast %92 : vector<4x1xf32> to vector<4x256xf32>
    %94 = arith.subf %86, %93 : vector<4x256xf32>
    %95 = arith.mulf %94, %94 : vector<4x256xf32>
    %cst_36 = arith.constant dense<0.000000e+00> : vector<4xf32>
    %96 = vector.multi_reduction <add>, %95, %cst_36 [1] : vector<4x256xf32> to vector<4xf32>
    %97 = vector.shape_cast %96 : vector<4xf32> to vector<4x1xf32>
    %cst_37 = arith.constant 2.560000e+02 : f32
    %98 = vector.broadcast %cst_37 : f32 to vector<4x1xf32>
    %99 = arith.divf %97, %98 : vector<4x1xf32>
    %cst_38 = arith.constant 9.99999974E-6 : f32
    %100 = vector.broadcast %cst_38 : f32 to vector<4x1xf32>
    %101 = arith.addf %99, %100 : vector<4x1xf32>
    %102 = math.rsqrt %101 : vector<4x1xf32>
    %103 = vector.broadcast %102 : vector<4x1xf32> to vector<4x256xf32>
    %104 = arith.mulf %94, %103 : vector<4x256xf32>
    %105 = vector.broadcast %87 : vector<1x256xf32> to vector<4x256xf32>
    %106 = arith.mulf %104, %105 : vector<4x256xf32>
    %107 = vector.broadcast %88 : vector<1x256xf32> to vector<4x256xf32>
    %108 = arith.addf %106, %107 : vector<4x256xf32>
    %109 = arith.truncf %108 : vector<4x256xf32> to vector<4x256xbf16>
    %c0_39 = arith.constant 0 : index
    %c0_40 = arith.constant 0 : index
    %110 = vector.load %arg10[%c0_39, %c0_40] : memref<256x512xbf16, #tpu.memory_space<vmem>>, vector<256x512xbf16>
    %cst_41 = arith.constant dense<0.000000e+00> : vector<4x512xf32>
    %111 = tpu.matmul %109, %110, %cst_41 {dimension_numbers = #tpu.dot_dimension_numbers<[1], [0], [0], [1], [0, 0, 1, 1], [], []>} : vector<4x256xbf16>, vector<256x512xbf16>, vector<4x512xf32> -> vector<4x512xf32>
    %c0_42 = arith.constant 0 : index
    %c0_43 = arith.constant 0 : index
    %112 = vector.load %arg11[%c0_42, %c0_43] : memref<1x512xf32, #tpu.memory_space<vmem>>, vector<1x512xf32>
    %113 = vector.broadcast %112 : vector<1x512xf32> to vector<4x512xf32>
    %114 = arith.addf %111, %113 : vector<4x512xf32>
    %115 = arith.mulf %114, %114 : vector<4x512xf32>
    %116 = arith.mulf %114, %115 : vector<4x512xf32>
    %cst_44 = arith.constant 4.471500e-02 : f32
    %117 = vector.broadcast %cst_44 : f32 to vector<4x512xf32>
    %118 = arith.mulf %117, %116 : vector<4x512xf32>
    %119 = arith.addf %114, %118 : vector<4x512xf32>
    %cst_45 = arith.constant 0.797884583 : f32
    %120 = vector.broadcast %cst_45 : f32 to vector<4x512xf32>
    %121 = arith.mulf %120, %119 : vector<4x512xf32>
    %122 = math.tanh %121 : vector<4x512xf32>
    %cst_46 = arith.constant 1.000000e+00 : f32
    %123 = vector.broadcast %cst_46 : f32 to vector<4x512xf32>
    %124 = arith.addf %123, %122 : vector<4x512xf32>
    %cst_47 = arith.constant 5.000000e-01 : f32
    %125 = vector.broadcast %cst_47 : f32 to vector<4x512xf32>
    %126 = arith.mulf %125, %124 : vector<4x512xf32>
    %127 = arith.mulf %114, %126 : vector<4x512xf32>
    %128 = arith.truncf %127 : vector<4x512xf32> to vector<4x512xbf16>
    %c0_48 = arith.constant 0 : index
    %c0_49 = arith.constant 0 : index
    %129 = vector.load %arg12[%c0_48, %c0_49] : memref<512x256xbf16, #tpu.memory_space<vmem>>, vector<512x256xbf16>
    %cst_50 = arith.constant dense<0.000000e+00> : vector<4x256xf32>
    %130 = tpu.matmul %128, %129, %cst_50 {dimension_numbers = #tpu.dot_dimension_numbers<[1], [0], [0], [1], [0, 0, 1, 1], [], []>} : vector<4x512xbf16>, vector<512x256xbf16>, vector<4x256xf32> -> vector<4x256xf32>
    %131 = arith.addf %86, %130 : vector<4x256xf32>
    %c0_51 = arith.constant 0 : index
    %c0_52 = arith.constant 0 : index
    %132 = vector.load %arg13[%c0_51, %c0_52] : memref<1x256xf32, #tpu.memory_space<vmem>>, vector<1x256xf32>
    %133 = vector.broadcast %132 : vector<1x256xf32> to vector<4x256xf32>
    %134 = arith.addf %131, %133 : vector<4x256xf32>
    %135 = vector.shape_cast %134 : vector<4x256xf32> to vector<1x4x256xf32>
    %c0_53 = arith.constant 0 : index
    %c0_54 = arith.constant 0 : index
    %c0_55 = arith.constant 0 : index
    %136 = vector.load %arg14[%c0_53, %c0_54, %c0_55] : memref<1x4x256xf32, #tpu.memory_space<vmem>>, vector<1x4x256xf32>
    tpu.vector_store %arg14[%c0_53, %c0_54, %c0_55], %135 {strides = array<i32>} : memref<1x4x256xf32, #tpu.memory_space<vmem>>, vector<1x4x256xf32>,
    return
  }
  func.func @transform_0(%arg0: i32) -> (i32, i32, i32) {
    %c0_i32 = arith.constant 0 : i32
    %c0_i32_0 = arith.constant 0 : i32
    %c0_i32_1 = arith.constant 0 : i32
    return %arg0, %c0_i32, %c0_i32_0 : i32, i32, i32
  }
  func.func @transform_1(%arg0: i32) -> (i32, i32) {
    %c0_i32 = arith.constant 0 : i32
    %c0_i32_0 = arith.constant 0 : i32
    %c0_i32_1 = arith.constant 0 : i32
    return %c0_i32, %c0_i32_0 : i32, i32
  }
  func.func @transform_2(%arg0: i32) -> (i32, i32) {
    %c0_i32 = arith.constant 0 : i32
    %c0_i32_0 = arith.constant 0 : i32
    %c0_i32_1 = arith.constant 0 : i32
    return %c0_i32, %c0_i32_0 : i32, i32
  }
  func.func @transform_3(%arg0: i32) -> (i32, i32) {
    %c0_i32 = arith.constant 0 : i32
    %c0_i32_0 = arith.constant 0 : i32
    %c0_i32_1 = arith.constant 0 : i32
    return %c0_i32, %c0_i32_0 : i32, i32
  }
  func.func @transform_4(%arg0: i32) -> (i32, i32) {
    %c0_i32 = arith.constant 0 : i32
    %c0_i32_0 = arith.constant 0 : i32
    %c0_i32_1 = arith.constant 0 : i32
    return %c0_i32, %c0_i32_0 : i32, i32
  }
  func.func @transform_5(%arg0: i32) -> (i32, i32) {
    %c0_i32 = arith.constant 0 : i32
    %c0_i32_0 = arith.constant 0 : i32
    %c0_i32_1 = arith.constant 0 : i32
    return %c0_i32, %c0_i32_0 : i32, i32
  }
  func.func @transform_6(%arg0: i32) -> (i32, i32) {
    %c0_i32 = arith.constant 0 : i32
    %c0_i32_0 = arith.constant 0 : i32
    %c0_i32_1 = arith.constant 0 : i32
    return %c0_i32, %c0_i32_0 : i32, i32
  }
  func.func @transform_7(%arg0: i32) -> (i32, i32) {
    %c0_i32 = arith.constant 0 : i32
    %c0_i32_0 = arith.constant 0 : i32
    %c0_i32_1 = arith.constant 0 : i32
    return %c0_i32, %c0_i32_0 : i32, i32
  }
  func.func @transform_8(%arg0: i32) -> (i32, i32) {
    %c0_i32 = arith.constant 0 : i32
    %c0_i32_0 = arith.constant 0 : i32
    %c0_i32_1 = arith.constant 0 : i32
    return %c0_i32, %c0_i32_0 : i32, i32
  }
  func.func @transform_9(%arg0: i32) -> (i32, i32) {
    %c0_i32 = arith.constant 0 : i32
    %c0_i32_0 = arith.constant 0 : i32
    %c0_i32_1 = arith.constant 0 : i32
    return %c0_i32, %c0_i32_0 : i32, i32
  }
  func.func @transform_10(%arg0: i32) -> (i32, i32) {
    %c0_i32 = arith.constant 0 : i32
    %c0_i32_0 = arith.constant 0 : i32
    %c0_i32_1 = arith.constant 0 : i32
    return %c0_i32, %c0_i32_0 : i32, i32
  }
  func.func @transform_11(%arg0: i32) -> (i32, i32) {
    %c0_i32 = arith.constant 0 : i32
    %c0_i32_0 = arith.constant 0 : i32
    %c0_i32_1 = arith.constant 0 : i32
    return %c0_i32, %c0_i32_0 : i32, i32
  }
  func.func @transform_12(%arg0: i32) -> (i32, i32) {
    %c0_i32 = arith.constant 0 : i32
    %c0_i32_0 = arith.constant 0 : i32
    %c0_i32_1 = arith.constant 0 : i32
    return %c0_i32, %c0_i32_0 : i32, i32
  }
  func.func @transform_13(%arg0: i32) -> (i32, i32, i32) {
    %c0_i32 = arith.constant 0 : i32
    %c0_i32_0 = arith.constant 0 : i32
    %c0_i32_1 = arith.constant 0 : i32
    return %arg0, %c0_i32, %c0_i32_0 : i32, i32, i32
  }
}

module attributes {stable_mosaic.version = 11 : i64} {
  func.func @_encoder_kernel(%arg0: i32, %arg1: memref<1x4x256xf32, #tpu.memory_space<vmem>>, %arg2: memref<1x256xf32, #tpu.memory_space<vmem>>, %arg3: memref<1x256xf32, #tpu.memory_space<vmem>>, %arg4: memref<256x768xbf16, #tpu.memory_space<vmem>>, %arg5: memref<1x768xf32, #tpu.memory_space<vmem>>, %arg6: memref<256x256xbf16, #tpu.memory_space<vmem>>, %arg7: memref<1x256xf32, #tpu.memory_space<vmem>>, %arg8: memref<1x256xf32, #tpu.memory_space<vmem>>, %arg9: memref<1x256xf32, #tpu.memory_space<vmem>>, %arg10: memref<256x512xbf16, #tpu.memory_space<vmem>>, %arg11: memref<1x512xf32, #tpu.memory_space<vmem>>, %arg12: memref<512x256xbf16, #tpu.memory_space<vmem>>, %arg13: memref<1x256xf32, #tpu.memory_space<vmem>>, %arg14: memref<256x3xbf16, #tpu.memory_space<vmem>>, %arg15: memref<1x3xf32, #tpu.memory_space<vmem>>, %arg16: memref<1x4x3xf32, #tpu.memory_space<vmem>>, %arg17: memref<1x1x3xf32, #tpu.memory_space<vmem>>) attributes {dimension_semantics = [#tpu.dimension_semantics<parallel>], iteration_bounds = array<i64: 2>, scalar_prefetch = 0 : i64, scratch_operands = 0 : i64, tpu.core_type = #tpu.core_type<tc>, window_params = [{transform_indices = @transform_0, window_bounds = array<i64: 1, 4, 256>}, {pipeline_mode = #tpu.pipeline_mode<synchronous>, transform_indices = @transform_1, window_bounds = array<i64: 1, 256>}, {pipeline_mode = #tpu.pipeline_mode<synchronous>, transform_indices = @transform_2, window_bounds = array<i64: 1, 256>}, {pipeline_mode = #tpu.pipeline_mode<synchronous>, transform_indices = @transform_3, window_bounds = array<i64: 256, 768>}, {pipeline_mode = #tpu.pipeline_mode<synchronous>, transform_indices = @transform_4, window_bounds = array<i64: 1, 768>}, {pipeline_mode = #tpu.pipeline_mode<synchronous>, transform_indices = @transform_5, window_bounds = array<i64: 256, 256>}, {pipeline_mode = #tpu.pipeline_mode<synchronous>, transform_indices = @transform_6, window_bounds = array<i64: 1, 256>}, {pipeline_mode = #tpu.pipeline_mode<synchronous>, transform_indices = @transform_7, window_bounds = array<i64: 1, 256>}, {pipeline_mode = #tpu.pipeline_mode<synchronous>, transform_indices = @transform_8, window_bounds = array<i64: 1, 256>}, {pipeline_mode = #tpu.pipeline_mode<synchronous>, transform_indices = @transform_9, window_bounds = array<i64: 256, 512>}, {pipeline_mode = #tpu.pipeline_mode<synchronous>, transform_indices = @transform_10, window_bounds = array<i64: 1, 512>}, {pipeline_mode = #tpu.pipeline_mode<synchronous>, transform_indices = @transform_11, window_bounds = array<i64: 512, 256>}, {pipeline_mode = #tpu.pipeline_mode<synchronous>, transform_indices = @transform_12, window_bounds = array<i64: 1, 256>}, {pipeline_mode = #tpu.pipeline_mode<synchronous>, transform_indices = @transform_13, window_bounds = array<i64: 256, 3>}, {pipeline_mode = #tpu.pipeline_mode<synchronous>, transform_indices = @transform_14, window_bounds = array<i64: 1, 3>}, {transform_indices = @transform_15, window_bounds = array<i64: 1, 4, 3>}, {transform_indices = @transform_16, window_bounds = array<i64: 1, 1, 3>}]} {
    %c0 = arith.constant 0 : index
    %c0_0 = arith.constant 0 : index
    %c0_1 = arith.constant 0 : index
    %0 = vector.load %arg1[%c0, %c0_0, %c0_1] : memref<1x4x256xf32, #tpu.memory_space<vmem>>, vector<1x4x256xf32>
    %1 = vector.shape_cast %0 : vector<1x4x256xf32> to vector<4x256xf32>
    %c0_2 = arith.constant 0 : index
    %c0_3 = arith.constant 0 : index
    %2 = vector.load %arg2[%c0_2, %c0_3] : memref<1x256xf32, #tpu.memory_space<vmem>>, vector<1x256xf32>
    %c0_4 = arith.constant 0 : index
    %c0_5 = arith.constant 0 : index
    %3 = vector.load %arg3[%c0_4, %c0_5] : memref<1x256xf32, #tpu.memory_space<vmem>>, vector<1x256xf32>
    %cst = arith.constant dense<0.000000e+00> : vector<4xf32>
    %4 = vector.multi_reduction <add>, %1, %cst [1] : vector<4x256xf32> to vector<4xf32>
    %5 = vector.shape_cast %4 : vector<4xf32> to vector<4x1xf32>
    %cst_6 = arith.constant 2.560000e+02 : f32
    %6 = vector.broadcast %cst_6 : f32 to vector<4x1xf32>
    %7 = arith.divf %5, %6 : vector<4x1xf32>
    %8 = vector.broadcast %7 : vector<4x1xf32> to vector<4x256xf32>
    %9 = arith.subf %1, %8 : vector<4x256xf32>
    %10 = arith.mulf %9, %9 : vector<4x256xf32>
    %cst_7 = arith.constant dense<0.000000e+00> : vector<4xf32>
    %11 = vector.multi_reduction <add>, %10, %cst_7 [1] : vector<4x256xf32> to vector<4xf32>
    %12 = vector.shape_cast %11 : vector<4xf32> to vector<4x1xf32>
    %cst_8 = arith.constant 2.560000e+02 : f32
    %13 = vector.broadcast %cst_8 : f32 to vector<4x1xf32>
    %14 = arith.divf %12, %13 : vector<4x1xf32>
    %cst_9 = arith.constant 9.99999974E-6 : f32
    %15 = vector.broadcast %cst_9 : f32 to vector<4x1xf32>
    %16 = arith.addf %14, %15 : vector<4x1xf32>
    %17 = math.rsqrt %16 : vector<4x1xf32>
    %18 = vector.broadcast %17 : vector<4x1xf32> to vector<4x256xf32>
    %19 = arith.mulf %9, %18 : vector<4x256xf32>
    %20 = vector.broadcast %2 : vector<1x256xf32> to vector<4x256xf32>
    %21 = arith.mulf %19, %20 : vector<4x256xf32>
    %22 = vector.broadcast %3 : vector<1x256xf32> to vector<4x256xf32>
    %23 = arith.addf %21, %22 : vector<4x256xf32>
    %24 = arith.truncf %23 : vector<4x256xf32> to vector<4x256xbf16>
    %c0_10 = arith.constant 0 : index
    %c0_11 = arith.constant 0 : index
    %25 = vector.load %arg4[%c0_10, %c0_11] : memref<256x768xbf16, #tpu.memory_space<vmem>>, vector<256x768xbf16>
    %cst_12 = arith.constant dense<0.000000e+00> : vector<4x768xf32>
    %26 = tpu.matmul %24, %25, %cst_12 {dimension_numbers = #tpu.dot_dimension_numbers<[1], [0], [0], [1], [0, 0, 1, 1], [], []>} : vector<4x256xbf16>, vector<256x768xbf16>, vector<4x768xf32> -> vector<4x768xf32>
    %c0_13 = arith.constant 0 : index
    %c0_14 = arith.constant 0 : index
    %27 = vector.load %arg5[%c0_13, %c0_14] : memref<1x768xf32, #tpu.memory_space<vmem>>, vector<1x768xf32>
    %28 = vector.broadcast %27 : vector<1x768xf32> to vector<4x768xf32>
    %29 = arith.addf %26, %28 : vector<4x768xf32>
    %30 = vector.extract_strided_slice %29 {offsets = [0, 0], sizes = [4, 256], strides = [1, 1]} : vector<4x768xf32> to vector<4x256xf32>
    %31 = vector.shape_cast %30 : vector<4x256xf32> to vector<1x4x256xf32>
    %32 = vector.extract_strided_slice %29 {offsets = [0, 256], sizes = [4, 256], strides = [1, 1]} : vector<4x768xf32> to vector<4x256xf32>
    %33 = vector.shape_cast %32 : vector<4x256xf32> to vector<1x4x256xf32>
    %34 = vector.extract_strided_slice %29 {offsets = [0, 512], sizes = [4, 256], strides = [1, 1]} : vector<4x768xf32> to vector<4x256xf32>
    %35 = vector.shape_cast %34 : vector<4x256xf32> to vector<1x4x256xf32>
    %36 = vector.extract_strided_slice %31 {offsets = [0, 0, 0], sizes = [1, 4, 128], strides = [1, 1, 1]} : vector<1x4x256xf32> to vector<1x4x128xf32>
    %37 = vector.extract_strided_slice %33 {offsets = [0, 0, 0], sizes = [1, 4, 128], strides = [1, 1, 1]} : vector<1x4x256xf32> to vector<1x4x128xf32>
    %38 = vector.extract_strided_slice %35 {offsets = [0, 0, 0], sizes = [1, 4, 128], strides = [1, 1, 1]} : vector<1x4x256xf32> to vector<1x4x128xf32>
    %39 = arith.truncf %36 : vector<1x4x128xf32> to vector<1x4x128xbf16>
    %40 = arith.truncf %37 : vector<1x4x128xf32> to vector<1x4x128xbf16>
    "tpu.trace_start"() <{level = 10 : i32, message = "bqd,bkd->bqk"}> : () -> ()
    %cst_15 = arith.constant dense<0.000000e+00> : vector<1x4x4xf32>
    %41 = tpu.matmul %39, %40, %cst_15 {dimension_numbers = #tpu.dot_dimension_numbers<[2], [2], [1], [1], [0, 0, 0, 1, 1, 1], [0], [0]>} : vector<1x4x128xbf16>, vector<1x4x128xbf16>, vector<1x4x4xf32> -> vector<1x4x4xf32>
    "tpu.trace_stop"() : () -> ()
    %cst_16 = arith.constant 0.0883883461 : f32
    %42 = vector.broadcast %cst_16 : f32 to vector<1x4x4xf32>
    %43 = arith.mulf %41, %42 : vector<1x4x4xf32>
    %cst_17 = arith.constant dense<0xFF800000> : vector<1x4xf32>
    %44 = vector.multi_reduction <maximumf>, %43, %cst_17 [2] : vector<1x4x4xf32> to vector<1x4xf32>
    %45 = vector.shape_cast %44 : vector<1x4xf32> to vector<1x4x1xf32>
    %46 = vector.broadcast %45 : vector<1x4x1xf32> to vector<1x4x4xf32>
    %47 = arith.subf %43, %46 : vector<1x4x4xf32>
    %48 = math.exp %47 : vector<1x4x4xf32>
    %cst_18 = arith.constant dense<0.000000e+00> : vector<1x4xf32>
    %49 = vector.multi_reduction <add>, %48, %cst_18 [2] : vector<1x4x4xf32> to vector<1x4xf32>
    %50 = vector.shape_cast %49 : vector<1x4xf32> to vector<1x4x1xf32>
    %51 = tpu.reciprocal %50 {approx = true} : vector<1x4x1xf32> -> vector<1x4x1xf32>
    %52 = vector.broadcast %51 : vector<1x4x1xf32> to vector<1x4x4xf32>
    %53 = arith.mulf %48, %52 : vector<1x4x4xf32>
    %54 = arith.truncf %53 : vector<1x4x4xf32> to vector<1x4x4xbf16>
    %55 = arith.truncf %38 : vector<1x4x128xf32> to vector<1x4x128xbf16>
    "tpu.trace_start"() <{level = 10 : i32, message = "bqk,bkd->bqd"}> : () -> ()
    %cst_19 = arith.constant dense<0.000000e+00> : vector<1x4x128xf32>
    %56 = tpu.matmul %54, %55, %cst_19 {dimension_numbers = #tpu.dot_dimension_numbers<[2], [1], [1], [2], [0, 0, 0, 1, 1, 2], [0], [0]>} : vector<1x4x4xbf16>, vector<1x4x128xbf16>, vector<1x4x128xf32> -> vector<1x4x128xf32>
    "tpu.trace_stop"() : () -> ()
    %57 = vector.extract_strided_slice %31 {offsets = [0, 0, 128], sizes = [1, 4, 128], strides = [1, 1, 1]} : vector<1x4x256xf32> to vector<1x4x128xf32>
    %58 = vector.extract_strided_slice %33 {offsets = [0, 0, 128], sizes = [1, 4, 128], strides = [1, 1, 1]} : vector<1x4x256xf32> to vector<1x4x128xf32>
    %59 = vector.extract_strided_slice %35 {offsets = [0, 0, 128], sizes = [1, 4, 128], strides = [1, 1, 1]} : vector<1x4x256xf32> to vector<1x4x128xf32>
    %60 = arith.truncf %57 : vector<1x4x128xf32> to vector<1x4x128xbf16>
    %61 = arith.truncf %58 : vector<1x4x128xf32> to vector<1x4x128xbf16>
    "tpu.trace_start"() <{level = 10 : i32, message = "bqd,bkd->bqk"}> : () -> ()
    %cst_20 = arith.constant dense<0.000000e+00> : vector<1x4x4xf32>
    %62 = tpu.matmul %60, %61, %cst_20 {dimension_numbers = #tpu.dot_dimension_numbers<[2], [2], [1], [1], [0, 0, 0, 1, 1, 1], [0], [0]>} : vector<1x4x128xbf16>, vector<1x4x128xbf16>, vector<1x4x4xf32> -> vector<1x4x4xf32>
    "tpu.trace_stop"() : () -> ()
    %cst_21 = arith.constant 0.0883883461 : f32
    %63 = vector.broadcast %cst_21 : f32 to vector<1x4x4xf32>
    %64 = arith.mulf %62, %63 : vector<1x4x4xf32>
    %cst_22 = arith.constant dense<0xFF800000> : vector<1x4xf32>
    %65 = vector.multi_reduction <maximumf>, %64, %cst_22 [2] : vector<1x4x4xf32> to vector<1x4xf32>
    %66 = vector.shape_cast %65 : vector<1x4xf32> to vector<1x4x1xf32>
    %67 = vector.broadcast %66 : vector<1x4x1xf32> to vector<1x4x4xf32>
    %68 = arith.subf %64, %67 : vector<1x4x4xf32>
    %69 = math.exp %68 : vector<1x4x4xf32>
    %cst_23 = arith.constant dense<0.000000e+00> : vector<1x4xf32>
    %70 = vector.multi_reduction <add>, %69, %cst_23 [2] : vector<1x4x4xf32> to vector<1x4xf32>
    %71 = vector.shape_cast %70 : vector<1x4xf32> to vector<1x4x1xf32>
    %72 = tpu.reciprocal %71 {approx = true} : vector<1x4x1xf32> -> vector<1x4x1xf32>
    %73 = vector.broadcast %72 : vector<1x4x1xf32> to vector<1x4x4xf32>
    %74 = arith.mulf %69, %73 : vector<1x4x4xf32>
    %75 = arith.truncf %74 : vector<1x4x4xf32> to vector<1x4x4xbf16>
    %76 = arith.truncf %59 : vector<1x4x128xf32> to vector<1x4x128xbf16>
    "tpu.trace_start"() <{level = 10 : i32, message = "bqk,bkd->bqd"}> : () -> ()
    %cst_24 = arith.constant dense<0.000000e+00> : vector<1x4x128xf32>
    %77 = tpu.matmul %75, %76, %cst_24 {dimension_numbers = #tpu.dot_dimension_numbers<[2], [1], [1], [2], [0, 0, 0, 1, 1, 2], [0], [0]>} : vector<1x4x4xbf16>, vector<1x4x128xbf16>, vector<1x4x128xf32> -> vector<1x4x128xf32>
    "tpu.trace_stop"() : () -> ()
    %78 = tpu.concatenate %56, %77 in 2 : vector<1x4x128xf32>, vector<1x4x128xf32> -> vector<1x4x256xf32>
    %79 = vector.shape_cast %78 : vector<1x4x256xf32> to vector<4x256xf32>
    %80 = arith.truncf %79 : vector<4x256xf32> to vector<4x256xbf16>
    %c0_25 = arith.constant 0 : index
    %c0_26 = arith.constant 0 : index
    %81 = vector.load %arg6[%c0_25, %c0_26] : memref<256x256xbf16, #tpu.memory_space<vmem>>, vector<256x256xbf16>
    %cst_27 = arith.constant dense<0.000000e+00> : vector<4x256xf32>
    %82 = tpu.matmul %80, %81, %cst_27 {dimension_numbers = #tpu.dot_dimension_numbers<[1], [0], [0], [1], [0, 0, 1, 1], [], []>} : vector<4x256xbf16>, vector<256x256xbf16>, vector<4x256xf32> -> vector<4x256xf32>
    %83 = arith.addf %1, %82 : vector<4x256xf32>
    %c0_28 = arith.constant 0 : index
    %c0_29 = arith.constant 0 : index
    %84 = vector.load %arg7[%c0_28, %c0_29] : memref<1x256xf32, #tpu.memory_space<vmem>>, vector<1x256xf32>
    %85 = vector.broadcast %84 : vector<1x256xf32> to vector<4x256xf32>
    %86 = arith.addf %83, %85 : vector<4x256xf32>
    %c0_30 = arith.constant 0 : index
    %c0_31 = arith.constant 0 : index
    %87 = vector.load %arg8[%c0_30, %c0_31] : memref<1x256xf32, #tpu.memory_space<vmem>>, vector<1x256xf32>
    %c0_32 = arith.constant 0 : index
    %c0_33 = arith.constant 0 : index
    %88 = vector.load %arg9[%c0_32, %c0_33] : memref<1x256xf32, #tpu.memory_space<vmem>>, vector<1x256xf32>
    %cst_34 = arith.constant dense<0.000000e+00> : vector<4xf32>
    %89 = vector.multi_reduction <add>, %86, %cst_34 [1] : vector<4x256xf32> to vector<4xf32>
    %90 = vector.shape_cast %89 : vector<4xf32> to vector<4x1xf32>
    %cst_35 = arith.constant 2.560000e+02 : f32
    %91 = vector.broadcast %cst_35 : f32 to vector<4x1xf32>
    %92 = arith.divf %90, %91 : vector<4x1xf32>
    %93 = vector.broadcast %92 : vector<4x1xf32> to vector<4x256xf32>
    %94 = arith.subf %86, %93 : vector<4x256xf32>
    %95 = arith.mulf %94, %94 : vector<4x256xf32>
    %cst_36 = arith.constant dense<0.000000e+00> : vector<4xf32>
    %96 = vector.multi_reduction <add>, %95, %cst_36 [1] : vector<4x256xf32> to vector<4xf32>
    %97 = vector.shape_cast %96 : vector<4xf32> to vector<4x1xf32>
    %cst_37 = arith.constant 2.560000e+02 : f32
    %98 = vector.broadcast %cst_37 : f32 to vector<4x1xf32>
    %99 = arith.divf %97, %98 : vector<4x1xf32>
    %cst_38 = arith.constant 9.99999974E-6 : f32
    %100 = vector.broadcast %cst_38 : f32 to vector<4x1xf32>
    %101 = arith.addf %99, %100 : vector<4x1xf32>
    %102 = math.rsqrt %101 : vector<4x1xf32>
    %103 = vector.broadcast %102 : vector<4x1xf32> to vector<4x256xf32>
    %104 = arith.mulf %94, %103 : vector<4x256xf32>
    %105 = vector.broadcast %87 : vector<1x256xf32> to vector<4x256xf32>
    %106 = arith.mulf %104, %105 : vector<4x256xf32>
    %107 = vector.broadcast %88 : vector<1x256xf32> to vector<4x256xf32>
    %108 = arith.addf %106, %107 : vector<4x256xf32>
    %109 = arith.truncf %108 : vector<4x256xf32> to vector<4x256xbf16>
    %c0_39 = arith.constant 0 : index
    %c0_40 = arith.constant 0 : index
    %110 = vector.load %arg10[%c0_39, %c0_40] : memref<256x512xbf16, #tpu.memory_space<vmem>>, vector<256x512xbf16>
    %cst_41 = arith.constant dense<0.000000e+00> : vector<4x512xf32>
    %111 = tpu.matmul %109, %110, %cst_41 {dimension_numbers = #tpu.dot_dimension_numbers<[1], [0], [0], [1], [0, 0, 1, 1], [], []>} : vector<4x256xbf16>, vector<256x512xbf16>, vector<4x512xf32> -> vector<4x512xf32>
    %c0_42 = arith.constant 0 : index
    %c0_43 = arith.constant 0 : index
    %112 = vector.load %arg11[%c0_42, %c0_43] : memref<1x512xf32, #tpu.memory_space<vmem>>, vector<1x512xf32>
    %113 = vector.broadcast %112 : vector<1x512xf32> to vector<4x512xf32>
    %114 = arith.addf %111, %113 : vector<4x512xf32>
    %115 = arith.mulf %114, %114 : vector<4x512xf32>
    %116 = arith.mulf %114, %115 : vector<4x512xf32>
    %cst_44 = arith.constant 4.471500e-02 : f32
    %117 = vector.broadcast %cst_44 : f32 to vector<4x512xf32>
    %118 = arith.mulf %117, %116 : vector<4x512xf32>
    %119 = arith.addf %114, %118 : vector<4x512xf32>
    %cst_45 = arith.constant 0.797884583 : f32
    %120 = vector.broadcast %cst_45 : f32 to vector<4x512xf32>
    %121 = arith.mulf %120, %119 : vector<4x512xf32>
    %122 = math.tanh %121 : vector<4x512xf32>
    %cst_46 = arith.constant 1.000000e+00 : f32
    %123 = vector.broadcast %cst_46 : f32 to vector<4x512xf32>
    %124 = arith.addf %123, %122 : vector<4x512xf32>
    %cst_47 = arith.constant 5.000000e-01 : f32
    %125 = vector.broadcast %cst_47 : f32 to vector<4x512xf32>
    %126 = arith.mulf %125, %124 : vector<4x512xf32>
    %127 = arith.mulf %114, %126 : vector<4x512xf32>
    %128 = arith.truncf %127 : vector<4x512xf32> to vector<4x512xbf16>
    %c0_48 = arith.constant 0 : index
    %c0_49 = arith.constant 0 : index
    %129 = vector.load %arg12[%c0_48, %c0_49] : memref<512x256xbf16, #tpu.memory_space<vmem>>, vector<512x256xbf16>
    %cst_50 = arith.constant dense<0.000000e+00> : vector<4x256xf32>
    %130 = tpu.matmul %128, %129, %cst_50 {dimension_numbers = #tpu.dot_dimension_numbers<[1], [0], [0], [1], [0, 0, 1, 1], [], []>} : vector<4x512xbf16>, vector<512x256xbf16>, vector<4x256xf32> -> vector<4x256xf32>
    %131 = arith.addf %86, %130 : vector<4x256xf32>
    %c0_51 = arith.constant 0 : index
    %c0_52 = arith.constant 0 : index
    %132 = vector.load %arg13[%c0_51, %c0_52] : memref<1x256xf32, #tpu.memory_space<vmem>>, vector<1x256xf32>
    %133 = vector.broadcast %132 : vector<1x256xf32> to vector<4x256xf32>
    %134 = arith.addf %131, %133 : vector<4x256xf32>
    %135 = arith.truncf %134 : vector<4x256xf32> to vector<4x256xbf16>
    %c0_53 = arith.constant 0 : index
    %c0_54 = arith.constant 0 : index
    %136 = vector.load %arg14[%c0_53, %c0_54] : memref<256x3xbf16, #tpu.memory_space<vmem>>, vector<256x3xbf16>
    %cst_55 = arith.constant dense<0.000000e+00> : vector<4x3xf32>
    %137 = tpu.matmul %135, %136, %cst_55 {dimension_numbers = #tpu.dot_dimension_numbers<[1], [0], [0], [1], [0, 0, 1, 1], [], []>} : vector<4x256xbf16>, vector<256x3xbf16>, vector<4x3xf32> -> vector<4x3xf32>
    %c0_56 = arith.constant 0 : index
    %c0_57 = arith.constant 0 : index
    %138 = vector.load %arg15[%c0_56, %c0_57] : memref<1x3xf32, #tpu.memory_space<vmem>>, vector<1x3xf32>
    %139 = vector.broadcast %138 : vector<1x3xf32> to vector<4x3xf32>
    %140 = arith.addf %137, %139 : vector<4x3xf32>
    %141 = vector.shape_cast %140 : vector<4x3xf32> to vector<1x4x3xf32>
    %c0_58 = arith.constant 0 : index
    %c0_59 = arith.constant 0 : index
    %c0_60 = arith.constant 0 : index
    %142 = vector.load %arg16[%c0_58, %c0_59, %c0_60] : memref<1x4x3xf32, #tpu.memory_space<vmem>>, vector<1x4x3xf32>
    tpu.vector_store %arg16[%c0_58, %c0_59, %c0_60], %141 {strides = array<i32>} : memref<1x4x3xf32, #tpu.memory_space<vmem>>, vector<1x4x3xf32>,
    %cst_61 = arith.constant dense<0.000000e+00> : vector<1x3xf32>
    %143 = vector.multi_reduction <add>, %141, %cst_61 [1] : vector<1x4x3xf32> to vector<1x3xf32>
    %144 = vector.shape_cast %143 : vector<1x3xf32> to vector<1x1x3xf32>
    %cst_62 = arith.constant 4.000000e+00 : f32
    %145 = vector.broadcast %cst_62 : f32 to vector<1x1x3xf32>
    %146 = arith.divf %144, %145 : vector<1x1x3xf32>
    %c0_63 = arith.constant 0 : index
    %c0_64 = arith.constant 0 : index
    %c0_65 = arith.constant 0 : index
    %147 = vector.load %arg17[%c0_63, %c0_64, %c0_65] : memref<1x1x3xf32, #tpu.memory_space<vmem>>, vector<1x1x3xf32>
    tpu.vector_store %arg17[%c0_63, %c0_64, %c0_65], %146 {strides = array<i32>} : memref<1x1x3xf32, #tpu.memory_space<vmem>>, vector<1x1x3xf32>,
    return
  }
  func.func @transform_0(%arg0: i32) -> (i32, i32, i32) {
    %c0_i32 = arith.constant 0 : i32
    %c0_i32_0 = arith.constant 0 : i32
    %c0_i32_1 = arith.constant 0 : i32
    return %arg0, %c0_i32, %c0_i32_0 : i32, i32, i32
  }
  func.func @transform_1(%arg0: i32) -> (i32, i32) {
    %c0_i32 = arith.constant 0 : i32
    %c0_i32_0 = arith.constant 0 : i32
    %c0_i32_1 = arith.constant 0 : i32
    return %c0_i32, %c0_i32_0 : i32, i32
  }
  func.func @transform_2(%arg0: i32) -> (i32, i32) {
    %c0_i32 = arith.constant 0 : i32
    %c0_i32_0 = arith.constant 0 : i32
    %c0_i32_1 = arith.constant 0 : i32
    return %c0_i32, %c0_i32_0 : i32, i32
  }
  func.func @transform_3(%arg0: i32) -> (i32, i32) {
    %c0_i32 = arith.constant 0 : i32
    %c0_i32_0 = arith.constant 0 : i32
    %c0_i32_1 = arith.constant 0 : i32
    return %c0_i32, %c0_i32_0 : i32, i32
  }
  func.func @transform_4(%arg0: i32) -> (i32, i32) {
    %c0_i32 = arith.constant 0 : i32
    %c0_i32_0 = arith.constant 0 : i32
    %c0_i32_1 = arith.constant 0 : i32
    return %c0_i32, %c0_i32_0 : i32, i32
  }
  func.func @transform_5(%arg0: i32) -> (i32, i32) {
    %c0_i32 = arith.constant 0 : i32
    %c0_i32_0 = arith.constant 0 : i32
    %c0_i32_1 = arith.constant 0 : i32
    return %c0_i32, %c0_i32_0 : i32, i32
  }
  func.func @transform_6(%arg0: i32) -> (i32, i32) {
    %c0_i32 = arith.constant 0 : i32
    %c0_i32_0 = arith.constant 0 : i32
    %c0_i32_1 = arith.constant 0 : i32
    return %c0_i32, %c0_i32_0 : i32, i32
  }
  func.func @transform_7(%arg0: i32) -> (i32, i32) {
    %c0_i32 = arith.constant 0 : i32
    %c0_i32_0 = arith.constant 0 : i32
    %c0_i32_1 = arith.constant 0 : i32
    return %c0_i32, %c0_i32_0 : i32, i32
  }
  func.func @transform_8(%arg0: i32) -> (i32, i32) {
    %c0_i32 = arith.constant 0 : i32
    %c0_i32_0 = arith.constant 0 : i32
    %c0_i32_1 = arith.constant 0 : i32
    return %c0_i32, %c0_i32_0 : i32, i32
  }
  func.func @transform_9(%arg0: i32) -> (i32, i32) {
    %c0_i32 = arith.constant 0 : i32
    %c0_i32_0 = arith.constant 0 : i32
    %c0_i32_1 = arith.constant 0 : i32
    return %c0_i32, %c0_i32_0 : i32, i32
  }
  func.func @transform_10(%arg0: i32) -> (i32, i32) {
    %c0_i32 = arith.constant 0 : i32
    %c0_i32_0 = arith.constant 0 : i32
    %c0_i32_1 = arith.constant 0 : i32
    return %c0_i32, %c0_i32_0 : i32, i32
  }
  func.func @transform_11(%arg0: i32) -> (i32, i32) {
    %c0_i32 = arith.constant 0 : i32
    %c0_i32_0 = arith.constant 0 : i32
    %c0_i32_1 = arith.constant 0 : i32
    return %c0_i32, %c0_i32_0 : i32, i32
  }
  func.func @transform_12(%arg0: i32) -> (i32, i32) {
    %c0_i32 = arith.constant 0 : i32
    %c0_i32_0 = arith.constant 0 : i32
    %c0_i32_1 = arith.constant 0 : i32
    return %c0_i32, %c0_i32_0 : i32, i32
  }
  func.func @transform_13(%arg0: i32) -> (i32, i32) {
    %c0_i32 = arith.constant 0 : i32
    %c0_i32_0 = arith.constant 0 : i32
    %c0_i32_1 = arith.constant 0 : i32
    return %c0_i32, %c0_i32_0 : i32, i32
  }
  func.func @transform_14(%arg0: i32) -> (i32, i32) {
    %c0_i32 = arith.constant 0 : i32
    %c0_i32_0 = arith.constant 0 : i32
    %c0_i32_1 = arith.constant 0 : i32
    return %c0_i32, %c0_i32_0 : i32, i32
  }
  func.func @transform_15(%arg0: i32) -> (i32, i32, i32) {
    %c0_i32 = arith.constant 0 : i32
    %c0_i32_0 = arith.constant 0 : i32
    %c0_i32_1 = arith.constant 0 : i32
    return %arg0, %c0_i32, %c0_i32_0 : i32, i32, i32
  }
  func.func @transform_16(%arg0: i32) -> (i32, i32, i32) {
    %c0_i32 = arith.constant 0 : i32
    %c0_i32_0 = arith.constant 0 : i32
    %c0_i32_1 = arith.constant 0 : i32
    return %arg0, %c0_i32, %c0_i32_0 : i32, i32, i32
  }
}

</mosaic_0001>

<bundles_post_ra>
// kernel: m3tnet_forward.5
= control target key start
LH: loop header
LB: loop body
LE: loop exit
PB: predicated region body
PF: predicated region fallthrough
CT: control target
= control target key end

     0   :  { %s1341_s18 = smov 0   ;;  %s1592_s0 = inlined_call_operand.vmem [shape: f32[8,4,768], index: 0, kind: input, shape index: {}]   ;;  %s1593_s1 = inlined_call_operand.vmem [shape: f32[8,3,1024], index: 1, kind: input, shape index: {}]   ;;  %s1594_s2 = inlined_call_operand.vmem [shape: bf16[768,128], index: 2, kind: input, shape index: {}]   ;;  %s1595_s3 = inlined_call_operand.vmem [shape: f32[3,128], index: 3, kind: input, shape index: {}]   ;;  %s1596_s4 = inlined_call_operand.vmem [shape: f32[1,128], index: 4, kind: input, shape index: {}]   ;;  %s1597_s5 = inlined_call_operand.vmem [shape: f32[8,4,128], index: 5, kind: output, shape index: {}]  }
   0x1 LB: > { %s1082_s19 = sadd.s32 4294967295, %s1309_s18   ;;  %p1086_p0 = scmp.ge.s32.totalorder %s1309_s18, 1  ;;  %s1309_s18 = sphi %s1341_s18, %s15_s18  }
   0x2   : > { %p201_p1 = scmp.lt.s32.totalorder %s1309_s18, 3 }
   0x4   : > { %p202_p2 = pnand %p1086_p0, %p201_p1 }
   0x5   : > { %v1221_v0 = vld [vmem:[%s1594_s2 + $0x40] sm:$0xff] (!%p202_p2)   ;;  %v1225_v4 = vld [vmem:[%s1594_s2 + $0x48] sm:$0xff] (!%p202_p2)   ;;  %v1229_v8 = vld [vmem:[%s1594_s2 + $0x50] sm:$0xff] (!%p202_p2)   ;;  %s1087_s29 = sshll.u32 (!%p202_p2), %s1082_s19, 2  ;;  %vm333_vm0 = vcmask (!%p202_p2), 1042432  }
   0x6   : > { %205 = sbr.rel (%p202_p2) target bundleno = 297 (0x129), region = 40  ;;  %v1222_v1 = vld [vmem:[%s1594_s2 + $0xc0] sm:$0xff] (!%p202_p2)   ;;  %1146 = vmatprep.subr.bf16.mxu0 (!%p202_p2), %v1221_v0  ;;  %v1226_v5 = vld [vmem:[%s1594_s2 + $0xc8] sm:$0xff] (!%p202_p2)   ;;  %v1230_v9 = vld [vmem:[%s1594_s2 + $0xd0] sm:$0xff] (!%p202_p2)   ;;  %p237_p3 = scmp.lt.s32.totalorder (!%p202_p2), %s1087_s29, 7 }
   0x7   : > { %v1223_v2 = vld [vmem:[%s1594_s2] sm:$0xff] (!%p202_p2)   ;;  %1168 = vmatprep.subr.bf16.mxu1 (!%p202_p2), %v1222_v1  ;;  %v1227_v6 = vld [vmem:[%s1594_s2 + $0x8] sm:$0xff] (!%p202_p2)   ;;  %v1231_v10 = vld [vmem:[%s1594_s2 + $0x10] sm:$0xff] (!%p202_p2)  }
   0x8   : > { %v1224_v3 = vld [vmem:[%s1594_s2 + $0x80] sm:$0xff] (!%p202_p2)   ;;  %1147 = vmatpush3.bf16.msra.mxu0 (!%p202_p2), %v1223_v2  ;;  %v1228_v7 = vld [vmem:[%s1594_s2 + $0x88] sm:$0xff] (!%p202_p2)   ;;  %v1232_v11 = vld [vmem:[%s1594_s2 + $0x90] sm:$0xff] (!%p202_p2)  }
   0x9   : > { %1169 = vmatpush3.bf16.msra.mxu1 (!%p202_p2), %v1224_v3  ;;  %1148 = vmatprep.subr.bf16.mxu0 (!%p202_p2), %v1225_v4  ;;  %v1233_v12 = vld [vmem:[%s1594_s2 + $0x58] sm:$0xff] (!%p202_p2)   ;;  %v1237_v16 = vld [vmem:[%s1594_s2 + $0x60] sm:$0xff] (!%p202_p2)   ;;  %v1241_v20 = vld [vmem:[%s1594_s2 + $0x68] sm:$0xff] (!%p202_p2)  }
   0xa   : > { %1170 = vmatprep.subr.bf16.mxu1 (!%p202_p2), %v1226_v5  ;;  %v1234_v13 = vld [vmem:[%s1594_s2 + $0xd8] sm:$0xff] (!%p202_p2)   ;;  %v1238_v17 = vld [vmem:[%s1594_s2 + $0xe0] sm:$0xff] (!%p202_p2)   ;;  %v1242_v21 = vld [vmem:[%s1594_s2 + $0xe8] sm:$0xff] (!%p202_p2)  }
   0xb   : > { %v1235_v14 = vld [vmem:[%s1594_s2 + $0x18] sm:$0xff] (!%p202_p2)   ;;  %v1239_v18 = vld [vmem:[%s1594_s2 + $0x20] sm:$0xff] (!%p202_p2)   ;;  %v1243_v22 = vld [vmem:[%s1594_s2 + $0x28] sm:$0xff] (!%p202_p2)  }
   0xc   : > { %1149 = vmatpush3.bf16.msra.mxu0 (!%p202_p2), %v1227_v6  ;;  %v1236_v15 = vld [vmem:[%s1594_s2 + $0x98] sm:$0xff] (!%p202_p2)   ;;  %v1240_v19 = vld [vmem:[%s1594_s2 + $0xa0] sm:$0xff] (!%p202_p2)   ;;  %v1244_v23 = vld [vmem:[%s1594_s2 + $0xa8] sm:$0xff] (!%p202_p2)  }
   0xd   : > { %1171 = vmatpush3.bf16.msra.mxu1 %v1228_v7  ;;  %1150 = vmatprep.subr.bf16.mxu0 %v1229_v8  ;;  %s1599_s29 = smov (!%p237_p3, %s1087_s29), 7  ;;  %v1245_v24 = vld [vmem:[%s1594_s2 + $0x70] sm:$0xff]   ;;  %v1249_v28 = vld [vmem:[%s1594_s2 + $0x78] sm:$0xff]   ;;  %v1265_v43 = vld [vmem:[%s1594_s2 + $0x140] sm:$0xff]  }
   0xe   : > { %1172 = vmatprep.subr.bf16.mxu1 %v1230_v9  ;;  %v1246_v25 = vld [vmem:[%s1594_s2 + $0xf0] sm:$0xff]   ;;  %s1212_s28 = smul.u32 24, %s1599_s29  ;;  %v1250_v29 = vld [vmem:[%s1594_s2 + $0xf8] sm:$0xff]   ;;  %v1266_v45 = vld [vmem:[%s1594_s2 + $0x100] sm:$0xff]   ;;  %s1145_s11 = sshll.u32 %s1599_s29, 5 }
   0xf   : > { %v1247_v26 = vld [vmem:[%s1594_s2 + $0x30] sm:$0xff]   ;;  %v1251_v30 = vld [vmem:[%s1594_s2 + $0x38] sm:$0xff]   ;;  %v1267_v46 = vld [vmem:[%s1594_s2 + $0x148] sm:$0xff]   ;;  %s1494_s16 = scalar_lea.vmem %s1593_s1, %s1145_s11  ;;  %s1093_s12 = sshll.u32 %s1599_s29, 2 }
  0x10   : > { %1151 = vmatpush3.bf16.msra.mxu0 %v1231_v10  ;;  %v1248_v27 = vld [vmem:[%s1594_s2 + $0xb0] sm:$0xff]   ;;  %s1450_s14 = scalar_lea.vmem %s1592_s0, %s1212_s28  ;;  %v1252_v31 = vld [vmem:[%s1594_s2 + $0xb8] sm:$0xff]   ;;  %v1268_v47 = vld [vmem:[%s1594_s2 + $0x108] sm:$0xff]   ;;  %s254_s15 = scalar_lea.vmem %s1597_s5, %s1093_s12 }
  0x11   : > { %1173 = vmatpush3.bf16.msra.mxu1 %v1232_v11  ;;  %1152 = vmatprep.subr.bf16.mxu0 %v1233_v12  ;;  %v1253_v32 = vld [vmem:[%s1450_s14] ss:$24 sps:$4 sm:$0xff]   ;;  %v1255_v33 = vld [vmem:[%s1450_s14 + $0x4] ss:$24 sps:$4 sm:$0xff]   ;;  %v1256_v34 = vld [vmem:[%s1450_s14 + $0x30] ss:$24 sps:$4 sm:$0xff]  }
  0x12   : > { %1174 = vmatprep.subr.bf16.mxu1 %v1234_v13  ;;  %v1258_v35 = vld [vmem:[%s1450_s14 + $0x34] ss:$24 sps:$4 sm:$0xff]   ;;  %v1259_v37 = vld [vmem:[%s1450_s14 + $0x8] ss:$24 sps:$4 sm:$0xff]   ;;  %v1262_v39 = vld [vmem:[%s1450_s14 + $0x38] ss:$24 sps:$4 sm:$0xff]   ;;  %v476_v40 = vpack.c.bf16 %v1256_v34, %v1253_v32 }
  0x13   : > { %v477_v36 = vpack.c.bf16 %v1258_v35, %v1255_v33  ;;  %v1261_v38 = vld [vmem:[%s1450_s14 + $0xc] ss:$24 sps:$4 sm:$0xff]   ;;  %v1264_v41 = vld [vmem:[%s1450_s14 + $0x3c] ss:$24 sps:$4 sm:$0xff]   ;;  %v478_v42 = vpack.c.bf16 %v1262_v39, %v1259_v37  ;;  %v1521_v6 = vld [vmem:[%s1450_s14 + $0x10] ss:$24 sps:$4 sm:$0xff]  }
  0x14   : > { %1153 = vmatpush3.bf16.msra.mxu0 %v1235_v14  ;;  %v479_v44 = vpack.c.bf16 %v1264_v41, %v1261_v38  ;;  %v1269_v48 = vld [vmem:[%s1594_s2 + $0x150] sm:$0xff]   ;;  %v1271_v50 = vld [vmem:[%s1594_s2 + $0x158] sm:$0xff]   ;;  %v1273_v52 = vld [vmem:[%s1594_s2 + $0x160] sm:$0xff]  }
  0x15   : > { %1175 = vmatpush3.bf16.msra.mxu1 %v1236_v15  ;;  %1154 = vmatprep.subr.bf16.mxu0 %v1237_v16  ;;  %v1270_v49 = vld [vmem:[%s1594_s2 + $0x110] sm:$0xff]   ;;  %v1272_v51 = vld [vmem:[%s1594_s2 + $0x118] sm:$0xff]   ;;  %v1274_v53 = vld [vmem:[%s1594_s2 + $0x120] sm:$0xff]  }
  0x16   : > { %1176 = vmatprep.subr.bf16.mxu1 %v1238_v17  ;;  %898 = vmatprep.mubr.bf16.mxu0 %v477_v36  ;;  %v1275_v54 = vld [vmem:[%s1594_s2 + $0x168] sm:$0xff]   ;;  %v1286_v56 = vld [vmem:[%s1450_s14 + $0x44] ss:$24 sps:$4 sm:$0xff]   ;;  %v271_v59 = vld [vmem:[%s1494_s16 + $0x10] sm:$0x77] }
  0x17   : > { %939 = vmatprep.mubr.bf16.mxu1 %v479_v44  ;;  %v1283_v55 = vld [vmem:[%s1450_s14 + $0x14] ss:$24 sps:$4 sm:$0xff]   ;;  %v269_v57 = vld [vmem:[%s1494_s16] sm:$0x77]  ;;  %v272_v62 = vld [vmem:[%s1494_s16 + $0x18] sm:$0x77]  ;;  %v303_v7 = vcombine.high %v271_v59, %v271_v59 }
  0x18   : > { %1155 = vmatpush3.bf16.msra.mxu0 %v1239_v18  ;;  %v270_v58 = vld [vmem:[%s1494_s16 + $0x8] sm:$0x77]  ;;  %v481_v61 = vpack.c.bf16 %v1286_v56, %v1283_v55  ;;  %v301_v63 = vcombine.high %v269_v57, %v269_v57  ;;  %v277_v1 = vld [vmem:[%s1494_s16 + $0x40] sm:$0x77]  ;;  %v1277_v2 = vld [vmem:[%s1594_s2 + $0x170] sm:$0xff]   ;;  %v334_v3 = vsel %vm333_vm0, %v269_v57, 0.0  ;;  %v304_v8 = vcombine.high %v272_v62, %v272_v62 }
  0x19   : > { %1177 = vmatpush3.bf16.msra.mxu1 %v1240_v19  ;;  %1156 = vmatprep.subr.bf16.mxu0 %v1241_v20  ;;  %v1276_v60 = vld [vmem:[%s1594_s2 + $0x128] sm:$0xff]   ;;  %v302_v0 = vcombine.high %v270_v58, %v270_v58  ;;  %v1278_v5 = vld [vmem:[%s1594_s2 + $0x130] sm:$0xff]   ;;  %v337_v10 = vsel %vm333_vm0, %v270_v58, 0.0  ;;  %v1527_v12 = vld [vmem:[%s1450_s14 + $0x40] ss:$24 sps:$4 sm:$0xff]   ;;  %v341_v15 = vsel %vm333_vm0, %v271_v59, 0.0  ;;  %v309_v17 = vcombine.high %v277_v1, %v277_v1 }
  0x1a   : > { %1178 = vmatprep.subr.bf16.mxu1 %v1242_v21  ;;  %v278_v4 = vld [vmem:[%s1494_s16 + $0x48] sm:$0x77]  ;;  %v335_v9 = vsel %vm333_vm0, %v301_v63, 0.0  ;;  %v279_v11 = vld [vmem:[%s1494_s16 + $0x50] sm:$0x77]  ;;  %v345_v18 = vsel %vm333_vm0, %v272_v62, 0.0  ;;  %v480_v38 = vpack.c.bf16 %v1527_v12, %v1521_v6 }
  0x1b   : > { %v336_v13 = vadd.f32 %v335_v9, %v334_v3  ;;  %v339_v14 = vsel %vm333_vm0, %v302_v0, 0.0  ;;  %v280_v16 = vld [vmem:[%s1494_s16 + $0x58] sm:$0x77]  ;;  %v310_v19 = vcombine.high %v278_v4, %v278_v4  ;;  %v368_v20 = vsel %vm333_vm0, %v277_v1, 0.0  ;;  %v273_v21 = vld [vmem:[%s1494_s16 + $0x20] sm:$0x77] }
  0x1c   : > { %1157 = vmatpush3.bf16.msra.mxu0 %v1243_v22  ;;  %v274_v22 = vld [vmem:[%s1494_s16 + $0x28] sm:$0x77]  ;;  %v1280_v32 = vld [vmem:[%s1594_s2 + $0x138] sm:$0xff]   ;;  %v275_v35 = vld [vmem:[%s1494_s16 + $0x30] sm:$0x77]  ;;  %v305_v36 = vcombine.high %v273_v21, %v273_v21 }
  0x1d   : > { %1179 = vmatpush3.bf16.msra.mxu1 %v1244_v23  ;;  %1158 = vmatprep.subr.bf16.mxu0 %v1245_v24  ;;  %v1279_v23 = vld [vmem:[%s1594_s2 + $0x178] sm:$0xff]   ;;  %v338_v24 = vadd.f32 %v337_v10, %v336_v13  ;;  %v373_v34 = vsel %vm333_vm0, %v310_v19, 0.0  ;;  %v306_v37 = vcombine.high %v274_v22, %v274_v22  ;;  %v358_v63 = vsel %vm333_vm0, %v275_v35, 0.0 }
  0x1e   : > { %1180 = vmatprep.subr.bf16.mxu1 %v1246_v25  ;;  %v311_v25 = vcombine.high %v279_v11, %v279_v11  ;;  %v276_v41 = vld [vmem:[%s1494_s16 + $0x38] sm:$0x77] }
  0x1f   : > { %v340_v33 = vadd.f32 %v339_v14, %v338_v24  ;;  %v356_v55 = vsel %vm333_vm0, %v306_v37, 0.0  ;;  %v308_v58 = vcombine.high %v276_v41, %v276_v41  ;;  %v284_v12 = vld [vmem:[%s1494_s16 + $0x78] sm:$0x77]  ;;  %v362_v14 = vsel %vm333_vm0, %v276_v41, 0.0 }
  0x20   : > { %1159 = vmatpush3.bf16.msra.mxu0 %v1247_v26  ;;  %v369_v26 = vsel %vm333_vm0, %v309_v17, 0.0  ;;  %v396_v24 = vsel %vm333_vm0, %v284_v12, 0.0 }
  0x21   : > { %1181 = vmatpush3.bf16.msra.mxu1 %v1248_v27  ;;  %1160 = vmatprep.subr.bf16.mxu0 %v1249_v28  ;;  %v371_v27 = vsel %vm333_vm0, %v278_v4, 0.0  ;;  %v343_v28 = vsel %vm333_vm0, %v303_v7, 0.0  ;;  %v342_v44 = vadd.f32 %v341_v15, %v340_v33  ;;  %v364_v19 = vsel %vm333_vm0, %v308_v58, 0.0 }
  0x22   : > { %1182 = vmatprep.subr.bf16.mxu1 %v1250_v29  ;;  %v347_v29 = vsel %vm333_vm0, %v304_v8, 0.0 }
  0x24   : > { %1161 = vmatpush3.bf16.msra.mxu0 %v1251_v30  ;;  %v312_v30 = vcombine.high %v280_v16, %v280_v16 }
  0x25   : > { %1183 = vmatpush3.bf16.msra.mxu1 %v1252_v31  ;;  %1190 = vmatprep.subr.bf16.mxu0 %v1265_v43  ;;  %v370_v31 = vadd.f32 %v369_v26, %v368_v20  ;;  %v281_v43 = vld [vmem:[%s1494_s16 + $0x60] sm:$0x77]  ;;  %v316_v20 = vcombine.high %v284_v12, %v284_v12 }
  0x26   : > { %v313_v56 = vcombine.high %v281_v43, %v281_v43  ;;  %v385_v0 = vsel %vm333_vm0, %v281_v43, 0.0 }
  0x27   : > { %899 = vmatmul.mubr.bf16.vlgmr.msra.gmra.mrb[0].mxu0 %v476_v40  ;;  %v372_v39 = vadd.f32 %v371_v27, %v370_v31  ;;  %v375_v40 = vsel %vm333_vm0, %v279_v11, 0.0  ;;  %v398_v27 = vsel %vm333_vm0, %v316_v20, 0.0  ;;  %v1142_v20 = vld [vmem:[%s1596_s4] ss:$0 sm:$0xff] }
  0x28   : > { %1191 = vmatpush3.bf16.msra.mxu0 %v1266_v45  ;;  %940 = vmatmul.mubr.bf16.vlgmr.msra.gmra.mrb[0].mxu1 %v478_v42  ;;  %v351_v42 = vsel %vm333_vm0, %v273_v21, 0.0  ;;  %v377_v45 = vsel %vm333_vm0, %v311_v25, 0.0  ;;  %v386_v1 = vsel %vm333_vm0, %v313_v56, 0.0 }
  0x29   : > { %1192 = vmatprep.subr.bf16.mxu0 %v1267_v46  ;;  %980 = vmatprep.mubr.bf16.mxu0 %v481_v61  ;;  %v352_v46 = vsel %vm333_vm0, %v305_v36, 0.0  ;;  %v387_v4 = vadd.f32 %v386_v1, %v385_v0 }
  0x2c   : > { %1193 = vmatpush3.bf16.msra.mxu0 %v1268_v47  ;;  %v354_v47 = vsel %vm333_vm0, %v274_v22, 0.0 }
  0x2d   : > { %1194 = vmatprep.subr.bf16.mxu0 %v1269_v48  ;;  %v282_v48 = vld [vmem:[%s1494_s16 + $0x68] sm:$0x77] }
  0x2e   : > { %v314_v61 = vcombine.high %v282_v48, %v282_v48 }
  0x30   : > { %1195 = vmatpush3.bf16.msra.mxu0 %v1270_v49  ;;  %v374_v49 = vadd.f32 %v373_v34, %v372_v39  ;;  %v390_v9 = vsel %vm333_vm0, %v314_v61, 0.0 }
  0x31   : > { %1196 = vmatprep.subr.bf16.mxu0 %v1271_v50  ;;  %v379_v50 = vsel %vm333_vm0, %v280_v16, 0.0 }
  0x32   : > { %v376_v57 = vadd.f32 %v375_v40, %v374_v49 }
  0x34   : > { %1197 = vmatpush3.bf16.msra.mxu0 %v1272_v51  ;;  %v381_v51 = vsel %vm333_vm0, %v312_v30, 0.0 }
  0x35   : > { %1198 = vmatprep.subr.bf16.mxu0 %v1273_v52  ;;  %v353_v52 = vadd.f32 %v352_v46, %v351_v42 }
  0x37   : > { %v355_v59 = vadd.f32 %v354_v47, %v353_v52  ;;  %v407_v47 = vld [vmem:[%s1595_s3] sm:$0x7] }
  0x38   : > { %1199 = vmatpush3.bf16.msra.mxu0 %v1274_v53  ;;  %v344_v53 = vadd.f32 %v343_v28, %v342_v44 }
  0x39   : > { %1200 = vmatprep.subr.bf16.mxu0 %v1275_v54  ;;  %v307_v54 = vcombine.high %v275_v35, %v275_v35  ;;  %v357_v3 = vadd.f32 %v356_v55, %v355_v59 }
  0x3a   : > { %v346_v62 = vadd.f32 %v345_v18, %v344_v53 }
  0x3b   : > { %v360_v7 = vsel %vm333_vm0, %v307_v54, 0.0  ;;  %v359_v11 = vadd.f32 %v358_v63, %v357_v3 }
  0x3c   : > { %1201 = vmatpush3.bf16.msra.mxu0 %v1276_v60  ;;  %v283_v60 = vld [vmem:[%s1494_s16 + $0x70] sm:$0x77]  ;;  %v348_v6 = vadd.f32 %v347_v29, %v346_v62 }
  0x3d   : > { %1202 = vmatprep.subr.bf16.mxu0 %v1277_v2  ;;  %v378_v2 = vadd.f32 %v377_v45, %v376_v57  ;;  %v315_v8 = vcombine.high %v283_v60, %v283_v60  ;;  %v392_v15 = vsel %vm333_vm0, %v283_v60, 0.0  ;;  %v361_v17 = vadd.f32 %v360_v7, %v359_v11 }
  0x3e   : > { %349 = vadd.xlane.f32.xlu0 %v348_v6 }
  0x3f   : > { %v380_v10 = vadd.f32 %v379_v50, %v378_v2  ;;  %v394_v21 = vsel %vm333_vm0, %v315_v8, 0.0  ;;  %v363_v22 = vadd.f32 %v362_v14, %v361_v17 }
  0x40   : > { %1203 = vmatpush3.bf16.msra.mxu0 %v1278_v5  ;;  %v388_v5 = vsel %vm333_vm0, %v282_v48, 0.0 }
  0x41   : > { %1204 = vmatprep.subr.bf16.mxu0 %v1279_v23  ;;  %v389_v13 = vadd.f32 %v388_v5, %v387_v4  ;;  %v382_v16 = vadd.f32 %v381_v51, %v380_v10  ;;  %v365_v25 = vadd.f32 %v364_v19, %v363_v22 }
  0x43   : > { %v391_v18 = vadd.f32 %v390_v9, %v389_v13  ;;  %383 = vadd.xlane.f32.xlu1 %v382_v16  ;;  %366 = vadd.xlane.f32.xlu0 %v365_v25 }
  0x44   : > { %1205 = vmatpush3.bf16.msra.mxu0 %v1280_v32 }
  0x45   : > { %v393_v23 = vadd.f32 %v392_v15, %v391_v18 }
  0x47   : > { %981 = vmatmul.mubr.bf16.vlgmr.msra.gmra.mrb[4].mxu0 %v480_v38  ;;  %v395_v26 = vadd.f32 %v394_v21, %v393_v23 }
  0x49   : > { %v397_v28 = vadd.f32 %v396_v24, %v395_v26 }
  0x4b   : > { %v399_v29 = vadd.f32 %v398_v27, %v397_v28 }
  0x4d   : > { %400 = vadd.xlane.f32.xlu1 %v399_v29 }
  0xcb   : > { %v350_v31 = vpop.xlane.xlu0 %349 }
  0xcc   : > { %v403_v46 = vmul.f32 0.0009765625, %v350_v31 }
  0xce   : > { %v408_v52 = vmul.f32 %v407_v47, %v403_v46 }
  0xd0   : > { %v384_v35 = vpop.xlane.xlu1 %383  ;;  %v367_v43 = vpop.xlane.xlu0 %366  ;;  %v412_v56 = vsel %vm333_vm0, %v408_v52, 0.0 }
  0xd1   : > { %v405_v49 = vmul.f32 0.0009765625, %v384_v35  ;;  %v404_v50 = vmul.f32 0.0009765625, %v367_v43  ;;  %v413_v60 = vrot.slane %v412_v56, 4 }
  0xd3   : > { %v410_v54 = vmul.f32 %v407_v47, %v405_v49  ;;  %v409_v55 = vmul.f32 %v407_v47, %v404_v50  ;;  %v414_v0 = vadd.f32 %v413_v60, %v412_v56 }
  0xd5   : > { %v426_v58 = vsel %vm333_vm0, %v410_v54, 0.0  ;;  %v419_v59 = vsel %vm333_vm0, %v409_v55, 0.0  ;;  %v415_v4 = vrot.slane %v414_v0, 2 }
  0xd6   : > { %v427_v61 = vrot.slane %v426_v58, 4  ;;  %v420_v62 = vrot.slane %v419_v59, 4 }
  0xd7   : > { %v416_v8 = vadd.f32 %v415_v4, %v414_v0 }
  0xd8   : > { %v428_v2 = vadd.f32 %v427_v61, %v426_v58  ;;  %v421_v3 = vadd.f32 %v420_v62, %v419_v59 }
  0xd9   : > { %v417_v13 = vrot.slane %v416_v8, 1 }
  0xda   : > { %v401_v51 = vpop.xlane.xlu1 %400  ;;  %v429_v6 = vrot.slane %v428_v2, 2  ;;  %v422_v7 = vrot.slane %v421_v3, 2 }
  0xdb   : > { %v406_v53 = vmul.f32 0.0009765625, %v401_v51  ;;  %v418_v24 = vadd.f32 %v417_v13, %v416_v8 }
  0xdc   : > { %v430_v10 = vadd.f32 %v429_v6, %v428_v2  ;;  %v423_v11 = vadd.f32 %v422_v7, %v421_v3 }
  0xdd   : > { %v411_v57 = vmul.f32 %v407_v47, %v406_v53 }
  0xde   : > { %v431_v18 = vrot.slane %v430_v10, 1  ;;  %v424_v19 = vrot.slane %v423_v11, 1 }
  0xdf   : > { %v433_v63 = vsel %vm333_vm0, %v411_v57, 0.0 }
  0xe0   : > { %v434_v1 = vrot.slane %v433_v63, 4  ;;  %v425_v29 = vadd.f32 %v424_v19, %v423_v11 }
  0xe2   : > { %v435_v5 = vadd.f32 %v434_v1, %v433_v63 }
  0xe4   : > { %v436_v9 = vrot.slane %v435_v5, 2 }
  0xe6   : > { %v437_v15 = vadd.f32 %v436_v9, %v435_v5 }
  0xe8   : > { %v438_v25 = vrot.slane %v437_v15, 1 }
  0xea   : > { %v439_v35 = vadd.f32 %v438_v25, %v437_v15 }
  0xfa   : > { %v1162_v30 = vpop.f32.mrb[0].mxu0 }
  0xfb   : > { %v1163_v32 = vpop.f32.mrb[1].mxu0  ;;  %v1184_v36 = vpop.f32.mrb[0].mxu1 }
  0xfc   : > { %v1164_v33 = vadd.f32 %v1163_v32, %v1162_v30  ;;  %v1165_v34 = vpop.f32.mrb[2].mxu0  ;;  %v1185_v38 = vpop.f32.mrb[1].mxu1  ;;  %v432_v30 = vadd.f32 %v431_v18, %v430_v10 }
  0xfd   : > { %v1166_v37 = vpop.f32.mrb[3].mxu0  ;;  %v1186_v40 = vadd.f32 %v1185_v38, %v1184_v36  ;;  %v1187_v41 = vpop.f32.mrb[2].mxu1 }
  0xfe   : > { %v1167_v39 = vadd.f32 %v1166_v37, %v1165_v34  ;;  %v1188_v42 = vpop.f32.mrb[3].mxu1 }
  0xff   : > { %v942_v44 = vadd.f32 %v1186_v40, %v1164_v33  ;;  %v1189_v45 = vadd.f32 %v1188_v42, %v1187_v41 }
 0x101   : > { %v945_v48 = vadd.f32 %v1189_v45, %v1167_v39 }
 0x11a   : > { %v1206_v12 = vpop.f32.mrb[4].mxu0 }
 0x11b   : > { %v1207_v14 = vpop.f32.mrb[5].mxu0 }
 0x11c   : > { %v1208_v16 = vadd.f32 %v1207_v14, %v1206_v12  ;;  %v1209_v17 = vpop.f32.mrb[6].mxu0 }
 0x11d   : > { %v1210_v21 = vpop.f32.mrb[7].mxu0 }
 0x11e   : > { %v983_v22 = vadd.f32 %v1208_v16, %v942_v44  ;;  %v1211_v23 = vadd.f32 %v1210_v21, %v1209_v17 }
 0x120   : > { %v991_v26 = vcombine.high %v983_v22, %v983_v22  ;;  %v1002_v27 = vadd.f32 %v1142_v20, %v983_v22  ;;  %v986_v28 = vadd.f32 %v1211_v23, %v945_v48 }
 0x122   : > { %v1003_v31 = vadd.f32 %v1142_v20, %v991_v26  ;;  %v1006_v32 = vsub.f32 %v1002_v27, %v418_v24  ;;  %v992_v33 = vcombine.high %v986_v28, %v986_v28  ;;  %v1004_v34 = vadd.f32 %v1142_v20, %v986_v28 }
 0x124   : > { %v1007_v36 = vsub.f32 %v1003_v31, %v425_v29  ;;  %1010 = vst [vmem:[%s254_s15] sm:$0xf] %v1006_v32  ;;  %v1005_v37 = vadd.f32 %v1142_v20, %v992_v33  ;;  %v1008_v38 = vsub.f32 %v1004_v34, %v432_v30 }
 0x126   : > { %1011 = vst [vmem:[%s254_s15 + $0x4] sm:$0xf] %v1007_v36  ;;  %v1009_v39 = vsub.f32 %v1005_v37, %v439_v35  ;;  %1012 = vst [vmem:[%s254_s15 + $0x8] sm:$0xf] %v1008_v38 }
 0x128   : > { %1013 = vst [vmem:[%s254_s15 + $0xc] sm:$0xf] %v1009_v39 }
 0x129 PF: > { %s15_s18 = sadd.s32 1, %s1309_s18  }
 0x12a   : > { %p12_p4 = scmp.ge.s32.totalorder %s15_s18, 4  }
 0x12c   :  { %14 = sbr.rel (!%p12_p4) target bundleno = 1 (0x1), region = 73 }

// kernel: m3tnet_forward.7
= control target key start
LH: loop header
LB: loop body
LE: loop exit
PB: predicated region body
PF: predicated region fallthrough
CT: control target
= control target key end

     0   :  { %v1218_v1 = vmov 0   ;;  %v1219_v28 = vmov 0.0   ;;  %vm1220_vm0 = vmmov 0   ;;  %vm417_vm1 = vcmask 1041409   ;;  %s1581_s2 = inlined_call_operand.vmem [shape: bf16[128,384], index: 2, kind: input, shape index: {}]   ;;  %s1582_s6 = inlined_call_operand.vmem [shape: bf16[384,256], index: 6, kind: input, shape index: {}]   ;;  %s1583_s1 = inlined_call_operand.vmem [shape: f32[2,8,128], index: 1, kind: input, shape index: {}]   ;;  %s1584_s4 = inlined_call_operand.vmem [shape: bf16[128,256], index: 4, kind: input, shape index: {}]   ;;  %s1585_s0 = inlined_call_operand.vmem [shape: f32[2,4,128], index: 0, kind: input, shape index: {}]   ;;  %s1586_s3 = inlined_call_operand.vmem [shape: f32[1,384], index: 3, kind: input, shape index: {}]   ;;  %s1587_s5 = inlined_call_operand.vmem [shape: f32[1,256], index: 5, kind: input, shape index: {}]   ;;  %s1588_s7 = inlined_call_operand.vmem [shape: f32[1,256], index: 7, kind: input, shape index: {}]   ;;  %s1589_s8 = inlined_call_operand.vmem [shape: f32[2,4,256], index: 8, kind: output, shape index: {}]  }
   0x1   :  { %v1089_v0 = vld [vmem:[%s1581_s2 + $0x4] ss:$12 sps:$4 sm:$0xff]   ;;  %244 = vmatprep.mubr.bf16.mxu1 %v1218_v1  ;;  %v1091_v2 = vld [vmem:[%s1581_s2] ss:$12 sps:$4 sm:$0xff]   ;;  %v1092_v3 = vld [vmem:[%s1581_s2 + $0x1c] ss:$12 sps:$4 sm:$0xff]  }
   0x2   :  { %212 = vmatprep.subr.bf16.mxu1 %v1089_v0  ;;  %v1094_v4 = vld [vmem:[%s1581_s2 + $0x18] ss:$12 sps:$4 sm:$0xff]   ;;  %v1095_v5 = vld [vmem:[%s1581_s2 + $0x34] ss:$12 sps:$4 sm:$0xff]   ;;  %v1097_v6 = vld [vmem:[%s1581_s2 + $0x30] ss:$12 sps:$4 sm:$0xff]  }
   0x3   :  { %213 = vmatpush1.bf16.msra.mxu1 %v1091_v2  ;;  %v1098_v7 = vld [vmem:[%s1581_s2 + $0x4c] ss:$12 sps:$4 sm:$0xff]   ;;  %v1100_v8 = vld [vmem:[%s1581_s2 + $0x48] ss:$12 sps:$4 sm:$0xff]   ;;  %v1101_v9 = vld [vmem:[%s1581_s2 + $0x64] ss:$12 sps:$4 sm:$0xff]  }
   0x4   :  { %214 = vmatprep.subr.bf16.mxu1 %v1092_v3  ;;  %v1103_v10 = vld [vmem:[%s1581_s2 + $0x60] ss:$12 sps:$4 sm:$0xff]   ;;  %v1104_v11 = vld [vmem:[%s1581_s2 + $0x7c] ss:$12 sps:$4 sm:$0xff]   ;;  %v1106_v12 = vld [vmem:[%s1581_s2 + $0x78] ss:$12 sps:$4 sm:$0xff]  }
   0x5   :  { %v1107_v13 = vld [vmem:[%s1581_s2 + $0x94] ss:$12 sps:$4 sm:$0xff]   ;;  %v1121_v14 = vld [vmem:[%s1582_s6 + $0x4] ss:$8 sps:$4 sm:$0xff]   ;;  %v1109_v17 = vld [vmem:[%s1581_s2 + $0x90] ss:$12 sps:$4 sm:$0xff]  }
   0x6   :  { %v1123_v15 = vld [vmem:[%s1582_s6] ss:$8 sps:$4 sm:$0xff]   ;;  %v1124_v16 = vld [vmem:[%s1582_s6 + $0x14] ss:$8 sps:$4 sm:$0xff]   ;;  %667 = vmatprep.subr.bf16.mxu0 %v1121_v14  ;;  %v1126_v18 = vld [vmem:[%s1582_s6 + $0x10] ss:$8 sps:$4 sm:$0xff]  }
   0x7   :  { %215 = vmatpush1.bf16.msra.mxu1 %v1094_v4  ;;  %668 = vmatpush1.bf16.msra.mxu0 %v1123_v15  ;;  %v1110_v19 = vld [vmem:[%s1581_s2 + $0xac] ss:$12 sps:$4 sm:$0xff]   ;;  %v1112_v21 = vld [vmem:[%s1581_s2 + $0xa8] ss:$12 sps:$4 sm:$0xff]   ;;  %v32_v22 = vld [vmem:[%s1583_s1] sm:$0xff] }
   0x8   :  { %216 = vmatprep.subr.bf16.mxu1 %v1095_v5  ;;  %669 = vmatprep.subr.bf16.mxu0 %v1124_v16  ;;  %v1127_v20 = vld [vmem:[%s1582_s6 + $0x24] ss:$8 sps:$4 sm:$0xff]   ;;  %v1129_v24 = vld [vmem:[%s1582_s6 + $0x20] ss:$8 sps:$4 sm:$0xff]   ;;  %v1130_v25 = vld [vmem:[%s1582_s6 + $0x34] ss:$8 sps:$4 sm:$0xff]  }
   0x9   :  { %v33_v23 = vld [vmem:[%s1583_s1 + $0x8] sm:$0xff]  ;;  %v1132_v29 = vld [vmem:[%s1582_s6 + $0x30] ss:$8 sps:$4 sm:$0xff]   ;;  %v1136_v33 = vld [vmem:[%s1582_s6 + $0x54] ss:$8 sps:$4 sm:$0xff]  }
   0xa   :  { %v34_v26 = vpack.c.bf16 %v33_v23, %v32_v22  ;;  %v1113_v27 = vld [vmem:[%s1581_s2 + $0x8] ss:$12 sps:$4 sm:$0xff]   ;;  %v1133_v30 = vld [vmem:[%s1582_s6 + $0x44] ss:$8 sps:$4 sm:$0xff]   ;;  %v1138_v35 = vld [vmem:[%s1582_s6 + $0x50] ss:$8 sps:$4 sm:$0xff]  }
   0xb   :  { %217 = vmatpush1.bf16.msra.mxu1 %v1097_v6  ;;  %670 = vmatpush1.bf16.msra.mxu0 %v1126_v18  ;;  %v1114_v31 = vld [vmem:[%s1581_s2 + $0x20] ss:$12 sps:$4 sm:$0xff]   ;;  %v1115_v34 = vld [vmem:[%s1581_s2 + $0x38] ss:$12 sps:$4 sm:$0xff]   ;;  %v1116_v37 = vld [vmem:[%s1581_s2 + $0x50] ss:$12 sps:$4 sm:$0xff]  }
   0xc   :  { %218 = vmatprep.subr.bf16.mxu1 %v1098_v7  ;;  %671 = vmatprep.subr.bf16.mxu0 %v1127_v20  ;;  %v1135_v32 = vld [vmem:[%s1582_s6 + $0x40] ss:$8 sps:$4 sm:$0xff]   ;;  %v1139_v36 = vld [vmem:[%s1582_s6 + $0x64] ss:$8 sps:$4 sm:$0xff]   ;;  %v1142_v39 = vld [vmem:[%s1582_s6 + $0x74] ss:$8 sps:$4 sm:$0xff]  }
   0xd   :  { %v1141_v38 = vld [vmem:[%s1582_s6 + $0x60] ss:$8 sps:$4 sm:$0xff]   ;;  %v1144_v41 = vld [vmem:[%s1582_s6 + $0x70] ss:$8 sps:$4 sm:$0xff]   ;;  %v1145_v42 = vld [vmem:[%s1582_s6 + $0x84] ss:$8 sps:$4 sm:$0xff]  }
   0xe   :  { %v1117_v40 = vld [vmem:[%s1581_s2 + $0x68] ss:$12 sps:$4 sm:$0xff]   ;;  %v1118_v43 = vld [vmem:[%s1581_s2 + $0x80] ss:$12 sps:$4 sm:$0xff]   ;;  %v1119_v46 = vld [vmem:[%s1581_s2 + $0x98] ss:$12 sps:$4 sm:$0xff]  }
   0xf   :  { %219 = vmatpush1.bf16.msra.mxu1 %v1100_v8  ;;  %672 = vmatpush1.bf16.msra.mxu0 %v1129_v24  ;;  %v1147_v44 = vld [vmem:[%s1582_s6 + $0x80] ss:$8 sps:$4 sm:$0xff]   ;;  %v1148_v45 = vld [vmem:[%s1582_s6 + $0x94] ss:$8 sps:$4 sm:$0xff]   ;;  %v1150_v48 = vld [vmem:[%s1582_s6 + $0x90] ss:$8 sps:$4 sm:$0xff]  }
  0x10   :  { %220 = vmatprep.subr.bf16.mxu1 %v1101_v9  ;;  %673 = vmatprep.subr.bf16.mxu0 %v1130_v25  ;;  %v1120_v47 = vld [vmem:[%s1581_s2 + $0xb0] ss:$12 sps:$4 sm:$0xff]   ;;  %v1151_v49 = vld [vmem:[%s1582_s6 + $0xa4] ss:$8 sps:$4 sm:$0xff]   ;;  %v1153_v50 = vld [vmem:[%s1582_s6 + $0xa0] ss:$8 sps:$4 sm:$0xff]  }
  0x11   :  { %v1154_v51 = vld [vmem:[%s1582_s6 + $0xb4] ss:$8 sps:$4 sm:$0xff]   ;;  %v1156_v52 = vld [vmem:[%s1582_s6 + $0xb0] ss:$8 sps:$4 sm:$0xff]   ;;  %v1157_v53 = vld [vmem:[%s1582_s6 + $0xc4] ss:$8 sps:$4 sm:$0xff]  }
  0x12   :  { %v1159_v54 = vld [vmem:[%s1582_s6 + $0xc0] ss:$8 sps:$4 sm:$0xff]   ;;  %v1160_v55 = vld [vmem:[%s1582_s6 + $0xd4] ss:$8 sps:$4 sm:$0xff]   ;;  %v1162_v56 = vld [vmem:[%s1582_s6 + $0xd0] ss:$8 sps:$4 sm:$0xff]  }
  0x13   :  { %221 = vmatpush1.bf16.msra.mxu1 %v1103_v10  ;;  %674 = vmatpush1.bf16.msra.mxu0 %v1132_v29  ;;  %v1163_v57 = vld [vmem:[%s1582_s6 + $0xe4] ss:$8 sps:$4 sm:$0xff]   ;;  %v1165_v58 = vld [vmem:[%s1582_s6 + $0xe0] ss:$8 sps:$4 sm:$0xff]   ;;  %v1166_v59 = vld [vmem:[%s1582_s6 + $0xf4] ss:$8 sps:$4 sm:$0xff]  }
  0x14   :  { %222 = vmatprep.subr.bf16.mxu1 %v1104_v11  ;;  %675 = vmatprep.subr.bf16.mxu0 %v1133_v30  ;;  %v1168_v60 = vld [vmem:[%s1582_s6 + $0xf0] ss:$8 sps:$4 sm:$0xff]   ;;  %v1171_v61 = vld [vmem:[%s1582_s6 + $0x104] ss:$8 sps:$4 sm:$0xff]   ;;  %v1175_v63 = vld [vmem:[%s1584_s4] ss:$8 sps:$4 sm:$0xff]  }
  0x15   :  { %v1177_v62 = vld [vmem:[%s1584_s4 + $0x4] ss:$8 sps:$4 sm:$0xff]   ;;  %v1183_v0 = vld [vmem:[%s1584_s4 + $0x14] ss:$8 sps:$4 sm:$0xff]   ;;  %v1181_v2 = vld [vmem:[%s1584_s4 + $0x10] ss:$8 sps:$4 sm:$0xff]  }
  0x16   :  { %v1189_v3 = vld [vmem:[%s1584_s4 + $0x24] ss:$8 sps:$4 sm:$0xff]   ;;  %v1187_v4 = vld [vmem:[%s1584_s4 + $0x20] ss:$8 sps:$4 sm:$0xff]   ;;  %v1195_v5 = vld [vmem:[%s1584_s4 + $0x34] ss:$8 sps:$4 sm:$0xff]  }
  0x17   :  { %223 = vmatpush1.bf16.msra.mxu1 %v1106_v12  ;;  %676 = vmatpush1.bf16.msra.mxu0 %v1135_v32  ;;  %v1193_v6 = vld [vmem:[%s1584_s4 + $0x30] ss:$8 sps:$4 sm:$0xff]   ;;  %v1201_v7 = vld [vmem:[%s1584_s4 + $0x44] ss:$8 sps:$4 sm:$0xff]   ;;  %v1199_v8 = vld [vmem:[%s1584_s4 + $0x40] ss:$8 sps:$4 sm:$0xff]  }
  0x18   :  { %224 = vmatprep.subr.bf16.mxu1 %v1107_v13  ;;  %677 = vmatprep.subr.bf16.mxu0 %v1136_v33  ;;  %v1205_v9 = vld [vmem:[%s1584_s4 + $0x50] ss:$8 sps:$4 sm:$0xff]   ;;  %v1207_v10 = vld [vmem:[%s1584_s4 + $0x54] ss:$8 sps:$4 sm:$0xff]   ;;  %v1211_v11 = vld [vmem:[%s1584_s4 + $0x60] ss:$8 sps:$4 sm:$0xff]  }
  0x19   :  { %v1213_v12 = vld [vmem:[%s1584_s4 + $0x64] ss:$8 sps:$4 sm:$0xff]   ;;  %v1214_v13 = vld [vmem:[%s1584_s4 + $0x70] ss:$8 sps:$4 sm:$0xff]   ;;  %v1216_v14 = vld [vmem:[%s1584_s4 + $0x74] ss:$8 sps:$4 sm:$0xff]  }
  0x1a   :  { %v1217_v15 = vld [vmem:[%s1585_s0] sm:$0xff]  }
  0x1b   :  { %225 = vmatpush1.bf16.msra.mxu1 %v1109_v17  ;;  %678 = vmatpush1.bf16.msra.mxu0 %v1138_v35  ;;  %v753_v16 = vpack.c.bf16 %v1217_v15, %v1217_v15  ;;  %v69_v17 = vlaneseq  ;;  %v67_v20 = vld [vmem:[%s1586_s3] sm:$0x7] }
  0x1c   :  { %226 = vmatprep.subr.bf16.mxu1 %v1110_v19  ;;  %679 = vmatprep.subr.bf16.mxu0 %v1139_v36 }
  0x1d   :  { %v1497_v18 = vshrl.u32 %v69_v17, 7 }
  0x1f   :  { %227 = vmatpush1.bf16.msra.mxu1 %v1112_v21  ;;  %680 = vmatpush1.bf16.msra.mxu0 %v1141_v38  ;;  %v1500_v19 = vsub.s32 0, %v1497_v18  ;;  %v1506_v21 = vsub.s32 1, %v1497_v18 }
  0x20   :  { %1059 = vmatprep.subr.bf16.mxu1 %v1219_v28  ;;  %681 = vmatprep.subr.bf16.mxu0 %v1142_v39 }
  0x21   :  { %v72_v22 = vrot.slane %v67_v20, %v1500_v19  ;;  %v76_v23 = vrot.slane %v67_v20, %v1506_v21 }
  0x22   :  { %245 = vmatmul.mubr.bf16.vlgmr.msra.gmra.mrb[0].mxu1 %v34_v26 }
  0x23   :  { %1060 = vmatpush3.bf16.msra.mxu1 %v1113_v27  ;;  %1075 = vmatprep.mubr.msk.bf16.mxu1 %vm1220_vm0, %v1219_v28 }
  0x24   :  { %1061 = vmatprep.subr.bf16.mxu1 %v1219_v28  ;;  %682 = vmatpush1.bf16.msra.mxu0 %v1144_v41 }
  0x25   :  { %683 = vmatprep.subr.bf16.mxu0 %v1145_v42 }
  0x27   :  { %1062 = vmatpush3.bf16.msra.mxu1 %v1114_v31 }
  0x28   :  { %1063 = vmatprep.subr.bf16.mxu1 %v1219_v28  ;;  %684 = vmatpush1.bf16.msra.mxu0 %v1147_v44 }
  0x29   :  { %685 = vmatprep.subr.bf16.mxu0 %v1148_v45 }
  0x2b   :  { %1064 = vmatpush3.bf16.msra.mxu1 %v1115_v34 }
  0x2c   :  { %1065 = vmatprep.subr.bf16.mxu1 %v1219_v28  ;;  %686 = vmatpush1.bf16.msra.mxu0 %v1150_v48 }
  0x2d   :  { %687 = vmatprep.subr.bf16.mxu0 %v1151_v49 }
  0x2f   :  { %1066 = vmatpush3.bf16.msra.mxu1 %v1116_v37 }
  0x30   :  { %1067 = vmatprep.subr.bf16.mxu1 %v1219_v28  ;;  %688 = vmatpush1.bf16.msra.mxu0 %v1153_v50 }
  0x31   :  { %689 = vmatprep.subr.bf16.mxu0 %v1154_v51 }
  0x33   :  { %1068 = vmatpush3.bf16.msra.mxu1 %v1117_v40 }
  0x34   :  { %1069 = vmatprep.subr.bf16.mxu1 %v1219_v28  ;;  %690 = vmatpush1.bf16.msra.mxu0 %v1156_v52 }
  0x35   :  { %691 = vmatprep.subr.bf16.mxu0 %v1157_v53 }
  0x37   :  { %1070 = vmatpush3.bf16.msra.mxu1 %v1118_v43 }
  0x38   :  { %1071 = vmatprep.subr.bf16.mxu1 %v1219_v28  ;;  %692 = vmatpush1.bf16.msra.mxu0 %v1159_v54 }
  0x39   :  { %693 = vmatprep.subr.bf16.mxu0 %v1160_v55 }
  0x3b   :  { %1072 = vmatpush3.bf16.msra.mxu1 %v1119_v46 }
  0x3c   :  { %1073 = vmatprep.subr.bf16.mxu1 %v1219_v28  ;;  %694 = vmatpush1.bf16.msra.mxu0 %v1162_v56 }
  0x3d   :  { %695 = vmatprep.subr.bf16.mxu0 %v1163_v57 }
  0x3f   :  { %1074 = vmatpush3.bf16.msra.mxu1 %v1120_v47 }
  0x40   :  { %696 = vmatpush1.bf16.msra.mxu0 %v1165_v58  ;;  %862 = vmatprep.subr.bf16.mxu1 %v1177_v62 }
  0x41   :  { %697 = vmatprep.subr.bf16.mxu0 %v1166_v59 }
  0x42   :  { %1076 = vmatmul.mubr.bf16.vlgmr.msra.gmra.mrb[4].mxu1 %v34_v26 }
  0x43   :  { %894 = vmatprep.mubr.bf16.mxu1 %v1218_v1  ;;  %863 = vmatpush1.bf16.msra.mxu1 %v1175_v63 }
  0x44   :  { %698 = vmatpush1.bf16.msra.mxu0 %v1168_v60  ;;  %864 = vmatprep.subr.bf16.mxu1 %v1183_v0 }
  0x45   :  { %708 = vmatprep.subr.bf16.mxu0 %v1171_v61 }
  0x47   :  { %865 = vmatpush1.bf16.msra.mxu1 %v1181_v2 }
  0x48   :  { %866 = vmatprep.subr.bf16.mxu1 %v1189_v3 }
  0x4b   :  { %867 = vmatpush1.bf16.msra.mxu1 %v1187_v4 }
  0x4c   :  { %868 = vmatprep.subr.bf16.mxu1 %v1195_v5 }
  0x4f   :  { %869 = vmatpush1.bf16.msra.mxu1 %v1193_v6 }
  0x50   :  { %870 = vmatprep.subr.bf16.mxu1 %v1201_v7 }
  0x53   :  { %871 = vmatpush1.bf16.msra.mxu1 %v1199_v8  ;;  %v1169_v8 = vld [vmem:[%s1582_s6 + $0x100] ss:$8 sps:$4 sm:$0xff]  }
  0x54   :  { %872 = vmatprep.subr.bf16.mxu1 %v1207_v10 }
  0x57   :  { %873 = vmatpush1.bf16.msra.mxu1 %v1205_v9  ;;  %v79_v9 = vsub.s32 2, %v1497_v18 }
  0x58   :  { %874 = vmatprep.subr.bf16.mxu1 %v1213_v12  ;;  %v1172_v12 = vld [vmem:[%s1582_s6 + $0x110] ss:$8 sps:$4 sm:$0xff]  }
  0x5b   :  { %875 = vmatpush1.bf16.msra.mxu1 %v1211_v11  ;;  %v1174_v11 = vld [vmem:[%s1582_s6 + $0x114] ss:$8 sps:$4 sm:$0xff]  }
  0x5c   :  { %876 = vmatprep.subr.bf16.mxu1 %v1216_v14  ;;  %v1180_v14 = vld [vmem:[%s1582_s6 + $0x124] ss:$8 sps:$4 sm:$0xff]  }
  0x5f   :  { %877 = vmatpush1.bf16.msra.mxu1 %v1214_v13  ;;  %v80_v13 = vrot.slane %v67_v20, %v79_v9  ;;  %v1186_v20 = vld [vmem:[%s1582_s6 + $0x134] ss:$8 sps:$4 sm:$0xff]  }
  0x62   :  { %895 = vmatmul.mubr.bf16.vlgmr.msra.gmra.mrb[8].mxu1 %v753_v16 }
  0xf5   :  { %v246_v24 = vpop.f32.mrb[0].mxu1 }
  0xf6   :  { %v247_v25 = vadd.f32 %v246_v24, %v72_v22  ;;  %v248_v26 = vpop.f32.mrb[1].mxu1 }
  0xf7   :  { %v249_v27 = vadd.f32 %v248_v26, %v76_v23  ;;  %v250_v28 = vpop.f32.mrb[2].mxu1 }
  0xf8   :  { %v296_v29 = vrot.slane %v247_v25, 4  ;;  %v251_v30 = vadd.f32 %v250_v28, %v72_v22  ;;  %v252_v31 = vpop.f32.mrb[3].mxu1  ;;  %v1178_v22 = vld [vmem:[%s1582_s6 + $0x120] ss:$8 sps:$4 sm:$0xff]   ;;  %v1184_v28 = vld [vmem:[%s1582_s6 + $0x130] ss:$8 sps:$4 sm:$0xff]  }
  0xf9   :  { %v302_v32 = vrot.slane %v249_v27, 4  ;;  %v253_v33 = vadd.f32 %v252_v31, %v76_v23 }
  0xfa   :  { %v297_v34 = vadd.f32 %v296_v29, %v247_v25  ;;  %v314_v35 = vrot.slane %v251_v30, 4  ;;  %v1192_v29 = vld [vmem:[%s1582_s6 + $0x144] ss:$8 sps:$4 sm:$0xff]  }
  0xfb   :  { %v303_v36 = vadd.f32 %v302_v32, %v249_v27  ;;  %v320_v37 = vrot.slane %v253_v33, 4 }
  0xfc   :  { %v298_v38 = vrot.slane %v297_v34, 2  ;;  %v315_v39 = vadd.f32 %v314_v35, %v251_v30  ;;  %v1198_v35 = vld [vmem:[%s1582_s6 + $0x154] ss:$8 sps:$4 sm:$0xff]  }
  0xfd   :  { %v304_v40 = vrot.slane %v303_v36, 2  ;;  %v321_v41 = vadd.f32 %v320_v37, %v253_v33 }
  0xfe   :  { %v299_v42 = vadd.f32 %v298_v38, %v297_v34  ;;  %v316_v43 = vrot.slane %v315_v39, 2  ;;  %v1190_v34 = vld [vmem:[%s1582_s6 + $0x140] ss:$8 sps:$4 sm:$0xff]  }
  0xff   :  { %v305_v44 = vadd.f32 %v304_v40, %v303_v36  ;;  %v322_v45 = vrot.slane %v321_v41, 2  ;;  %v1196_v40 = vld [vmem:[%s1582_s6 + $0x150] ss:$8 sps:$4 sm:$0xff]  }
 0x100   :  { %v300_v46 = vrot.slane %v299_v42, 1  ;;  %v317_v47 = vadd.f32 %v316_v43, %v315_v39 }
 0x101   :  { %v306_v48 = vrot.slane %v305_v44, 1  ;;  %v323_v49 = vadd.f32 %v322_v45, %v321_v41  ;;  %v1204_v41 = vld [vmem:[%s1582_s6 + $0x164] ss:$8 sps:$4 sm:$0xff]  }
 0x102   :  { %v301_v50 = vadd.f32 %v300_v46, %v299_v42  ;;  %v318_v51 = vrot.slane %v317_v47, 1  ;;  %v1202_v46 = vld [vmem:[%s1582_s6 + $0x160] ss:$8 sps:$4 sm:$0xff]  }
 0x103   :  { %v324_v52 = vrot.slane %v323_v49, 1  ;;  %v307_v53 = vadd.f32 %v306_v48, %v305_v44 }
 0x104   :  { %v333_v54 = vmul.f32 0.125, %v301_v50  ;;  %v319_v55 = vadd.f32 %v318_v51, %v317_v47  ;;  %v1210_v47 = vld [vmem:[%s1582_s6 + $0x174] ss:$8 sps:$4 sm:$0xff]   ;;  %v1208_v51 = vld [vmem:[%s1582_s6 + $0x170] ss:$8 sps:$4 sm:$0xff]  }
 0x105   :  { %v325_v56 = vadd.f32 %v324_v52, %v323_v49  ;;  %v334_v57 = vmul.f32 0.125, %v307_v53 }
 0x106   :  { %v339_v58 = vpack.c.bf16 %v333_v54, %v333_v54  ;;  %v336_v59 = vmul.f32 0.125, %v319_v55  ;;  %v770_v54 = vld [vmem:[%s1587_s5] sm:$0x3] }
 0x107   :  { %v337_v60 = vmul.f32 0.125, %v325_v56  ;;  %v340_v61 = vpack.c.bf16 %v334_v57, %v334_v57  ;;  %v775_v56 = vrot.slane %v770_v54, %v1500_v19  ;;  %v779_v57 = vrot.slane %v770_v54, %v1506_v21 }
 0x108   :  { %v342_v62 = vpack.c.bf16 %v336_v59, %v336_v59  ;;  %v411_v0 = vunpack.c.l.b16 %v339_v58 }
 0x109   :  { %v343_v63 = vpack.c.bf16 %v337_v60, %v337_v60  ;;  %v412_v3 = vunpack.c.l.b16 %v340_v61 }
 0x10a   :  { %v414_v2 = vunpack.c.l.b16 %v342_v62 }
 0x10b   :  { %v415_v4 = vunpack.c.l.b16 %v343_v63 }
 0x10c   :  { %v418_v5 = vsel %vm417_vm1, %v414_v2, %v411_v0  ;;  %v393_v2 = vld [vmem:[%s1588_s7] sm:$0x3] }
 0x10d   :  { %v419_v6 = vsel %vm417_vm1, %v415_v4, %v412_v3  ;;  %v421_v10 = vpack.c.b16 %v418_v5, %v418_v5  ;;  %v1221_v3 = vmov 1966171168   ;;  %v398_v5 = vrot.slane %v393_v2, %v1500_v19 }
 0x10e   :  { %v422_v7 = vpack.c.b16 %v419_v6, %v419_v6  ;;  %v913_v4 = vunpack.c.l.s4 %v1221_v3  ;;  %v402_v6 = vrot.slane %v393_v2, %v1506_v21 }
 0x110   :  { %699 = vmatprep.mubr.bf16.mxu0 %v422_v7  ;;  %v914_v7 = vunpack.c.0.s8 %v913_v4 }
 0x111   :  { %700 = vmatmul.mubr.bf16.vlgmr.msra.gmra.mrb[0].mxu0 %v421_v10 }
 0x112   :  { %709 = vmatpush1.bf16.msra.mxu0 %v1169_v8  ;;  %740 = vmatprep.mubr.bf16.mxu0 %v1218_v1 }
 0x113   :  { %710 = vmatprep.subr.bf16.mxu0 %v1174_v11 }
 0x115   :  { %v289_v15 = vpop.f32.mrb[4].mxu1 }
 0x116   :  { %v290_v16 = vadd.f32 %v289_v15, %v80_v13  ;;  %711 = vmatpush1.bf16.msra.mxu0 %v1172_v12  ;;  %v1077_v17 = vpop.f32.mrb[5].mxu1  ;;  %v917_v12 = vsub.s32 %v914_v7, %v1497_v18 }
 0x117   :  { %v292_v23 = vpop.f32.mrb[6].mxu1  ;;  %712 = vmatprep.subr.bf16.mxu0 %v1180_v14 }
 0x118   :  { %v308_v1 = vrot.slane %v290_v16, 4  ;;  %v293_v24 = vadd.f32 %v292_v23, %v80_v13  ;;  %v1078_v25 = vpop.f32.mrb[7].mxu1 }
 0x11a   :  { %v309_v26 = vadd.f32 %v308_v1, %v290_v16  ;;  %v326_v27 = vrot.slane %v293_v24, 4  ;;  %713 = vmatpush1.bf16.msra.mxu0 %v1178_v22 }
 0x11b   :  { %714 = vmatprep.subr.bf16.mxu0 %v1186_v20 }
 0x11c   :  { %v310_v30 = vrot.slane %v309_v26, 2  ;;  %v327_v31 = vadd.f32 %v326_v27, %v293_v24 }
 0x11e   :  { %v311_v32 = vadd.f32 %v310_v30, %v309_v26  ;;  %v328_v33 = vrot.slane %v327_v31, 2  ;;  %715 = vmatpush1.bf16.msra.mxu0 %v1184_v28 }
 0x11f   :  { %716 = vmatprep.subr.bf16.mxu0 %v1192_v29 }
 0x120   :  { %v312_v36 = vrot.slane %v311_v32, 1  ;;  %v329_v37 = vadd.f32 %v328_v33, %v327_v31 }
 0x122   :  { %v313_v38 = vadd.f32 %v312_v36, %v311_v32  ;;  %v330_v39 = vrot.slane %v329_v37, 1  ;;  %717 = vmatpush1.bf16.msra.mxu0 %v1190_v34 }
 0x123   :  { %718 = vmatprep.subr.bf16.mxu0 %v1198_v35 }
 0x124   :  { %v335_v42 = vmul.f32 0.125, %v313_v38  ;;  %v331_v43 = vadd.f32 %v330_v39, %v329_v37 }
 0x126   :  { %v341_v44 = vpack.c.bf16 %v335_v42, %v335_v42  ;;  %v338_v45 = vmul.f32 0.125, %v331_v43  ;;  %719 = vmatpush1.bf16.msra.mxu0 %v1196_v40 }
 0x127   :  { %720 = vmatprep.subr.bf16.mxu0 %v1204_v41 }
 0x128   :  { %v344_v48 = vpack.c.bf16 %v338_v45, %v338_v45  ;;  %v413_v49 = vunpack.c.l.b16 %v341_v44 }
 0x12a   :  { %v416_v50 = vunpack.c.l.b16 %v344_v48  ;;  %721 = vmatpush1.bf16.msra.mxu0 %v1202_v46 }
 0x12b   :  { %722 = vmatprep.subr.bf16.mxu0 %v1210_v47 }
 0x12c   :  { %v420_v52 = vsel %vm417_vm1, %v416_v50, %v413_v49 }
 0x12d   :  { %v423_v53 = vpack.c.b16 %v420_v52, %v420_v52 }
 0x12e   :  { %723 = vmatpush1.bf16.msra.mxu0 %v1208_v51 }
 0x131   :  { %741 = vmatmul.mubr.bf16.vlgmr.msra.gmra.mrb[0].mxu0 %v423_v53 }
 0x135   :  { %v896_v55 = vpop.f32.mrb[8].mxu1 }
 0x136   :  { %v898_v58 = vpop.f32.mrb[9].mxu1  ;;  %v897_v60 = vadd.f32 %v896_v55, %v775_v56 }
 0x137   :  { %v900_v59 = vpop.f32.mrb[10].mxu1  ;;  %v899_v61 = vadd.f32 %v898_v58, %v779_v57 }
 0x138   :  { %v901_v62 = vpop.f32.mrb[11].mxu1 }
 0x139   :  { %v905_v63 = vcombine.low %v897_v60, %v899_v61  ;;  %v906_v0 = vcombine.high %v897_v60, %v899_v61 }
 0x204   :  { %v742_v8 = vpop.f32.mrb[0].mxu0 }
 0x205   :  { %v1079_v9 = vadd.f32 %v742_v8, %v398_v5  ;;  %v744_v10 = vpop.f32.mrb[1].mxu0 }
 0x206   :  { %v1080_v11 = vadd.f32 %v744_v10, %v402_v6  ;;  %v746_v13 = vpop.f32.mrb[2].mxu0 }
 0x207   :  { %v747_v14 = vpop.f32.mrb[3].mxu0 }
 0x208   :  { %v911_v15 = vcombine.low %v1079_v9, %v1080_v11 }
 0x20a   :  { %v918_v16 = vrot.slane %v911_v15, %v917_v12 }
 0x20c   :  { %v919_v17 = vcombine.high %v918_v16, %v918_v16  ;;  %v926_v22 = vrot.slane %v918_v16, %v917_v12 }
 0x20e   :  { %v933_v23 = vrot.slane %v919_v17, %v917_v12  ;;  %v937_v20 = vrot.slane %v926_v22, %v1500_v19  ;;  %v941_v1 = vrot.slane %v926_v22, %v1506_v21 }
 0x210   :  { %v945_v24 = vrot.slane %v933_v23, %v1500_v19  ;;  %v949_v25 = vrot.slane %v933_v23, %v1506_v21  ;;  %v950_v26 = vcombine.low %v937_v20, %v941_v1 }
 0x212   :  { %v951_v27 = vcombine.low %v945_v24, %v949_v25  ;;  %v954_v28 = vadd.f32 %v950_v26, %v905_v63 }
 0x214   :  { %v955_v29 = vadd.f32 %v951_v27, %v906_v0  ;;  %956 = vst [vmem:[%s1589_s8] sm:$0xff] %v954_v28 }
 0x216   :  { %957 = vst [vmem:[%s1589_s8 + $0x8] sm:$0xff] %v955_v29 }

// kernel: m3tnet_forward.6
= control target key start
LH: loop header
LB: loop body
LE: loop exit
PB: predicated region body
PF: predicated region fallthrough
CT: control target
= control target key end

     0   :  { %s3075_s25 = smov 0   ;;  %s3605_s0 = inlined_call_operand.vmem [shape: f32[8,4,128], index: 0, kind: input, shape index: {}]   ;;  %s3606_s1 = inlined_call_operand.vmem [shape: f32[1,128], index: 1, kind: input, shape index: {}]   ;;  %s3607_s2 = inlined_call_operand.vmem [shape: f32[1,128], index: 2, kind: input, shape index: {}]   ;;  %s3608_s3 = inlined_call_operand.vmem [shape: bf16[128,384], index: 3, kind: input, shape index: {}]   ;;  %s3609_s4 = inlined_call_operand.vmem [shape: f32[1,384], index: 4, kind: input, shape index: {}]   ;;  %s3610_s5 = inlined_call_operand.vmem [shape: bf16[128,128], index: 5, kind: input, shape index: {}]   ;;  %s3611_s6 = inlined_call_operand.vmem [shape: f32[1,128], index: 6, kind: input, shape index: {}]   ;;  %s3612_s7 = inlined_call_operand.vmem [shape: f32[1,128], index: 7, kind: input, shape index: {}]   ;;  %s3613_s8 = inlined_call_operand.vmem [shape: f32[1,128], index: 8, kind: input, shape index: {}]   ;;  %s3614_s9 = inlined_call_operand.vmem [shape: bf16[128,256], index: 9, kind: input, shape index: {}]   ;;  %s3615_s10 = inlined_call_operand.vmem [shape: f32[1,256], index: 10, kind: input, shape index: {}]   ;;  %s3616_s11 = inlined_call_operand.vmem [shape: bf16[256,128], index: 11, kind: input, shape index: {}]   ;;  %s3617_s12 = inlined_call_operand.vmem [shape: f32[1,128], index: 12, kind: input, shape index: {}]   ;;  %s3618_s13 = inlined_call_operand.vmem [shape: f32[8,1,128], index: 13, kind: output, shape index: {}]  }
   0x1 LB: > { %s2539_s26 = sadd.s32 4294967295, %s2997_s25   ;;  %p2543_p0 = scmp.ge.s32.totalorder %s2997_s25, 1  ;;  %s2997_s25 = sphi %s3075_s25, %s23_s25  }
   0x2   : > { %p388_p1 = scmp.lt.s32.totalorder %s2997_s25, 3 }
   0x4   : > { %p389_p2 = pnand %p2543_p0, %p388_p1 }
   0x5   : > { %s2544_s27 = sshll.u32 (!%p389_p2), %s2539_s26, 2  ;;  %v2859_v6 = vld [vmem:[%s3608_s3 + $0x4] ss:$12 sps:$4 sm:$0xff] (!%p389_p2)   ;;  %v2999_v7 = vmov (!%p389_p2), 0.0   ;;  %v3000_v8 = vmov (!%p389_p2), 839922192   ;;  %v469_v10 = vlaneseq (!%p389_p2) }
   0x6   : > { %392 = sbr.rel (%p389_p2) target bundleno = 3122 (0xc32), region = 72  ;;  %p432_p3 = scmp.lt.s32.totalorder (!%p389_p2), %s2544_s27, 7  ;;  %2707 = vmatprep.subr.bf16.mxu1 (!%p389_p2), %v2999_v7  ;;  %772 = vmatprep.subr.bf16.mxu0 (!%p389_p2), %v2859_v6  ;;  %v467_v9 = vunpack.c.l.s4 (!%p389_p2), %v3000_v8  ;;  %v3001_v11 = vmov (!%p389_p2), 1985246804   ;;  %v2861_v36 = vld [vmem:[%s3608_s3] ss:$12 sps:$4 sm:$0xff] (!%p389_p2)  }
   0x7   : > { %v474_v12 = vunpack.c.l.s4 (!%p389_p2), %v3001_v11  ;;  %v3099_v14 = vshrl.u32 (!%p389_p2), %v469_v10, 7  ;;  %v2862_v37 = vld [vmem:[%s3608_s3 + $0x8] ss:$12 sps:$4 sm:$0xff] (!%p389_p2)   ;;  %773 = vmatpush1.bf16.msra.mxu0 (!%p389_p2), %v2861_v36  ;;  %v2865_v39 = vld [vmem:[%s3608_s3 + $0x18] ss:$12 sps:$4 sm:$0xff] (!%p389_p2)   ;;  %v3002_v57 = vmov (!%p389_p2), 0  }
   0x8   : > { %v468_v13 = vunpack.c.0.s8 (!%p389_p2), %v467_v9  ;;  %2708 = vmatpush3.bf16.msra.mxu1 (!%p389_p2), %v2862_v37  ;;  %v2863_v38 = vld [vmem:[%s3608_s3 + $0x1c] ss:$12 sps:$4 sm:$0xff] (!%p389_p2)   ;;  %v2866_v40 = vld [vmem:[%s3608_s3 + $0x20] ss:$12 sps:$4 sm:$0xff] (!%p389_p2)   ;;  %v2870_v43 = vld [vmem:[%s3608_s3 + $0x38] ss:$12 sps:$4 sm:$0xff] (!%p389_p2)   ;;  %804 = vmatprep.mubr.bf16.mxu0 (!%p389_p2), %v3002_v57 }
   0x9   : > { %v475_v15 = vunpack.c.0.s8 (!%p389_p2), %v474_v12  ;;  %2709 = vmatprep.subr.bf16.mxu1 (!%p389_p2), %v2999_v7  ;;  %774 = vmatprep.subr.bf16.mxu0 (!%p389_p2), %v2863_v38  ;;  %v2867_v41 = vld [vmem:[%s3608_s3 + $0x34] ss:$12 sps:$4 sm:$0xff] (!%p389_p2)   ;;  %v2869_v42 = vld [vmem:[%s3608_s3 + $0x30] ss:$12 sps:$4 sm:$0xff] (!%p389_p2)   ;;  %v2871_v44 = vld [vmem:[%s3608_s3 + $0x4c] ss:$12 sps:$4 sm:$0xff] (!%p389_p2)  }
   0xa   : > { %v3102_v16 = vsub.s32 (!%p389_p2), %v468_v13, %v3099_v14  ;;  %v2873_v45 = vld [vmem:[%s3608_s3 + $0x48] ss:$12 sps:$4 sm:$0xff] (!%p389_p2)   ;;  %v2874_v46 = vld [vmem:[%s3608_s3 + $0x50] ss:$12 sps:$4 sm:$0xff] (!%p389_p2)   ;;  %v2877_v48 = vld [vmem:[%s3608_s3 + $0x60] ss:$12 sps:$4 sm:$0xff] (!%p389_p2)  }
   0xb   : > { %v3105_v17 = vsub.s32 (!%p389_p2), %v475_v15, %v3099_v14  ;;  %775 = vmatpush1.bf16.msra.mxu0 (!%p389_p2), %v2865_v39  ;;  %v2875_v47 = vld [vmem:[%s3608_s3 + $0x64] ss:$12 sps:$4 sm:$0xff] (!%p389_p2)   ;;  %v2878_v49 = vld [vmem:[%s3608_s3 + $0x68] ss:$12 sps:$4 sm:$0xff] (!%p389_p2)   ;;  %v2882_v52 = vld [vmem:[%s3608_s3 + $0x80] ss:$12 sps:$4 sm:$0xff] (!%p389_p2)  }
   0xc   : > { %2710 = vmatpush3.bf16.msra.mxu1 (!%p389_p2), %v2866_v40  ;;  %776 = vmatprep.subr.bf16.mxu0 (!%p389_p2), %v2867_v41  ;;  %v2879_v50 = vld [vmem:[%s3608_s3 + $0x7c] ss:$12 sps:$4 sm:$0xff] (!%p389_p2)   ;;  %v2881_v51 = vld [vmem:[%s3608_s3 + $0x78] ss:$12 sps:$4 sm:$0xff] (!%p389_p2)   ;;  %v2883_v53 = vld [vmem:[%s3608_s3 + $0x94] ss:$12 sps:$4 sm:$0xff] (!%p389_p2)  }
   0xd   : > { %s3620_s27 = smov (!%p432_p3, %s2544_s27), 7  ;;  %2711 = vmatprep.subr.bf16.mxu1 %v2999_v7  ;;  %v2885_v54 = vld [vmem:[%s3608_s3 + $0x90] ss:$12 sps:$4 sm:$0xff]   ;;  %v2886_v55 = vld [vmem:[%s3608_s3 + $0x98] ss:$12 sps:$4 sm:$0xff]   ;;  %vm3003_vm0 = vmmov 0  }
   0xe   : > { %s2545_s28 = sshll.u32 %s3620_s27, 2  ;;  %v2887_v56 = vld [vmem:[%s3608_s3 + $0xac] ss:$12 sps:$4 sm:$0xff]   ;;  %2723 = vmatprep.mubr.msk.bf16.mxu1 %vm3003_vm0, %v2999_v7  ;;  %v2889_v58 = vld [vmem:[%s3608_s3 + $0xa8] ss:$12 sps:$4 sm:$0xff]   ;;  %v631_v38 = vsub.s32 0, %v3099_v14  ;;  %s440_s17 = scalar_lea.vmem %s3618_s13, %s3620_s27 }
   0xf   : > { %s3089_s14 = scalar_lea.vmem %s3605_s0, %s2545_s28  ;;  %777 = vmatpush1.bf16.msra.mxu0 %v2869_v42  ;;  %v2890_v59 = vld [vmem:[%s3608_s3 + $0xb0] ss:$12 sps:$4 sm:$0xff]   ;;  %v2548_v6 = vld [vmem:[%s3607_s2] ss:$0 sm:$0xff]  ;;  %vm1128_vm1 = vcmask 1041408   ;;  %vm882_vm2 = vcmask 523264  }
  0x10   : > { %v443_v0 = vld [vmem:[%s3089_s14] sm:$0xf]  ;;  %v444_v1 = vld [vmem:[%s3089_s14 + $0x4] sm:$0xf]  ;;  %v445_v2 = vld [vmem:[%s3089_s14 + $0x8] sm:$0xf]  ;;  %2712 = vmatpush3.bf16.msra.mxu1 %v2870_v43  ;;  %778 = vmatprep.subr.bf16.mxu0 %v2871_v44  ;;  %v580_v12 = vcombine.high %v2548_v6, %v2548_v6 }
  0x11   : > { %v453_v3 = vcombine.low %v443_v0, %v444_v1  ;;  %v446_v4 = vld [vmem:[%s3089_s14 + $0xc] sm:$0xf]  ;;  %2713 = vmatprep.subr.bf16.mxu1 %v2999_v7  ;;  %vm1071_vm3 = vcmask 27648   ;;  %s3004_s29 = smov 64   ;;  %vm1124_vm4 = vcmask 31744   ;;  %vm2451_vm5 = vcmask 1043456  }
  0x12   : > { %v454_v5 = vcombine.low %v445_v2, %v446_v4 }
  0x13   : > { %457 = vadd.xlane.f32.xlu0 %v453_v3  ;;  %779 = vmatpush1.bf16.msra.mxu0 %v2873_v45 }
  0x14   : > { %2714 = vmatpush3.bf16.msra.mxu1 %v2874_v46  ;;  %780 = vmatprep.subr.bf16.mxu0 %v2875_v47 }
  0x15   : > { %2715 = vmatprep.subr.bf16.mxu1 %v2999_v7 }
  0x17   : > { %459 = vadd.xlane.f32.xlu0 %v454_v5  ;;  %781 = vmatpush1.bf16.msra.mxu0 %v2877_v48 }
  0x18   : > { %2716 = vmatpush3.bf16.msra.mxu1 %v2878_v49  ;;  %782 = vmatprep.subr.bf16.mxu0 %v2879_v50 }
  0x19   : > { %2717 = vmatprep.subr.bf16.mxu1 %v2999_v7 }
  0x1b   : > { %783 = vmatpush1.bf16.msra.mxu0 %v2881_v51 }
  0x1c   : > { %2718 = vmatpush3.bf16.msra.mxu1 %v2882_v52  ;;  %784 = vmatprep.subr.bf16.mxu0 %v2883_v53 }
  0x1d   : > { %2719 = vmatprep.subr.bf16.mxu1 %v2999_v7 }
  0x1f   : > { %785 = vmatpush1.bf16.msra.mxu0 %v2885_v54 }
  0x20   : > { %2720 = vmatpush3.bf16.msra.mxu1 %v2886_v55  ;;  %786 = vmatprep.subr.bf16.mxu0 %v2887_v56 }
  0x21   : > { %2721 = vmatprep.subr.bf16.mxu1 %v2999_v7 }
  0x23   : > { %787 = vmatpush1.bf16.msra.mxu0 %v2889_v58 }
  0x24   : > { %2722 = vmatpush3.bf16.msra.mxu1 %v2890_v59  ;;  %2751 = vmatprep.subr.bf16.mxu0 %v2999_v7 }
  0x25   : > { %2727 = vmatprep.subr.bf16.mxu1 %v2999_v7 }
  0xa0   : > { %v458_v18 = vpop.xlane.xlu0 %457 }
  0xa1   : > { %v462_v19 = vmul.f32 0.0078125, %v458_v18 }
  0xa3   : > { %v472_v20 = vrot.slane %v462_v19, %v3102_v16  ;;  %v479_v21 = vrot.slane %v462_v19, %v3105_v17 }
  0xa4   : > { %v460_v22 = vpop.xlane.xlu0 %459 }
  0xa5   : > { %v463_v23 = vmul.f32 0.0078125, %v460_v22  ;;  %v3109_v24 = vsub.f32 %v443_v0, %v472_v20  ;;  %v3111_v25 = vsub.f32 %v444_v1, %v479_v21 }
  0xa7   : > { %v486_v26 = vrot.slane %v463_v23, %v3102_v16  ;;  %v493_v27 = vrot.slane %v463_v23, %v3105_v17  ;;  %v502_v28 = vmul.f32 %v3109_v24, %v3109_v24  ;;  %v503_v29 = vmul.f32 %v3111_v25, %v3111_v25 }
  0xa9   : > { %v3119_v30 = vsub.f32 %v445_v2, %v486_v26  ;;  %v3121_v31 = vsub.f32 %v446_v4, %v493_v27  ;;  %v510_v32 = vcombine.low %v502_v28, %v503_v29  ;;  %v2547_v2 = vld [vmem:[%s3606_s1] ss:$0 sm:$0xff] }
  0xaa   : > { %v568_v8 = vcombine.high %v2547_v2, %v2547_v2 }
  0xab   : > { %514 = vadd.xlane.f32.xlu1 %v510_v32  ;;  %v504_v33 = vmul.f32 %v3119_v30, %v3119_v30  ;;  %v505_v34 = vmul.f32 %v3121_v31, %v3121_v31 }
  0xad   : > { %v511_v35 = vcombine.low %v504_v33, %v505_v34  ;;  %v635_v33 = vsub.s32 1, %v3099_v14 }
  0xaf   : > { %516 = vadd.xlane.f32.xlu1 %v511_v35 }
 0x138   : > { %v515_v60 = vpop.xlane.xlu1 %514 }
 0x139   : > { %v518_v61 = vmul.f32 0.0078125, %v515_v60 }
 0x13b   : > { %v520_v62 = vadd.f32 1e-05, %v518_v61 }
 0x13c   : > { %v517_v63 = vpop.xlane.xlu1 %516 }
 0x13d   : > { %2939 = vrsqrt.f32 %v520_v62  ;;  %v519_v0 = vmul.f32 0.0078125, %v517_v63 }
 0x13f   : > { %v521_v1 = vadd.f32 1e-05, %v519_v0 }
 0x141   : > { %2941 = vrsqrt.f32 %v521_v1 }
 0x147   : > { %v2940_v3 = vpop.eup %2939 }
 0x148   : > { %v532_v4 = vrot.slane %v2940_v3, %v3102_v16  ;;  %v539_v5 = vrot.slane %v2940_v3, %v3105_v17 }
 0x14a   : > { %v558_v9 = vmul.f32 %v532_v4, %v3109_v24  ;;  %v559_v10 = vmul.f32 %v539_v5, %v3111_v25 }
 0x14b   : > { %v2942_v11 = vpop.eup %2941 }
 0x14c   : > { %v546_v13 = vrot.slane %v2942_v11, %v3102_v16  ;;  %v553_v15 = vrot.slane %v2942_v11, %v3105_v17  ;;  %v570_v18 = vmul.f32 %v2547_v2, %v558_v9  ;;  %v571_v19 = vmul.f32 %v568_v8, %v559_v10 }
 0x14e   : > { %v560_v20 = vmul.f32 %v546_v13, %v3119_v30  ;;  %v561_v21 = vmul.f32 %v553_v15, %v3121_v31  ;;  %v582_v26 = vadd.f32 %v2548_v6, %v570_v18  ;;  %v583_v27 = vadd.f32 %v580_v12, %v571_v19  ;;  %v627_v31 = vld [vmem:[%s3609_s4] sm:$0x7] }
 0x14f   : > { %v639_v30 = vsub.s32 2, %v3099_v14  ;;  %v636_v35 = vrot.slane %v627_v31, %v635_v33  ;;  %v632_v50 = vrot.slane %v627_v31, %v631_v38 }
 0x150   : > { %v572_v22 = vmul.f32 %v2547_v2, %v560_v20  ;;  %v573_v23 = vmul.f32 %v568_v8, %v561_v21  ;;  %v590_v29 = vcombine.low %v582_v26, %v583_v27 }
 0x151   : > { %v640_v34 = vrot.slane %v627_v31, %v639_v30 }
 0x152   : > { %v584_v28 = vadd.f32 %v2548_v6, %v572_v22  ;;  %v585_v24 = vadd.f32 %v580_v12, %v573_v23 }
 0x154   : > { %v591_v25 = vcombine.low %v584_v28, %v585_v24 }
 0x156   : > { %v594_v32 = vpack.c.bf16 %v591_v25, %v590_v29 }
 0x158   : > { %805 = vmatmul.mubr.bf16.vlgmr.msra.gmra.mrb[0].mxu0 %v594_v32  ;;  %2724 = vmatmul.mubr.bf16.vlgmr.msra.gmra.mrb[0].mxu1 %v594_v32 }
 0x159   : > { %2729 = vmatprep.mubr.msk.bf16.mxu1 %vm3003_vm0, %v2999_v7  ;;  %2753 = vmatprep.mubr.msk.bf16.mxu0 %vm3003_vm0, %v2999_v7 }
 0x22b   : > { %v806_v36 = vpop.f32.mrb[0].mxu0  ;;  %v849_v37 = vpop.f32.mrb[0].mxu1 }
 0x22c   : > { %v850_v39 = vadd.f32 %v849_v37, %v640_v34  ;;  %v808_v40 = vpop.f32.mrb[1].mxu0  ;;  %v2725_v41 = vpop.f32.mrb[1].mxu1  ;;  %v807_v54 = vadd.f32 %v806_v36, %v632_v50 }
 0x22d   : > { %v809_v42 = vadd.f32 %v808_v40, %v636_v35  ;;  %v810_v43 = vpop.f32.mrb[2].mxu0  ;;  %v852_v44 = vpop.f32.mrb[2].mxu1 }
 0x22e   : > { %v3234_v45 = vpack.c.bf16 %v850_v39, %v850_v39  ;;  %v812_v46 = vpop.f32.mrb[3].mxu0  ;;  %v2726_v47 = vpop.f32.mrb[3].mxu1  ;;  %v3238_v49 = vadd.f32 %v852_v44, %v640_v34  ;;  %v3250_v56 = vpack.c.bf16 %v807_v54, %v807_v54  ;;  %v858_v60 = vcombine.high %v807_v54, %v807_v54 }
 0x22f   : > { %v3236_v48 = vpack.c.bf16 %v809_v42, %v809_v42  ;;  %v864_v52 = vcombine.high %v809_v42, %v809_v42  ;;  %v813_v58 = vadd.f32 %v812_v46, %v636_v35  ;;  %v811_v1 = vadd.f32 %v810_v43, %v632_v50 }
 0x230   : > { %v1130_v51 = vsel %vm1128_vm1, %v3234_v45, 0  ;;  %v3261_v62 = vpack.c.bf16 %v858_v60, %v858_v60  ;;  %v870_v4 = vcombine.high %v850_v39, %v850_v39 }
 0x231   : > { %2752 = vmatpush3.bf16.msra.mxu0 %v1130_v51  ;;  %v887_v53 = vsel %vm882_vm2, %v3236_v48, 0  ;;  %v3248_v55 = vpack.c.bf16 %v864_v52, %v864_v52  ;;  %v3259_v61 = vpack.c.bf16 %v813_v58, %v813_v58  ;;  %v865_v63 = vcombine.high %v813_v58, %v813_v58 }
 0x232   : > { %2763 = vmatprep.subr.bf16.mxu0 %v2999_v7  ;;  %2728 = vmatpush3.bf16.xpose.msra.mxu1 %v887_v53  ;;  %v3272_v3 = vpack.c.bf16 %v811_v1, %v811_v1  ;;  %v859_v6 = vcombine.high %v811_v1, %v811_v1  ;;  %v3281_v8 = vpack.c.bf16 %v870_v4, %v870_v4 }
 0x233   : > { %2733 = vmatprep.subr.bf16.mxu1 %v2999_v7  ;;  %v933_v59 = vsel %vm882_vm2, %v3248_v55, 0  ;;  %v979_v0 = vsel %vm882_vm2, %v3259_v61, 0  ;;  %v3270_v2 = vpack.c.bf16 %v865_v63, %v865_v63 }
 0x234   : > { %v3283_v9 = vpack.c.bf16 %v859_v6, %v859_v6  ;;  %v1176_v10 = vsel %vm1128_vm1, %v3281_v8, 0 }
 0x235   : > { %v1025_v5 = vsel %vm882_vm2, %v3270_v2, 0 }
 0x239   : > { %2730 = vmatmul.mubr.msk.bf16.vlgmr.msra.gmra.mrb[4].mxu1 %vm882_vm2, %v3250_v56 }
 0x23a   : > { %2734 = vmatpush3.bf16.xpose.msra.mxu1 %v933_v59  ;;  %2735 = vmatprep.mubr.msk.bf16.mxu1 %vm3003_vm0, %v2999_v7 }
 0x23b   : > { %2739 = vmatprep.subr.bf16.mxu1 %v2999_v7 }
 0x241   : > { %2736 = vmatmul.mubr.msk.bf16.vlgmr.msra.gmra.mrb[8].mxu1 %vm882_vm2, %v3261_v62 }
 0x242   : > { %2740 = vmatpush3.bf16.xpose.msra.mxu1 %v979_v0  ;;  %2741 = vmatprep.mubr.msk.bf16.mxu1 %vm3003_vm0, %v2999_v7 }
 0x243   : > { %2745 = vmatprep.subr.bf16.mxu1 %v2999_v7 }
 0x249   : > { %2742 = vmatmul.mubr.msk.bf16.vlgmr.msra.gmra.mrb[12].mxu1 %vm882_vm2, %v3272_v3 }
 0x24a   : > { %2746 = vmatpush3.bf16.xpose.msra.mxu1 %v1025_v5  ;;  %2747 = vmatprep.mubr.msk.bf16.mxu1 %vm3003_vm0, %v2999_v7 }
 0x24b   : > { %2757 = vmatprep.subr.bf16.mxu1 %v2999_v7 }
 0x251   : > { %2748 = vmatmul.mubr.msk.bf16.vlgmr.msra.gmra.mrb[16].mxu1 %vm882_vm2, %v3283_v9 }
 0x252   : > { %2758 = vmatpush3.bf16.msra.mxu1 %v1176_v10  ;;  %2759 = vmatprep.mubr.msk.bf16.mxu1 %vm3003_vm0, %v2999_v7 }
 0x253   : > { %2769 = vmatprep.subr.bf16.mxu1 %v2999_v7 }
 0x30c   : > { %v923_v11 = vpop.f32.mrb[4].mxu1 }
 0x30d   : > { %v1067_v12 = vmul.f32 0.125, %v923_v11  ;;  %v2731_v13 = vpop.f32.mrb[5].mxu1 }
 0x30e   : > { %v926_v15 = vpop.f32.mrb[6].mxu1 }
 0x30f   : > { %v2732_v18 = vpop.f32.mrb[7].mxu1  ;;  %v1072_v19 = vsel %vm1071_vm3, %v1067_v12, -inf }
 0x310   : > { %1073 = vmax.xlane.f32.xlu0 %v1072_v19 }
 0x314   : > { %v969_v20 = vpop.f32.mrb[8].mxu1 }
 0x315   : > { %v1068_v21 = vmul.f32 0.125, %v969_v20  ;;  %v2737_v22 = vpop.f32.mrb[9].mxu1 }
 0x316   : > { %v972_v23 = vpop.f32.mrb[10].mxu1 }
 0x317   : > { %v2738_v26 = vpop.f32.mrb[11].mxu1  ;;  %v1075_v27 = vsel %vm1071_vm3, %v1068_v21, -inf }
 0x318   : > { %1076 = vmax.xlane.f32.xlu1 %v1075_v27 }
 0x31c   : > { %v1015_v28 = vpop.f32.mrb[12].mxu1 }
 0x31d   : > { %v1069_v24 = vmul.f32 0.125, %v1015_v28  ;;  %v2743_v29 = vpop.f32.mrb[13].mxu1 }
 0x31e   : > { %v1018_v25 = vpop.f32.mrb[14].mxu1 }
 0x31f   : > { %v2744_v32 = vpop.f32.mrb[15].mxu1  ;;  %v1078_v30 = vsel %vm1071_vm3, %v1069_v24, -inf }
 0x320   : > { %1079 = vmax.xlane.f32.xlu0 %v1078_v30 }
 0x324   : > { %v1061_v31 = vpop.f32.mrb[16].mxu1 }
 0x325   : > { %v1070_v34 = vmul.f32 0.125, %v1061_v31  ;;  %v2749_v35 = vpop.f32.mrb[17].mxu1 }
 0x326   : > { %v1064_v36 = vpop.f32.mrb[18].mxu1 }
 0x327   : > { %v2750_v37 = vpop.f32.mrb[19].mxu1  ;;  %v1081_v39 = vsel %vm1071_vm3, %v1070_v34, -inf }
 0x328   : > { %1082 = vmax.xlane.f32.xlu1 %v1081_v39 }
 0x39d   : > { %v1074_v40 = vpop.xlane.xlu0 %1073 }
 0x39e   : > { %v1084_v41 = vsub.f32 %v1067_v12, %v1074_v40 }
 0x3a0   : > { %v1088_v42 = vmul.f32 1.442695, %v1084_v41 }
 0x3a2   : > { %2943 = vpow2.f32 %v1088_v42 }
 0x3a5   : > { %v1077_v43 = vpop.xlane.xlu1 %1076 }
 0x3a6   : > { %v1085_v44 = vsub.f32 %v1068_v21, %v1077_v43 }
 0x3a8   : > { %v1090_v46 = vmul.f32 1.442695, %v1085_v44 }
 0x3aa   : > { %2945 = vpow2.f32 %v1090_v46 }
 0x3ac   : > { %v2944_v47 = vpop.eup %2943 }
 0x3ad   : > { %v1080_v50 = vpop.xlane.xlu0 %1079  ;;  %v1096_v51 = vsel %vm1071_vm3, %v2944_v47, 0.0 }
 0x3ae   : > { %v1086_v52 = vsub.f32 %v1069_v24, %v1080_v50  ;;  %1097 = vadd.xlane.f32.xlu0 %v1096_v51 }
 0x3b0   : > { %v1092_v53 = vmul.f32 1.442695, %v1086_v52 }
 0x3b2   : > { %2947 = vpow2.f32 %v1092_v53 }
 0x3b4   : > { %v2946_v54 = vpop.eup %2945 }
 0x3b5   : > { %v1099_v58 = vsel %vm1071_vm3, %v2946_v54, 0.0  ;;  %v1083_v63 = vpop.xlane.xlu1 %1082 }
 0x3b6   : > { %1100 = vadd.xlane.f32.xlu1 %v1099_v58  ;;  %v1087_v0 = vsub.f32 %v1070_v34, %v1083_v63 }
 0x3b8   : > { %v1094_v1 = vmul.f32 1.442695, %v1087_v0 }
 0x3ba   : > { %2949 = vpow2.f32 %v1094_v1 }
 0x3bc   : > { %v2948_v59 = vpop.eup %2947 }
 0x3bd   : > { %v1102_v60 = vsel %vm1071_vm3, %v2948_v59, 0.0 }
 0x3be   : > { %1103 = vadd.xlane.f32.xlu0 %v1102_v60 }
 0x3c4   : > { %v2950_v4 = vpop.eup %2949 }
 0x3c5   : > { %v1105_v5 = vsel %vm1071_vm3, %v2950_v4, 0.0 }
 0x3c7   : > { %1366 = vrot.lane.b32.xlu1 %v3248_v55, %s3004_s29 }
 0x3cb   : > { %1311 = vrot.lane.b32.xlu1 %v3250_v56, %s3004_s29 }
 0x3d4   : > { %1314 = vrot.lane.b32.xlu0 %v3236_v48, %s3004_s29 }
 0x3d8   : > { %1418 = vrot.lane.b32.xlu0 %v3259_v61, %s3004_s29  ;;  %v3318_v61 = vpack.c.bf16 %v3238_v49, %v3238_v49 }
 0x3dc   : > { %1415 = vrot.lane.b32.xlu0 %v3272_v3, %s3004_s29 }
 0x3ef   : > { %1106 = vadd.xlane.f32.xlu1 %v1105_v5 }
 0x400   : > { %1363 = vrot.lane.b32.xlu1 %v3261_v62, %s3004_s29  ;;  %v871_v62 = vcombine.high %v3238_v49, %v3238_v49 }
 0x402   : > { %v3328_v11 = vpack.c.bf16 %v871_v62, %v871_v62 }
 0x404   : > { %1470 = vrot.lane.b32.xlu1 %v3270_v2, %s3004_s29  ;;  %v1222_v2 = vsel %vm1128_vm1, %v3318_v61, 0  ;;  %v1268_v49 = vsel %vm1128_vm1, %v3328_v11, 0 }
 0x408   : > { %1467 = vrot.lane.b32.xlu1 %v3283_v9, %s3004_s29 }
 0x43b   : > { %v1098_v48 = vpop.xlane.xlu0 %1097 }
 0x43c   : > { %2951 = vrcp.f32 %v1098_v48 }
 0x443   : > { %v1101_v55 = vpop.xlane.xlu1 %1100 }
 0x444   : > { %2953 = vrcp.f32 %v1101_v55 }
 0x446   : > { %v2952_v56 = vpop.eup %2951 }
 0x447   : > { %v1112_v3 = vmul.f32 %v2952_v56, %v2944_v47  ;;  %v1367_v22 = vpop.permute.xlu1 %1366 }
 0x448   : > { %v1372_v31 = vsel %vm882_vm2, %v1367_v22, 0 }
 0x449   : > { %v1116_v6 = vpack.c.bf16 %v1112_v3, %v1112_v3 }
 0x44b   : > { %2754 = vmatmul.mubr.msk.bf16.vlgmr.msra.gmra.mrb[4].mxu0 %vm1124_vm4, %v1116_v6  ;;  %v1104_v9 = vpop.xlane.xlu0 %1103  ;;  %v1312_v26 = vpop.permute.xlu1 %1311 }
 0x44c   : > { %2764 = vmatpush3.bf16.msra.mxu0 %v1222_v2  ;;  %2955 = vrcp.f32 %v1104_v9  ;;  %2765 = vmatprep.mubr.msk.bf16.mxu0 %vm3003_vm0, %v2999_v7 }
 0x44d   : > { %2775 = vmatprep.subr.bf16.mxu0 %v2999_v7 }
 0x44e   : > { %v2954_v10 = vpop.eup %2953 }
 0x44f   : > { %v1113_v12 = vmul.f32 %v2954_v10, %v2946_v54  ;;  %v1315_v19 = vpop.permute.xlu0 %1314 }
 0x450   : > { %v1320_v21 = vsel %vm882_vm2, %v1315_v19, 0 }
 0x451   : > { %v1117_v13 = vpack.c.bf16 %v1113_v12, %v1113_v12 }
 0x453   : > { %2760 = vmatmul.mubr.msk.bf16.vlgmr.msra.gmra.mrb[20].mxu1 %vm1124_vm4, %v1117_v13  ;;  %v1419_v23 = vpop.permute.xlu0 %1418 }
 0x454   : > { %2770 = vmatpush3.bf16.msra.mxu1 %v1268_v49  ;;  %2771 = vmatprep.mubr.msk.bf16.mxu1 %vm3003_vm0, %v2999_v7  ;;  %v1424_v27 = vsel %vm882_vm2, %v1419_v23, 0 }
 0x455   : > { %2781 = vmatprep.subr.bf16.mxu1 %v2999_v7 }
 0x456   : > { %v2956_v15 = vpop.eup %2955 }
 0x457   : > { %v1114_v18 = vmul.f32 %v2956_v15, %v2948_v59  ;;  %v1416_v28 = vpop.permute.xlu0 %1415 }
 0x459   : > { %v1118_v20 = vpack.c.bf16 %v1114_v18, %v1114_v18 }
 0x45b   : > { %2766 = vmatmul.mubr.msk.bf16.vlgmr.msra.gmra.mrb[8].mxu0 %vm1124_vm4, %v1118_v20 }
 0x45c   : > { %2776 = vmatpush3.bf16.xpose.msra.mxu0 %v1320_v21  ;;  %2777 = vmatprep.mubr.msk.bf16.mxu0 %vm3003_vm0, %v2999_v7 }
 0x45d   : > { %2787 = vmatprep.subr.bf16.mxu0 %v2999_v7 }
 0x463   : > { %2778 = vmatmul.mubr.msk.bf16.vlgmr.msra.gmra.mrb[12].mxu0 %vm882_vm2, %v1312_v26 }
 0x464   : > { %2788 = vmatpush3.bf16.xpose.msra.mxu0 %v1424_v27  ;;  %2789 = vmatprep.mubr.msk.bf16.mxu0 %vm3003_vm0, %v2999_v7 }
 0x465   : > { %2799 = vmatprep.subr.bf16.mxu0 %v2999_v7 }
 0x46b   : > { %2790 = vmatmul.mubr.msk.bf16.vlgmr.msra.gmra.mrb[16].mxu0 %vm882_vm2, %v1416_v28 }
 0x46c   : > { %2801 = vmatprep.mubr.msk.bf16.mxu0 %vm3003_vm0, %v2999_v7 }
 0x47c   : > { %v1107_v24 = vpop.xlane.xlu1 %1106 }
 0x47d   : > { %2957 = vrcp.f32 %v1107_v24 }
 0x480   : > { %v1364_v30 = vpop.permute.xlu1 %1363 }
 0x484   : > { %v1471_v34 = vpop.permute.xlu1 %1470 }
 0x485   : > { %v1476_v35 = vsel %vm882_vm2, %v1471_v34, 0 }
 0x487   : > { %v2958_v29 = vpop.eup %2957 }
 0x488   : > { %v1115_v25 = vmul.f32 %v2958_v29, %v2950_v4  ;;  %v1468_v36 = vpop.permute.xlu1 %1467 }
 0x48a   : > { %v1119_v32 = vpack.c.bf16 %v1115_v25, %v1115_v25 }
 0x48c   : > { %2772 = vmatmul.mubr.msk.bf16.vlgmr.msra.gmra.mrb[24].mxu1 %vm1124_vm4, %v1119_v32 }
 0x48d   : > { %2782 = vmatpush3.bf16.xpose.msra.mxu1 %v1372_v31  ;;  %2783 = vmatprep.mubr.msk.bf16.mxu1 %vm3003_vm0, %v2999_v7 }
 0x48e   : > { %2793 = vmatprep.subr.bf16.mxu1 %v2999_v7 }
 0x494   : > { %2784 = vmatmul.mubr.msk.bf16.vlgmr.msra.gmra.mrb[28].mxu1 %vm882_vm2, %v1364_v30 }
 0x495   : > { %2794 = vmatpush3.bf16.xpose.msra.mxu1 %v1476_v35  ;;  %2795 = vmatprep.mubr.msk.bf16.mxu1 %vm3003_vm0, %v2999_v7 }
 0x496   : > { %2805 = vmatprep.subr.bf16.mxu1 %v2999_v7 }
 0x49c   : > { %2796 = vmatmul.mubr.msk.bf16.vlgmr.msra.gmra.mrb[32].mxu1 %vm882_vm2, %v1468_v36 }
 0x49d   : > { %2807 = vmatprep.mubr.msk.bf16.mxu1 %vm3003_vm0, %v2999_v7 }
 0x51e   : > { %v3362_v37 = vpop.f32.mrb[4].mxu0 }
 0x51f   : > { %v2755_v39 = vpop.f32.mrb[5].mxu0 }
 0x520   : > { %v1169_v40 = vpop.f32.mrb[6].mxu0 }
 0x521   : > { %v2756_v41 = vpop.f32.mrb[7].mxu0 }
 0x526   : > { %v3364_v42 = vpop.f32.mrb[20].mxu1 }
 0x527   : > { %v2761_v43 = vpop.f32.mrb[21].mxu1 }
 0x528   : > { %v1215_v44 = vpop.f32.mrb[22].mxu1 }
 0x529   : > { %v2762_v46 = vpop.f32.mrb[23].mxu1 }
 0x52e   : > { %v3366_v47 = vpop.f32.mrb[8].mxu0 }
 0x52f   : > { %v2767_v50 = vpop.f32.mrb[9].mxu0 }
 0x530   : > { %v1261_v51 = vpop.f32.mrb[10].mxu0 }
 0x531   : > { %v2768_v52 = vpop.f32.mrb[11].mxu0 }
 0x536   : > { %v1356_v53 = vpop.f32.mrb[12].mxu0 }
 0x537   : > { %v1518_v54 = vmul.f32 0.125, %v1356_v53  ;;  %v2779_v58 = vpop.f32.mrb[13].mxu0 }
 0x538   : > { %v1359_v59 = vpop.f32.mrb[14].mxu0 }
 0x539   : > { %v2780_v60 = vpop.f32.mrb[15].mxu0  ;;  %v1522_v63 = vsel %vm1071_vm3, %v1518_v54, -inf }
 0x53a   : > { %1523 = vmax.xlane.f32.xlu0 %v1522_v63 }
 0x53e   : > { %v1460_v0 = vpop.f32.mrb[16].mxu0 }
 0x53f   : > { %v1520_v1 = vmul.f32 0.125, %v1460_v0  ;;  %v2791_v4 = vpop.f32.mrb[17].mxu0 }
 0x540   : > { %v1463_v5 = vpop.f32.mrb[18].mxu0 }
 0x541   : > { %v2792_v48 = vpop.f32.mrb[19].mxu0  ;;  %v1528_v55 = vsel %vm1071_vm3, %v1520_v1, -inf }
 0x542   : > { %1529 = vmax.xlane.f32.xlu0 %v1528_v55 }
 0x55f   : > { %v3370_v56 = vpop.f32.mrb[24].mxu1 }
 0x560   : > { %v2773_v3 = vpop.f32.mrb[25].mxu1 }
 0x561   : > { %v1307_v6 = vpop.f32.mrb[26].mxu1 }
 0x562   : > { %v2774_v62 = vpop.f32.mrb[27].mxu1 }
 0x567   : > { %v1408_v2 = vpop.f32.mrb[28].mxu1 }
 0x568   : > { %v1519_v9 = vmul.f32 0.125, %v1408_v2  ;;  %v2785_v10 = vpop.f32.mrb[29].mxu1 }
 0x569   : > { %v1411_v12 = vpop.f32.mrb[30].mxu1 }
 0x56a   : > { %v2786_v13 = vpop.f32.mrb[31].mxu1  ;;  %v1525_v49 = vsel %vm1071_vm3, %v1519_v9, -inf }
 0x56b   : > { %1526 = vmax.xlane.f32.xlu1 %v1525_v49 }
 0x56f   : > { %v1512_v15 = vpop.f32.mrb[32].mxu1 }
 0x570   : > { %v1521_v18 = vmul.f32 0.125, %v1512_v15  ;;  %v2797_v19 = vpop.f32.mrb[33].mxu1 }
 0x571   : > { %v1515_v20 = vpop.f32.mrb[34].mxu1  ;;  %v2892_v19 = vld [vmem:[%s3610_s5 + $0x8] sm:$0xff]  }
 0x572   : > { %v2798_v21 = vpop.f32.mrb[35].mxu1  ;;  %v1531_v22 = vsel %vm1071_vm3, %v1521_v18, -inf }
 0x573   : > { %1532 = vmax.xlane.f32.xlu0 %v1531_v22 }
 0x5c7   : > { %v1524_v23 = vpop.xlane.xlu0 %1523 }
 0x5c8   : > { %v1534_v26 = vsub.f32 %v1518_v54, %v1524_v23  ;;  %v2894_v23 = vld [vmem:[%s3610_s5 + $0x18] sm:$0xff]  }
 0x5ca   : > { %v1538_v27 = vmul.f32 1.442695, %v1534_v26 }
 0x5cc   : > { %2959 = vpow2.f32 %v1538_v27 }
 0x5cf   : > { %v1530_v28 = vpop.xlane.xlu0 %1529 }
 0x5d0   : > { %v1536_v24 = vsub.f32 %v1520_v1, %v1530_v28 }
 0x5d2   : > { %v1542_v29 = vmul.f32 1.442695, %v1536_v24 }
 0x5d4   : > { %2961 = vpow2.f32 %v1542_v29 }
 0x5d6   : > { %v2960_v25 = vpop.eup %2959 }
 0x5d7   : > { %v1546_v32 = vsel %vm1071_vm3, %v2960_v25, 0.0 }
 0x5d8   : > { %1547 = vadd.xlane.f32.xlu0 %v1546_v32  ;;  %v2896_v32 = vld [vmem:[%s3610_s5 + $0x28] sm:$0xff]  }
 0x5de   : > { %v2962_v30 = vpop.eup %2961 }
 0x5df   : > { %v1552_v31 = vsel %vm1071_vm3, %v2962_v30, 0.0 }
 0x5e0   : > { %1553 = vadd.xlane.f32.xlu0 %v1552_v31  ;;  %v2898_v31 = vld [vmem:[%s3610_s5 + $0x38] sm:$0xff]  }
 0x5f6   : > { %1571 = vrot.lane.b32.xlu0 %v3234_v45, %s3004_s29 }
 0x5f8   : > { %v1527_v34 = vpop.xlane.xlu1 %1526 }
 0x5f9   : > { %v1535_v35 = vsub.f32 %v1519_v9, %v1527_v34 }
 0x5fb   : > { %v1540_v36 = vmul.f32 1.442695, %v1535_v35 }
 0x5fd   : > { %2963 = vpow2.f32 %v1540_v36 }
 0x600   : > { %v1533_v41 = vpop.xlane.xlu0 %1532 }
 0x601   : > { %v1537_v43 = vsub.f32 %v1521_v18, %v1533_v41  ;;  %v2891_v18 = vld [vmem:[%s3610_s5] sm:$0xff]  }
 0x603   : > { %v1544_v44 = vmul.f32 1.442695, %v1537_v43 }
 0x605   : > { %2965 = vpow2.f32 %v1544_v44 }
 0x607   : > { %v2964_v39 = vpop.eup %2963 }
 0x608   : > { %v1549_v40 = vsel %vm1071_vm3, %v2964_v39, 0.0 }
 0x609   : > { %1550 = vadd.xlane.f32.xlu1 %v1549_v40 }
 0x60f   : > { %v2966_v46 = vpop.eup %2965 }
 0x610   : > { %v1555_v45 = vsel %vm1071_vm3, %v2966_v46, 0.0 }
 0x61a   : > { %1620 = vrot.lane.b32.xlu1 %v3281_v8, %s3004_s29 }
 0x61e   : > { %1669 = vrot.lane.b32.xlu1 %v3318_v61, %s3004_s29 }
 0x642   : > { %1556 = vadd.xlane.f32.xlu1 %v1555_v45 }
 0x653   : > { %1718 = vrot.lane.b32.xlu1 %v3328_v11, %s3004_s29 }
 0x665   : > { %v1548_v50 = vpop.xlane.xlu0 %1547 }
 0x666   : > { %2967 = vrcp.f32 %v1548_v50 }
 0x66d   : > { %v1554_v51 = vpop.xlane.xlu0 %1553 }
 0x66e   : > { %2969 = vrcp.f32 %v1554_v51 }
 0x670   : > { %v2968_v52 = vpop.eup %2967 }
 0x671   : > { %v1562_v53 = vmul.f32 %v2968_v52, %v2960_v25  ;;  %v1572_v8 = vpop.permute.xlu0 %1571  ;;  %v2895_v25 = vld [vmem:[%s3610_s5 + $0x20] sm:$0xff]  }
 0x672   : > { %v1577_v54 = vsel %vm1128_vm1, %v1572_v8, 0 }
 0x673   : > { %2800 = vmatpush3.bf16.msra.mxu0 %v1577_v54  ;;  %v1566_v61 = vpack.c.bf16 %v1562_v53, %v1562_v53  ;;  %v2987_v54 = vld [vmem:[%s3089_s14] sm:$0xf] }
 0x674   : > { %2811 = vmatprep.subr.bf16.mxu0 %v2999_v7 }
 0x676   : > { %2802 = vmatmul.mubr.msk.bf16.vlgmr.msra.gmra.mrb[20].mxu0 %vm1124_vm4, %v1566_v61 }
 0x677   : > { %2813 = vmatprep.mubr.msk.bf16.mxu0 %vm3003_vm0, %v2999_v7 }
 0x678   : > { %v2970_v11 = vpop.eup %2969 }
 0x679   : > { %v1564_v63 = vmul.f32 %v2970_v11, %v2962_v30  ;;  %v2897_v30 = vld [vmem:[%s3610_s5 + $0x30] sm:$0xff]  }
 0x67b   : > { %v1568_v5 = vpack.c.bf16 %v1564_v63, %v1564_v63 }
 0x696   : > { %v1551_v58 = vpop.xlane.xlu1 %1550 }
 0x697   : > { %2971 = vrcp.f32 %v1551_v58 }
 0x69a   : > { %v1621_v59 = vpop.permute.xlu1 %1620 }
 0x69b   : > { %v1626_v60 = vsel %vm1128_vm1, %v1621_v59, 0 }
 0x69c   : > { %2806 = vmatpush3.bf16.msra.mxu1 %v1626_v60 }
 0x69d   : > { %2817 = vmatprep.subr.bf16.mxu1 %v2999_v7 }
 0x69e   : > { %v1670_v0 = vpop.permute.xlu1 %1669 }
 0x69f   : > { %v1675_v1 = vsel %vm1128_vm1, %v1670_v0, 0  ;;  %v2989_v0 = vld [vmem:[%s3089_s14 + $0x8] sm:$0xf] }
 0x6a0   : > { %2812 = vmatpush3.bf16.msra.mxu0 %v1675_v1 }
 0x6a1   : > { %v2972_v4 = vpop.eup %2971  ;;  %2823 = vmatprep.subr.bf16.mxu0 %v2999_v7 }
 0x6a2   : > { %v1563_v48 = vmul.f32 %v2972_v4, %v2964_v39 }
 0x6a3   : > { %2814 = vmatmul.mubr.msk.bf16.vlgmr.msra.gmra.mrb[24].mxu0 %vm1124_vm4, %v1568_v5 }
 0x6a4   : > { %v1567_v55 = vpack.c.bf16 %v1563_v48, %v1563_v48  ;;  %2839 = vmatprep.mubr.msk.bf16.mxu0 %vm3003_vm0, %v2999_v7  ;;  %2824 = vmatpush3.bf16.msra.mxu0 %v2891_v18  ;;  %v2990_v48 = vld [vmem:[%s3089_s14 + $0xc] sm:$0xf] }
 0x6a5   : > { %2825 = vmatprep.subr.bf16.mxu0 %v2999_v7 }
 0x6a6   : > { %2808 = vmatmul.mubr.msk.bf16.vlgmr.msra.gmra.mrb[36].mxu1 %vm1124_vm4, %v1567_v55 }
 0x6a7   : > { %2819 = vmatprep.mubr.msk.bf16.mxu1 %vm3003_vm0, %v2999_v7 }
 0x6a8   : > { %2826 = vmatpush3.bf16.msra.mxu0 %v2892_v19 }
 0x6a9   : > { %2827 = vmatprep.subr.bf16.mxu0 %v2999_v7 }
 0x6cf   : > { %v1557_v3 = vpop.xlane.xlu1 %1556 }
 0x6d0   : > { %2973 = vrcp.f32 %v1557_v3 }
 0x6d3   : > { %v1719_v6 = vpop.permute.xlu1 %1718 }
 0x6d4   : > { %v1724_v62 = vsel %vm1128_vm1, %v1719_v6, 0 }
 0x6d5   : > { %2818 = vmatpush3.bf16.msra.mxu1 %v1724_v62 }
 0x6da   : > { %v2974_v2 = vpop.eup %2973 }
 0x6db   : > { %v1565_v9 = vmul.f32 %v2974_v2, %v2966_v46 }
 0x6dd   : > { %v1569_v10 = vpack.c.bf16 %v1565_v9, %v1565_v9  ;;  %v2899_v9 = vld [vmem:[%s3614_s9] ss:$8 sps:$4 sm:$0xff]  }
 0x6df   : > { %2820 = vmatmul.mubr.msk.bf16.vlgmr.msra.gmra.mrb[40].mxu1 %vm1124_vm4, %v1569_v10  ;;  %v2901_v10 = vld [vmem:[%s3614_s9 + $0x4] ss:$8 sps:$4 sm:$0xff]  }
 0x6e0   : > { %2210 = vmatprep.mubr.bf16.mxu1 %v3002_v57  ;;  %v2893_v57 = vld [vmem:[%s3610_s5 + $0x10] sm:$0xff]   ;;  %2178 = vmatprep.subr.bf16.mxu1 %v2901_v10 }
 0x6e1   : > { %2828 = vmatpush3.bf16.msra.mxu0 %v2893_v57  ;;  %2179 = vmatpush1.bf16.msra.mxu1 %v2899_v9 }
 0x6e2   : > { %2829 = vmatprep.subr.bf16.mxu0 %v2999_v7 }
 0x6e5   : > { %2830 = vmatpush3.bf16.msra.mxu0 %v2894_v23 }
 0x6e6   : > { %2831 = vmatprep.subr.bf16.mxu0 %v2999_v7 }
 0x6e9   : > { %2832 = vmatpush3.bf16.msra.mxu0 %v2895_v25 }
 0x6ea   : > { %2833 = vmatprep.subr.bf16.mxu0 %v2999_v7 }
 0x6ed   : > { %2834 = vmatpush3.bf16.msra.mxu0 %v2896_v32 }
 0x6ee   : > { %2835 = vmatprep.subr.bf16.mxu0 %v2999_v7 }
 0x6f1   : > { %2836 = vmatpush3.bf16.msra.mxu0 %v2897_v30  ;;  %v2904_v30 = vld [vmem:[%s3614_s9 + $0x14] ss:$8 sps:$4 sm:$0xff]  }
 0x6f2   : > { %2837 = vmatprep.subr.bf16.mxu0 %v2999_v7  ;;  %2180 = vmatprep.subr.bf16.mxu1 %v2904_v30  ;;  %v2935_v30 = vld [vmem:[%s3616_s11 + $0x70] sm:$0xff]  }
 0x6f5   : > { %2838 = vmatpush3.bf16.msra.mxu0 %v2898_v31  ;;  %v2902_v31 = vld [vmem:[%s3614_s9 + $0x10] ss:$8 sps:$4 sm:$0xff]  }
 0x6f6   : > { %2181 = vmatpush1.bf16.msra.mxu1 %v2902_v31  ;;  %v2936_v31 = vld [vmem:[%s3616_s11 + $0x30] sm:$0xff]  }
 0x749   : > { %v1613_v12 = vpop.f32.mrb[20].mxu0 }
 0x74a   : > { %1770 = vrot.lane.b32.xlu0 %v1613_v12, %s3004_s29  ;;  %v2803_v13 = vpop.f32.mrb[21].mxu0 }
 0x74b   : > { %v1616_v49 = vpop.f32.mrb[22].mxu0 }
 0x74c   : > { %v2804_v15 = vpop.f32.mrb[23].mxu0 }
 0x776   : > { %v1711_v20 = vpop.f32.mrb[24].mxu0 }
 0x777   : > { %1774 = vrot.lane.b32.xlu0 %v1711_v20, %s3004_s29  ;;  %v2815_v21 = vpop.f32.mrb[25].mxu0 }
 0x778   : > { %v1714_v22 = vpop.f32.mrb[26].mxu0 }
 0x779   : > { %v1662_v26 = vpop.f32.mrb[36].mxu1  ;;  %v2816_v27 = vpop.f32.mrb[27].mxu0 }
 0x77a   : > { %1772 = vrot.lane.b32.xlu1 %v1662_v26, %s3004_s29  ;;  %v2809_v28 = vpop.f32.mrb[37].mxu1 }
 0x77b   : > { %v1665_v24 = vpop.f32.mrb[38].mxu1 }
 0x77c   : > { %v2810_v29 = vpop.f32.mrb[39].mxu1 }
 0x7b2   : > { %v1760_v34 = vpop.f32.mrb[40].mxu1 }
 0x7b3   : > { %1776 = vrot.lane.b32.xlu1 %v1760_v34, %s3004_s29  ;;  %v2821_v35 = vpop.f32.mrb[41].mxu1  ;;  %v2907_v34 = vld [vmem:[%s3614_s9 + $0x24] ss:$8 sps:$4 sm:$0xff]  }
 0x7b4   : > { %v1763_v36 = vpop.f32.mrb[42].mxu1  ;;  %v2905_v35 = vld [vmem:[%s3614_s9 + $0x20] ss:$8 sps:$4 sm:$0xff]   ;;  %2182 = vmatprep.subr.bf16.mxu1 %v2907_v34  ;;  %v2937_v34 = vld [vmem:[%s3616_s11 + $0x78] sm:$0xff]  }
 0x7b5   : > { %v2822_v39 = vpop.f32.mrb[43].mxu1  ;;  %2183 = vmatpush1.bf16.msra.mxu1 %v2905_v35  ;;  %v2910_v36 = vld [vmem:[%s3614_s9 + $0x34] ss:$8 sps:$4 sm:$0xff]  }
 0x7b6   : > { %v2908_v39 = vld [vmem:[%s3614_s9 + $0x30] ss:$8 sps:$4 sm:$0xff]   ;;  %2184 = vmatprep.subr.bf16.mxu1 %v2910_v36  ;;  %v2086_v36 = vld [vmem:[%s3615_s10] sm:$0x3] }
 0x7b7   : > { %v2938_v35 = vld [vmem:[%s3616_s11 + $0x38] sm:$0xff]  }
 0x7b9   : > { %2185 = vmatpush1.bf16.msra.mxu1 %v2908_v39  ;;  %v2091_v39 = vrot.slane %v2086_v36, %v631_v38 }
 0x7bc   : > { %v1771_v40 = vpop.permute.xlu0 %1770 }
 0x7bd   : > { %v1782_v43 = vsel %vm882_vm2, %v3362_v37, %v1771_v40  ;;  %v2597_v37 = vld [vmem:[%s3611_s6] ss:$0 sm:$0xff]  ;;  %v2913_v40 = vld [vmem:[%s3614_s9 + $0x44] ss:$8 sps:$4 sm:$0xff]  }
 0x7be   : > { %v1917_v58 = vcombine.high %v2597_v37, %v2597_v37  ;;  %2186 = vmatprep.subr.bf16.mxu1 %v2913_v40  ;;  %v2095_v40 = vrot.slane %v2086_v36, %v635_v33 }
 0x7e9   : > { %v1775_v46 = vpop.permute.xlu0 %1774 }
 0x7ea   : > { %v1784_v50 = vsel %vm882_vm2, %v3366_v47, %v1775_v46  ;;  %v2988_v47 = vld [vmem:[%s3089_s14 + $0x4] sm:$0xf] }
 0x7eb   : > { %v2919_v46 = vld [vmem:[%s3614_s9 + $0x64] ss:$8 sps:$4 sm:$0xff]  }
 0x7ec   : > { %v1773_v41 = vpop.permute.xlu1 %1772 }
 0x7ed   : > { %v1783_v7 = vsel %vm882_vm2, %v3364_v42, %v1773_v41  ;;  %v2911_v41 = vld [vmem:[%s3614_s9 + $0x40] ss:$8 sps:$4 sm:$0xff]  }
 0x7ee   : > { %v1790_v44 = vcombine.low %v1782_v43, %v1783_v7  ;;  %2187 = vmatpush1.bf16.msra.mxu1 %v2911_v41  ;;  %v2916_v43 = vld [vmem:[%s3614_s9 + $0x54] ss:$8 sps:$4 sm:$0xff]   ;;  %v2914_v7 = vld [vmem:[%s3614_s9 + $0x50] ss:$8 sps:$4 sm:$0xff]  }
 0x7ef   : > { %2188 = vmatprep.subr.bf16.mxu1 %v2916_v43 }
 0x7f2   : > { %2189 = vmatpush1.bf16.msra.mxu1 %v2914_v7 }
 0x7f3   : > { %2190 = vmatprep.subr.bf16.mxu1 %v2919_v46 }
 0x825   : > { %v1777_v45 = vpop.permute.xlu1 %1776 }
 0x826   : > { %v1785_v51 = vsel %vm882_vm2, %v3370_v56, %v1777_v45  ;;  %v2922_v45 = vld [vmem:[%s3614_s9 + $0x74] ss:$8 sps:$4 sm:$0xff]  }
 0x827   : > { %v1791_v52 = vcombine.low %v1784_v50, %v1785_v51  ;;  %v2920_v50 = vld [vmem:[%s3614_s9 + $0x70] ss:$8 sps:$4 sm:$0xff]  }
 0x829   : > { %v1794_v53 = vpack.c.bf16 %v1791_v52, %v1790_v44  ;;  %v2917_v44 = vld [vmem:[%s3614_s9 + $0x60] ss:$8 sps:$4 sm:$0xff]  }
 0x82a   : > { %2191 = vmatpush1.bf16.msra.mxu1 %v2917_v44 }
 0x82b   : > { %2840 = vmatmul.mubr.bf16.vlgmr.msra.gmra.mrb[28].mxu0 %v1794_v53  ;;  %2192 = vmatprep.subr.bf16.mxu1 %v2922_v45 }
 0x82e   : > { %2193 = vmatpush1.bf16.msra.mxu1 %v2920_v50 }
 0x8fe   : > { %v1893_v42 = vpop.f32.mrb[28].mxu0 }
 0x8ff   : > { %v1902_v8 = vcombine.high %v1893_v42, %v1893_v42  ;;  %v1906_v61 = vadd.f32 %v2987_v54, %v1893_v42  ;;  %v2841_v11 = vpop.f32.mrb[29].mxu0  ;;  %v2598_v54 = vld [vmem:[%s3612_s7] ss:$0 sm:$0xff] }
 0x900   : > { %v1896_v59 = vpop.f32.mrb[30].mxu0 }
 0x901   : > { %v1907_v60 = vadd.f32 %v2988_v47, %v1902_v8  ;;  %v1903_v63 = vcombine.high %v1896_v59, %v1896_v59  ;;  %v1908_v56 = vadd.f32 %v2989_v0, %v1896_v59  ;;  %v2842_v1 = vpop.f32.mrb[31].mxu0  ;;  %v3453_v4 = vadd.f32 %v2597_v37, %v1906_v61  ;;  %v2599_v59 = vld [vmem:[%s3613_s8] ss:$0 sm:$0xff] }
 0x902   : > { %v2043_v47 = vcombine.high %v2598_v54, %v2598_v54 }
 0x903   : > { %v3455_v5 = vadd.f32 %v1917_v58, %v1907_v60  ;;  %v1909_v55 = vadd.f32 %v2990_v48, %v1903_v63  ;;  %v3458_v3 = vadd.f32 %v2597_v37, %v1908_v56  ;;  %v2055_v56 = vcombine.high %v2599_v59, %v2599_v59 }
 0x905   : > { %v3460_v6 = vadd.f32 %v1917_v58, %v1909_v55  ;;  %v1929_v62 = vcombine.low %v3453_v4, %v3455_v5 }
 0x907   : > { %1933 = vadd.xlane.f32.xlu0 %v1929_v62  ;;  %v1930_v2 = vcombine.low %v3458_v3, %v3460_v6 }
 0x909   : > { %1935 = vadd.xlane.f32.xlu1 %v1930_v2 }
 0x994   : > { %v1934_v12 = vpop.xlane.xlu0 %1933 }
 0x995   : > { %v1937_v13 = vmul.f32 0.0078125, %v1934_v12 }
 0x996   : > { %v1936_v49 = vpop.xlane.xlu1 %1935 }
 0x997   : > { %v1947_v15 = vrot.slane %v1937_v13, %v3102_v16  ;;  %v1954_v18 = vrot.slane %v1937_v13, %v3105_v17  ;;  %v1938_v19 = vmul.f32 0.0078125, %v1936_v49 }
 0x999   : > { %v1973_v57 = vsub.f32 %v3453_v4, %v1947_v15  ;;  %v1974_v20 = vsub.f32 %v3455_v5, %v1954_v18  ;;  %v1961_v21 = vrot.slane %v1938_v19, %v3102_v16  ;;  %v1968_v22 = vrot.slane %v1938_v19, %v3105_v17 }
 0x99b   : > { %v1975_v23 = vsub.f32 %v3458_v3, %v1961_v21  ;;  %v1976_v26 = vsub.f32 %v3460_v6, %v1968_v22  ;;  %v1977_v27 = vmul.f32 %v1973_v57, %v1973_v57  ;;  %v1978_v28 = vmul.f32 %v1974_v20, %v1974_v20  ;;  %v2926_v22 = vld [vmem:[%s3616_s11 + $0x8] sm:$0xff]  }
 0x99d   : > { %v1985_v24 = vcombine.low %v1977_v27, %v1978_v28  ;;  %v1979_v29 = vmul.f32 %v1975_v23, %v1975_v23  ;;  %v1980_v25 = vmul.f32 %v1976_v26, %v1976_v26  ;;  %v2929_v27 = vld [vmem:[%s3616_s11 + $0x58] sm:$0xff]  }
 0x99e   : > { %v2930_v28 = vld [vmem:[%s3616_s11 + $0x18] sm:$0xff]  }
 0x99f   : > { %1989 = vadd.xlane.f32.xlu0 %v1985_v24  ;;  %v1986_v32 = vcombine.low %v1979_v29, %v1980_v25  ;;  %v2931_v24 = vld [vmem:[%s3616_s11 + $0x60] sm:$0xff]   ;;  %v2933_v25 = vld [vmem:[%s3616_s11 + $0x68] sm:$0xff]  }
 0x9a0   : > { %v2932_v29 = vld [vmem:[%s3616_s11 + $0x20] sm:$0xff]  }
 0x9a3   : > { %1991 = vadd.xlane.f32.xlu0 %v1986_v32  ;;  %v2934_v32 = vld [vmem:[%s3616_s11 + $0x28] sm:$0xff]  }
 0xa2c   : > { %v1990_v51 = vpop.xlane.xlu0 %1989 }
 0xa2d   : > { %v1993_v52 = vmul.f32 0.0078125, %v1990_v51 }
 0xa2f   : > { %v1995_v53 = vadd.f32 1e-05, %v1993_v52 }
 0xa30   : > { %v1992_v37 = vpop.xlane.xlu0 %1991 }
 0xa31   : > { %2975 = vrsqrt.f32 %v1995_v53  ;;  %v1994_v42 = vmul.f32 0.0078125, %v1992_v37 }
 0xa33   : > { %v1996_v8 = vadd.f32 1e-05, %v1994_v42 }
 0xa35   : > { %2977 = vrsqrt.f32 %v1996_v8 }
 0xa3b   : > { %v2976_v61 = vpop.eup %2975 }
 0xa3c   : > { %v2007_v58 = vrot.slane %v2976_v61, %v3102_v16  ;;  %v2014_v11 = vrot.slane %v2976_v61, %v3105_v17 }
 0xa3e   : > { %v2033_v60 = vmul.f32 %v2007_v58, %v1973_v57  ;;  %v2034_v63 = vmul.f32 %v2014_v11, %v1974_v20  ;;  %v2925_v20 = vld [vmem:[%s3616_s11 + $0x48] sm:$0xff]  }
 0xa3f   : > { %v2978_v0 = vpop.eup %2977 }
 0xa40   : > { %v2021_v1 = vrot.slane %v2978_v0, %v3102_v16  ;;  %v2028_v48 = vrot.slane %v2978_v0, %v3105_v17  ;;  %v2045_v55 = vmul.f32 %v2598_v54, %v2033_v60  ;;  %v2046_v62 = vmul.f32 %v2043_v47, %v2034_v63  ;;  %v2923_v16 = vld [vmem:[%s3616_s11 + $0x40] sm:$0xff]  }
 0xa41   : > { %v2924_v17 = vld [vmem:[%s3616_s11] sm:$0xff]   ;;  %2685 = vmatprep.subr.bf16.mxu0 %v2923_v16 }
 0xa42   : > { %v2035_v2 = vmul.f32 %v2021_v1, %v1975_v23  ;;  %v2036_v9 = vmul.f32 %v2028_v48, %v1976_v26  ;;  %v2057_v13 = vadd.f32 %v2599_v59, %v2045_v55  ;;  %v2058_v49 = vadd.f32 %v2055_v56, %v2046_v62  ;;  %2686 = vmatpush3.bf16.msra.mxu0 %v2924_v17  ;;  %v2927_v23 = vld [vmem:[%s3616_s11 + $0x50] sm:$0xff]  }
 0xa43   : > { %2687 = vmatprep.subr.bf16.mxu0 %v2925_v20  ;;  %v2928_v26 = vld [vmem:[%s3616_s11 + $0x10] sm:$0xff]  }
 0xa44   : > { %v2047_v10 = vmul.f32 %v2598_v54, %v2035_v2  ;;  %v2048_v12 = vmul.f32 %v2043_v47, %v2036_v9  ;;  %v2065_v19 = vcombine.low %v2057_v13, %v2058_v49 }
 0xa46   : > { %v2059_v15 = vadd.f32 %v2599_v59, %v2047_v10  ;;  %v2060_v18 = vadd.f32 %v2055_v56, %v2048_v12  ;;  %2688 = vmatpush3.bf16.msra.mxu0 %v2926_v22 }
 0xa47   : > { %2689 = vmatprep.subr.bf16.mxu0 %v2927_v23 }
 0xa48   : > { %v2066_v21 = vcombine.low %v2059_v15, %v2060_v18 }
 0xa4a   : > { %v2069_v57 = vpack.c.bf16 %v2066_v21, %v2065_v19  ;;  %2690 = vmatpush3.bf16.msra.mxu0 %v2928_v26 }
 0xa4b   : > { %2691 = vmatprep.subr.bf16.mxu0 %v2929_v27 }
 0xa4c   : > { %2211 = vmatmul.mubr.bf16.vlgmr.msra.gmra.mrb[44].mxu1 %v2069_v57 }
 0xa4e   : > { %2692 = vmatpush3.bf16.msra.mxu0 %v2930_v28  ;;  %v2632_v28 = vld [vmem:[%s3617_s12] ss:$0 sm:$0xff] }
 0xa4f   : > { %2693 = vmatprep.subr.bf16.mxu0 %v2931_v24 }
 0xa52   : > { %2694 = vmatpush3.bf16.msra.mxu0 %v2932_v29 }
 0xa53   : > { %2695 = vmatprep.subr.bf16.mxu0 %v2933_v25 }
 0xa56   : > { %2696 = vmatpush3.bf16.msra.mxu0 %v2934_v32 }
 0xa57   : > { %2697 = vmatprep.subr.bf16.mxu0 %v2935_v30 }
 0xa5a   : > { %2698 = vmatpush3.bf16.msra.mxu0 %v2936_v31  ;;  %v2445_v31 = vcombine.high %v2632_v28, %v2632_v28 }
 0xa5b   : > { %2699 = vmatprep.subr.bf16.mxu0 %v2937_v34 }
 0xa5e   : > { %2700 = vmatpush3.bf16.msra.mxu0 %v2938_v35 }
 0xb1f   : > { %v2212_v41 = vpop.f32.mrb[44].mxu1 }
 0xb20   : > { %v2213_v43 = vadd.f32 %v2212_v41, %v2091_v39  ;;  %v2214_v7 = vpop.f32.mrb[45].mxu1 }
 0xb21   : > { %v2215_v44 = vadd.f32 %v2214_v7, %v2095_v40  ;;  %v2216_v46 = vpop.f32.mrb[46].mxu1 }
 0xb22   : > { %v2221_v45 = vmul.f32 %v2213_v43, %v2213_v43  ;;  %v2217_v50 = vadd.f32 %v2216_v46, %v2091_v39  ;;  %v2218_v51 = vpop.f32.mrb[47].mxu1 }
 0xb23   : > { %v2222_v52 = vmul.f32 %v2215_v44, %v2215_v44  ;;  %v2219_v53 = vadd.f32 %v2218_v51, %v2095_v40 }
 0xb24   : > { %v2225_v37 = vmul.f32 %v2221_v45, %v2213_v43  ;;  %v2223_v42 = vmul.f32 %v2217_v50, %v2217_v50 }
 0xb25   : > { %v2226_v8 = vmul.f32 %v2222_v52, %v2215_v44  ;;  %v2224_v54 = vmul.f32 %v2219_v53, %v2219_v53 }
 0xb26   : > { %v2229_v61 = vmul.f32 0.044715, %v2225_v37  ;;  %v2227_v58 = vmul.f32 %v2223_v42, %v2217_v50 }
 0xb27   : > { %v2230_v38 = vmul.f32 0.044715, %v2226_v8  ;;  %v2228_v11 = vmul.f32 %v2224_v54, %v2219_v53 }
 0xb28   : > { %v2233_v14 = vadd.f32 %v2229_v61, %v2213_v43  ;;  %v2231_v33 = vmul.f32 0.044715, %v2227_v58 }
 0xb29   : > { %v2234_v59 = vadd.f32 %v2230_v38, %v2215_v44  ;;  %v2232_v47 = vmul.f32 0.044715, %v2228_v11 }
 0xb2a   : > { %v2237_v60 = vmul.f32 0.7978846, %v2233_v14  ;;  %v2235_v63 = vadd.f32 %v2231_v33, %v2217_v50 }
 0xb2b   : > { %v2238_v0 = vmul.f32 0.7978846, %v2234_v59  ;;  %v2236_v56 = vadd.f32 %v2232_v47, %v2219_v53 }
 0xb2c   : > { %2979 = vtanh.f32 %v2237_v60  ;;  %v2239_v1 = vmul.f32 0.7978846, %v2235_v63 }
 0xb2d   : > { %2981 = vtanh.f32 %v2238_v0  ;;  %v2240_v48 = vmul.f32 0.7978846, %v2236_v56 }
 0xb2e   : > { %2983 = vtanh.f32 %v2239_v1 }
 0xb2f   : > { %2985 = vtanh.f32 %v2240_v48 }
 0xb36   : > { %v2980_v55 = vpop.eup %2979 }
 0xb37   : > { %v2982_v62 = vpop.eup %2981  ;;  %v2245_v2 = vadd.f32 1.0, %v2980_v55 }
 0xb38   : > { %v2984_v9 = vpop.eup %2983  ;;  %v2246_v10 = vadd.f32 1.0, %v2982_v62 }
 0xb39   : > { %v2986_v12 = vpop.eup %2985  ;;  %v2249_v13 = vmul.f32 0.5, %v2245_v2  ;;  %v2247_v49 = vadd.f32 1.0, %v2984_v9 }
 0xb3a   : > { %v2248_v15 = vadd.f32 1.0, %v2986_v12  ;;  %v2250_v18 = vmul.f32 0.5, %v2246_v10 }
 0xb3b   : > { %v2251_v19 = vmul.f32 0.5, %v2247_v49  ;;  %v2253_v57 = vmul.f32 %v2249_v13, %v2213_v43 }
 0xb3c   : > { %v2252_v21 = vmul.f32 0.5, %v2248_v15  ;;  %v2254_v17 = vmul.f32 %v2250_v18, %v2215_v44 }
 0xb3d   : > { %v2255_v16 = vmul.f32 %v2251_v19, %v2217_v50 }
 0xb3e   : > { %v2256_v20 = vmul.f32 %v2252_v21, %v2219_v53 }
 0xb3f   : > { %v2257_v22 = vpack.c.bf16 %v2255_v16, %v2253_v57 }
 0xb40   : > { %v2258_v23 = vpack.c.bf16 %v2256_v20, %v2254_v17 }
 0xb42   : > { %2419 = vmatprep.mubr.bf16.mxu0 %v2258_v23 }
 0xb43   : > { %2420 = vmatmul.mubr.bf16.vlgmr.msra.gmra.mrb[32].mxu0 %v2257_v22 }
 0xc16   : > { %v2701_v26 = vpop.f32.mrb[32].mxu0 }
 0xc17   : > { %v2702_v27 = vpop.f32.mrb[33].mxu0 }
 0xc18   : > { %v2703_v24 = vadd.f32 %v2702_v27, %v2701_v26  ;;  %v2704_v29 = vpop.f32.mrb[34].mxu0 }
 0xc19   : > { %v2705_v25 = vpop.f32.mrb[35].mxu0 }
 0xc1a   : > { %v2430_v32 = vcombine.high %v2703_v24, %v2703_v24  ;;  %v2434_v30 = vadd.f32 %v2703_v24, %v3453_v4  ;;  %v2706_v34 = vadd.f32 %v2705_v25, %v2704_v29 }
 0xc1c   : > { %v2435_v35 = vadd.f32 %v2430_v32, %v3455_v5  ;;  %v2447_v36 = vadd.f32 %v2632_v28, %v2434_v30  ;;  %v2431_v39 = vcombine.high %v2706_v34, %v2706_v34  ;;  %v2436_v40 = vadd.f32 %v2706_v34, %v3458_v3 }
 0xc1e   : > { %v2448_v41 = vadd.f32 %v2445_v31, %v2435_v35  ;;  %v2452_v43 = vsel %vm2451_vm5, %v2447_v36, 0.0  ;;  %v2437_v7 = vadd.f32 %v2431_v39, %v3460_v6  ;;  %v2449_v44 = vadd.f32 %v2632_v28, %v2436_v40 }
 0xc1f   : > { %v2453_v46 = vrot.slane %v2452_v43, 4 }
 0xc20   : > { %v2459_v45 = vsel %vm2451_vm5, %v2448_v41, 0.0  ;;  %v2450_v50 = vadd.f32 %v2445_v31, %v2437_v7  ;;  %v2466_v4 = vsel %vm2451_vm5, %v2449_v44, 0.0 }
 0xc21   : > { %v2454_v51 = vadd.f32 %v2453_v46, %v2452_v43  ;;  %v2460_v52 = vrot.slane %v2459_v45, 4  ;;  %v2467_v53 = vrot.slane %v2466_v4, 4 }
 0xc22   : > { %v2473_v5 = vsel %vm2451_vm5, %v2450_v50, 0.0 }
 0xc23   : > { %v2455_v37 = vrot.slane %v2454_v51, 2  ;;  %v2461_v3 = vadd.f32 %v2460_v52, %v2459_v45  ;;  %v2468_v42 = vadd.f32 %v2467_v53, %v2466_v4  ;;  %v2474_v8 = vrot.slane %v2473_v5, 4 }
 0xc25   : > { %v2456_v54 = vadd.f32 %v2455_v37, %v2454_v51  ;;  %v2462_v61 = vrot.slane %v2461_v3, 2  ;;  %v2469_v6 = vrot.slane %v2468_v42, 2  ;;  %v2475_v58 = vadd.f32 %v2474_v8, %v2473_v5 }
 0xc27   : > { %v2457_v38 = vrot.slane %v2456_v54, 1  ;;  %v2463_v11 = vadd.f32 %v2462_v61, %v2461_v3  ;;  %v2470_v14 = vadd.f32 %v2469_v6, %v2468_v42  ;;  %v2476_v33 = vrot.slane %v2475_v58, 2 }
 0xc29   : > { %v2458_v59 = vadd.f32 %v2457_v38, %v2456_v54  ;;  %v2464_v47 = vrot.slane %v2463_v11, 1  ;;  %v2471_v60 = vrot.slane %v2470_v14, 1  ;;  %v2477_v63 = vadd.f32 %v2476_v33, %v2475_v58 }
 0xc2b   : > { %v2465_v0 = vadd.f32 %v2464_v47, %v2463_v11  ;;  %v2481_v56 = vmul.f32 0.25, %v2458_v59  ;;  %v2472_v1 = vadd.f32 %v2471_v60, %v2470_v14  ;;  %v2478_v48 = vrot.slane %v2477_v63, 1 }
 0xc2d   : > { %v2482_v55 = vmul.f32 0.25, %v2465_v0  ;;  %2485 = vst [vmem:[%s440_s17] sm:$0x1] %v2481_v56  ;;  %v2479_v62 = vadd.f32 %v2478_v48, %v2477_v63  ;;  %v2483_v2 = vmul.f32 0.25, %v2472_v1 }
 0xc2f   : > { %2486 = vst [vmem:[%s440_s17 + $0x1] sm:$0x1] %v2482_v55  ;;  %v2484_v9 = vmul.f32 0.25, %v2479_v62  ;;  %2487 = vst [vmem:[%s440_s17 + $0x2] sm:$0x1] %v2483_v2 }
 0xc31   : > { %2488 = vst [vmem:[%s440_s17 + $0x3] sm:$0x1] %v2484_v9 }
 0xc32 PF: > { %s23_s25 = sadd.s32 1, %s2997_s25  }
 0xc33   : > { %p20_p4 = scmp.ge.s32.totalorder %s23_s25, 4  }
 0xc35   :  { %22 = sbr.rel (!%p20_p4) target bundleno = 1 (0x1), region = 102 }

// kernel: m3tnet_forward.8
= control target key start
LH: loop header
LB: loop body
LE: loop exit
PB: predicated region body
PF: predicated region fallthrough
CT: control target
= control target key end

     0   :  { %s3653_s25 = smov 0   ;;  %s4560_s0 = inlined_call_operand.vmem [shape: f32[2,4,256], index: 0, kind: input, shape index: {}]   ;;  %s4561_s1 = inlined_call_operand.vmem [shape: f32[1,256], index: 1, kind: input, shape index: {}]   ;;  %s4562_s2 = inlined_call_operand.vmem [shape: f32[1,256], index: 2, kind: input, shape index: {}]   ;;  %s4563_s3 = inlined_call_operand.vmem [shape: bf16[256,768], index: 3, kind: input, shape index: {}]   ;;  %s4564_s4 = inlined_call_operand.vmem [shape: f32[1,768], index: 4, kind: input, shape index: {}]   ;;  %s4565_s5 = inlined_call_operand.vmem [shape: bf16[256,256], index: 5, kind: input, shape index: {}]   ;;  %s4566_s6 = inlined_call_operand.vmem [shape: f32[1,256], index: 6, kind: input, shape index: {}]   ;;  %s4567_s7 = inlined_call_operand.vmem [shape: f32[1,256], index: 7, kind: input, shape index: {}]   ;;  %s4568_s8 = inlined_call_operand.vmem [shape: f32[1,256], index: 8, kind: input, shape index: {}]   ;;  %s4569_s9 = inlined_call_operand.vmem [shape: bf16[256,512], index: 9, kind: input, shape index: {}]   ;;  %s4570_s10 = inlined_call_operand.vmem [shape: f32[1,512], index: 10, kind: input, shape index: {}]   ;;  %s4571_s11 = inlined_call_operand.vmem [shape: bf16[512,256], index: 11, kind: input, shape index: {}]   ;;  %s4572_s12 = inlined_call_operand.vmem [shape: f32[1,256], index: 12, kind: input, shape index: {}]   ;;  %s4573_s13 = inlined_call_operand.vmem [shape: f32[2,4,256], index: 13, kind: output, shape index: {}]  }
   0x1 LB: > { %s2848_s26 = sadd.s32 4294967295, %s3578_s25   ;;  %p2852_p0 = scmp.ge.s32.totalorder %s3578_s25, 1  ;;  %s3578_s25 = sphi %s3653_s25, %s23_s25  }
   0x2   : > { %p387_p1 = scmp.lt.s32.totalorder %s3578_s25, 3 }
   0x4   : > { %p388_p2 = pnand %p2852_p0, %p387_p1 }
   0x5   : > { %p431_p3 = scmp.lt.s32.totalorder (!%p388_p2), %s2848_s26, 1  ;;  %vm448_vm0 = vcmask (!%p388_p2), 1043456   ;;  %v3167_v5 = vld [vmem:[%s4563_s3 + $0x4] ss:$24 sps:$4 sm:$0xff] (!%p388_p2)   ;;  %v3169_v6 = vld [vmem:[%s4563_s3] ss:$24 sps:$4 sm:$0xff] (!%p388_p2)   ;;  %v460_v44 = vlaneseq (!%p388_p2) }
   0x6   : > { %391 = sbr.rel (%p388_p2) target bundleno = 2461 (0x99d), region = 72  ;;  %v3170_v7 = vld [vmem:[%s4563_s3 + $0x14] ss:$24 sps:$4 sm:$0xff] (!%p388_p2)   ;;  %v3172_v8 = vld [vmem:[%s4563_s3 + $0x10] ss:$24 sps:$4 sm:$0xff] (!%p388_p2)   ;;  %1125 = vmatprep.subr.bf16.mxu1 (!%p388_p2), %v3167_v5  ;;  %vm3582_vm1 = vmmov (!%p388_p2), 0  }
   0x7   : > { %v3173_v9 = vld [vmem:[%s4563_s3 + $0x34] ss:$24 sps:$4 sm:$0xff] (!%p388_p2)   ;;  %1207 = vmatprep.subr.bf16.mxu0 (!%p388_p2), %v3170_v7  ;;  %v3176_v10 = vld [vmem:[%s4563_s3 + $0x44] ss:$24 sps:$4 sm:$0xff] (!%p388_p2)   ;;  %1126 = vmatpush1.bf16.msra.mxu1 (!%p388_p2), %v3169_v6  ;;  %v3175_v11 = vld [vmem:[%s4563_s3 + $0x30] ss:$24 sps:$4 sm:$0xff] (!%p388_p2)  }
   0x8   : > { %1208 = vmatpush1.bf16.msra.mxu0 (!%p388_p2), %v3172_v8  ;;  %v3178_v12 = vld [vmem:[%s4563_s3 + $0x40] ss:$24 sps:$4 sm:$0xff] (!%p388_p2)   ;;  %1127 = vmatprep.subr.bf16.mxu1 (!%p388_p2), %v3173_v9  ;;  %v3179_v13 = vld [vmem:[%s4563_s3 + $0x64] ss:$24 sps:$4 sm:$0xff] (!%p388_p2)   ;;  %v3182_v14 = vld [vmem:[%s4563_s3 + $0x74] ss:$24 sps:$4 sm:$0xff] (!%p388_p2)  }
   0x9   : > { %1209 = vmatprep.subr.bf16.mxu0 (!%p388_p2), %v3176_v10  ;;  %v3181_v15 = vld [vmem:[%s4563_s3 + $0x60] ss:$24 sps:$4 sm:$0xff] (!%p388_p2)   ;;  %v3184_v16 = vld [vmem:[%s4563_s3 + $0x70] ss:$24 sps:$4 sm:$0xff] (!%p388_p2)   ;;  %v3185_v17 = vld [vmem:[%s4563_s3 + $0x94] ss:$24 sps:$4 sm:$0xff] (!%p388_p2)  }
   0xa   : > { %v3188_v18 = vld [vmem:[%s4563_s3 + $0xa4] ss:$24 sps:$4 sm:$0xff] (!%p388_p2)   ;;  %v3187_v19 = vld [vmem:[%s4563_s3 + $0x90] ss:$24 sps:$4 sm:$0xff] (!%p388_p2)   ;;  %v3190_v20 = vld [vmem:[%s4563_s3 + $0xa0] ss:$24 sps:$4 sm:$0xff] (!%p388_p2)  }
   0xb   : > { %1128 = vmatpush1.bf16.msra.mxu1 (!%p388_p2), %v3175_v11  ;;  %v3191_v21 = vld [vmem:[%s4563_s3 + $0xc4] ss:$24 sps:$4 sm:$0xff] (!%p388_p2)   ;;  %v3194_v22 = vld [vmem:[%s4563_s3 + $0xd4] ss:$24 sps:$4 sm:$0xff] (!%p388_p2)   ;;  %v3193_v23 = vld [vmem:[%s4563_s3 + $0xc0] ss:$24 sps:$4 sm:$0xff] (!%p388_p2)  }
   0xc   : > { %1210 = vmatpush1.bf16.msra.mxu0 (!%p388_p2), %v3178_v12  ;;  %1129 = vmatprep.subr.bf16.mxu1 (!%p388_p2), %v3179_v13  ;;  %v3196_v24 = vld [vmem:[%s4563_s3 + $0xd0] ss:$24 sps:$4 sm:$0xff] (!%p388_p2)   ;;  %v3197_v25 = vld [vmem:[%s4563_s3 + $0xf4] ss:$24 sps:$4 sm:$0xff] (!%p388_p2)   ;;  %v3200_v26 = vld [vmem:[%s4563_s3 + $0x104] ss:$24 sps:$4 sm:$0xff] (!%p388_p2)  }
   0xd   : > { %s4575_s26 = smov (!%p431_p3, %s2848_s26), 1  ;;  %1211 = vmatprep.subr.bf16.mxu0 %v3182_v14  ;;  %v3199_v27 = vld [vmem:[%s4563_s3 + $0xf0] ss:$24 sps:$4 sm:$0xff]   ;;  %v3202_v28 = vld [vmem:[%s4563_s3 + $0x100] ss:$24 sps:$4 sm:$0xff]   ;;  %v3790_v46 = vshrl.u32 %v460_v44, 7 }
   0xe   : > { %s3117_s27 = sshll.u32 %s4575_s26, 3  ;;  %v3203_v29 = vld [vmem:[%s4563_s3 + $0x124] ss:$24 sps:$4 sm:$0xff]   ;;  %v3206_v30 = vld [vmem:[%s4563_s3 + $0x134] ss:$24 sps:$4 sm:$0xff]   ;;  %vm1309_vm2 = vcmask 1041408  }
   0xf   : > { %s3669_s30 = scalar_lea.vmem %s4560_s0, %s3117_s27  ;;  %1130 = vmatpush1.bf16.msra.mxu1 %v3181_v15  ;;  %v3205_v31 = vld [vmem:[%s4563_s3 + $0x120] ss:$24 sps:$4 sm:$0xff]   ;;  %v3208_v32 = vld [vmem:[%s4563_s3 + $0x130] ss:$24 sps:$4 sm:$0xff]   ;;  %v3209_v33 = vld [vmem:[%s4563_s3 + $0x154] ss:$24 sps:$4 sm:$0xff]   ;;  %s440_s18 = scalar_lea.vmem %s4573_s13, %s3117_s27 }
  0x10   : > { %v3672_v0 = vld [vmem:[%s3669_s30] sm:$0xff]  ;;  %1212 = vmatpush1.bf16.msra.mxu0 %v3184_v16  ;;  %1131 = vmatprep.subr.bf16.mxu1 %v3185_v17  ;;  %v3211_v35 = vld [vmem:[%s4563_s3 + $0x150] ss:$24 sps:$4 sm:$0xff]   ;;  %v3218_v38 = vld [vmem:[%s4563_s3 + $0x194] ss:$24 sps:$4 sm:$0xff]   ;;  %vm1291_vm3 = vcmask 27648  }
  0x11   : > { %v446_v1 = vcombine.high %v3672_v0, %v3672_v0  ;;  %v449_v2 = vsel %vm448_vm0, %v3672_v0, 0.0  ;;  %1213 = vmatprep.subr.bf16.mxu0 %v3188_v18  ;;  %v3212_v34 = vld [vmem:[%s4563_s3 + $0x164] ss:$24 sps:$4 sm:$0xff]   ;;  %v3214_v36 = vld [vmem:[%s4563_s3 + $0x160] ss:$24 sps:$4 sm:$0xff]   ;;  %vm1305_vm4 = vcmask 31744  }
  0x12   : > { %v3215_v37 = vld [vmem:[%s4563_s3 + $0x184] ss:$24 sps:$4 sm:$0xff]   ;;  %v3217_v39 = vld [vmem:[%s4563_s3 + $0x180] ss:$24 sps:$4 sm:$0xff]   ;;  %v3220_v40 = vld [vmem:[%s4563_s3 + $0x190] ss:$24 sps:$4 sm:$0xff]  }
  0x13   : > { %v450_v3 = vsel %vm448_vm0, %v446_v1, 0.0  ;;  %1132 = vmatpush1.bf16.msra.mxu1 %v3187_v19  ;;  %v3221_v41 = vld [vmem:[%s4563_s3 + $0x1b4] ss:$24 sps:$4 sm:$0xff]   ;;  %v3580_v42 = vmov 839922192  }
  0x14   : > { %v451_v4 = vadd.f32 %v450_v3, %v449_v2  ;;  %1214 = vmatpush1.bf16.msra.mxu0 %v3190_v20  ;;  %1133 = vmatprep.subr.bf16.mxu1 %v3191_v21  ;;  %v458_v43 = vunpack.c.l.s4 %v3580_v42  ;;  %v3223_v57 = vld [vmem:[%s4563_s3 + $0x1b0] ss:$24 sps:$4 sm:$0xff]   ;;  %v3224_v58 = vld [vmem:[%s4563_s3 + $0x1c4] ss:$24 sps:$4 sm:$0xff]   ;;  %v3226_v59 = vld [vmem:[%s4563_s3 + $0x1c0] ss:$24 sps:$4 sm:$0xff]  }
  0x15   : > { %1215 = vmatprep.subr.bf16.mxu0 %v3194_v22  ;;  %v3227_v60 = vld [vmem:[%s4563_s3 + $0x1e4] ss:$24 sps:$4 sm:$0xff]   ;;  %v3229_v61 = vld [vmem:[%s4563_s3 + $0x1e0] ss:$24 sps:$4 sm:$0xff]   ;;  %v3230_v62 = vld [vmem:[%s4563_s3 + $0x1f4] ss:$24 sps:$4 sm:$0xff]  }
  0x16   : > { %452 = vadd.xlane.f32.xlu0 %v451_v4  ;;  %v459_v45 = vunpack.c.0.s8 %v458_v43  ;;  %v3232_v63 = vld [vmem:[%s4563_s3 + $0x1f0] ss:$24 sps:$4 sm:$0xff]   ;;  %v3236_v2 = vld [vmem:[%s4563_s3 + $0x224] ss:$24 sps:$4 sm:$0xff]   ;;  %v3238_v3 = vld [vmem:[%s4563_s3 + $0x220] ss:$24 sps:$4 sm:$0xff]  }
  0x17   : > { %1134 = vmatpush1.bf16.msra.mxu1 %v3193_v23  ;;  %v3235_v1 = vld [vmem:[%s4563_s3 + $0x210] ss:$24 sps:$4 sm:$0xff]   ;;  %v3239_v4 = vld [vmem:[%s4563_s3 + $0x244] ss:$24 sps:$4 sm:$0xff]   ;;  %v3242_v5 = vld [vmem:[%s4563_s3 + $0x254] ss:$24 sps:$4 sm:$0xff]  }
  0x18   : > { %1216 = vmatpush1.bf16.msra.mxu0 %v3196_v24  ;;  %1135 = vmatprep.subr.bf16.mxu1 %v3197_v25  ;;  %v3793_v47 = vsub.s32 %v459_v45, %v3790_v46  ;;  %v3241_v6 = vld [vmem:[%s4563_s3 + $0x240] ss:$24 sps:$4 sm:$0xff]   ;;  %v3244_v7 = vld [vmem:[%s4563_s3 + $0x250] ss:$24 sps:$4 sm:$0xff]   ;;  %v3245_v8 = vld [vmem:[%s4563_s3 + $0x274] ss:$24 sps:$4 sm:$0xff]  }
  0x19   : > { %1217 = vmatprep.subr.bf16.mxu0 %v3200_v26  ;;  %v3248_v9 = vld [vmem:[%s4563_s3 + $0x284] ss:$24 sps:$4 sm:$0xff]   ;;  %v3247_v10 = vld [vmem:[%s4563_s3 + $0x270] ss:$24 sps:$4 sm:$0xff]   ;;  %v3250_v11 = vld [vmem:[%s4563_s3 + $0x280] ss:$24 sps:$4 sm:$0xff]  }
  0x1a   : > { %v3251_v12 = vld [vmem:[%s4563_s3 + $0x2a4] ss:$24 sps:$4 sm:$0xff]   ;;  %v3254_v13 = vld [vmem:[%s4563_s3 + $0x2b4] ss:$24 sps:$4 sm:$0xff]   ;;  %v3253_v14 = vld [vmem:[%s4563_s3 + $0x2a0] ss:$24 sps:$4 sm:$0xff]  }
  0x1b   : > { %1136 = vmatpush1.bf16.msra.mxu1 %v3199_v27  ;;  %v3256_v15 = vld [vmem:[%s4563_s3 + $0x2b0] ss:$24 sps:$4 sm:$0xff]   ;;  %v3257_v16 = vld [vmem:[%s4563_s3 + $0x2d4] ss:$24 sps:$4 sm:$0xff]   ;;  %v3260_v17 = vld [vmem:[%s4563_s3 + $0x2e4] ss:$24 sps:$4 sm:$0xff]  }
  0x1c   : > { %1218 = vmatpush1.bf16.msra.mxu0 %v3202_v28  ;;  %1137 = vmatprep.subr.bf16.mxu1 %v3203_v29  ;;  %v3259_v18 = vld [vmem:[%s4563_s3 + $0x2d0] ss:$24 sps:$4 sm:$0xff]   ;;  %v3262_v19 = vld [vmem:[%s4563_s3 + $0x2e0] ss:$24 sps:$4 sm:$0xff]   ;;  %v3265_v20 = vld [vmem:[%s4563_s3 + $0xc] ss:$24 sps:$4 sm:$0xff]  }
  0x1d   : > { %1219 = vmatprep.subr.bf16.mxu0 %v3206_v30  ;;  %v3888_v24 = vsub.s32 0, %v3790_v46  ;;  %v3891_v25 = vsub.s32 1, %v3790_v46  ;;  %v443_v26 = vld [vmem:[%s4561_s1] sm:$0x3]  ;;  %v3268_v43 = vld [vmem:[%s4563_s3 + $0x3c] ss:$24 sps:$4 sm:$0xff]  }
  0x1e   : > { %v444_v27 = vld [vmem:[%s4562_s2] sm:$0x3]  ;;  %v3266_v44 = vld [vmem:[%s4563_s3 + $0x38] ss:$24 sps:$4 sm:$0xff]   ;;  %v3271_v45 = vld [vmem:[%s4563_s3 + $0x6c] ss:$24 sps:$4 sm:$0xff]  }
  0x1f   : > { %1138 = vmatpush1.bf16.msra.mxu1 %v3205_v31  ;;  %v492_v28 = vrot.slane %v443_v26, %v3888_v24  ;;  %v496_v29 = vrot.slane %v443_v26, %v3891_v25  ;;  %v504_v30 = vrot.slane %v444_v27, %v3888_v24  ;;  %v508_v31 = vrot.slane %v444_v27, %v3891_v25 }
  0x20   : > { %1220 = vmatpush1.bf16.msra.mxu0 %v3208_v32  ;;  %1139 = vmatprep.subr.bf16.mxu1 %v3209_v33  ;;  %v637_v26 = vsub.s32 5, %v3790_v46 }
  0x21   : > { %1221 = vmatprep.subr.bf16.mxu0 %v3212_v34  ;;  %v497_v34 = vcombine.low %v492_v28, %v496_v29 }
  0x23   : > { %1140 = vmatpush1.bf16.msra.mxu1 %v3211_v35 }
  0x24   : > { %1222 = vmatpush1.bf16.msra.mxu0 %v3214_v36  ;;  %1141 = vmatprep.subr.bf16.mxu1 %v3215_v37  ;;  %v509_v36 = vcombine.low %v504_v30, %v508_v31 }
  0x25   : > { %1223 = vmatprep.subr.bf16.mxu0 %v3218_v38 }
  0x27   : > { %1142 = vmatpush1.bf16.msra.mxu1 %v3217_v39 }
  0x28   : > { %1224 = vmatpush1.bf16.msra.mxu0 %v3220_v40  ;;  %1143 = vmatprep.subr.bf16.mxu1 %v3221_v41  ;;  %v3263_v41 = vld [vmem:[%s4563_s3 + $0x8] ss:$24 sps:$4 sm:$0xff]  }
  0x29   : > { %1225 = vmatprep.subr.bf16.mxu0 %v3224_v58  ;;  %v3284_v58 = vld [vmem:[%s4563_s3 + $0x158] ss:$24 sps:$4 sm:$0xff]  }
  0x2b   : > { %1144 = vmatpush1.bf16.msra.mxu1 %v3223_v57  ;;  %v3286_v57 = vld [vmem:[%s4563_s3 + $0x15c] ss:$24 sps:$4 sm:$0xff]  }
  0x2c   : > { %1226 = vmatpush1.bf16.msra.mxu0 %v3226_v59  ;;  %1145 = vmatprep.subr.bf16.mxu1 %v3227_v60  ;;  %v3289_v59 = vld [vmem:[%s4563_s3 + $0x18c] ss:$24 sps:$4 sm:$0xff]   ;;  %v3287_v60 = vld [vmem:[%s4563_s3 + $0x188] ss:$24 sps:$4 sm:$0xff]  }
  0x2d   : > { %1227 = vmatprep.subr.bf16.mxu0 %v3230_v62  ;;  %v3290_v62 = vld [vmem:[%s4563_s3 + $0x1b8] ss:$24 sps:$4 sm:$0xff]  }
  0x2f   : > { %1146 = vmatpush1.bf16.msra.mxu1 %v3229_v61  ;;  %v3292_v61 = vld [vmem:[%s4563_s3 + $0x1bc] ss:$24 sps:$4 sm:$0xff]  }
  0x30   : > { %1228 = vmatpush1.bf16.msra.mxu0 %v3232_v63  ;;  %v3295_v63 = vld [vmem:[%s4563_s3 + $0x1ec] ss:$24 sps:$4 sm:$0xff]  }
  0x31   : > { %1229 = vmatprep.subr.bf16.mxu0 %v3236_v2  ;;  %v3296_v2 = vld [vmem:[%s4563_s3 + $0x218] ss:$24 sps:$4 sm:$0xff]  }
  0x34   : > { %1230 = vmatpush1.bf16.msra.mxu0 %v3238_v3  ;;  %v3301_v3 = vld [vmem:[%s4563_s3 + $0x24c] ss:$24 sps:$4 sm:$0xff]  }
  0x35   : > { %1231 = vmatprep.subr.bf16.mxu0 %v3242_v5  ;;  %v3304_v5 = vld [vmem:[%s4563_s3 + $0x27c] ss:$24 sps:$4 sm:$0xff]  }
  0x38   : > { %1232 = vmatpush1.bf16.msra.mxu0 %v3244_v7  ;;  %v3307_v7 = vld [vmem:[%s4563_s3 + $0x2ac] ss:$24 sps:$4 sm:$0xff]  }
  0x39   : > { %1233 = vmatprep.subr.bf16.mxu0 %v3248_v9  ;;  %v3310_v9 = vld [vmem:[%s4563_s3 + $0x2dc] ss:$24 sps:$4 sm:$0xff]  }
  0x3c   : > { %1234 = vmatpush1.bf16.msra.mxu0 %v3250_v11  ;;  %v3581_v11 = vmov 0.0  }
  0x3d   : > { %1235 = vmatprep.subr.bf16.mxu0 %v3254_v13 }
  0x40   : > { %1236 = vmatpush1.bf16.msra.mxu0 %v3256_v15 }
  0x41   : > { %1237 = vmatprep.subr.bf16.mxu0 %v3260_v17 }
  0x44   : > { %1238 = vmatpush1.bf16.msra.mxu0 %v3262_v19 }
  0x45   : > { %3127 = vmatprep.subr.bf16.mxu0 %v3581_v11 }
  0xa3   : > { %v453_v48 = vpop.xlane.xlu0 %452 }
  0xa4   : > { %v455_v49 = vmul.f32 0.00390625, %v453_v48  ;;  %v3269_v48 = vld [vmem:[%s4563_s3 + $0x68] ss:$24 sps:$4 sm:$0xff]  }
  0xa6   : > { %v463_v50 = vrot.slane %v455_v49, %v3793_v47  ;;  %v3274_v49 = vld [vmem:[%s4563_s3 + $0x9c] ss:$24 sps:$4 sm:$0xff]  }
  0xa8   : > { %v3797_v51 = vsub.f32 %v3672_v0, %v463_v50  ;;  %v3233_v0 = vld [vmem:[%s4563_s3 + $0x214] ss:$24 sps:$4 sm:$0xff]   ;;  %v3272_v50 = vld [vmem:[%s4563_s3 + $0x98] ss:$24 sps:$4 sm:$0xff]  }
  0xa9   : > { %1147 = vmatprep.subr.bf16.mxu1 %v3233_v0  ;;  %v3293_v0 = vld [vmem:[%s4563_s3 + $0x1e8] ss:$24 sps:$4 sm:$0xff]  }
  0xaa   : > { %v466_v52 = vmul.f32 %v3797_v51, %v3797_v51  ;;  %1148 = vmatpush1.bf16.msra.mxu1 %v3235_v1  ;;  %v3298_v1 = vld [vmem:[%s4563_s3 + $0x21c] ss:$24 sps:$4 sm:$0xff]  }
  0xab   : > { %1149 = vmatprep.subr.bf16.mxu1 %v3239_v4  ;;  %v3299_v4 = vld [vmem:[%s4563_s3 + $0x248] ss:$24 sps:$4 sm:$0xff]  }
  0xac   : > { %v468_v53 = vcombine.high %v466_v52, %v466_v52  ;;  %v470_v54 = vsel %vm448_vm0, %v466_v52, 0.0  ;;  %v3275_v52 = vld [vmem:[%s4563_s3 + $0xc8] ss:$24 sps:$4 sm:$0xff]  }
  0xae   : > { %v471_v55 = vsel %vm448_vm0, %v468_v53, 0.0  ;;  %1150 = vmatpush1.bf16.msra.mxu1 %v3241_v6  ;;  %v3280_v53 = vld [vmem:[%s4563_s3 + $0xfc] ss:$24 sps:$4 sm:$0xff]   ;;  %v3302_v6 = vld [vmem:[%s4563_s3 + $0x278] ss:$24 sps:$4 sm:$0xff]  }
  0xaf   : > { %v472_v56 = vadd.f32 %v471_v55, %v470_v54  ;;  %1151 = vmatprep.subr.bf16.mxu1 %v3245_v8  ;;  %v3278_v54 = vld [vmem:[%s4563_s3 + $0xf8] ss:$24 sps:$4 sm:$0xff]   ;;  %v3283_v55 = vld [vmem:[%s4563_s3 + $0x12c] ss:$24 sps:$4 sm:$0xff]   ;;  %v3305_v8 = vld [vmem:[%s4563_s3 + $0x2a8] ss:$24 sps:$4 sm:$0xff]  }
  0xb1   : > { %473 = vadd.xlane.f32.xlu0 %v472_v56  ;;  %v3281_v56 = vld [vmem:[%s4563_s3 + $0x128] ss:$24 sps:$4 sm:$0xff]  }
  0xb2   : > { %1152 = vmatpush1.bf16.msra.mxu1 %v3247_v10  ;;  %v3308_v10 = vld [vmem:[%s4563_s3 + $0x2d8] ss:$24 sps:$4 sm:$0xff]  }
  0xb3   : > { %1153 = vmatprep.subr.bf16.mxu1 %v3251_v12 }
  0xb6   : > { %1154 = vmatpush1.bf16.msra.mxu1 %v3253_v14 }
  0xb7   : > { %1155 = vmatprep.subr.bf16.mxu1 %v3257_v16 }
  0xba   : > { %1156 = vmatpush1.bf16.msra.mxu1 %v3259_v18 }
  0xbb   : > { %1166 = vmatprep.subr.bf16.mxu1 %v3265_v20  ;;  %v625_v20 = vsub.s32 2, %v3790_v46 }
 0x13e   : > { %v474_v21 = vpop.xlane.xlu0 %473 }
 0x13f   : > { %v475_v22 = vmul.f32 0.00390625, %v474_v21  ;;  %v629_v21 = vsub.s32 3, %v3790_v46 }
 0x141   : > { %v476_v23 = vadd.f32 1e-05, %v475_v22  ;;  %v613_v22 = vld [vmem:[%s4564_s4] sm:$0x3f] }
 0x142   : > { %v626_v27 = vrot.slane %v613_v22, %v625_v20  ;;  %v630_v28 = vrot.slane %v613_v22, %v629_v21  ;;  %v638_v31 = vrot.slane %v613_v22, %v637_v26 }
 0x143   : > { %3551 = vrsqrt.f32 %v476_v23  ;;  %v633_v23 = vsub.s32 4, %v3790_v46  ;;  %v3520_v46 = vld [vmem:[%s4571_s11 + $0x154] ss:$8 sps:$4 sm:$0xff]  }
 0x145   : > { %v634_v29 = vrot.slane %v613_v22, %v633_v23  ;;  %v3314_v23 = vld [vmem:[%s4565_s5 + $0x10] ss:$8 sps:$4 sm:$0xff]  }
 0x14d   : > { %v3552_v32 = vpop.eup %3551 }
 0x14e   : > { %v485_v33 = vrot.slane %v3552_v32, %v3793_v47 }
 0x150   : > { %v487_v35 = vmul.f32 %v485_v33, %v3797_v51  ;;  %v3277_v51 = vld [vmem:[%s4563_s3 + $0xcc] ss:$24 sps:$4 sm:$0xff]  }
 0x152   : > { %v499_v37 = vmul.f32 %v497_v34, %v487_v35  ;;  %v618_v34 = vrot.slane %v613_v22, %v3888_v24 }
 0x154   : > { %v511_v38 = vadd.f32 %v509_v36, %v499_v37  ;;  %v622_v37 = vrot.slane %v613_v22, %v3891_v25 }
 0x156   : > { %v513_v39 = vcombine.high %v511_v38, %v511_v38  ;;  %v3908_v42 = vpack.c.bf16 %v511_v38, %v511_v38 }
 0x158   : > { %v516_v40 = vpack.c.bf16 %v513_v39, %v513_v39 }
 0x15a   : > { %1157 = vmatprep.mubr.bf16.mxu1 %v516_v40  ;;  %1239 = vmatprep.mubr.bf16.mxu0 %v516_v40 }
 0x15b   : > { %1158 = vmatmul.mubr.bf16.vlgmr.msra.gmra.mrb[0].mxu1 %v3908_v42  ;;  %1240 = vmatmul.mubr.bf16.vlgmr.msra.gmra.mrb[0].mxu0 %v3908_v42 }
 0x15c   : > { %1167 = vmatpush1.bf16.msra.mxu1 %v3263_v41  ;;  %1198 = vmatprep.mubr.bf16.mxu1 %v516_v40 }
 0x15d   : > { %1168 = vmatprep.subr.bf16.mxu1 %v3268_v43  ;;  %3129 = vmatprep.mubr.msk.bf16.mxu0 %vm3582_vm1, %v3581_v11 }
 0x160   : > { %1169 = vmatpush1.bf16.msra.mxu1 %v3266_v44 }
 0x161   : > { %1170 = vmatprep.subr.bf16.mxu1 %v3271_v45 }
 0x164   : > { %1171 = vmatpush1.bf16.msra.mxu1 %v3269_v48 }
 0x165   : > { %1172 = vmatprep.subr.bf16.mxu1 %v3274_v49 }
 0x168   : > { %1173 = vmatpush1.bf16.msra.mxu1 %v3272_v50 }
 0x169   : > { %1174 = vmatprep.subr.bf16.mxu1 %v3277_v51 }
 0x16c   : > { %1175 = vmatpush1.bf16.msra.mxu1 %v3275_v52 }
 0x16d   : > { %1176 = vmatprep.subr.bf16.mxu1 %v3280_v53 }
 0x170   : > { %1177 = vmatpush1.bf16.msra.mxu1 %v3278_v54 }
 0x171   : > { %1178 = vmatprep.subr.bf16.mxu1 %v3283_v55 }
 0x174   : > { %1179 = vmatpush1.bf16.msra.mxu1 %v3281_v56 }
 0x175   : > { %1180 = vmatprep.subr.bf16.mxu1 %v3286_v57 }
 0x178   : > { %1181 = vmatpush1.bf16.msra.mxu1 %v3284_v58 }
 0x179   : > { %1182 = vmatprep.subr.bf16.mxu1 %v3289_v59 }
 0x17c   : > { %1183 = vmatpush1.bf16.msra.mxu1 %v3287_v60 }
 0x17d   : > { %1184 = vmatprep.subr.bf16.mxu1 %v3292_v61 }
 0x180   : > { %1185 = vmatpush1.bf16.msra.mxu1 %v3290_v62 }
 0x181   : > { %1186 = vmatprep.subr.bf16.mxu1 %v3295_v63 }
 0x184   : > { %1187 = vmatpush1.bf16.msra.mxu1 %v3293_v0 }
 0x185   : > { %1188 = vmatprep.subr.bf16.mxu1 %v3298_v1 }
 0x188   : > { %1189 = vmatpush1.bf16.msra.mxu1 %v3296_v2 }
 0x189   : > { %1190 = vmatprep.subr.bf16.mxu1 %v3301_v3 }
 0x18c   : > { %1191 = vmatpush1.bf16.msra.mxu1 %v3299_v4 }
 0x18d   : > { %1192 = vmatprep.subr.bf16.mxu1 %v3304_v5 }
 0x190   : > { %1193 = vmatpush1.bf16.msra.mxu1 %v3302_v6 }
 0x191   : > { %1194 = vmatprep.subr.bf16.mxu1 %v3307_v7 }
 0x194   : > { %1195 = vmatpush1.bf16.msra.mxu1 %v3305_v8 }
 0x195   : > { %1196 = vmatprep.subr.bf16.mxu1 %v3310_v9 }
 0x198   : > { %1197 = vmatpush1.bf16.msra.mxu1 %v3308_v10 }
 0x199   : > { %3139 = vmatprep.subr.bf16.mxu1 %v3581_v11 }
 0x19b   : > { %1199 = vmatmul.mubr.bf16.vlgmr.msra.gmra.mrb[4].mxu1 %v3908_v42 }
 0x19c   : > { %3141 = vmatprep.mubr.msk.bf16.mxu1 %vm3582_vm1, %v3581_v11 }
 0x22e   : > { %v1159_v12 = vpop.f32.mrb[0].mxu1  ;;  %v1241_v13 = vpop.f32.mrb[0].mxu0 }
 0x22f   : > { %v1161_v14 = vpop.f32.mrb[1].mxu1  ;;  %v1243_v15 = vpop.f32.mrb[1].mxu0  ;;  %v1242_v40 = vadd.f32 %v1241_v13, %v634_v29  ;;  %v1160_v43 = vadd.f32 %v1159_v12, %v618_v34  ;;  %v3322_v29 = vld [vmem:[%s4565_s5 + $0x34] ss:$8 sps:$4 sm:$0xff]   ;;  %v3326_v34 = vld [vmem:[%s4565_s5 + $0x50] ss:$8 sps:$4 sm:$0xff]  }
 0x230   : > { %v1163_v16 = vpop.f32.mrb[2].mxu1  ;;  %v1245_v17 = vpop.f32.mrb[2].mxu0  ;;  %v1244_v42 = vadd.f32 %v1243_v15, %v638_v31  ;;  %v1162_v44 = vadd.f32 %v1161_v14, %v622_v37  ;;  %v3325_v31 = vld [vmem:[%s4565_s5 + $0x44] ss:$8 sps:$4 sm:$0xff]   ;;  %v3334_v37 = vld [vmem:[%s4565_s5 + $0x74] ss:$8 sps:$4 sm:$0xff]  }
 0x231   : > { %v1164_v18 = vpop.f32.mrb[3].mxu1  ;;  %v1246_v19 = vpop.f32.mrb[3].mxu0  ;;  %v1304_v45 = vpack.c.bf16 %v1242_v40, %v1242_v40  ;;  %v1248_v49 = vpack.c.bf16 %v1160_v43, %v1160_v43  ;;  %v3311_v16 = vld [vmem:[%s4565_s5] ss:$8 sps:$4 sm:$0xff]   ;;  %v3343_v43 = vld [vmem:[%s4565_s5 + $0xa4] ss:$8 sps:$4 sm:$0xff]  }
 0x232   : > { %v1408_v48 = vpack.c.bf16 %v1244_v42, %v1244_v42  ;;  %v1353_v50 = vpack.c.bf16 %v1162_v44, %v1162_v44  ;;  %v3316_v18 = vld [vmem:[%s4565_s5 + $0x14] ss:$8 sps:$4 sm:$0xff]   ;;  %v3335_v40 = vld [vmem:[%s4565_s5 + $0x80] ss:$8 sps:$4 sm:$0xff]   ;;  %v3338_v42 = vld [vmem:[%s4565_s5 + $0x90] ss:$8 sps:$4 sm:$0xff]  }
 0x233   : > { %v1311_v51 = vsel %vm1309_vm2, %v1304_v45, 0  ;;  %v3341_v44 = vld [vmem:[%s4565_s5 + $0xa0] ss:$8 sps:$4 sm:$0xff]   ;;  %v3346_v45 = vld [vmem:[%s4565_s5 + $0xb4] ss:$8 sps:$4 sm:$0xff]  }
 0x234   : > { %v1413_v52 = vsel %vm1309_vm2, %v1408_v48, 0  ;;  %v3344_v48 = vld [vmem:[%s4565_s5 + $0xb0] ss:$8 sps:$4 sm:$0xff]  }
 0x26e   : > { %v1200_v30 = vpop.f32.mrb[4].mxu1 }
 0x26f   : > { %v1201_v32 = vadd.f32 %v1200_v30, %v626_v27  ;;  %v1202_v33 = vpop.f32.mrb[5].mxu1  ;;  %v3319_v27 = vld [vmem:[%s4565_s5 + $0x24] ss:$8 sps:$4 sm:$0xff]   ;;  %v3320_v30 = vld [vmem:[%s4565_s5 + $0x30] ss:$8 sps:$4 sm:$0xff]  }
 0x270   : > { %v1203_v35 = vadd.f32 %v1202_v33, %v630_v28  ;;  %v1204_v36 = vpop.f32.mrb[6].mxu1  ;;  %v3317_v28 = vld [vmem:[%s4565_s5 + $0x20] ss:$8 sps:$4 sm:$0xff]   ;;  %v3328_v33 = vld [vmem:[%s4565_s5 + $0x54] ss:$8 sps:$4 sm:$0xff]  }
 0x271   : > { %v1249_v38 = vpack.c.bf16 %v1201_v32, %v1201_v32  ;;  %v1205_v39 = vpop.f32.mrb[7].mxu1  ;;  %v3323_v32 = vld [vmem:[%s4565_s5 + $0x40] ss:$8 sps:$4 sm:$0xff]  }
 0x272   : > { %v1354_v41 = vpack.c.bf16 %v1203_v35, %v1203_v35  ;;  %v3331_v35 = vld [vmem:[%s4565_s5 + $0x64] ss:$8 sps:$4 sm:$0xff]   ;;  %v3329_v36 = vld [vmem:[%s4565_s5 + $0x60] ss:$8 sps:$4 sm:$0xff]  }
 0x273   : > { %3128 = vmatpush3.bf16.xpose.msra.mxu0 %v1249_v38  ;;  %v3332_v38 = vld [vmem:[%s4565_s5 + $0x70] ss:$8 sps:$4 sm:$0xff]   ;;  %v3337_v39 = vld [vmem:[%s4565_s5 + $0x84] ss:$8 sps:$4 sm:$0xff]  }
 0x274   : > { %3140 = vmatpush3.bf16.xpose.msra.mxu1 %v1354_v41  ;;  %3133 = vmatprep.subr.bf16.mxu0 %v3581_v11  ;;  %v3340_v41 = vld [vmem:[%s4565_s5 + $0x94] ss:$8 sps:$4 sm:$0xff]  }
 0x275   : > { %3145 = vmatprep.subr.bf16.mxu1 %v3581_v11 }
 0x27a   : > { %3130 = vmatmul.mubr.bf16.vlgmr.msra.gmra.mrb[4].mxu0 %v1248_v49  ;;  %v3349_v49 = vld [vmem:[%s4565_s5 + $0xc4] ss:$8 sps:$4 sm:$0xff]  }
 0x27b   : > { %3134 = vmatpush3.bf16.msra.mxu0 %v1311_v51  ;;  %3142 = vmatmul.mubr.bf16.vlgmr.msra.gmra.mrb[8].mxu1 %v1353_v50  ;;  %v3347_v50 = vld [vmem:[%s4565_s5 + $0xc0] ss:$8 sps:$4 sm:$0xff]   ;;  %v3352_v51 = vld [vmem:[%s4565_s5 + $0xd4] ss:$8 sps:$4 sm:$0xff]  }
 0x27c   : > { %3146 = vmatpush3.bf16.msra.mxu1 %v1413_v52  ;;  %3147 = vmatprep.mubr.msk.bf16.mxu1 %vm3582_vm1, %v3581_v11  ;;  %v3350_v52 = vld [vmem:[%s4565_s5 + $0xd0] ss:$8 sps:$4 sm:$0xff]  }
 0x27d   : > { %3135 = vmatprep.mubr.msk.bf16.mxu0 %vm3582_vm1, %v3581_v11  ;;  %v3313_v11 = vld [vmem:[%s4565_s5 + $0x4] ss:$8 sps:$4 sm:$0xff]  }
 0x27e   : > { %1649 = vmatprep.subr.bf16.mxu1 %v3313_v11 }
 0x34d   : > { %v1284_v53 = vpop.f32.mrb[4].mxu0 }
 0x34e   : > { %v3131_v54 = vpop.f32.mrb[5].mxu0  ;;  %v1389_v55 = vpop.f32.mrb[8].mxu1  ;;  %v1290_v61 = vmul.f32 0.088388346, %v1284_v53  ;;  %v3355_v53 = vld [vmem:[%s4565_s5 + $0xe4] ss:$8 sps:$4 sm:$0xff]  }
 0x34f   : > { %v1395_v56 = vmul.f32 0.088388346, %v1389_v55  ;;  %v1287_v57 = vpop.f32.mrb[6].mxu0  ;;  %v3143_v58 = vpop.f32.mrb[9].mxu1  ;;  %v3353_v54 = vld [vmem:[%s4565_s5 + $0xe0] ss:$8 sps:$4 sm:$0xff]  }
 0x350   : > { %v3132_v59 = vpop.f32.mrb[7].mxu0  ;;  %v1392_v60 = vpop.f32.mrb[10].mxu1  ;;  %v1292_v0 = vsel %vm1291_vm3, %v1290_v61, -inf  ;;  %v3358_v55 = vld [vmem:[%s4565_s5 + $0xf4] ss:$8 sps:$4 sm:$0xff]  }
 0x351   : > { %v3144_v62 = vpop.f32.mrb[11].mxu1  ;;  %v1396_v63 = vsel %vm1291_vm3, %v1395_v56, -inf }
 0x352   : > { %1397 = vmax.xlane.f32.xlu1 %v1396_v63 }
 0x356   : > { %1293 = vmax.xlane.f32.xlu1 %v1292_v0 }
 0x3df   : > { %v1398_v1 = vpop.xlane.xlu1 %1397 }
 0x3e0   : > { %v1399_v2 = vsub.f32 %v1395_v56, %v1398_v1  ;;  %v3356_v56 = vld [vmem:[%s4565_s5 + $0xf0] ss:$8 sps:$4 sm:$0xff]  }
 0x3e2   : > { %v1400_v3 = vmul.f32 1.442695, %v1399_v2 }
 0x3e3   : > { %v1294_v4 = vpop.xlane.xlu1 %1293 }
 0x3e4   : > { %3553 = vpow2.f32 %v1400_v3  ;;  %v1295_v5 = vsub.f32 %v1290_v61, %v1294_v4  ;;  %v1695_v3 = vld [vmem:[%s4566_s6] sm:$0x3] }
 0x3e5   : > { %v1700_v4 = vrot.slane %v1695_v3, %v3888_v24 }
 0x3e6   : > { %v1296_v6 = vmul.f32 1.442695, %v1295_v5  ;;  %v1704_v5 = vrot.slane %v1695_v3, %v3891_v25 }
 0x3e8   : > { %3555 = vpow2.f32 %v1296_v6 }
 0x3ee   : > { %v3554_v7 = vpop.eup %3553 }
 0x3ef   : > { %v1402_v8 = vsel %vm1291_vm3, %v3554_v7, 0.0 }
 0x3f0   : > { %1403 = vadd.xlane.f32.xlu0 %v1402_v8 }
 0x3f2   : > { %v3556_v9 = vpop.eup %3555 }
 0x3f3   : > { %v1298_v10 = vsel %vm1291_vm3, %v3556_v9, 0.0 }
 0x3f4   : > { %1299 = vadd.xlane.f32.xlu1 %v1298_v10 }
 0x47d   : > { %v1404_v12 = vpop.xlane.xlu0 %1403 }
 0x47e   : > { %3557 = vrcp.f32 %v1404_v12  ;;  %v3571_v12 = vld [vmem:[%s3669_s30] sm:$0xff] }
 0x481   : > { %v1300_v13 = vpop.xlane.xlu1 %1299 }
 0x482   : > { %3559 = vrcp.f32 %v1300_v13 }
 0x488   : > { %v3558_v14 = vpop.eup %3557 }
 0x489   : > { %v1406_v15 = vmul.f32 %v3558_v14, %v3554_v7 }
 0x48b   : > { %v1407_v17 = vpack.c.bf16 %v1406_v15, %v1406_v15 }
 0x48c   : > { %v3560_v19 = vpop.eup %3559 }
 0x48d   : > { %v1302_v22 = vmul.f32 %v3560_v19, %v3556_v9  ;;  %3148 = vmatmul.mubr.msk.bf16.vlgmr.msra.gmra.mrb[12].mxu1 %vm1305_vm4, %v1407_v17  ;;  %v1705_v9 = vcombine.low %v1700_v4, %v1704_v5  ;;  %v3359_v19 = vld [vmem:[%s4569_s9] ss:$16 sps:$4 sm:$0xff]  }
 0x48e   : > { %1650 = vmatpush1.bf16.msra.mxu1 %v3311_v16 }
 0x48f   : > { %v1303_v26 = vpack.c.bf16 %v1302_v22, %v1302_v22  ;;  %1651 = vmatprep.subr.bf16.mxu1 %v3316_v18  ;;  %v3361_v22 = vld [vmem:[%s4569_s9 + $0x4] ss:$16 sps:$4 sm:$0xff]  }
 0x490   : > { %2186 = vmatprep.subr.bf16.mxu0 %v3361_v22  ;;  %v3436_v22 = vld [vmem:[%s4569_s9 + $0x18c] ss:$16 sps:$4 sm:$0xff]  }
 0x491   : > { %3136 = vmatmul.mubr.msk.bf16.vlgmr.msra.gmra.mrb[8].mxu0 %vm1305_vm4, %v1303_v26  ;;  %v3364_v26 = vld [vmem:[%s4569_s9 + $0xc] ss:$16 sps:$4 sm:$0xff]  }
 0x492   : > { %1652 = vmatpush1.bf16.msra.mxu1 %v3314_v23  ;;  %v3362_v23 = vld [vmem:[%s4569_s9 + $0x8] ss:$16 sps:$4 sm:$0xff]   ;;  %2187 = vmatpush1.bf16.msra.mxu0 %v3359_v19  ;;  %v3433_v19 = vld [vmem:[%s4569_s9 + $0x184] ss:$16 sps:$4 sm:$0xff]  }
 0x493   : > { %1653 = vmatprep.subr.bf16.mxu1 %v3319_v27  ;;  %v3367_v27 = vld [vmem:[%s4569_s9 + $0x24] ss:$16 sps:$4 sm:$0xff]  }
 0x494   : > { %2188 = vmatprep.subr.bf16.mxu0 %v3367_v27  ;;  %v3439_v27 = vld [vmem:[%s4569_s9 + $0x1a4] ss:$16 sps:$4 sm:$0xff]  }
 0x496   : > { %1654 = vmatpush1.bf16.msra.mxu1 %v3317_v28  ;;  %v3370_v28 = vld [vmem:[%s4569_s9 + $0x2c] ss:$16 sps:$4 sm:$0xff]  }
 0x497   : > { %1655 = vmatprep.subr.bf16.mxu1 %v3322_v29  ;;  %v3365_v29 = vld [vmem:[%s4569_s9 + $0x20] ss:$16 sps:$4 sm:$0xff]  }
 0x498   : > { %2189 = vmatpush1.bf16.msra.mxu0 %v3365_v29  ;;  %v3437_v29 = vld [vmem:[%s4569_s9 + $0x1a0] ss:$16 sps:$4 sm:$0xff]  }
 0x49a   : > { %1656 = vmatpush1.bf16.msra.mxu1 %v3320_v30  ;;  %v3368_v30 = vld [vmem:[%s4569_s9 + $0x28] ss:$16 sps:$4 sm:$0xff]  }
 0x49b   : > { %1657 = vmatprep.subr.bf16.mxu1 %v3325_v31  ;;  %v3373_v31 = vld [vmem:[%s4569_s9 + $0x44] ss:$16 sps:$4 sm:$0xff]  }
 0x49c   : > { %2190 = vmatprep.subr.bf16.mxu0 %v3373_v31  ;;  %v3445_v31 = vld [vmem:[%s4569_s9 + $0x1c4] ss:$16 sps:$4 sm:$0xff]  }
 0x49e   : > { %1658 = vmatpush1.bf16.msra.mxu1 %v3323_v32  ;;  %v3376_v32 = vld [vmem:[%s4569_s9 + $0x4c] ss:$16 sps:$4 sm:$0xff]  }
 0x49f   : > { %1659 = vmatprep.subr.bf16.mxu1 %v3328_v33  ;;  %v3371_v33 = vld [vmem:[%s4569_s9 + $0x40] ss:$16 sps:$4 sm:$0xff]  }
 0x4a0   : > { %2191 = vmatpush1.bf16.msra.mxu0 %v3371_v33  ;;  %v3443_v33 = vld [vmem:[%s4569_s9 + $0x1c0] ss:$16 sps:$4 sm:$0xff]  }
 0x4a2   : > { %1660 = vmatpush1.bf16.msra.mxu1 %v3326_v34  ;;  %v3374_v34 = vld [vmem:[%s4569_s9 + $0x48] ss:$16 sps:$4 sm:$0xff]  }
 0x4a3   : > { %1661 = vmatprep.subr.bf16.mxu1 %v3331_v35  ;;  %v3379_v35 = vld [vmem:[%s4569_s9 + $0x64] ss:$16 sps:$4 sm:$0xff]  }
 0x4a4   : > { %2192 = vmatprep.subr.bf16.mxu0 %v3379_v35  ;;  %v3451_v35 = vld [vmem:[%s4569_s9 + $0x1e4] ss:$16 sps:$4 sm:$0xff]  }
 0x4a6   : > { %1662 = vmatpush1.bf16.msra.mxu1 %v3329_v36  ;;  %v3382_v36 = vld [vmem:[%s4569_s9 + $0x6c] ss:$16 sps:$4 sm:$0xff]  }
 0x4a7   : > { %1663 = vmatprep.subr.bf16.mxu1 %v3334_v37  ;;  %v3377_v37 = vld [vmem:[%s4569_s9 + $0x60] ss:$16 sps:$4 sm:$0xff]  }
 0x4a8   : > { %2193 = vmatpush1.bf16.msra.mxu0 %v3377_v37  ;;  %v3449_v37 = vld [vmem:[%s4569_s9 + $0x1e0] ss:$16 sps:$4 sm:$0xff]  }
 0x4aa   : > { %1664 = vmatpush1.bf16.msra.mxu1 %v3332_v38  ;;  %v3380_v38 = vld [vmem:[%s4569_s9 + $0x68] ss:$16 sps:$4 sm:$0xff]  }
 0x4ab   : > { %1665 = vmatprep.subr.bf16.mxu1 %v3337_v39  ;;  %v3385_v39 = vld [vmem:[%s4569_s9 + $0x84] ss:$16 sps:$4 sm:$0xff]  }
 0x4ac   : > { %2194 = vmatprep.subr.bf16.mxu0 %v3385_v39  ;;  %v3457_v39 = vld [vmem:[%s4571_s11 + $0x4] ss:$8 sps:$4 sm:$0xff]  }
 0x4ae   : > { %1666 = vmatpush1.bf16.msra.mxu1 %v3335_v40  ;;  %v3388_v40 = vld [vmem:[%s4569_s9 + $0x8c] ss:$16 sps:$4 sm:$0xff]  }
 0x4af   : > { %1667 = vmatprep.subr.bf16.mxu1 %v3340_v41  ;;  %v3383_v41 = vld [vmem:[%s4569_s9 + $0x80] ss:$16 sps:$4 sm:$0xff]  }
 0x4b0   : > { %2195 = vmatpush1.bf16.msra.mxu0 %v3383_v41 }
 0x4b2   : > { %1668 = vmatpush1.bf16.msra.mxu1 %v3338_v42  ;;  %v3386_v42 = vld [vmem:[%s4569_s9 + $0x88] ss:$16 sps:$4 sm:$0xff]  }
 0x4b3   : > { %1669 = vmatprep.subr.bf16.mxu1 %v3343_v43  ;;  %v3391_v43 = vld [vmem:[%s4569_s9 + $0xa4] ss:$16 sps:$4 sm:$0xff]  }
 0x4b4   : > { %2196 = vmatprep.subr.bf16.mxu0 %v3391_v43  ;;  %v1708_v43 = vld [vmem:[%s4567_s7] sm:$0x3] }
 0x4b6   : > { %1670 = vmatpush1.bf16.msra.mxu1 %v3341_v44  ;;  %v3394_v44 = vld [vmem:[%s4569_s9 + $0xac] ss:$16 sps:$4 sm:$0xff]  }
 0x4b7   : > { %1671 = vmatprep.subr.bf16.mxu1 %v3346_v45  ;;  %v3389_v45 = vld [vmem:[%s4569_s9 + $0xa0] ss:$16 sps:$4 sm:$0xff]  }
 0x4b8   : > { %2197 = vmatpush1.bf16.msra.mxu0 %v3389_v45  ;;  %v1755_v45 = vrot.slane %v1708_v43, %v3888_v24 }
 0x4ba   : > { %1672 = vmatpush1.bf16.msra.mxu1 %v3344_v48  ;;  %v3392_v48 = vld [vmem:[%s4569_s9 + $0xa8] ss:$16 sps:$4 sm:$0xff]  }
 0x4bb   : > { %1673 = vmatprep.subr.bf16.mxu1 %v3349_v49  ;;  %v3397_v49 = vld [vmem:[%s4569_s9 + $0xc4] ss:$16 sps:$4 sm:$0xff]  }
 0x4bc   : > { %2198 = vmatprep.subr.bf16.mxu0 %v3397_v49 }
 0x4be   : > { %1674 = vmatpush1.bf16.msra.mxu1 %v3347_v50  ;;  %v3400_v50 = vld [vmem:[%s4569_s9 + $0xcc] ss:$16 sps:$4 sm:$0xff]  }
 0x4bf   : > { %1675 = vmatprep.subr.bf16.mxu1 %v3352_v51  ;;  %v3395_v51 = vld [vmem:[%s4569_s9 + $0xc0] ss:$16 sps:$4 sm:$0xff]  }
 0x4c0   : > { %2199 = vmatpush1.bf16.msra.mxu0 %v3395_v51 }
 0x4c2   : > { %1676 = vmatpush1.bf16.msra.mxu1 %v3350_v52  ;;  %v3398_v52 = vld [vmem:[%s4569_s9 + $0xc8] ss:$16 sps:$4 sm:$0xff]  }
 0x4c3   : > { %1677 = vmatprep.subr.bf16.mxu1 %v3355_v53  ;;  %v3403_v53 = vld [vmem:[%s4569_s9 + $0xe4] ss:$16 sps:$4 sm:$0xff]  }
 0x4c4   : > { %2200 = vmatprep.subr.bf16.mxu0 %v3403_v53 }
 0x4c6   : > { %1678 = vmatpush1.bf16.msra.mxu1 %v3353_v54  ;;  %v3406_v54 = vld [vmem:[%s4569_s9 + $0xec] ss:$16 sps:$4 sm:$0xff]  }
 0x4c7   : > { %1679 = vmatprep.subr.bf16.mxu1 %v3358_v55  ;;  %v3401_v55 = vld [vmem:[%s4569_s9 + $0xe0] ss:$16 sps:$4 sm:$0xff]  }
 0x4c8   : > { %2201 = vmatpush1.bf16.msra.mxu0 %v3401_v55 }
 0x4ca   : > { %1680 = vmatpush1.bf16.msra.mxu1 %v3356_v56  ;;  %v3404_v56 = vld [vmem:[%s4569_s9 + $0xe8] ss:$16 sps:$4 sm:$0xff]  }
 0x4cb   : > { %2227 = vmatprep.subr.bf16.mxu1 %v3364_v26  ;;  %v3434_v26 = vld [vmem:[%s4569_s9 + $0x188] ss:$16 sps:$4 sm:$0xff]  }
 0x560   : > { %v1449_v57 = vpop.f32.mrb[12].mxu1 }
 0x561   : > { %v1456_v58 = vpack.c.bf16 %v1449_v57, %v1449_v57  ;;  %v3149_v59 = vpop.f32.mrb[13].mxu1  ;;  %v3409_v57 = vld [vmem:[%s4569_s9 + $0x104] ss:$16 sps:$4 sm:$0xff]  }
 0x562   : > { %v1452_v60 = vpop.f32.mrb[14].mxu1  ;;  %v3407_v59 = vld [vmem:[%s4569_s9 + $0x100] ss:$16 sps:$4 sm:$0xff]   ;;  %2202 = vmatprep.subr.bf16.mxu0 %v3409_v57 }
 0x563   : > { %v3150_v61 = vpop.f32.mrb[15].mxu1  ;;  %1681 = vmatprep.mubr.bf16.mxu1 %v1456_v58  ;;  %v3412_v58 = vld [vmem:[%s4569_s9 + $0x10c] ss:$16 sps:$4 sm:$0xff]   ;;  %v3410_v60 = vld [vmem:[%s4569_s9 + $0x108] ss:$16 sps:$4 sm:$0xff]   ;;  %2203 = vmatpush1.bf16.msra.mxu0 %v3407_v59 }
 0x564   : > { %v1347_v62 = vpop.f32.mrb[8].mxu0 }
 0x565   : > { %v1455_v63 = vpack.c.bf16 %v1347_v62, %v1347_v62  ;;  %v3137_v0 = vpop.f32.mrb[9].mxu0 }
 0x566   : > { %v1350_v1 = vpop.f32.mrb[10].mxu0 }
 0x567   : > { %v3138_v2 = vpop.f32.mrb[11].mxu0  ;;  %1682 = vmatmul.mubr.bf16.vlgmr.msra.gmra.mrb[16].mxu1 %v1455_v63 }
 0x568   : > { %2228 = vmatpush1.bf16.msra.mxu1 %v3362_v23  ;;  %v3431_v23 = vld [vmem:[%s4569_s9 + $0x180] ss:$16 sps:$4 sm:$0xff]  }
 0x569   : > { %2229 = vmatprep.subr.bf16.mxu1 %v3370_v28  ;;  %v3442_v28 = vld [vmem:[%s4569_s9 + $0x1ac] ss:$16 sps:$4 sm:$0xff]  }
 0x56c   : > { %2230 = vmatpush1.bf16.msra.mxu1 %v3368_v30  ;;  %v3440_v30 = vld [vmem:[%s4569_s9 + $0x1a8] ss:$16 sps:$4 sm:$0xff]  }
 0x56d   : > { %2231 = vmatprep.subr.bf16.mxu1 %v3376_v32  ;;  %v3448_v32 = vld [vmem:[%s4569_s9 + $0x1cc] ss:$16 sps:$4 sm:$0xff]  }
 0x570   : > { %2232 = vmatpush1.bf16.msra.mxu1 %v3374_v34  ;;  %v3446_v34 = vld [vmem:[%s4569_s9 + $0x1c8] ss:$16 sps:$4 sm:$0xff]  }
 0x571   : > { %2233 = vmatprep.subr.bf16.mxu1 %v3382_v36  ;;  %v3454_v36 = vld [vmem:[%s4569_s9 + $0x1ec] ss:$16 sps:$4 sm:$0xff]  }
 0x574   : > { %2234 = vmatpush1.bf16.msra.mxu1 %v3380_v38  ;;  %v3452_v38 = vld [vmem:[%s4569_s9 + $0x1e8] ss:$16 sps:$4 sm:$0xff]  }
 0x575   : > { %2235 = vmatprep.subr.bf16.mxu1 %v3388_v40 }
 0x578   : > { %2236 = vmatpush1.bf16.msra.mxu1 %v3386_v42 }
 0x579   : > { %2237 = vmatprep.subr.bf16.mxu1 %v3394_v44  ;;  %v1709_v44 = vld [vmem:[%s4568_s8] sm:$0x3] }
 0x57a   : > { %v1767_v49 = vrot.slane %v1709_v44, %v3888_v24 }
 0x57c   : > { %2238 = vmatpush1.bf16.msra.mxu1 %v3392_v48  ;;  %v1759_v48 = vrot.slane %v1708_v43, %v3891_v25 }
 0x57d   : > { %2239 = vmatprep.subr.bf16.mxu1 %v3400_v50  ;;  %v1771_v50 = vrot.slane %v1709_v44, %v3891_v25 }
 0x57e   : > { %v1760_v53 = vcombine.low %v1755_v45, %v1759_v48 }
 0x57f   : > { %v1772_v55 = vcombine.low %v1767_v49, %v1771_v50 }
 0x580   : > { %2240 = vmatpush1.bf16.msra.mxu1 %v3398_v52 }
 0x581   : > { %2241 = vmatprep.subr.bf16.mxu1 %v3406_v54 }
 0x584   : > { %2242 = vmatpush1.bf16.msra.mxu1 %v3404_v56 }
 0x585   : > { %2243 = vmatprep.subr.bf16.mxu1 %v3412_v58 }
 0x588   : > { %2244 = vmatpush1.bf16.msra.mxu1 %v3410_v60  ;;  %v3455_v60 = vld [vmem:[%s4571_s11] ss:$8 sps:$4 sm:$0xff]  }
 0x63a   : > { %v1683_v6 = vpop.f32.mrb[16].mxu1 }
 0x63b   : > { %v1685_v7 = vpop.f32.mrb[17].mxu1 }
 0x63c   : > { %v1692_v8 = vcombine.low %v1683_v6, %v1685_v7  ;;  %v1687_v10 = vpop.f32.mrb[18].mxu1  ;;  %v3415_v6 = vld [vmem:[%s4569_s9 + $0x124] ss:$16 sps:$4 sm:$0xff]   ;;  %v3418_v7 = vld [vmem:[%s4569_s9 + $0x12c] ss:$16 sps:$4 sm:$0xff]  }
 0x63d   : > { %v1688_v11 = vpop.f32.mrb[19].mxu1  ;;  %2204 = vmatprep.subr.bf16.mxu0 %v3415_v6  ;;  %2245 = vmatprep.subr.bf16.mxu1 %v3418_v7  ;;  %v3421_v10 = vld [vmem:[%s4569_s9 + $0x144] ss:$16 sps:$4 sm:$0xff]   ;;  %v3470_v6 = vld [vmem:[%s4571_s11 + $0x50] ss:$8 sps:$4 sm:$0xff]  }
 0x63e   : > { %v1694_v13 = vadd.f32 %v3571_v12, %v1692_v8  ;;  %v3413_v8 = vld [vmem:[%s4569_s9 + $0x120] ss:$16 sps:$4 sm:$0xff]   ;;  %v3424_v11 = vld [vmem:[%s4569_s9 + $0x14c] ss:$16 sps:$4 sm:$0xff]  }
 0x63f   : > { %2205 = vmatpush1.bf16.msra.mxu0 %v3413_v8  ;;  %v3419_v12 = vld [vmem:[%s4569_s9 + $0x140] ss:$16 sps:$4 sm:$0xff]   ;;  %v3475_v7 = vld [vmem:[%s4571_s11 + $0x64] ss:$8 sps:$4 sm:$0xff]  }
 0x640   : > { %v4126_v14 = vadd.f32 %v1705_v9, %v1694_v13  ;;  %v3416_v9 = vld [vmem:[%s4569_s9 + $0x128] ss:$16 sps:$4 sm:$0xff]   ;;  %2206 = vmatprep.subr.bf16.mxu0 %v3421_v10 }
 0x641   : > { %2246 = vmatpush1.bf16.msra.mxu1 %v3416_v9  ;;  %v3422_v13 = vld [vmem:[%s4569_s9 + $0x148] ss:$16 sps:$4 sm:$0xff]   ;;  %v3478_v9 = vld [vmem:[%s4571_s11 + $0x74] ss:$8 sps:$4 sm:$0xff]  }
 0x642   : > { %v1711_v15 = vcombine.high %v4126_v14, %v4126_v14  ;;  %v1713_v16 = vsel %vm448_vm0, %v4126_v14, 0.0  ;;  %2247 = vmatprep.subr.bf16.mxu1 %v3424_v11  ;;  %v3473_v8 = vld [vmem:[%s4571_s11 + $0x60] ss:$8 sps:$4 sm:$0xff]   ;;  %v3476_v10 = vld [vmem:[%s4571_s11 + $0x70] ss:$8 sps:$4 sm:$0xff]  }
 0x643   : > { %2207 = vmatpush1.bf16.msra.mxu0 %v3419_v12  ;;  %v3481_v11 = vld [vmem:[%s4571_s11 + $0x84] ss:$8 sps:$4 sm:$0xff]   ;;  %v3479_v12 = vld [vmem:[%s4571_s11 + $0x80] ss:$8 sps:$4 sm:$0xff]  }
 0x644   : > { %v1714_v17 = vsel %vm448_vm0, %v1711_v15, 0.0  ;;  %v3427_v15 = vld [vmem:[%s4569_s9 + $0x164] ss:$16 sps:$4 sm:$0xff]  }
 0x645   : > { %v1715_v18 = vadd.f32 %v1714_v17, %v1713_v16  ;;  %2248 = vmatpush1.bf16.msra.mxu1 %v3422_v13  ;;  %v3430_v16 = vld [vmem:[%s4569_s9 + $0x16c] ss:$16 sps:$4 sm:$0xff]   ;;  %v3425_v17 = vld [vmem:[%s4569_s9 + $0x160] ss:$16 sps:$4 sm:$0xff]   ;;  %2208 = vmatprep.subr.bf16.mxu0 %v3427_v15 }
 0x646   : > { %2249 = vmatprep.subr.bf16.mxu1 %v3430_v16  ;;  %v3484_v13 = vld [vmem:[%s4571_s11 + $0x94] ss:$8 sps:$4 sm:$0xff]   ;;  %v3482_v15 = vld [vmem:[%s4571_s11 + $0x90] ss:$8 sps:$4 sm:$0xff]   ;;  %v3487_v16 = vld [vmem:[%s4571_s11 + $0xa4] ss:$8 sps:$4 sm:$0xff]  }
 0x647   : > { %1716 = vadd.xlane.f32.xlu0 %v1715_v18  ;;  %v3428_v18 = vld [vmem:[%s4569_s9 + $0x168] ss:$16 sps:$4 sm:$0xff]   ;;  %2209 = vmatpush1.bf16.msra.mxu0 %v3425_v17 }
 0x648   : > { %2210 = vmatprep.subr.bf16.mxu0 %v3433_v19  ;;  %v3485_v17 = vld [vmem:[%s4571_s11 + $0xa0] ss:$8 sps:$4 sm:$0xff]   ;;  %v3488_v19 = vld [vmem:[%s4571_s11 + $0xb0] ss:$8 sps:$4 sm:$0xff]  }
 0x649   : > { %2250 = vmatpush1.bf16.msra.mxu1 %v3428_v18  ;;  %v3490_v18 = vld [vmem:[%s4571_s11 + $0xb4] ss:$8 sps:$4 sm:$0xff]  }
 0x64a   : > { %2251 = vmatprep.subr.bf16.mxu1 %v3436_v22  ;;  %v3491_v22 = vld [vmem:[%s4571_s11 + $0xc0] ss:$8 sps:$4 sm:$0xff]  }
 0x64b   : > { %2211 = vmatpush1.bf16.msra.mxu0 %v3431_v23  ;;  %v3493_v23 = vld [vmem:[%s4571_s11 + $0xc4] ss:$8 sps:$4 sm:$0xff]  }
 0x64c   : > { %2212 = vmatprep.subr.bf16.mxu0 %v3439_v27  ;;  %v3494_v27 = vld [vmem:[%s4571_s11 + $0xd0] ss:$8 sps:$4 sm:$0xff]  }
 0x64d   : > { %2252 = vmatpush1.bf16.msra.mxu1 %v3434_v26  ;;  %v3496_v26 = vld [vmem:[%s4571_s11 + $0xd4] ss:$8 sps:$4 sm:$0xff]  }
 0x64e   : > { %2253 = vmatprep.subr.bf16.mxu1 %v3442_v28  ;;  %v3499_v28 = vld [vmem:[%s4571_s11 + $0xe4] ss:$8 sps:$4 sm:$0xff]  }
 0x64f   : > { %2213 = vmatpush1.bf16.msra.mxu0 %v3437_v29  ;;  %v3497_v29 = vld [vmem:[%s4571_s11 + $0xe0] ss:$8 sps:$4 sm:$0xff]  }
 0x650   : > { %2214 = vmatprep.subr.bf16.mxu0 %v3445_v31  ;;  %v3500_v31 = vld [vmem:[%s4571_s11 + $0xf0] ss:$8 sps:$4 sm:$0xff]  }
 0x651   : > { %2254 = vmatpush1.bf16.msra.mxu1 %v3440_v30  ;;  %v3502_v30 = vld [vmem:[%s4571_s11 + $0xf4] ss:$8 sps:$4 sm:$0xff]  }
 0x652   : > { %2255 = vmatprep.subr.bf16.mxu1 %v3448_v32  ;;  %v3505_v32 = vld [vmem:[%s4571_s11 + $0x104] ss:$8 sps:$4 sm:$0xff]  }
 0x653   : > { %2215 = vmatpush1.bf16.msra.mxu0 %v3443_v33  ;;  %v1844_v33 = vld [vmem:[%s4570_s10] sm:$0xf] }
 0x654   : > { %2216 = vmatprep.subr.bf16.mxu0 %v3451_v35  ;;  %v1853_v35 = vrot.slane %v1844_v33, %v3891_v25 }
 0x655   : > { %2256 = vmatpush1.bf16.msra.mxu1 %v3446_v34  ;;  %v1849_v34 = vrot.slane %v1844_v33, %v3888_v24 }
 0x656   : > { %2257 = vmatprep.subr.bf16.mxu1 %v3454_v36  ;;  %v1861_v36 = vrot.slane %v1844_v33, %v629_v21 }
 0x657   : > { %2217 = vmatpush1.bf16.msra.mxu0 %v3449_v37 }
 0x658   : > { %2692 = vmatprep.subr.bf16.mxu0 %v3457_v39 }
 0x659   : > { %2258 = vmatpush1.bf16.msra.mxu1 %v3452_v38 }
 0x6d4   : > { %v1717_v61 = vpop.xlane.xlu0 %1716 }
 0x6d5   : > { %v1718_v62 = vmul.f32 0.00390625, %v1717_v61 }
 0x6d7   : > { %v1726_v63 = vrot.slane %v1718_v62, %v3793_v47  ;;  %v3460_v62 = vld [vmem:[%s4571_s11 + $0x14] ss:$8 sps:$4 sm:$0xff]  }
 0x6d9   : > { %v4243_v0 = vsub.f32 %v4126_v14, %v1726_v63  ;;  %v3463_v63 = vld [vmem:[%s4571_s11 + $0x24] ss:$8 sps:$4 sm:$0xff]  }
 0x6db   : > { %v1729_v1 = vmul.f32 %v4243_v0, %v4243_v0 }
 0x6dd   : > { %v1731_v2 = vcombine.high %v1729_v1, %v1729_v1  ;;  %v1733_v3 = vsel %vm448_vm0, %v1729_v1, 0.0  ;;  %v3466_v1 = vld [vmem:[%s4571_s11 + $0x34] ss:$8 sps:$4 sm:$0xff]  }
 0x6df   : > { %v1734_v4 = vsel %vm448_vm0, %v1731_v2, 0.0  ;;  %v3464_v2 = vld [vmem:[%s4571_s11 + $0x30] ss:$8 sps:$4 sm:$0xff]  }
 0x6e0   : > { %v1735_v5 = vadd.f32 %v1734_v4, %v1733_v3  ;;  %v3469_v3 = vld [vmem:[%s4571_s11 + $0x44] ss:$8 sps:$4 sm:$0xff]   ;;  %v3467_v4 = vld [vmem:[%s4571_s11 + $0x40] ss:$8 sps:$4 sm:$0xff]  }
 0x6e2   : > { %1736 = vadd.xlane.f32.xlu1 %v1735_v5  ;;  %v3472_v5 = vld [vmem:[%s4571_s11 + $0x54] ss:$8 sps:$4 sm:$0xff]  }
 0x76f   : > { %v1737_v40 = vpop.xlane.xlu1 %1736 }
 0x770   : > { %v1738_v41 = vmul.f32 0.00390625, %v1737_v40 }
 0x772   : > { %v1739_v42 = vadd.f32 1e-05, %v1738_v41 }
 0x774   : > { %3561 = vrsqrt.f32 %v1739_v42 }
 0x77e   : > { %v3562_v51 = vpop.eup %3561 }
 0x77f   : > { %v1748_v52 = vrot.slane %v3562_v51, %v3793_v47  ;;  %v3458_v47 = vld [vmem:[%s4571_s11 + $0x10] ss:$8 sps:$4 sm:$0xff]  }
 0x781   : > { %v1750_v54 = vmul.f32 %v1748_v52, %v4243_v0  ;;  %v3461_v0 = vld [vmem:[%s4571_s11 + $0x20] ss:$8 sps:$4 sm:$0xff]  }
 0x783   : > { %v1762_v56 = vmul.f32 %v1760_v53, %v1750_v54 }
 0x785   : > { %v1774_v57 = vadd.f32 %v1772_v55, %v1762_v56 }
 0x787   : > { %v1776_v58 = vcombine.high %v1774_v57, %v1774_v57  ;;  %v1778_v61 = vpack.c.bf16 %v1774_v57, %v1774_v57 }
 0x789   : > { %v1779_v59 = vpack.c.bf16 %v1776_v58, %v1776_v58 }
 0x78b   : > { %2218 = vmatprep.mubr.bf16.mxu0 %v1779_v59  ;;  %2259 = vmatprep.mubr.bf16.mxu1 %v1779_v59 }
 0x78c   : > { %2219 = vmatmul.mubr.bf16.vlgmr.msra.gmra.mrb[12].mxu0 %v1778_v61  ;;  %2260 = vmatmul.mubr.bf16.vlgmr.msra.gmra.mrb[20].mxu1 %v1778_v61 }
 0x78d   : > { %2693 = vmatpush1.bf16.msra.mxu0 %v3455_v60 }
 0x78e   : > { %2694 = vmatprep.subr.bf16.mxu0 %v3460_v62 }
 0x791   : > { %2695 = vmatpush1.bf16.msra.mxu0 %v3458_v47 }
 0x792   : > { %2696 = vmatprep.subr.bf16.mxu0 %v3463_v63 }
 0x795   : > { %2697 = vmatpush1.bf16.msra.mxu0 %v3461_v0 }
 0x796   : > { %2698 = vmatprep.subr.bf16.mxu0 %v3466_v1 }
 0x799   : > { %2699 = vmatpush1.bf16.msra.mxu0 %v3464_v2 }
 0x79a   : > { %2700 = vmatprep.subr.bf16.mxu0 %v3469_v3 }
 0x79d   : > { %2701 = vmatpush1.bf16.msra.mxu0 %v3467_v4 }
 0x79e   : > { %2702 = vmatprep.subr.bf16.mxu0 %v3472_v5 }
 0x7a1   : > { %2703 = vmatpush1.bf16.msra.mxu0 %v3470_v6 }
 0x7a2   : > { %2704 = vmatprep.subr.bf16.mxu0 %v3475_v7 }
 0x7a5   : > { %2705 = vmatpush1.bf16.msra.mxu0 %v3473_v8 }
 0x7a6   : > { %2706 = vmatprep.subr.bf16.mxu0 %v3478_v9 }
 0x7a9   : > { %2707 = vmatpush1.bf16.msra.mxu0 %v3476_v10 }
 0x7aa   : > { %2708 = vmatprep.subr.bf16.mxu0 %v3481_v11 }
 0x7ad   : > { %2709 = vmatpush1.bf16.msra.mxu0 %v3479_v12  ;;  %v3503_v12 = vld [vmem:[%s4571_s11 + $0x100] ss:$8 sps:$4 sm:$0xff]  }
 0x7ae   : > { %2710 = vmatprep.subr.bf16.mxu0 %v3484_v13 }
 0x7b1   : > { %2711 = vmatpush1.bf16.msra.mxu0 %v3482_v15  ;;  %v3508_v15 = vld [vmem:[%s4571_s11 + $0x114] ss:$8 sps:$4 sm:$0xff]  }
 0x7b2   : > { %2712 = vmatprep.subr.bf16.mxu0 %v3487_v16 }
 0x7b5   : > { %2713 = vmatpush1.bf16.msra.mxu0 %v3485_v17  ;;  %v3506_v17 = vld [vmem:[%s4571_s11 + $0x110] ss:$8 sps:$4 sm:$0xff]  }
 0x7b6   : > { %2714 = vmatprep.subr.bf16.mxu0 %v3490_v18  ;;  %v3511_v18 = vld [vmem:[%s4571_s11 + $0x124] ss:$8 sps:$4 sm:$0xff]  }
 0x7b9   : > { %2715 = vmatpush1.bf16.msra.mxu0 %v3488_v19  ;;  %v3509_v19 = vld [vmem:[%s4571_s11 + $0x120] ss:$8 sps:$4 sm:$0xff]  }
 0x7ba   : > { %2716 = vmatprep.subr.bf16.mxu0 %v3493_v23  ;;  %v1857_v23 = vrot.slane %v1844_v33, %v625_v20  ;;  %v3521_v33 = vld [vmem:[%s4571_s11 + $0x160] ss:$8 sps:$4 sm:$0xff]  }
 0x7bd   : > { %2717 = vmatpush1.bf16.msra.mxu0 %v3491_v22  ;;  %v3514_v22 = vld [vmem:[%s4571_s11 + $0x134] ss:$8 sps:$4 sm:$0xff]  }
 0x7be   : > { %2718 = vmatprep.subr.bf16.mxu0 %v3496_v26  ;;  %v3512_v26 = vld [vmem:[%s4571_s11 + $0x130] ss:$8 sps:$4 sm:$0xff]  }
 0x7c1   : > { %2719 = vmatpush1.bf16.msra.mxu0 %v3494_v27  ;;  %v3517_v27 = vld [vmem:[%s4571_s11 + $0x144] ss:$8 sps:$4 sm:$0xff]  }
 0x7c2   : > { %2720 = vmatprep.subr.bf16.mxu0 %v3499_v28 }
 0x7c5   : > { %2721 = vmatpush1.bf16.msra.mxu0 %v3497_v29  ;;  %v3515_v29 = vld [vmem:[%s4571_s11 + $0x140] ss:$8 sps:$4 sm:$0xff]  }
 0x7c6   : > { %2722 = vmatprep.subr.bf16.mxu0 %v3502_v30  ;;  %v3518_v30 = vld [vmem:[%s4571_s11 + $0x150] ss:$8 sps:$4 sm:$0xff]  }
 0x7c9   : > { %2723 = vmatpush1.bf16.msra.mxu0 %v3500_v31  ;;  %v3523_v31 = vld [vmem:[%s4571_s11 + $0x164] ss:$8 sps:$4 sm:$0xff]  }
 0x7ca   : > { %2733 = vmatprep.subr.bf16.mxu0 %v3505_v32 }
 0x85f   : > { %v2220_v37 = vpop.f32.mrb[12].mxu0  ;;  %v2261_v38 = vpop.f32.mrb[20].mxu1 }
 0x860   : > { %v2221_v39 = vadd.f32 %v2220_v37, %v1849_v34  ;;  %v2222_v40 = vpop.f32.mrb[13].mxu0  ;;  %v2263_v41 = vpop.f32.mrb[21].mxu1  ;;  %v2262_v28 = vadd.f32 %v2261_v38, %v1857_v23  ;;  %v3526_v34 = vld [vmem:[%s4571_s11 + $0x174] ss:$8 sps:$4 sm:$0xff]   ;;  %v3529_v37 = vld [vmem:[%s4571_s11 + $0x184] ss:$8 sps:$4 sm:$0xff]  }
 0x861   : > { %v2223_v42 = vadd.f32 %v2222_v40, %v1853_v35  ;;  %v2264_v43 = vadd.f32 %v2263_v41, %v1861_v36  ;;  %v2224_v44 = vpop.f32.mrb[14].mxu0  ;;  %v2265_v45 = vpop.f32.mrb[22].mxu1  ;;  %v3524_v36 = vld [vmem:[%s4571_s11 + $0x170] ss:$8 sps:$4 sm:$0xff]   ;;  %v3532_v40 = vld [vmem:[%s4571_s11 + $0x194] ss:$8 sps:$4 sm:$0xff]  }
 0x862   : > { %v2268_v48 = vmul.f32 %v2221_v39, %v2221_v39  ;;  %v2225_v49 = vpop.f32.mrb[15].mxu0  ;;  %v2266_v50 = vpop.f32.mrb[23].mxu1  ;;  %v2270_v20 = vmul.f32 %v2262_v28, %v2262_v28  ;;  %v3533_v44 = vld [vmem:[%s4571_s11 + $0x1a0] ss:$8 sps:$4 sm:$0xff]   ;;  %v3538_v45 = vld [vmem:[%s4571_s11 + $0x1b4] ss:$8 sps:$4 sm:$0xff]  }
 0x863   : > { %v2269_v51 = vmul.f32 %v2223_v42, %v2223_v42  ;;  %v2271_v52 = vmul.f32 %v2264_v43, %v2264_v43  ;;  %v3541_v49 = vld [vmem:[%s4571_s11 + $0x1c4] ss:$8 sps:$4 sm:$0xff]   ;;  %v3539_v50 = vld [vmem:[%s4571_s11 + $0x1c0] ss:$8 sps:$4 sm:$0xff]  }
 0x864   : > { %v2272_v53 = vmul.f32 %v2268_v48, %v2221_v39  ;;  %v2274_v32 = vmul.f32 %v2270_v20, %v2262_v28  ;;  %v3536_v48 = vld [vmem:[%s4571_s11 + $0x1b0] ss:$8 sps:$4 sm:$0xff]  }
 0x865   : > { %v2273_v54 = vmul.f32 %v2269_v51, %v2223_v42  ;;  %v2275_v55 = vmul.f32 %v2271_v52, %v2264_v43  ;;  %v3544_v51 = vld [vmem:[%s4571_s11 + $0x1d4] ss:$8 sps:$4 sm:$0xff]  }
 0x866   : > { %v2276_v56 = vmul.f32 0.044715, %v2272_v53  ;;  %v2278_v35 = vmul.f32 0.044715, %v2274_v32  ;;  %v3542_v53 = vld [vmem:[%s4571_s11 + $0x1d0] ss:$8 sps:$4 sm:$0xff]  }
 0x867   : > { %v2277_v57 = vmul.f32 0.044715, %v2273_v54  ;;  %v2279_v21 = vmul.f32 0.044715, %v2275_v55  ;;  %v3547_v54 = vld [vmem:[%s4571_s11 + $0x1e4] ss:$8 sps:$4 sm:$0xff]  }
 0x868   : > { %v2280_v58 = vadd.f32 %v2276_v56, %v2221_v39  ;;  %v2282_v38 = vadd.f32 %v2278_v35, %v2262_v28  ;;  %v3545_v56 = vld [vmem:[%s4571_s11 + $0x1e0] ss:$8 sps:$4 sm:$0xff]  }
 0x869   : > { %v2281_v59 = vadd.f32 %v2277_v57, %v2223_v42  ;;  %v2283_v60 = vadd.f32 %v2279_v21, %v2264_v43  ;;  %v3550_v57 = vld [vmem:[%s4571_s11 + $0x1f4] ss:$8 sps:$4 sm:$0xff]  }
 0x86a   : > { %v2284_v61 = vmul.f32 0.7978846, %v2280_v58  ;;  %v2286_v41 = vmul.f32 0.7978846, %v2282_v38  ;;  %v3548_v58 = vld [vmem:[%s4571_s11 + $0x1f0] ss:$8 sps:$4 sm:$0xff]  }
 0x86b   : > { %v2285_v62 = vmul.f32 0.7978846, %v2281_v59  ;;  %v2287_v47 = vmul.f32 0.7978846, %v2283_v60 }
 0x86c   : > { %3563 = vtanh.f32 %v2284_v61  ;;  %v2779_v61 = vld [vmem:[%s4572_s12] sm:$0x3] }
 0x86d   : > { %3565 = vtanh.f32 %v2285_v62  ;;  %v2784_v62 = vrot.slane %v2779_v61, %v3888_v24 }
 0x86e   : > { %3567 = vtanh.f32 %v2287_v47  ;;  %v2788_v47 = vrot.slane %v2779_v61, %v3891_v25 }
 0x86f   : > { %3569 = vtanh.f32 %v2286_v41 }
 0x876   : > { %v3564_v63 = vpop.eup %3563 }
 0x877   : > { %v2292_v0 = vadd.f32 1.0, %v3564_v63  ;;  %v3566_v1 = vpop.eup %3565 }
 0x878   : > { %v3568_v2 = vpop.eup %3567  ;;  %v2293_v3 = vadd.f32 1.0, %v3566_v1 }
 0x879   : > { %v2296_v4 = vmul.f32 0.5, %v2292_v0  ;;  %v2295_v5 = vadd.f32 1.0, %v3568_v2  ;;  %v3570_v52 = vpop.eup %3569  ;;  %v2789_v2 = vcombine.low %v2784_v62, %v2788_v47 }
 0x87a   : > { %v2297_v6 = vmul.f32 0.5, %v2293_v3  ;;  %v2294_v55 = vadd.f32 1.0, %v3570_v52 }
 0x87b   : > { %v2300_v7 = vmul.f32 %v2296_v4, %v2221_v39  ;;  %v2299_v8 = vmul.f32 0.5, %v2295_v5  ;;  %v3527_v39 = vld [vmem:[%s4571_s11 + $0x180] ss:$8 sps:$4 sm:$0xff]  }
 0x87c   : > { %v2301_v9 = vmul.f32 %v2297_v6, %v2223_v42  ;;  %v3530_v42 = vld [vmem:[%s4571_s11 + $0x190] ss:$8 sps:$4 sm:$0xff]   ;;  %v2298_v21 = vmul.f32 0.5, %v2294_v55 }
 0x87d   : > { %v2303_v10 = vmul.f32 %v2299_v8, %v2264_v43  ;;  %v2304_v13 = vpack.c.bf16 %v2300_v7, %v2300_v7  ;;  %v3535_v43 = vld [vmem:[%s4571_s11 + $0x1a4] ss:$8 sps:$4 sm:$0xff]  }
 0x87e   : > { %v2305_v11 = vpack.c.bf16 %v2301_v9, %v2301_v9  ;;  %v2302_v59 = vmul.f32 %v2298_v21, %v2262_v28 }
 0x87f   : > { %v2307_v16 = vpack.c.bf16 %v2303_v10, %v2303_v10 }
 0x880   : > { %2724 = vmatprep.mubr.bf16.mxu0 %v2305_v11  ;;  %v2306_v60 = vpack.c.bf16 %v2302_v59, %v2302_v59 }
 0x881   : > { %2725 = vmatmul.mubr.bf16.vlgmr.msra.gmra.mrb[16].mxu0 %v2304_v13 }
 0x882   : > { %2734 = vmatpush1.bf16.msra.mxu0 %v3503_v12  ;;  %2765 = vmatprep.mubr.bf16.mxu0 %v2307_v16 }
 0x883   : > { %2735 = vmatprep.subr.bf16.mxu0 %v3508_v15 }
 0x886   : > { %2736 = vmatpush1.bf16.msra.mxu0 %v3506_v17 }
 0x887   : > { %2737 = vmatprep.subr.bf16.mxu0 %v3511_v18 }
 0x88a   : > { %2738 = vmatpush1.bf16.msra.mxu0 %v3509_v19 }
 0x88b   : > { %2739 = vmatprep.subr.bf16.mxu0 %v3514_v22 }
 0x88e   : > { %2740 = vmatpush1.bf16.msra.mxu0 %v3512_v26 }
 0x88f   : > { %2741 = vmatprep.subr.bf16.mxu0 %v3517_v27 }
 0x892   : > { %2742 = vmatpush1.bf16.msra.mxu0 %v3515_v29 }
 0x893   : > { %2743 = vmatprep.subr.bf16.mxu0 %v3520_v46 }
 0x896   : > { %2744 = vmatpush1.bf16.msra.mxu0 %v3518_v30 }
 0x897   : > { %2745 = vmatprep.subr.bf16.mxu0 %v3523_v31 }
 0x89a   : > { %2746 = vmatpush1.bf16.msra.mxu0 %v3521_v33 }
 0x89b   : > { %2747 = vmatprep.subr.bf16.mxu0 %v3526_v34 }
 0x89e   : > { %2748 = vmatpush1.bf16.msra.mxu0 %v3524_v36 }
 0x89f   : > { %2749 = vmatprep.subr.bf16.mxu0 %v3529_v37 }
 0x8a2   : > { %2750 = vmatpush1.bf16.msra.mxu0 %v3527_v39 }
 0x8a3   : > { %2751 = vmatprep.subr.bf16.mxu0 %v3532_v40 }
 0x8a6   : > { %2752 = vmatpush1.bf16.msra.mxu0 %v3530_v42 }
 0x8a7   : > { %2753 = vmatprep.subr.bf16.mxu0 %v3535_v43 }
 0x8aa   : > { %2754 = vmatpush1.bf16.msra.mxu0 %v3533_v44 }
 0x8ab   : > { %2755 = vmatprep.subr.bf16.mxu0 %v3538_v45 }
 0x8ae   : > { %2756 = vmatpush1.bf16.msra.mxu0 %v3536_v48 }
 0x8af   : > { %2757 = vmatprep.subr.bf16.mxu0 %v3541_v49 }
 0x8b2   : > { %2758 = vmatpush1.bf16.msra.mxu0 %v3539_v50 }
 0x8b3   : > { %2759 = vmatprep.subr.bf16.mxu0 %v3544_v51 }
 0x8b6   : > { %2760 = vmatpush1.bf16.msra.mxu0 %v3542_v53 }
 0x8b7   : > { %2761 = vmatprep.subr.bf16.mxu0 %v3547_v54 }
 0x8ba   : > { %2762 = vmatpush1.bf16.msra.mxu0 %v3545_v56 }
 0x8bb   : > { %2763 = vmatprep.subr.bf16.mxu0 %v3550_v57 }
 0x8be   : > { %2764 = vmatpush1.bf16.msra.mxu0 %v3548_v58 }
 0x8c1   : > { %2766 = vmatmul.mubr.bf16.vlgmr.msra.gmra.mrb[16].mxu0 %v2306_v60 }
 0x994   : > { %v2767_v63 = vpop.f32.mrb[16].mxu0 }
 0x995   : > { %v2769_v0 = vpop.f32.mrb[17].mxu0 }
 0x996   : > { %v2776_v1 = vcombine.low %v2767_v63, %v2769_v0  ;;  %v2771_v3 = vpop.f32.mrb[18].mxu0 }
 0x997   : > { %v2772_v4 = vpop.f32.mrb[19].mxu0 }
 0x998   : > { %v2778_v5 = vadd.f32 %v2776_v1, %v4126_v14 }
 0x99a   : > { %v2791_v6 = vadd.f32 %v2789_v2, %v2778_v5 }
 0x99c   : > { %2792 = vst [vmem:[%s440_s18] sm:$0xff] %v2791_v6 }
 0x99d PF: > { %s23_s25 = sadd.s32 1, %s3578_s25  }
 0x99e   : > { %p20_p4 = scmp.ge.s32.totalorder %s23_s25, 4  }
 0x9a0   :  { %22 = sbr.rel (!%p20_p4) target bundleno = 1 (0x1), region = 102 }

// kernel: m3tnet_forward.9
= control target key start
LH: loop header
LB: loop body
LE: loop exit
PB: predicated region body
PF: predicated region fallthrough
CT: control target
= control target key end

     0   :  { %s4024_s21 = smov 0   ;;  %s5005_s0 = inlined_call_operand.vmem [shape: f32[2,4,256], index: 0, kind: input, shape index: {}]   ;;  %s5006_s1 = inlined_call_operand.vmem [shape: f32[1,256], index: 1, kind: input, shape index: {}]   ;;  %s5007_s2 = inlined_call_operand.vmem [shape: f32[1,256], index: 2, kind: input, shape index: {}]   ;;  %s5008_s3 = inlined_call_operand.vmem [shape: bf16[256,768], index: 3, kind: input, shape index: {}]   ;;  %s5009_s4 = inlined_call_operand.vmem [shape: f32[1,768], index: 4, kind: input, shape index: {}]   ;;  %s5010_s5 = inlined_call_operand.vmem [shape: bf16[256,256], index: 5, kind: input, shape index: {}]   ;;  %s5011_s6 = inlined_call_operand.vmem [shape: f32[1,256], index: 6, kind: input, shape index: {}]   ;;  %s5012_s7 = inlined_call_operand.vmem [shape: f32[1,256], index: 7, kind: input, shape index: {}]   ;;  %s5013_s8 = inlined_call_operand.vmem [shape: f32[1,256], index: 8, kind: input, shape index: {}]   ;;  %s5014_s9 = inlined_call_operand.vmem [shape: bf16[256,512], index: 9, kind: input, shape index: {}]   ;;  %s5015_s10 = inlined_call_operand.vmem [shape: f32[1,512], index: 10, kind: input, shape index: {}]   ;;  %s5016_s11 = inlined_call_operand.vmem [shape: bf16[512,256], index: 11, kind: input, shape index: {}]   ;;  %s5017_s12 = inlined_call_operand.vmem [shape: f32[1,256], index: 12, kind: input, shape index: {}]   ;;  %s5018_s13 = inlined_call_operand.vmem [shape: bf16[256,3], index: 13, kind: input, shape index: {}]   ;;  %s5019_s14 = inlined_call_operand.vmem [shape: f32[1,3], index: 14, kind: input, shape index: {}]   ;;  %s5020_s15 = inlined_call_operand.vmem [shape: f32[2,4,3], index: 15, kind: output, shape index: {0}]   ;;  %s5021_s16 = inlined_call_operand.vmem [shape: f32[2,1,3], index: 16, kind: output, shape index: {1}]  }
   0x1   :  { %5022 = sst [smem:[#allocation2_spill]] %s5005_s0 }
   0x2 LB: > { %s3151_s22 = sadd.s32 4294967295, %s3934_s21   ;;  %p3155_p0 = scmp.ge.s32.totalorder %s3934_s21, 1  ;;  %s3934_s21 = sphi %s4024_s21, %s27_s21  }
   0x3   : > { %p465_p1 = scmp.lt.s32.totalorder %s3934_s21, 3 }
   0x5   : > { %p466_p2 = pnand %p3155_p0, %p465_p1 }
   0x6   : > { %p517_p3 = scmp.lt.s32.totalorder (!%p466_p2), %s3151_s22, 1  ;;  %vm536_vm0 = vcmask (!%p466_p2), 1043456   ;;  %s5023_s26 = sld [smem:[#allocation2_spill]] (!%p466_p2)  ;;  %v3507_v5 = vld [vmem:[%s5008_s3 + $0x4] ss:$24 sps:$4 sm:$0xff] (!%p466_p2)   ;;  %v548_v44 = vlaneseq (!%p466_p2)  ;;  %vm3938_vm1 = vmmov (!%p466_p2), 0  }
   0x7   : > { %469 = sbr.rel (%p466_p2) target bundleno = 3169 (0xc61), region = 80  ;;  %v3509_v6 = vld [vmem:[%s5008_s3] ss:$24 sps:$4 sm:$0xff] (!%p466_p2)   ;;  %v3510_v7 = vld [vmem:[%s5008_s3 + $0xc] ss:$24 sps:$4 sm:$0xff] (!%p466_p2)   ;;  %1213 = vmatprep.subr.bf16.mxu0 (!%p466_p2), %v3507_v5  ;;  %vm1397_vm2 = vcmask (!%p466_p2), 1041408  }
   0x8   : > { %v3512_v8 = vld [vmem:[%s5008_s3 + $0x8] ss:$24 sps:$4 sm:$0xff] (!%p466_p2)   ;;  %v3513_v9 = vld [vmem:[%s5008_s3 + $0x34] ss:$24 sps:$4 sm:$0xff] (!%p466_p2)   ;;  %1254 = vmatprep.subr.bf16.mxu1 (!%p466_p2), %v3510_v7  ;;  %1214 = vmatpush1.bf16.msra.mxu0 (!%p466_p2), %v3509_v6  ;;  %v3518_v12 = vld [vmem:[%s5008_s3 + $0x38] ss:$24 sps:$4 sm:$0xff] (!%p466_p2)  }
   0x9   : > { %v3516_v10 = vld [vmem:[%s5008_s3 + $0x3c] ss:$24 sps:$4 sm:$0xff] (!%p466_p2)   ;;  %1255 = vmatpush1.bf16.msra.mxu1 (!%p466_p2), %v3512_v8  ;;  %v3515_v11 = vld [vmem:[%s5008_s3 + $0x30] ss:$24 sps:$4 sm:$0xff] (!%p466_p2)   ;;  %1215 = vmatprep.subr.bf16.mxu0 (!%p466_p2), %v3513_v9  ;;  %v3522_v14 = vld [vmem:[%s5008_s3 + $0x6c] ss:$24 sps:$4 sm:$0xff] (!%p466_p2)  }
   0xa   : > { %1256 = vmatprep.subr.bf16.mxu1 (!%p466_p2), %v3516_v10  ;;  %v3519_v13 = vld [vmem:[%s5008_s3 + $0x64] ss:$24 sps:$4 sm:$0xff] (!%p466_p2)   ;;  %v3521_v15 = vld [vmem:[%s5008_s3 + $0x60] ss:$24 sps:$4 sm:$0xff] (!%p466_p2)   ;;  %v3525_v17 = vld [vmem:[%s5008_s3 + $0x94] ss:$24 sps:$4 sm:$0xff] (!%p466_p2)  }
   0xb   : > { %v3524_v16 = vld [vmem:[%s5008_s3 + $0x68] ss:$24 sps:$4 sm:$0xff] (!%p466_p2)   ;;  %v3528_v18 = vld [vmem:[%s5008_s3 + $0x9c] ss:$24 sps:$4 sm:$0xff] (!%p466_p2)   ;;  %v3530_v20 = vld [vmem:[%s5008_s3 + $0x98] ss:$24 sps:$4 sm:$0xff] (!%p466_p2)  }
   0xc   : > { %1216 = vmatpush1.bf16.msra.mxu0 (!%p466_p2), %v3515_v11  ;;  %v3527_v19 = vld [vmem:[%s5008_s3 + $0x90] ss:$24 sps:$4 sm:$0xff] (!%p466_p2)   ;;  %v3531_v21 = vld [vmem:[%s5008_s3 + $0xc4] ss:$24 sps:$4 sm:$0xff] (!%p466_p2)   ;;  %v3533_v23 = vld [vmem:[%s5008_s3 + $0xc0] ss:$24 sps:$4 sm:$0xff] (!%p466_p2)  }
   0xd   : > { %1257 = vmatpush1.bf16.msra.mxu1 (!%p466_p2), %v3518_v12  ;;  %1217 = vmatprep.subr.bf16.mxu0 (!%p466_p2), %v3519_v13  ;;  %v3534_v22 = vld [vmem:[%s5008_s3 + $0xcc] ss:$24 sps:$4 sm:$0xff] (!%p466_p2)   ;;  %v3536_v24 = vld [vmem:[%s5008_s3 + $0xc8] ss:$24 sps:$4 sm:$0xff] (!%p466_p2)   ;;  %v3540_v26 = vld [vmem:[%s5008_s3 + $0xfc] ss:$24 sps:$4 sm:$0xff] (!%p466_p2)  }
   0xe   : > { %s5025_s22 = smov (!%p517_p3, %s3151_s22), 1  ;;  %1258 = vmatprep.subr.bf16.mxu1 %v3522_v14  ;;  %v3537_v25 = vld [vmem:[%s5008_s3 + $0xf4] ss:$24 sps:$4 sm:$0xff]   ;;  %v3539_v27 = vld [vmem:[%s5008_s3 + $0xf0] ss:$24 sps:$4 sm:$0xff]   ;;  %v4159_v46 = vshrl.u32 %v548_v44, 7 }
   0xf   : > { %s3436_s23 = sshll.u32 %s5025_s22, 3  ;;  %v3542_v28 = vld [vmem:[%s5008_s3 + $0xf8] ss:$24 sps:$4 sm:$0xff]   ;;  %v3543_v29 = vld [vmem:[%s5008_s3 + $0x124] ss:$24 sps:$4 sm:$0xff]   ;;  %vm1379_vm3 = vcmask 27648   ;;  %s528_s17 = scalar_lea.vmem %s5021_s16, %s5025_s22 }
  0x10   : > { %s4038_s27 = scalar_lea.vmem %s5023_s26, %s3436_s23  ;;  %1218 = vmatpush1.bf16.msra.mxu0 %v3521_v15  ;;  %v3546_v30 = vld [vmem:[%s5008_s3 + $0x12c] ss:$24 sps:$4 sm:$0xff]   ;;  %v3545_v31 = vld [vmem:[%s5008_s3 + $0x120] ss:$24 sps:$4 sm:$0xff]   ;;  %v3552_v34 = vld [vmem:[%s5008_s3 + $0x15c] ss:$24 sps:$4 sm:$0xff]  }
  0x11   : > { %v4041_v0 = vld [vmem:[%s4038_s27] sm:$0xff]  ;;  %1259 = vmatpush1.bf16.msra.mxu1 %v3524_v16  ;;  %1219 = vmatprep.subr.bf16.mxu0 %v3525_v17  ;;  %v3549_v33 = vld [vmem:[%s5008_s3 + $0x154] ss:$24 sps:$4 sm:$0xff]   ;;  %v3551_v35 = vld [vmem:[%s5008_s3 + $0x150] ss:$24 sps:$4 sm:$0xff]   ;;  %vm1393_vm4 = vcmask 31744  }
  0x12   : > { %v534_v1 = vcombine.high %v4041_v0, %v4041_v0  ;;  %v537_v2 = vsel %vm536_vm0, %v4041_v0, 0.0  ;;  %1260 = vmatprep.subr.bf16.mxu1 %v3528_v18  ;;  %v3548_v32 = vld [vmem:[%s5008_s3 + $0x128] ss:$24 sps:$4 sm:$0xff]   ;;  %v3554_v36 = vld [vmem:[%s5008_s3 + $0x158] ss:$24 sps:$4 sm:$0xff]   ;;  %s3158_s24 = sshll.u32 %s5025_s22, 2 }
  0x13   : > { %v3555_v37 = vld [vmem:[%s5008_s3 + $0x184] ss:$24 sps:$4 sm:$0xff]   ;;  %v3557_v39 = vld [vmem:[%s5008_s3 + $0x180] ss:$24 sps:$4 sm:$0xff]   ;;  %v3561_v41 = vld [vmem:[%s5008_s3 + $0x1b4] ss:$24 sps:$4 sm:$0xff]   ;;  %s525_s30 = scalar_lea.vmem %s5020_s15, %s3158_s24 }
  0x14   : > { %v538_v3 = vsel %vm536_vm0, %v534_v1, 0.0  ;;  %1220 = vmatpush1.bf16.msra.mxu0 %v3527_v19  ;;  %v3558_v38 = vld [vmem:[%s5008_s3 + $0x18c] ss:$24 sps:$4 sm:$0xff]   ;;  %v3560_v40 = vld [vmem:[%s5008_s3 + $0x188] ss:$24 sps:$4 sm:$0xff]   ;;  %vm3060_vm5 = vcmask 19456  }
  0x15   : > { %v539_v4 = vadd.f32 %v538_v3, %v537_v2  ;;  %1261 = vmatpush1.bf16.msra.mxu1 %v3530_v20  ;;  %1221 = vmatprep.subr.bf16.mxu0 %v3531_v21  ;;  %v3936_v42 = vmov 839922192   ;;  %v3563_v57 = vld [vmem:[%s5008_s3 + $0x1b0] ss:$24 sps:$4 sm:$0xff]   ;;  %v3564_v58 = vld [vmem:[%s5008_s3 + $0x1bc] ss:$24 sps:$4 sm:$0xff]  }
  0x16   : > { %1262 = vmatprep.subr.bf16.mxu1 %v3534_v22  ;;  %v546_v43 = vunpack.c.l.s4 %v3936_v42  ;;  %v3566_v59 = vld [vmem:[%s5008_s3 + $0x1b8] ss:$24 sps:$4 sm:$0xff]   ;;  %v3567_v60 = vld [vmem:[%s5008_s3 + $0x1e4] ss:$24 sps:$4 sm:$0xff]   ;;  %v3572_v63 = vld [vmem:[%s5008_s3 + $0x1e8] ss:$24 sps:$4 sm:$0xff]  }
  0x17   : > { %540 = vadd.xlane.f32.xlu0 %v539_v4  ;;  %v3569_v61 = vld [vmem:[%s5008_s3 + $0x1e0] ss:$24 sps:$4 sm:$0xff]   ;;  %v3570_v62 = vld [vmem:[%s5008_s3 + $0x1ec] ss:$24 sps:$4 sm:$0xff]   ;;  %v3575_v1 = vld [vmem:[%s5008_s3 + $0x210] ss:$24 sps:$4 sm:$0xff]  }
  0x18   : > { %1222 = vmatpush1.bf16.msra.mxu0 %v3533_v23  ;;  %v547_v45 = vunpack.c.0.s8 %v546_v43  ;;  %v3576_v2 = vld [vmem:[%s5008_s3 + $0x21c] ss:$24 sps:$4 sm:$0xff]   ;;  %v3578_v3 = vld [vmem:[%s5008_s3 + $0x218] ss:$24 sps:$4 sm:$0xff]   ;;  %v3582_v5 = vld [vmem:[%s5008_s3 + $0x24c] ss:$24 sps:$4 sm:$0xff]  }
  0x19   : > { %1263 = vmatpush1.bf16.msra.mxu1 %v3536_v24  ;;  %1223 = vmatprep.subr.bf16.mxu0 %v3537_v25  ;;  %v3579_v4 = vld [vmem:[%s5008_s3 + $0x244] ss:$24 sps:$4 sm:$0xff]   ;;  %v3581_v6 = vld [vmem:[%s5008_s3 + $0x240] ss:$24 sps:$4 sm:$0xff]   ;;  %v3585_v8 = vld [vmem:[%s5008_s3 + $0x274] ss:$24 sps:$4 sm:$0xff]  }
  0x1a   : > { %1264 = vmatprep.subr.bf16.mxu1 %v3540_v26  ;;  %v4162_v47 = vsub.s32 %v547_v45, %v4159_v46  ;;  %v3584_v7 = vld [vmem:[%s5008_s3 + $0x248] ss:$24 sps:$4 sm:$0xff]   ;;  %v3588_v9 = vld [vmem:[%s5008_s3 + $0x27c] ss:$24 sps:$4 sm:$0xff]   ;;  %v3590_v11 = vld [vmem:[%s5008_s3 + $0x278] ss:$24 sps:$4 sm:$0xff]  }
  0x1b   : > { %v3587_v10 = vld [vmem:[%s5008_s3 + $0x270] ss:$24 sps:$4 sm:$0xff]   ;;  %v3591_v12 = vld [vmem:[%s5008_s3 + $0x2a4] ss:$24 sps:$4 sm:$0xff]   ;;  %v3593_v14 = vld [vmem:[%s5008_s3 + $0x2a0] ss:$24 sps:$4 sm:$0xff]  }
  0x1c   : > { %1224 = vmatpush1.bf16.msra.mxu0 %v3539_v27  ;;  %v3594_v13 = vld [vmem:[%s5008_s3 + $0x2ac] ss:$24 sps:$4 sm:$0xff]   ;;  %v3596_v15 = vld [vmem:[%s5008_s3 + $0x2a8] ss:$24 sps:$4 sm:$0xff]   ;;  %v3600_v17 = vld [vmem:[%s5008_s3 + $0x2dc] ss:$24 sps:$4 sm:$0xff]  }
  0x1d   : > { %1265 = vmatpush1.bf16.msra.mxu1 %v3542_v28  ;;  %1225 = vmatprep.subr.bf16.mxu0 %v3543_v29  ;;  %v3597_v16 = vld [vmem:[%s5008_s3 + $0x2d4] ss:$24 sps:$4 sm:$0xff]   ;;  %v3599_v18 = vld [vmem:[%s5008_s3 + $0x2d0] ss:$24 sps:$4 sm:$0xff]   ;;  %v4257_v24 = vsub.s32 0, %v4159_v46  ;;  %v4260_v25 = vsub.s32 1, %v4159_v46 }
  0x1e   : > { %1266 = vmatprep.subr.bf16.mxu1 %v3546_v30  ;;  %v3602_v19 = vld [vmem:[%s5008_s3 + $0x2d8] ss:$24 sps:$4 sm:$0xff]   ;;  %v3605_v20 = vld [vmem:[%s5008_s3 + $0x14] ss:$24 sps:$4 sm:$0xff]   ;;  %v531_v26 = vld [vmem:[%s5006_s1] sm:$0x3] }
  0x1f   : > { %v532_v27 = vld [vmem:[%s5007_s2] sm:$0x3]  ;;  %v580_v28 = vrot.slane %v531_v26, %v4257_v24  ;;  %v584_v29 = vrot.slane %v531_v26, %v4260_v25  ;;  %v3608_v43 = vld [vmem:[%s5008_s3 + $0x44] ss:$24 sps:$4 sm:$0xff]   ;;  %v3611_v45 = vld [vmem:[%s5008_s3 + $0x74] ss:$24 sps:$4 sm:$0xff]  }
  0x20   : > { %1226 = vmatpush1.bf16.msra.mxu0 %v3545_v31  ;;  %v592_v30 = vrot.slane %v532_v27, %v4257_v24  ;;  %v596_v31 = vrot.slane %v532_v27, %v4260_v25  ;;  %v3606_v44 = vld [vmem:[%s5008_s3 + $0x40] ss:$24 sps:$4 sm:$0xff]   ;;  %vm3071_vm6 = vcmask 16384  }
  0x21   : > { %1267 = vmatpush1.bf16.msra.mxu1 %v3548_v32  ;;  %1227 = vmatprep.subr.bf16.mxu0 %v3549_v33 }
  0x22   : > { %1268 = vmatprep.subr.bf16.mxu1 %v3552_v34  ;;  %v585_v34 = vcombine.low %v580_v28, %v584_v29 }
  0x24   : > { %1228 = vmatpush1.bf16.msra.mxu0 %v3551_v35 }
  0x25   : > { %1269 = vmatpush1.bf16.msra.mxu1 %v3554_v36  ;;  %1229 = vmatprep.subr.bf16.mxu0 %v3555_v37  ;;  %v597_v36 = vcombine.low %v592_v30, %v596_v31  ;;  %v721_v30 = vsub.s32 4, %v4159_v46  ;;  %v725_v31 = vsub.s32 5, %v4159_v46 }
  0x26   : > { %1270 = vmatprep.subr.bf16.mxu1 %v3558_v38 }
  0x28   : > { %1230 = vmatpush1.bf16.msra.mxu0 %v3557_v39 }
  0x29   : > { %1271 = vmatpush1.bf16.msra.mxu1 %v3560_v40  ;;  %1231 = vmatprep.subr.bf16.mxu0 %v3561_v41  ;;  %v3603_v41 = vld [vmem:[%s5008_s3 + $0x10] ss:$24 sps:$4 sm:$0xff]  }
  0x2a   : > { %1272 = vmatprep.subr.bf16.mxu1 %v3564_v58  ;;  %v3624_v58 = vld [vmem:[%s5008_s3 + $0x160] ss:$24 sps:$4 sm:$0xff]  }
  0x2c   : > { %1232 = vmatpush1.bf16.msra.mxu0 %v3563_v57  ;;  %v3626_v57 = vld [vmem:[%s5008_s3 + $0x164] ss:$24 sps:$4 sm:$0xff]  }
  0x2d   : > { %1273 = vmatpush1.bf16.msra.mxu1 %v3566_v59  ;;  %1233 = vmatprep.subr.bf16.mxu0 %v3567_v60  ;;  %v3629_v59 = vld [vmem:[%s5008_s3 + $0x194] ss:$24 sps:$4 sm:$0xff]   ;;  %v3627_v60 = vld [vmem:[%s5008_s3 + $0x190] ss:$24 sps:$4 sm:$0xff]  }
  0x2e   : > { %1274 = vmatprep.subr.bf16.mxu1 %v3570_v62  ;;  %v3630_v62 = vld [vmem:[%s5008_s3 + $0x1c0] ss:$24 sps:$4 sm:$0xff]  }
  0x30   : > { %1234 = vmatpush1.bf16.msra.mxu0 %v3569_v61  ;;  %v3632_v61 = vld [vmem:[%s5008_s3 + $0x1c4] ss:$24 sps:$4 sm:$0xff]  }
  0x31   : > { %1275 = vmatpush1.bf16.msra.mxu1 %v3572_v63  ;;  %v3635_v63 = vld [vmem:[%s5008_s3 + $0x1f4] ss:$24 sps:$4 sm:$0xff]  }
  0x32   : > { %1276 = vmatprep.subr.bf16.mxu1 %v3576_v2  ;;  %v3636_v2 = vld [vmem:[%s5008_s3 + $0x220] ss:$24 sps:$4 sm:$0xff]  }
  0x35   : > { %1277 = vmatpush1.bf16.msra.mxu1 %v3578_v3  ;;  %v3641_v3 = vld [vmem:[%s5008_s3 + $0x254] ss:$24 sps:$4 sm:$0xff]  }
  0x36   : > { %1278 = vmatprep.subr.bf16.mxu1 %v3582_v5  ;;  %v3644_v5 = vld [vmem:[%s5008_s3 + $0x284] ss:$24 sps:$4 sm:$0xff]  }
  0x39   : > { %1279 = vmatpush1.bf16.msra.mxu1 %v3584_v7  ;;  %v3647_v7 = vld [vmem:[%s5008_s3 + $0x2b4] ss:$24 sps:$4 sm:$0xff]  }
  0x3a   : > { %1280 = vmatprep.subr.bf16.mxu1 %v3588_v9  ;;  %v3650_v9 = vld [vmem:[%s5008_s3 + $0x2e4] ss:$24 sps:$4 sm:$0xff]  }
  0x3d   : > { %1281 = vmatpush1.bf16.msra.mxu1 %v3590_v11  ;;  %v3937_v11 = vmov 0.0  }
  0x3e   : > { %1282 = vmatprep.subr.bf16.mxu1 %v3594_v13  ;;  %v4379_v13 = vld [vmem:[%s5009_s4] sm:$0x3f] }
  0x41   : > { %1283 = vmatpush1.bf16.msra.mxu1 %v3596_v15 }
  0x42   : > { %1284 = vmatprep.subr.bf16.mxu1 %v3600_v17 }
  0x45   : > { %1285 = vmatpush1.bf16.msra.mxu1 %v3602_v19 }
  0x46   : > { %3467 = vmatprep.subr.bf16.mxu1 %v3937_v11 }
  0xa4   : > { %v541_v48 = vpop.xlane.xlu0 %540 }
  0xa5   : > { %v543_v49 = vmul.f32 0.00390625, %v541_v48  ;;  %v3609_v48 = vld [vmem:[%s5008_s3 + $0x70] ss:$24 sps:$4 sm:$0xff]  }
  0xa7   : > { %v551_v50 = vrot.slane %v543_v49, %v4162_v47  ;;  %v3614_v49 = vld [vmem:[%s5008_s3 + $0xa4] ss:$24 sps:$4 sm:$0xff]  }
  0xa9   : > { %v4166_v51 = vsub.f32 %v4041_v0, %v551_v50  ;;  %v3573_v0 = vld [vmem:[%s5008_s3 + $0x214] ss:$24 sps:$4 sm:$0xff]   ;;  %v3612_v50 = vld [vmem:[%s5008_s3 + $0xa0] ss:$24 sps:$4 sm:$0xff]  }
  0xaa   : > { %1235 = vmatprep.subr.bf16.mxu0 %v3573_v0  ;;  %v3633_v0 = vld [vmem:[%s5008_s3 + $0x1f0] ss:$24 sps:$4 sm:$0xff]  }
  0xab   : > { %v554_v52 = vmul.f32 %v4166_v51, %v4166_v51  ;;  %1236 = vmatpush1.bf16.msra.mxu0 %v3575_v1  ;;  %v3638_v1 = vld [vmem:[%s5008_s3 + $0x224] ss:$24 sps:$4 sm:$0xff]  }
  0xac   : > { %1237 = vmatprep.subr.bf16.mxu0 %v3579_v4  ;;  %v3639_v4 = vld [vmem:[%s5008_s3 + $0x250] ss:$24 sps:$4 sm:$0xff]  }
  0xad   : > { %v556_v53 = vcombine.high %v554_v52, %v554_v52  ;;  %v558_v54 = vsel %vm536_vm0, %v554_v52, 0.0  ;;  %v3615_v52 = vld [vmem:[%s5008_s3 + $0xd0] ss:$24 sps:$4 sm:$0xff]  }
  0xaf   : > { %v559_v55 = vsel %vm536_vm0, %v556_v53, 0.0  ;;  %1238 = vmatpush1.bf16.msra.mxu0 %v3581_v6  ;;  %v3620_v53 = vld [vmem:[%s5008_s3 + $0x104] ss:$24 sps:$4 sm:$0xff]   ;;  %v3642_v6 = vld [vmem:[%s5008_s3 + $0x280] ss:$24 sps:$4 sm:$0xff]  }
  0xb0   : > { %v560_v56 = vadd.f32 %v559_v55, %v558_v54  ;;  %1239 = vmatprep.subr.bf16.mxu0 %v3585_v8  ;;  %v3618_v54 = vld [vmem:[%s5008_s3 + $0x100] ss:$24 sps:$4 sm:$0xff]   ;;  %v3623_v55 = vld [vmem:[%s5008_s3 + $0x134] ss:$24 sps:$4 sm:$0xff]   ;;  %v3645_v8 = vld [vmem:[%s5008_s3 + $0x2b0] ss:$24 sps:$4 sm:$0xff]  }
  0xb2   : > { %561 = vadd.xlane.f32.xlu0 %v560_v56  ;;  %v3621_v56 = vld [vmem:[%s5008_s3 + $0x130] ss:$24 sps:$4 sm:$0xff]  }
  0xb3   : > { %1240 = vmatpush1.bf16.msra.mxu0 %v3587_v10  ;;  %v3648_v10 = vld [vmem:[%s5008_s3 + $0x2e0] ss:$24 sps:$4 sm:$0xff]  }
  0xb4   : > { %1241 = vmatprep.subr.bf16.mxu0 %v3591_v12  ;;  %v713_v12 = vsub.s32 2, %v4159_v46 }
  0xb7   : > { %1242 = vmatpush1.bf16.msra.mxu0 %v3593_v14  ;;  %v714_v14 = vrot.slane %v4379_v13, %v713_v12 }
  0xb8   : > { %1243 = vmatprep.subr.bf16.mxu0 %v3597_v16 }
  0xbb   : > { %1244 = vmatpush1.bf16.msra.mxu0 %v3599_v18 }
  0xbc   : > { %1295 = vmatprep.subr.bf16.mxu0 %v3605_v20  ;;  %v706_v20 = vrot.slane %v4379_v13, %v4257_v24 }
 0x13f   : > { %v562_v21 = vpop.xlane.xlu0 %561 }
 0x140   : > { %v563_v22 = vmul.f32 0.00390625, %v562_v21 }
 0x142   : > { %v564_v23 = vadd.f32 1e-05, %v563_v22 }
 0x144   : > { %3907 = vrsqrt.f32 %v564_v23 }
 0x14e   : > { %v3908_v32 = vpop.eup %3907 }
 0x14f   : > { %v573_v33 = vrot.slane %v3908_v32, %v4162_v47  ;;  %v722_v32 = vrot.slane %v4379_v13, %v721_v30  ;;  %v3659_v30 = vld [vmem:[%s5010_s5 + $0x24] ss:$8 sps:$4 sm:$0xff]  }
 0x151   : > { %v575_v35 = vmul.f32 %v573_v33, %v4166_v51  ;;  %v3617_v51 = vld [vmem:[%s5008_s3 + $0xd4] ss:$24 sps:$4 sm:$0xff]   ;;  %v726_v33 = vrot.slane %v4379_v13, %v725_v31  ;;  %v3657_v31 = vld [vmem:[%s5010_s5 + $0x20] ss:$8 sps:$4 sm:$0xff]  }
 0x153   : > { %v587_v37 = vmul.f32 %v585_v34, %v575_v35 }
 0x155   : > { %v599_v38 = vadd.f32 %v597_v36, %v587_v37 }
 0x157   : > { %v601_v39 = vcombine.high %v599_v38, %v599_v38  ;;  %v4277_v42 = vpack.c.bf16 %v599_v38, %v599_v38 }
 0x159   : > { %v604_v40 = vpack.c.bf16 %v601_v39, %v601_v39 }
 0x15b   : > { %1245 = vmatprep.mubr.bf16.mxu0 %v604_v40  ;;  %1286 = vmatprep.mubr.bf16.mxu1 %v604_v40 }
 0x15c   : > { %1246 = vmatmul.mubr.bf16.vlgmr.msra.gmra.mrb[0].mxu0 %v4277_v42  ;;  %1287 = vmatmul.mubr.bf16.vlgmr.msra.gmra.mrb[0].mxu1 %v4277_v42 }
 0x15d   : > { %1296 = vmatpush1.bf16.msra.mxu0 %v3603_v41  ;;  %1327 = vmatprep.mubr.bf16.mxu0 %v604_v40 }
 0x15e   : > { %1297 = vmatprep.subr.bf16.mxu0 %v3608_v43  ;;  %3469 = vmatprep.mubr.msk.bf16.mxu1 %vm3938_vm1, %v3937_v11 }
 0x161   : > { %1298 = vmatpush1.bf16.msra.mxu0 %v3606_v44 }
 0x162   : > { %1299 = vmatprep.subr.bf16.mxu0 %v3611_v45 }
 0x165   : > { %1300 = vmatpush1.bf16.msra.mxu0 %v3609_v48 }
 0x166   : > { %1301 = vmatprep.subr.bf16.mxu0 %v3614_v49 }
 0x169   : > { %1302 = vmatpush1.bf16.msra.mxu0 %v3612_v50 }
 0x16a   : > { %1303 = vmatprep.subr.bf16.mxu0 %v3617_v51 }
 0x16d   : > { %1304 = vmatpush1.bf16.msra.mxu0 %v3615_v52 }
 0x16e   : > { %1305 = vmatprep.subr.bf16.mxu0 %v3620_v53 }
 0x171   : > { %1306 = vmatpush1.bf16.msra.mxu0 %v3618_v54 }
 0x172   : > { %1307 = vmatprep.subr.bf16.mxu0 %v3623_v55 }
 0x175   : > { %1308 = vmatpush1.bf16.msra.mxu0 %v3621_v56 }
 0x176   : > { %1309 = vmatprep.subr.bf16.mxu0 %v3626_v57 }
 0x179   : > { %1310 = vmatpush1.bf16.msra.mxu0 %v3624_v58  ;;  %v717_v58 = vsub.s32 3, %v4159_v46  ;;  %v3860_v46 = vld [vmem:[%s5016_s11 + $0x154] ss:$8 sps:$4 sm:$0xff]  }
 0x17a   : > { %1311 = vmatprep.subr.bf16.mxu0 %v3629_v59 }
 0x17b   : > { %v718_v59 = vrot.slane %v4379_v13, %v717_v58 }
 0x17d   : > { %1312 = vmatpush1.bf16.msra.mxu0 %v3627_v60 }
 0x17e   : > { %1313 = vmatprep.subr.bf16.mxu0 %v3632_v61 }
 0x181   : > { %1314 = vmatpush1.bf16.msra.mxu0 %v3630_v62 }
 0x182   : > { %1315 = vmatprep.subr.bf16.mxu0 %v3635_v63  ;;  %v710_v63 = vrot.slane %v4379_v13, %v4260_v25 }
 0x185   : > { %1316 = vmatpush1.bf16.msra.mxu0 %v3633_v0 }
 0x186   : > { %1317 = vmatprep.subr.bf16.mxu0 %v3638_v1 }
 0x189   : > { %1318 = vmatpush1.bf16.msra.mxu0 %v3636_v2 }
 0x18a   : > { %1319 = vmatprep.subr.bf16.mxu0 %v3641_v3 }
 0x18d   : > { %1320 = vmatpush1.bf16.msra.mxu0 %v3639_v4 }
 0x18e   : > { %1321 = vmatprep.subr.bf16.mxu0 %v3644_v5 }
 0x191   : > { %1322 = vmatpush1.bf16.msra.mxu0 %v3642_v6 }
 0x192   : > { %1323 = vmatprep.subr.bf16.mxu0 %v3647_v7 }
 0x195   : > { %1324 = vmatpush1.bf16.msra.mxu0 %v3645_v8 }
 0x196   : > { %1325 = vmatprep.subr.bf16.mxu0 %v3650_v9 }
 0x199   : > { %1326 = vmatpush1.bf16.msra.mxu0 %v3648_v10 }
 0x19c   : > { %1328 = vmatmul.mubr.bf16.vlgmr.msra.gmra.mrb[4].mxu0 %v4277_v42 }
 0x22f   : > { %v1247_v15 = vpop.f32.mrb[0].mxu0  ;;  %v1288_v16 = vpop.f32.mrb[0].mxu1 }
 0x230   : > { %v1289_v17 = vadd.f32 %v1288_v16, %v714_v14  ;;  %v1249_v18 = vpop.f32.mrb[1].mxu0  ;;  %v1290_v19 = vpop.f32.mrb[1].mxu1  ;;  %v1248_v28 = vadd.f32 %v1247_v15, %v706_v20  ;;  %v3653_v20 = vld [vmem:[%s5010_s5 + $0x4] ss:$8 sps:$4 sm:$0xff]  }
 0x231   : > { %v1251_v21 = vpop.f32.mrb[2].mxu0  ;;  %v1292_v22 = vpop.f32.mrb[2].mxu1  ;;  %v1291_v61 = vadd.f32 %v1290_v19, %v718_v59  ;;  %v1250_v2 = vadd.f32 %v1249_v18, %v710_v63  ;;  %v3698_v59 = vld [vmem:[%s5010_s5 + $0xf4] ss:$8 sps:$4 sm:$0xff]  }
 0x232   : > { %v1337_v23 = vpack.c.bf16 %v1289_v17, %v1289_v17  ;;  %v1252_v26 = vpop.f32.mrb[3].mxu0  ;;  %v1293_v27 = vpop.f32.mrb[3].mxu1  ;;  %v1336_v29 = vpack.c.bf16 %v1248_v28, %v1248_v28  ;;  %v3656_v28 = vld [vmem:[%s5010_s5 + $0x14] ss:$8 sps:$4 sm:$0xff]  }
 0x233   : > { %v1442_v1 = vpack.c.bf16 %v1291_v61, %v1291_v61  ;;  %v1441_v3 = vpack.c.bf16 %v1250_v2, %v1250_v2  ;;  %v3651_v26 = vld [vmem:[%s5010_s5] ss:$8 sps:$4 sm:$0xff]  }
 0x234   : > { %3468 = vmatpush3.bf16.xpose.msra.mxu1 %v1337_v23 }
 0x235   : > { %3473 = vmatprep.subr.bf16.mxu1 %v3937_v11 }
 0x23b   : > { %3470 = vmatmul.mubr.bf16.vlgmr.msra.gmra.mrb[4].mxu1 %v1336_v29  ;;  %v3654_v29 = vld [vmem:[%s5010_s5 + $0x10] ss:$8 sps:$4 sm:$0xff]  }
 0x23c   : > { %3475 = vmatprep.mubr.msk.bf16.mxu1 %vm3938_vm1, %v3937_v11 }
 0x26f   : > { %v1329_v34 = vpop.f32.mrb[4].mxu0 }
 0x270   : > { %v1330_v35 = vadd.f32 %v1329_v34, %v722_v32  ;;  %v1331_v36 = vpop.f32.mrb[5].mxu0  ;;  %v3662_v32 = vld [vmem:[%s5010_s5 + $0x34] ss:$8 sps:$4 sm:$0xff]   ;;  %v3665_v34 = vld [vmem:[%s5010_s5 + $0x44] ss:$8 sps:$4 sm:$0xff]  }
 0x271   : > { %v1332_v37 = vadd.f32 %v1331_v36, %v726_v33  ;;  %v1333_v38 = vpop.f32.mrb[6].mxu0  ;;  %v3660_v33 = vld [vmem:[%s5010_s5 + $0x30] ss:$8 sps:$4 sm:$0xff]   ;;  %v3668_v36 = vld [vmem:[%s5010_s5 + $0x54] ss:$8 sps:$4 sm:$0xff]  }
 0x272   : > { %v1392_v39 = vpack.c.bf16 %v1330_v35, %v1330_v35  ;;  %v1334_v40 = vpop.f32.mrb[7].mxu0  ;;  %v3663_v35 = vld [vmem:[%s5010_s5 + $0x40] ss:$8 sps:$4 sm:$0xff]   ;;  %v3671_v38 = vld [vmem:[%s5010_s5 + $0x64] ss:$8 sps:$4 sm:$0xff]  }
 0x273   : > { %v1496_v41 = vpack.c.bf16 %v1332_v37, %v1332_v37  ;;  %v3666_v37 = vld [vmem:[%s5010_s5 + $0x50] ss:$8 sps:$4 sm:$0xff]   ;;  %v3674_v40 = vld [vmem:[%s5010_s5 + $0x74] ss:$8 sps:$4 sm:$0xff]  }
 0x274   : > { %v1399_v42 = vsel %vm1397_vm2, %v1392_v39, 0  ;;  %v3669_v39 = vld [vmem:[%s5010_s5 + $0x60] ss:$8 sps:$4 sm:$0xff]  }
 0x275   : > { %v1501_v43 = vsel %vm1397_vm2, %v1496_v41, 0  ;;  %3474 = vmatpush3.bf16.msra.mxu1 %v1399_v42  ;;  %v3672_v41 = vld [vmem:[%s5010_s5 + $0x70] ss:$8 sps:$4 sm:$0xff]   ;;  %v3677_v42 = vld [vmem:[%s5010_s5 + $0x84] ss:$8 sps:$4 sm:$0xff]  }
 0x276   : > { %3479 = vmatprep.subr.bf16.mxu1 %v3937_v11 }
 0x30e   : > { %v1372_v44 = vpop.f32.mrb[4].mxu1 }
 0x30f   : > { %v1378_v45 = vmul.f32 0.088388346, %v1372_v44  ;;  %v3471_v48 = vpop.f32.mrb[5].mxu1  ;;  %v3680_v44 = vld [vmem:[%s5010_s5 + $0x94] ss:$8 sps:$4 sm:$0xff]  }
 0x310   : > { %v1375_v49 = vpop.f32.mrb[6].mxu1  ;;  %v3683_v48 = vld [vmem:[%s5010_s5 + $0xa4] ss:$8 sps:$4 sm:$0xff]  }
 0x311   : > { %v3472_v50 = vpop.f32.mrb[7].mxu1  ;;  %v1380_v51 = vsel %vm1379_vm3, %v1378_v45, -inf  ;;  %v3681_v49 = vld [vmem:[%s5010_s5 + $0xa0] ss:$8 sps:$4 sm:$0xff]  }
 0x312   : > { %1381 = vmax.xlane.f32.xlu1 %v1380_v51  ;;  %v3686_v50 = vld [vmem:[%s5010_s5 + $0xb4] ss:$8 sps:$4 sm:$0xff]   ;;  %v3684_v51 = vld [vmem:[%s5010_s5 + $0xb0] ss:$8 sps:$4 sm:$0xff]  }
 0x39f   : > { %v1382_v52 = vpop.xlane.xlu1 %1381 }
 0x3a0   : > { %v1383_v53 = vsub.f32 %v1378_v45, %v1382_v52  ;;  %v3678_v45 = vld [vmem:[%s5010_s5 + $0x90] ss:$8 sps:$4 sm:$0xff]   ;;  %v3689_v52 = vld [vmem:[%s5010_s5 + $0xc4] ss:$8 sps:$4 sm:$0xff]  }
 0x3a2   : > { %v1384_v54 = vmul.f32 1.442695, %v1383_v53  ;;  %v3687_v53 = vld [vmem:[%s5010_s5 + $0xc0] ss:$8 sps:$4 sm:$0xff]  }
 0x3a4   : > { %3909 = vpow2.f32 %v1384_v54  ;;  %v3692_v54 = vld [vmem:[%s5010_s5 + $0xd4] ss:$8 sps:$4 sm:$0xff]  }
 0x3ae   : > { %v3910_v55 = vpop.eup %3909 }
 0x3af   : > { %v1386_v56 = vsel %vm1379_vm3, %v3910_v55, 0.0 }
 0x3b0   : > { %1387 = vadd.xlane.f32.xlu1 %v1386_v56  ;;  %v3695_v56 = vld [vmem:[%s5010_s5 + $0xe4] ss:$8 sps:$4 sm:$0xff]  }
 0x43d   : > { %v1388_v57 = vpop.xlane.xlu1 %1387 }
 0x43e   : > { %3911 = vrcp.f32 %v1388_v57  ;;  %v3693_v57 = vld [vmem:[%s5010_s5 + $0xe0] ss:$8 sps:$4 sm:$0xff]  }
 0x448   : > { %v3912_v60 = vpop.eup %3911 }
 0x449   : > { %v1390_v62 = vmul.f32 %v3912_v60, %v3910_v55  ;;  %v3690_v55 = vld [vmem:[%s5010_s5 + $0xd0] ss:$8 sps:$4 sm:$0xff]  }
 0x44a   : > { %v3696_v60 = vld [vmem:[%s5010_s5 + $0xf0] ss:$8 sps:$4 sm:$0xff]  }
 0x44b   : > { %v1391_v0 = vpack.c.bf16 %v1390_v62, %v1390_v62 }
 0x44d   : > { %3476 = vmatmul.mubr.msk.bf16.vlgmr.msra.gmra.mrb[8].mxu1 %vm1393_vm4, %v1391_v0 }
 0x44e   : > { %3480 = vmatpush3.bf16.xpose.msra.mxu1 %v1442_v1  ;;  %3481 = vmatprep.mubr.msk.bf16.mxu1 %vm3938_vm1, %v3937_v11 }
 0x44f   : > { %3485 = vmatprep.subr.bf16.mxu1 %v3937_v11 }
 0x455   : > { %3482 = vmatmul.mubr.bf16.vlgmr.msra.gmra.mrb[12].mxu1 %v1441_v3  ;;  %v1783_v3 = vld [vmem:[%s5011_s6] sm:$0x3] }
 0x456   : > { %3486 = vmatpush3.bf16.msra.mxu1 %v1501_v43  ;;  %3487 = vmatprep.mubr.msk.bf16.mxu1 %vm3938_vm1, %v3937_v11  ;;  %v3675_v43 = vld [vmem:[%s5010_s5 + $0x80] ss:$8 sps:$4 sm:$0xff]  }
 0x457   : > { %1737 = vmatprep.subr.bf16.mxu1 %v3653_v20  ;;  %v3699_v20 = vld [vmem:[%s5014_s9] ss:$16 sps:$4 sm:$0xff]  }
 0x520   : > { %v4408_v4 = vpop.f32.mrb[8].mxu1 }
 0x521   : > { %v3477_v5 = vpop.f32.mrb[9].mxu1  ;;  %v1543_v0 = vpack.c.bf16 %v4408_v4, %v4408_v4 }
 0x522   : > { %v1438_v6 = vpop.f32.mrb[10].mxu1  ;;  %v1788_v5 = vrot.slane %v1783_v3, %v4257_v24 }
 0x523   : > { %v3478_v7 = vpop.f32.mrb[11].mxu1  ;;  %v1792_v6 = vrot.slane %v1783_v3, %v4260_v25 }
 0x528   : > { %v1477_v8 = vpop.f32.mrb[12].mxu1 }
 0x529   : > { %v1483_v9 = vmul.f32 0.088388346, %v1477_v8  ;;  %v3483_v10 = vpop.f32.mrb[13].mxu1 }
 0x52a   : > { %v1480_v13 = vpop.f32.mrb[14].mxu1  ;;  %v1793_v10 = vcombine.low %v1788_v5, %v1792_v6 }
 0x52b   : > { %v3484_v14 = vpop.f32.mrb[15].mxu1  ;;  %v1484_v15 = vsel %vm1379_vm3, %v1483_v9, -inf }
 0x52c   : > { %1485 = vmax.xlane.f32.xlu0 %v1484_v15  ;;  %v3927_v15 = vld [vmem:[%s4038_s27] sm:$0xff] }
 0x5b9   : > { %v1486_v16 = vpop.xlane.xlu0 %1485 }
 0x5ba   : > { %v1487_v17 = vsub.f32 %v1483_v9, %v1486_v16 }
 0x5bc   : > { %v1488_v18 = vmul.f32 1.442695, %v1487_v17 }
 0x5be   : > { %3913 = vpow2.f32 %v1488_v18 }
 0x5c8   : > { %v3914_v19 = vpop.eup %3913 }
 0x5c9   : > { %v1490_v11 = vsel %vm1379_vm3, %v3914_v19, 0.0 }
 0x5ca   : > { %1491 = vadd.xlane.f32.xlu1 %v1490_v11 }
 0x657   : > { %v1492_v21 = vpop.xlane.xlu1 %1491 }
 0x658   : > { %3915 = vrcp.f32 %v1492_v21  ;;  %v3701_v21 = vld [vmem:[%s5014_s9 + $0x4] ss:$16 sps:$4 sm:$0xff]  }
 0x659   : > { %2274 = vmatprep.subr.bf16.mxu0 %v3701_v21  ;;  %v3776_v21 = vld [vmem:[%s5014_s9 + $0x18c] ss:$16 sps:$4 sm:$0xff]  }
 0x65a   : > { %2275 = vmatpush1.bf16.msra.mxu0 %v3699_v20  ;;  %v3773_v20 = vld [vmem:[%s5014_s9 + $0x184] ss:$16 sps:$4 sm:$0xff]  }
 0x662   : > { %v3916_v22 = vpop.eup %3915 }
 0x663   : > { %v1494_v23 = vmul.f32 %v3916_v22, %v3914_v19  ;;  %v3702_v22 = vld [vmem:[%s5014_s9 + $0x8] ss:$16 sps:$4 sm:$0xff]  }
 0x665   : > { %v1495_v27 = vpack.c.bf16 %v1494_v23, %v1494_v23  ;;  %v3704_v23 = vld [vmem:[%s5014_s9 + $0xc] ss:$16 sps:$4 sm:$0xff]  }
 0x667   : > { %3488 = vmatmul.mubr.msk.bf16.vlgmr.msra.gmra.mrb[16].mxu1 %vm1393_vm4, %v1495_v27  ;;  %v3710_v27 = vld [vmem:[%s5014_s9 + $0x2c] ss:$16 sps:$4 sm:$0xff]  }
 0x668   : > { %1738 = vmatpush1.bf16.msra.mxu1 %v3651_v26  ;;  %v3707_v26 = vld [vmem:[%s5014_s9 + $0x24] ss:$16 sps:$4 sm:$0xff]  }
 0x669   : > { %1739 = vmatprep.subr.bf16.mxu1 %v3656_v28  ;;  %v3705_v28 = vld [vmem:[%s5014_s9 + $0x20] ss:$16 sps:$4 sm:$0xff]   ;;  %2276 = vmatprep.subr.bf16.mxu0 %v3707_v26 }
 0x66a   : > { %2277 = vmatpush1.bf16.msra.mxu0 %v3705_v28  ;;  %v3777_v26 = vld [vmem:[%s5014_s9 + $0x1a0] ss:$16 sps:$4 sm:$0xff]   ;;  %v3780_v28 = vld [vmem:[%s5014_s9 + $0x1a8] ss:$16 sps:$4 sm:$0xff]  }
 0x66c   : > { %1740 = vmatpush1.bf16.msra.mxu1 %v3654_v29  ;;  %v3708_v29 = vld [vmem:[%s5014_s9 + $0x28] ss:$16 sps:$4 sm:$0xff]  }
 0x66d   : > { %1741 = vmatprep.subr.bf16.mxu1 %v3659_v30  ;;  %v3713_v30 = vld [vmem:[%s5014_s9 + $0x44] ss:$16 sps:$4 sm:$0xff]  }
 0x66e   : > { %2278 = vmatprep.subr.bf16.mxu0 %v3713_v30  ;;  %v3785_v30 = vld [vmem:[%s5014_s9 + $0x1c4] ss:$16 sps:$4 sm:$0xff]  }
 0x670   : > { %1742 = vmatpush1.bf16.msra.mxu1 %v3657_v31  ;;  %v3716_v31 = vld [vmem:[%s5014_s9 + $0x4c] ss:$16 sps:$4 sm:$0xff]  }
 0x671   : > { %1743 = vmatprep.subr.bf16.mxu1 %v3662_v32  ;;  %v3711_v32 = vld [vmem:[%s5014_s9 + $0x40] ss:$16 sps:$4 sm:$0xff]  }
 0x672   : > { %2279 = vmatpush1.bf16.msra.mxu0 %v3711_v32  ;;  %v3783_v32 = vld [vmem:[%s5014_s9 + $0x1c0] ss:$16 sps:$4 sm:$0xff]  }
 0x674   : > { %1744 = vmatpush1.bf16.msra.mxu1 %v3660_v33  ;;  %v3714_v33 = vld [vmem:[%s5014_s9 + $0x48] ss:$16 sps:$4 sm:$0xff]  }
 0x675   : > { %1745 = vmatprep.subr.bf16.mxu1 %v3665_v34  ;;  %v3719_v34 = vld [vmem:[%s5014_s9 + $0x64] ss:$16 sps:$4 sm:$0xff]  }
 0x676   : > { %2280 = vmatprep.subr.bf16.mxu0 %v3719_v34  ;;  %v3791_v34 = vld [vmem:[%s5014_s9 + $0x1e4] ss:$16 sps:$4 sm:$0xff]  }
 0x678   : > { %1746 = vmatpush1.bf16.msra.mxu1 %v3663_v35  ;;  %v3722_v35 = vld [vmem:[%s5014_s9 + $0x6c] ss:$16 sps:$4 sm:$0xff]  }
 0x679   : > { %1747 = vmatprep.subr.bf16.mxu1 %v3668_v36  ;;  %v3717_v36 = vld [vmem:[%s5014_s9 + $0x60] ss:$16 sps:$4 sm:$0xff]  }
 0x67a   : > { %2281 = vmatpush1.bf16.msra.mxu0 %v3717_v36  ;;  %v3789_v36 = vld [vmem:[%s5014_s9 + $0x1e0] ss:$16 sps:$4 sm:$0xff]  }
 0x67c   : > { %1748 = vmatpush1.bf16.msra.mxu1 %v3666_v37  ;;  %v3720_v37 = vld [vmem:[%s5014_s9 + $0x68] ss:$16 sps:$4 sm:$0xff]  }
 0x67d   : > { %1749 = vmatprep.subr.bf16.mxu1 %v3671_v38  ;;  %v3725_v38 = vld [vmem:[%s5014_s9 + $0x84] ss:$16 sps:$4 sm:$0xff]  }
 0x67e   : > { %2282 = vmatprep.subr.bf16.mxu0 %v3725_v38  ;;  %v3797_v38 = vld [vmem:[%s5016_s11 + $0x4] ss:$8 sps:$4 sm:$0xff]  }
 0x680   : > { %1750 = vmatpush1.bf16.msra.mxu1 %v3669_v39  ;;  %v3728_v39 = vld [vmem:[%s5014_s9 + $0x8c] ss:$16 sps:$4 sm:$0xff]  }
 0x681   : > { %1751 = vmatprep.subr.bf16.mxu1 %v3674_v40  ;;  %v3723_v40 = vld [vmem:[%s5014_s9 + $0x80] ss:$16 sps:$4 sm:$0xff]  }
 0x682   : > { %2283 = vmatpush1.bf16.msra.mxu0 %v3723_v40 }
 0x684   : > { %1752 = vmatpush1.bf16.msra.mxu1 %v3672_v41  ;;  %v3726_v41 = vld [vmem:[%s5014_s9 + $0x88] ss:$16 sps:$4 sm:$0xff]  }
 0x685   : > { %1753 = vmatprep.subr.bf16.mxu1 %v3677_v42  ;;  %v3731_v42 = vld [vmem:[%s5014_s9 + $0xa4] ss:$16 sps:$4 sm:$0xff]  }
 0x686   : > { %2284 = vmatprep.subr.bf16.mxu0 %v3731_v42  ;;  %v1796_v42 = vld [vmem:[%s5012_s7] sm:$0x3] }
 0x688   : > { %1754 = vmatpush1.bf16.msra.mxu1 %v3675_v43  ;;  %v3734_v43 = vld [vmem:[%s5014_s9 + $0xac] ss:$16 sps:$4 sm:$0xff]  }
 0x689   : > { %1755 = vmatprep.subr.bf16.mxu1 %v3680_v44  ;;  %v3729_v44 = vld [vmem:[%s5014_s9 + $0xa0] ss:$16 sps:$4 sm:$0xff]  }
 0x68a   : > { %2285 = vmatpush1.bf16.msra.mxu0 %v3729_v44  ;;  %v1843_v44 = vrot.slane %v1796_v42, %v4257_v24 }
 0x68c   : > { %1756 = vmatpush1.bf16.msra.mxu1 %v3678_v45  ;;  %v3732_v45 = vld [vmem:[%s5014_s9 + $0xa8] ss:$16 sps:$4 sm:$0xff]  }
 0x68d   : > { %1757 = vmatprep.subr.bf16.mxu1 %v3683_v48  ;;  %v3737_v48 = vld [vmem:[%s5014_s9 + $0xc4] ss:$16 sps:$4 sm:$0xff]  }
 0x68e   : > { %2286 = vmatprep.subr.bf16.mxu0 %v3737_v48 }
 0x690   : > { %1758 = vmatpush1.bf16.msra.mxu1 %v3681_v49  ;;  %v3740_v49 = vld [vmem:[%s5014_s9 + $0xcc] ss:$16 sps:$4 sm:$0xff]  }
 0x691   : > { %1759 = vmatprep.subr.bf16.mxu1 %v3686_v50  ;;  %v3735_v50 = vld [vmem:[%s5014_s9 + $0xc0] ss:$16 sps:$4 sm:$0xff]  }
 0x692   : > { %2287 = vmatpush1.bf16.msra.mxu0 %v3735_v50 }
 0x694   : > { %1760 = vmatpush1.bf16.msra.mxu1 %v3684_v51  ;;  %v3738_v51 = vld [vmem:[%s5014_s9 + $0xc8] ss:$16 sps:$4 sm:$0xff]  }
 0x695   : > { %1761 = vmatprep.subr.bf16.mxu1 %v3689_v52  ;;  %v3743_v52 = vld [vmem:[%s5014_s9 + $0xe4] ss:$16 sps:$4 sm:$0xff]  }
 0x696   : > { %2288 = vmatprep.subr.bf16.mxu0 %v3743_v52 }
 0x698   : > { %1762 = vmatpush1.bf16.msra.mxu1 %v3687_v53  ;;  %v3746_v53 = vld [vmem:[%s5014_s9 + $0xec] ss:$16 sps:$4 sm:$0xff]  }
 0x699   : > { %1763 = vmatprep.subr.bf16.mxu1 %v3692_v54  ;;  %v3741_v54 = vld [vmem:[%s5014_s9 + $0xe0] ss:$16 sps:$4 sm:$0xff]  }
 0x69a   : > { %2289 = vmatpush1.bf16.msra.mxu0 %v3741_v54 }
 0x69c   : > { %1764 = vmatpush1.bf16.msra.mxu1 %v3690_v55  ;;  %v3744_v55 = vld [vmem:[%s5014_s9 + $0xe8] ss:$16 sps:$4 sm:$0xff]  }
 0x69d   : > { %1765 = vmatprep.subr.bf16.mxu1 %v3695_v56  ;;  %v3749_v56 = vld [vmem:[%s5014_s9 + $0x104] ss:$16 sps:$4 sm:$0xff]  }
 0x69e   : > { %2290 = vmatprep.subr.bf16.mxu0 %v3749_v56 }
 0x6a0   : > { %1766 = vmatpush1.bf16.msra.mxu1 %v3693_v57  ;;  %v3752_v57 = vld [vmem:[%s5014_s9 + $0x10c] ss:$16 sps:$4 sm:$0xff]  }
 0x6a1   : > { %1767 = vmatprep.subr.bf16.mxu1 %v3698_v59  ;;  %v3747_v59 = vld [vmem:[%s5014_s9 + $0x100] ss:$16 sps:$4 sm:$0xff]  }
 0x6a2   : > { %2291 = vmatpush1.bf16.msra.mxu0 %v3747_v59 }
 0x6a4   : > { %1768 = vmatpush1.bf16.msra.mxu1 %v3696_v60  ;;  %v3750_v60 = vld [vmem:[%s5014_s9 + $0x108] ss:$16 sps:$4 sm:$0xff]  }
 0x6a5   : > { %2315 = vmatprep.subr.bf16.mxu1 %v3704_v23  ;;  %v3774_v23 = vld [vmem:[%s5014_s9 + $0x188] ss:$16 sps:$4 sm:$0xff]  }
 0x73a   : > { %v1537_v61 = vpop.f32.mrb[16].mxu1 }
 0x73b   : > { %v1544_v62 = vpack.c.bf16 %v1537_v61, %v1537_v61  ;;  %v3489_v63 = vpop.f32.mrb[17].mxu1 }
 0x73c   : > { %v1540_v1 = vpop.f32.mrb[18].mxu1 }
 0x73d   : > { %v3490_v2 = vpop.f32.mrb[19].mxu1  ;;  %1769 = vmatprep.mubr.bf16.mxu1 %v1544_v62 }
 0x73e   : > { %1770 = vmatmul.mubr.bf16.vlgmr.msra.gmra.mrb[20].mxu1 %v1543_v0 }
 0x73f   : > { %2316 = vmatpush1.bf16.msra.mxu1 %v3702_v22  ;;  %v3771_v22 = vld [vmem:[%s5014_s9 + $0x180] ss:$16 sps:$4 sm:$0xff]  }
 0x740   : > { %2317 = vmatprep.subr.bf16.mxu1 %v3710_v27  ;;  %v3779_v27 = vld [vmem:[%s5014_s9 + $0x1a4] ss:$16 sps:$4 sm:$0xff]  }
 0x743   : > { %2318 = vmatpush1.bf16.msra.mxu1 %v3708_v29  ;;  %v3782_v29 = vld [vmem:[%s5014_s9 + $0x1ac] ss:$16 sps:$4 sm:$0xff]  }
 0x744   : > { %2319 = vmatprep.subr.bf16.mxu1 %v3716_v31  ;;  %v3788_v31 = vld [vmem:[%s5014_s9 + $0x1cc] ss:$16 sps:$4 sm:$0xff]  }
 0x747   : > { %2320 = vmatpush1.bf16.msra.mxu1 %v3714_v33  ;;  %v3786_v33 = vld [vmem:[%s5014_s9 + $0x1c8] ss:$16 sps:$4 sm:$0xff]  }
 0x748   : > { %2321 = vmatprep.subr.bf16.mxu1 %v3722_v35  ;;  %v3794_v35 = vld [vmem:[%s5014_s9 + $0x1ec] ss:$16 sps:$4 sm:$0xff]  }
 0x74b   : > { %2322 = vmatpush1.bf16.msra.mxu1 %v3720_v37  ;;  %v3792_v37 = vld [vmem:[%s5014_s9 + $0x1e8] ss:$16 sps:$4 sm:$0xff]  }
 0x74c   : > { %2323 = vmatprep.subr.bf16.mxu1 %v3728_v39 }
 0x74f   : > { %2324 = vmatpush1.bf16.msra.mxu1 %v3726_v41 }
 0x750   : > { %2325 = vmatprep.subr.bf16.mxu1 %v3734_v43  ;;  %v1797_v43 = vld [vmem:[%s5013_s8] sm:$0x3] }
 0x751   : > { %v1855_v48 = vrot.slane %v1797_v43, %v4257_v24 }
 0x753   : > { %2326 = vmatpush1.bf16.msra.mxu1 %v3732_v45  ;;  %v1847_v45 = vrot.slane %v1796_v42, %v4260_v25  ;;  %v1932_v42 = vld [vmem:[%s5015_s10] sm:$0xf] }
 0x754   : > { %2327 = vmatprep.subr.bf16.mxu1 %v3740_v49  ;;  %v1859_v49 = vrot.slane %v1797_v43, %v4260_v25  ;;  %v1937_v43 = vrot.slane %v1932_v42, %v4257_v24 }
 0x755   : > { %v1848_v52 = vcombine.low %v1843_v44, %v1847_v45  ;;  %v1941_v44 = vrot.slane %v1932_v42, %v4260_v25  ;;  %v1949_v45 = vrot.slane %v1932_v42, %v717_v58 }
 0x756   : > { %v1860_v54 = vcombine.low %v1855_v48, %v1859_v49 }
 0x757   : > { %2328 = vmatpush1.bf16.msra.mxu1 %v3738_v51 }
 0x758   : > { %2329 = vmatprep.subr.bf16.mxu1 %v3746_v53 }
 0x75b   : > { %2330 = vmatpush1.bf16.msra.mxu1 %v3744_v55 }
 0x75c   : > { %2331 = vmatprep.subr.bf16.mxu1 %v3752_v57 }
 0x75f   : > { %2332 = vmatpush1.bf16.msra.mxu1 %v3750_v60  ;;  %v3795_v60 = vld [vmem:[%s5016_s11] ss:$8 sps:$4 sm:$0xff]  }
 0x811   : > { %v1771_v7 = vpop.f32.mrb[20].mxu1 }
 0x812   : > { %v1773_v8 = vpop.f32.mrb[21].mxu1 }
 0x813   : > { %v1780_v9 = vcombine.low %v1771_v7, %v1773_v8  ;;  %v1775_v13 = vpop.f32.mrb[22].mxu1  ;;  %v3755_v7 = vld [vmem:[%s5014_s9 + $0x124] ss:$16 sps:$4 sm:$0xff]   ;;  %v3758_v8 = vld [vmem:[%s5014_s9 + $0x12c] ss:$16 sps:$4 sm:$0xff]  }
 0x814   : > { %v1776_v14 = vpop.f32.mrb[23].mxu1  ;;  %2292 = vmatprep.subr.bf16.mxu0 %v3755_v7  ;;  %2333 = vmatprep.subr.bf16.mxu1 %v3758_v8  ;;  %v3761_v13 = vld [vmem:[%s5014_s9 + $0x144] ss:$16 sps:$4 sm:$0xff]   ;;  %v3810_v7 = vld [vmem:[%s5016_s11 + $0x50] ss:$8 sps:$4 sm:$0xff]  }
 0x815   : > { %v1782_v4 = vadd.f32 %v3927_v15, %v1780_v9  ;;  %v3753_v9 = vld [vmem:[%s5014_s9 + $0x120] ss:$16 sps:$4 sm:$0xff]   ;;  %v3764_v14 = vld [vmem:[%s5014_s9 + $0x14c] ss:$16 sps:$4 sm:$0xff]  }
 0x816   : > { %2293 = vmatpush1.bf16.msra.mxu0 %v3753_v9  ;;  %v3759_v15 = vld [vmem:[%s5014_s9 + $0x140] ss:$16 sps:$4 sm:$0xff]   ;;  %v3815_v8 = vld [vmem:[%s5016_s11 + $0x64] ss:$8 sps:$4 sm:$0xff]  }
 0x817   : > { %v4517_v16 = vadd.f32 %v1793_v10, %v1782_v4  ;;  %v3756_v10 = vld [vmem:[%s5014_s9 + $0x128] ss:$16 sps:$4 sm:$0xff]   ;;  %2294 = vmatprep.subr.bf16.mxu0 %v3761_v13 }
 0x818   : > { %2334 = vmatpush1.bf16.msra.mxu1 %v3756_v10  ;;  %v3762_v4 = vld [vmem:[%s5014_s9 + $0x148] ss:$16 sps:$4 sm:$0xff]   ;;  %v3818_v10 = vld [vmem:[%s5016_s11 + $0x74] ss:$8 sps:$4 sm:$0xff]  }
 0x819   : > { %v1799_v17 = vcombine.high %v4517_v16, %v4517_v16  ;;  %v1801_v18 = vsel %vm536_vm0, %v4517_v16, 0.0  ;;  %2335 = vmatprep.subr.bf16.mxu1 %v3764_v14  ;;  %v3813_v9 = vld [vmem:[%s5016_s11 + $0x60] ss:$8 sps:$4 sm:$0xff]   ;;  %v3816_v13 = vld [vmem:[%s5016_s11 + $0x70] ss:$8 sps:$4 sm:$0xff]  }
 0x81a   : > { %2295 = vmatpush1.bf16.msra.mxu0 %v3759_v15  ;;  %v3821_v14 = vld [vmem:[%s5016_s11 + $0x84] ss:$8 sps:$4 sm:$0xff]   ;;  %v3819_v15 = vld [vmem:[%s5016_s11 + $0x80] ss:$8 sps:$4 sm:$0xff]  }
 0x81b   : > { %v1802_v19 = vsel %vm536_vm0, %v1799_v17, 0.0  ;;  %v3767_v17 = vld [vmem:[%s5014_s9 + $0x164] ss:$16 sps:$4 sm:$0xff]  }
 0x81c   : > { %v1803_v11 = vadd.f32 %v1802_v19, %v1801_v18  ;;  %2336 = vmatpush1.bf16.msra.mxu1 %v3762_v4  ;;  %v3770_v18 = vld [vmem:[%s5014_s9 + $0x16c] ss:$16 sps:$4 sm:$0xff]   ;;  %v3765_v19 = vld [vmem:[%s5014_s9 + $0x160] ss:$16 sps:$4 sm:$0xff]   ;;  %2296 = vmatprep.subr.bf16.mxu0 %v3767_v17 }
 0x81d   : > { %2337 = vmatprep.subr.bf16.mxu1 %v3770_v18  ;;  %v3824_v4 = vld [vmem:[%s5016_s11 + $0x94] ss:$8 sps:$4 sm:$0xff]   ;;  %v3822_v17 = vld [vmem:[%s5016_s11 + $0x90] ss:$8 sps:$4 sm:$0xff]   ;;  %v3827_v18 = vld [vmem:[%s5016_s11 + $0xa4] ss:$8 sps:$4 sm:$0xff]  }
 0x81e   : > { %1804 = vadd.xlane.f32.xlu0 %v1803_v11  ;;  %v3768_v11 = vld [vmem:[%s5014_s9 + $0x168] ss:$16 sps:$4 sm:$0xff]   ;;  %2297 = vmatpush1.bf16.msra.mxu0 %v3765_v19 }
 0x81f   : > { %2298 = vmatprep.subr.bf16.mxu0 %v3773_v20  ;;  %v3825_v19 = vld [vmem:[%s5016_s11 + $0xa0] ss:$8 sps:$4 sm:$0xff]   ;;  %v3828_v20 = vld [vmem:[%s5016_s11 + $0xb0] ss:$8 sps:$4 sm:$0xff]  }
 0x820   : > { %2338 = vmatpush1.bf16.msra.mxu1 %v3768_v11  ;;  %v3830_v11 = vld [vmem:[%s5016_s11 + $0xb4] ss:$8 sps:$4 sm:$0xff]  }
 0x821   : > { %2339 = vmatprep.subr.bf16.mxu1 %v3776_v21  ;;  %v3831_v21 = vld [vmem:[%s5016_s11 + $0xc0] ss:$8 sps:$4 sm:$0xff]  }
 0x822   : > { %2299 = vmatpush1.bf16.msra.mxu0 %v3771_v22  ;;  %v3833_v22 = vld [vmem:[%s5016_s11 + $0xc4] ss:$8 sps:$4 sm:$0xff]  }
 0x823   : > { %2300 = vmatprep.subr.bf16.mxu0 %v3779_v27  ;;  %v3839_v27 = vld [vmem:[%s5016_s11 + $0xe4] ss:$8 sps:$4 sm:$0xff]  }
 0x824   : > { %2340 = vmatpush1.bf16.msra.mxu1 %v3774_v23  ;;  %v3836_v23 = vld [vmem:[%s5016_s11 + $0xd4] ss:$8 sps:$4 sm:$0xff]  }
 0x825   : > { %2341 = vmatprep.subr.bf16.mxu1 %v3782_v29  ;;  %v3842_v29 = vld [vmem:[%s5016_s11 + $0xf4] ss:$8 sps:$4 sm:$0xff]  }
 0x826   : > { %2301 = vmatpush1.bf16.msra.mxu0 %v3777_v26  ;;  %v3834_v26 = vld [vmem:[%s5016_s11 + $0xd0] ss:$8 sps:$4 sm:$0xff]  }
 0x827   : > { %2302 = vmatprep.subr.bf16.mxu0 %v3785_v30  ;;  %v3840_v30 = vld [vmem:[%s5016_s11 + $0xf0] ss:$8 sps:$4 sm:$0xff]  }
 0x828   : > { %2342 = vmatpush1.bf16.msra.mxu1 %v3780_v28  ;;  %v3837_v28 = vld [vmem:[%s5016_s11 + $0xe0] ss:$8 sps:$4 sm:$0xff]  }
 0x829   : > { %2343 = vmatprep.subr.bf16.mxu1 %v3788_v31  ;;  %v3845_v31 = vld [vmem:[%s5016_s11 + $0x104] ss:$8 sps:$4 sm:$0xff]  }
 0x82a   : > { %2303 = vmatpush1.bf16.msra.mxu0 %v3783_v32  ;;  %v3891_v32 = vld [vmem:[%s5018_s13 + $0x40] sm:$0xff]  }
 0x82b   : > { %2304 = vmatprep.subr.bf16.mxu0 %v3791_v34  ;;  %v3893_v34 = vld [vmem:[%s5018_s13 + $0x48] sm:$0xff]  }
 0x82c   : > { %2344 = vmatpush1.bf16.msra.mxu1 %v3786_v33  ;;  %v3892_v33 = vld [vmem:[%s5018_s13] sm:$0xff]  }
 0x82d   : > { %2345 = vmatprep.subr.bf16.mxu1 %v3794_v35  ;;  %v3894_v35 = vld [vmem:[%s5018_s13 + $0x8] sm:$0xff]  }
 0x82e   : > { %2305 = vmatpush1.bf16.msra.mxu0 %v3789_v36  ;;  %v3895_v36 = vld [vmem:[%s5018_s13 + $0x50] sm:$0xff]  }
 0x82f   : > { %2780 = vmatprep.subr.bf16.mxu0 %v3797_v38  ;;  %v3897_v38 = vld [vmem:[%s5018_s13 + $0x58] sm:$0xff]  }
 0x830   : > { %2346 = vmatpush1.bf16.msra.mxu1 %v3792_v37  ;;  %v3896_v37 = vld [vmem:[%s5018_s13 + $0x10] sm:$0xff]  }
 0x831   : > { %3445 = vmatprep.subr.bf16.mxu1 %v3891_v32  ;;  %v3849_v32 = vld [vmem:[%s5016_s11 + $0x120] ss:$8 sps:$4 sm:$0xff]  }
 0x8ab   : > { %v1805_v61 = vpop.xlane.xlu0 %1804 }
 0x8ac   : > { %v1806_v62 = vmul.f32 0.00390625, %v1805_v61 }
 0x8ae   : > { %v1814_v63 = vrot.slane %v1806_v62, %v4162_v47  ;;  %v3800_v62 = vld [vmem:[%s5016_s11 + $0x14] ss:$8 sps:$4 sm:$0xff]  }
 0x8b0   : > { %v4634_v0 = vsub.f32 %v4517_v16, %v1814_v63  ;;  %v3803_v63 = vld [vmem:[%s5016_s11 + $0x24] ss:$8 sps:$4 sm:$0xff]  }
 0x8b2   : > { %v1817_v1 = vmul.f32 %v4634_v0, %v4634_v0 }
 0x8b4   : > { %v1819_v2 = vcombine.high %v1817_v1, %v1817_v1  ;;  %v1821_v3 = vsel %vm536_vm0, %v1817_v1, 0.0  ;;  %v3806_v1 = vld [vmem:[%s5016_s11 + $0x34] ss:$8 sps:$4 sm:$0xff]  }
 0x8b6   : > { %v1822_v5 = vsel %vm536_vm0, %v1819_v2, 0.0  ;;  %v3804_v2 = vld [vmem:[%s5016_s11 + $0x30] ss:$8 sps:$4 sm:$0xff]  }
 0x8b7   : > { %v1823_v6 = vadd.f32 %v1822_v5, %v1821_v3  ;;  %v3809_v3 = vld [vmem:[%s5016_s11 + $0x44] ss:$8 sps:$4 sm:$0xff]   ;;  %v3807_v5 = vld [vmem:[%s5016_s11 + $0x40] ss:$8 sps:$4 sm:$0xff]  }
 0x8b9   : > { %1824 = vadd.xlane.f32.xlu1 %v1823_v6  ;;  %v3812_v6 = vld [vmem:[%s5016_s11 + $0x54] ss:$8 sps:$4 sm:$0xff]  }
 0x946   : > { %v1825_v39 = vpop.xlane.xlu1 %1824 }
 0x947   : > { %v1826_v40 = vmul.f32 0.00390625, %v1825_v39  ;;  %v3898_v39 = vld [vmem:[%s5018_s13 + $0x18] sm:$0xff]  }
 0x949   : > { %v1827_v41 = vadd.f32 1e-05, %v1826_v40  ;;  %v3899_v40 = vld [vmem:[%s5018_s13 + $0x60] sm:$0xff]  }
 0x94b   : > { %3917 = vrsqrt.f32 %v1827_v41  ;;  %v3900_v41 = vld [vmem:[%s5018_s13 + $0x20] sm:$0xff]  }
 0x955   : > { %v3918_v50 = vpop.eup %3917 }
 0x956   : > { %v1836_v51 = vrot.slane %v3918_v50, %v4162_v47  ;;  %v3798_v47 = vld [vmem:[%s5016_s11 + $0x10] ss:$8 sps:$4 sm:$0xff]  }
 0x958   : > { %v1838_v53 = vmul.f32 %v1836_v51, %v4634_v0  ;;  %v3801_v0 = vld [vmem:[%s5016_s11 + $0x20] ss:$8 sps:$4 sm:$0xff]  }
 0x95a   : > { %v1850_v55 = vmul.f32 %v1848_v52, %v1838_v53 }
 0x95c   : > { %v1862_v56 = vadd.f32 %v1860_v54, %v1850_v55 }
 0x95e   : > { %v1864_v57 = vcombine.high %v1862_v56, %v1862_v56  ;;  %v1866_v61 = vpack.c.bf16 %v1862_v56, %v1862_v56 }
 0x960   : > { %v1867_v59 = vpack.c.bf16 %v1864_v57, %v1864_v57 }
 0x962   : > { %2306 = vmatprep.mubr.bf16.mxu0 %v1867_v59  ;;  %2347 = vmatprep.mubr.bf16.mxu1 %v1867_v59 }
 0x963   : > { %2307 = vmatmul.mubr.bf16.vlgmr.msra.gmra.mrb[8].mxu0 %v1866_v61  ;;  %2348 = vmatmul.mubr.bf16.vlgmr.msra.gmra.mrb[24].mxu1 %v1866_v61 }
 0x964   : > { %2781 = vmatpush1.bf16.msra.mxu0 %v3795_v60  ;;  %3446 = vmatpush3.bf16.msra.mxu1 %v3892_v33  ;;  %v3854_v33 = vld [vmem:[%s5016_s11 + $0x134] ss:$8 sps:$4 sm:$0xff]  }
 0x965   : > { %2782 = vmatprep.subr.bf16.mxu0 %v3800_v62  ;;  %3447 = vmatprep.subr.bf16.mxu1 %v3893_v34  ;;  %v1945_v34 = vrot.slane %v1932_v42, %v713_v12  ;;  %v3861_v42 = vld [vmem:[%s5016_s11 + $0x160] ss:$8 sps:$4 sm:$0xff]  }
 0x968   : > { %2783 = vmatpush1.bf16.msra.mxu0 %v3798_v47  ;;  %3448 = vmatpush3.bf16.msra.mxu1 %v3894_v35  ;;  %v3852_v35 = vld [vmem:[%s5016_s11 + $0x130] ss:$8 sps:$4 sm:$0xff]  }
 0x969   : > { %2784 = vmatprep.subr.bf16.mxu0 %v3803_v63  ;;  %3449 = vmatprep.subr.bf16.mxu1 %v3895_v36  ;;  %v3857_v36 = vld [vmem:[%s5016_s11 + $0x144] ss:$8 sps:$4 sm:$0xff]  }
 0x96c   : > { %2785 = vmatpush1.bf16.msra.mxu0 %v3801_v0  ;;  %3450 = vmatpush3.bf16.msra.mxu1 %v3896_v37 }
 0x96d   : > { %2786 = vmatprep.subr.bf16.mxu0 %v3806_v1  ;;  %3451 = vmatprep.subr.bf16.mxu1 %v3897_v38  ;;  %v3855_v38 = vld [vmem:[%s5016_s11 + $0x140] ss:$8 sps:$4 sm:$0xff]  }
 0x970   : > { %2787 = vmatpush1.bf16.msra.mxu0 %v3804_v2  ;;  %3452 = vmatpush3.bf16.msra.mxu1 %v3898_v39  ;;  %v3858_v39 = vld [vmem:[%s5016_s11 + $0x150] ss:$8 sps:$4 sm:$0xff]  }
 0x971   : > { %2788 = vmatprep.subr.bf16.mxu0 %v3809_v3  ;;  %3453 = vmatprep.subr.bf16.mxu1 %v3899_v40  ;;  %v3863_v40 = vld [vmem:[%s5016_s11 + $0x164] ss:$8 sps:$4 sm:$0xff]  }
 0x974   : > { %2789 = vmatpush1.bf16.msra.mxu0 %v3807_v5  ;;  %3454 = vmatpush3.bf16.msra.mxu1 %v3900_v41 }
 0x975   : > { %2790 = vmatprep.subr.bf16.mxu0 %v3812_v6 }
 0x978   : > { %2791 = vmatpush1.bf16.msra.mxu0 %v3810_v7 }
 0x979   : > { %2792 = vmatprep.subr.bf16.mxu0 %v3815_v8 }
 0x97c   : > { %2793 = vmatpush1.bf16.msra.mxu0 %v3813_v9 }
 0x97d   : > { %2794 = vmatprep.subr.bf16.mxu0 %v3818_v10 }
 0x980   : > { %2795 = vmatpush1.bf16.msra.mxu0 %v3816_v13 }
 0x981   : > { %2796 = vmatprep.subr.bf16.mxu0 %v3821_v14 }
 0x984   : > { %2797 = vmatpush1.bf16.msra.mxu0 %v3819_v15 }
 0x985   : > { %2798 = vmatprep.subr.bf16.mxu0 %v3824_v4 }
 0x988   : > { %2799 = vmatpush1.bf16.msra.mxu0 %v3822_v17 }
 0x989   : > { %2800 = vmatprep.subr.bf16.mxu0 %v3827_v18 }
 0x98c   : > { %2801 = vmatpush1.bf16.msra.mxu0 %v3825_v19 }
 0x98d   : > { %2802 = vmatprep.subr.bf16.mxu0 %v3830_v11 }
 0x990   : > { %2803 = vmatpush1.bf16.msra.mxu0 %v3828_v20 }
 0x991   : > { %2804 = vmatprep.subr.bf16.mxu0 %v3833_v22 }
 0x994   : > { %2805 = vmatpush1.bf16.msra.mxu0 %v3831_v21 }
 0x995   : > { %2806 = vmatprep.subr.bf16.mxu0 %v3836_v23 }
 0x998   : > { %2807 = vmatpush1.bf16.msra.mxu0 %v3834_v26  ;;  %v3843_v26 = vld [vmem:[%s5016_s11 + $0x100] ss:$8 sps:$4 sm:$0xff]  }
 0x999   : > { %2808 = vmatprep.subr.bf16.mxu0 %v3839_v27 }
 0x99c   : > { %2809 = vmatpush1.bf16.msra.mxu0 %v3837_v28  ;;  %v3848_v28 = vld [vmem:[%s5016_s11 + $0x114] ss:$8 sps:$4 sm:$0xff]  }
 0x99d   : > { %2810 = vmatprep.subr.bf16.mxu0 %v3842_v29 }
 0x9a0   : > { %2811 = vmatpush1.bf16.msra.mxu0 %v3840_v30  ;;  %v3846_v30 = vld [vmem:[%s5016_s11 + $0x110] ss:$8 sps:$4 sm:$0xff]  }
 0x9a1   : > { %2821 = vmatprep.subr.bf16.mxu0 %v3845_v31  ;;  %v3851_v31 = vld [vmem:[%s5016_s11 + $0x124] ss:$8 sps:$4 sm:$0xff]  }
 0xa36   : > { %v2308_v48 = vpop.f32.mrb[8].mxu0  ;;  %v2349_v49 = vpop.f32.mrb[24].mxu1 }
 0xa37   : > { %v2309_v50 = vadd.f32 %v2308_v48, %v1937_v43  ;;  %v2310_v51 = vpop.f32.mrb[9].mxu0  ;;  %v2351_v52 = vpop.f32.mrb[25].mxu1  ;;  %v2350_v37 = vadd.f32 %v2349_v49, %v1945_v34  ;;  %v3866_v43 = vld [vmem:[%s5016_s11 + $0x174] ss:$8 sps:$4 sm:$0xff]   ;;  %v3869_v48 = vld [vmem:[%s5016_s11 + $0x184] ss:$8 sps:$4 sm:$0xff]  }
 0xa38   : > { %v2311_v53 = vadd.f32 %v2310_v51, %v1941_v44  ;;  %v2352_v54 = vadd.f32 %v2351_v52, %v1949_v45  ;;  %v2312_v55 = vpop.f32.mrb[10].mxu0  ;;  %v2353_v56 = vpop.f32.mrb[26].mxu1  ;;  %v3864_v45 = vld [vmem:[%s5016_s11 + $0x170] ss:$8 sps:$4 sm:$0xff]   ;;  %v3872_v51 = vld [vmem:[%s5016_s11 + $0x194] ss:$8 sps:$4 sm:$0xff]  }
 0xa39   : > { %v2356_v57 = vmul.f32 %v2309_v50, %v2309_v50  ;;  %v2313_v59 = vpop.f32.mrb[11].mxu0  ;;  %v2354_v60 = vpop.f32.mrb[27].mxu1  ;;  %v2358_v12 = vmul.f32 %v2350_v37, %v2350_v37  ;;  %v3873_v55 = vld [vmem:[%s5016_s11 + $0x1a0] ss:$8 sps:$4 sm:$0xff]   ;;  %v3878_v56 = vld [vmem:[%s5016_s11 + $0x1b4] ss:$8 sps:$4 sm:$0xff]  }
 0xa3a   : > { %v2357_v61 = vmul.f32 %v2311_v53, %v2311_v53  ;;  %v2359_v62 = vmul.f32 %v2352_v54, %v2352_v54  ;;  %v3881_v59 = vld [vmem:[%s5016_s11 + $0x1c4] ss:$8 sps:$4 sm:$0xff]   ;;  %v3879_v60 = vld [vmem:[%s5016_s11 + $0x1c0] ss:$8 sps:$4 sm:$0xff]  }
 0xa3b   : > { %v2360_v47 = vmul.f32 %v2356_v57, %v2309_v50  ;;  %v2362_v41 = vmul.f32 %v2358_v12, %v2350_v37  ;;  %v3876_v57 = vld [vmem:[%s5016_s11 + $0x1b0] ss:$8 sps:$4 sm:$0xff]  }
 0xa3c   : > { %v2361_v63 = vmul.f32 %v2357_v61, %v2311_v53  ;;  %v2363_v0 = vmul.f32 %v2359_v62, %v2352_v54  ;;  %v3884_v61 = vld [vmem:[%s5016_s11 + $0x1d4] ss:$8 sps:$4 sm:$0xff]  }
 0xa3d   : > { %v2364_v1 = vmul.f32 0.044715, %v2360_v47  ;;  %v2366_v44 = vmul.f32 0.044715, %v2362_v41  ;;  %v3882_v47 = vld [vmem:[%s5016_s11 + $0x1d0] ss:$8 sps:$4 sm:$0xff]  }
 0xa3e   : > { %v2365_v2 = vmul.f32 0.044715, %v2361_v63  ;;  %v2367_v58 = vmul.f32 0.044715, %v2363_v0  ;;  %v3887_v63 = vld [vmem:[%s5016_s11 + $0x1e4] ss:$8 sps:$4 sm:$0xff]  }
 0xa3f   : > { %v2368_v3 = vadd.f32 %v2364_v1, %v2309_v50  ;;  %v2370_v49 = vadd.f32 %v2366_v44, %v2350_v37  ;;  %v3885_v1 = vld [vmem:[%s5016_s11 + $0x1e0] ss:$8 sps:$4 sm:$0xff]  }
 0xa40   : > { %v2369_v5 = vadd.f32 %v2365_v2, %v2311_v53  ;;  %v2371_v6 = vadd.f32 %v2367_v58, %v2352_v54  ;;  %v3890_v2 = vld [vmem:[%s5016_s11 + $0x1f4] ss:$8 sps:$4 sm:$0xff]  }
 0xa41   : > { %v2372_v7 = vmul.f32 0.7978846, %v2368_v3  ;;  %v2374_v52 = vmul.f32 0.7978846, %v2370_v49  ;;  %v3888_v3 = vld [vmem:[%s5016_s11 + $0x1f0] ss:$8 sps:$4 sm:$0xff]  }
 0xa42   : > { %v2373_v8 = vmul.f32 0.7978846, %v2369_v5  ;;  %v2375_v9 = vmul.f32 0.7978846, %v2371_v6 }
 0xa43   : > { %3919 = vtanh.f32 %v2372_v7  ;;  %v3901_v7 = vld [vmem:[%s5018_s13 + $0x68] sm:$0xff]  }
 0xa44   : > { %3921 = vtanh.f32 %v2373_v8  ;;  %v3902_v8 = vld [vmem:[%s5018_s13 + $0x28] sm:$0xff]   ;;  %3455 = vmatprep.subr.bf16.mxu1 %v3901_v7 }
 0xa45   : > { %3923 = vtanh.f32 %v2375_v9  ;;  %3456 = vmatpush3.bf16.msra.mxu1 %v3902_v8  ;;  %v3903_v9 = vld [vmem:[%s5018_s13 + $0x70] sm:$0xff]  }
 0xa46   : > { %3925 = vtanh.f32 %v2374_v52  ;;  %3457 = vmatprep.subr.bf16.mxu1 %v3903_v9 }
 0xa4d   : > { %v3920_v10 = vpop.eup %3919 }
 0xa4e   : > { %v2380_v13 = vadd.f32 1.0, %v3920_v10  ;;  %v3922_v14 = vpop.eup %3921  ;;  %v3904_v10 = vld [vmem:[%s5018_s13 + $0x30] sm:$0xff]  }
 0xa4f   : > { %v3924_v15 = vpop.eup %3923  ;;  %v2381_v4 = vadd.f32 1.0, %v3922_v14  ;;  %3458 = vmatpush3.bf16.msra.mxu1 %v3904_v10  ;;  %v3906_v14 = vld [vmem:[%s5018_s13 + $0x38] sm:$0xff]  }
 0xa50   : > { %v2384_v17 = vmul.f32 0.5, %v2380_v13  ;;  %v2383_v18 = vadd.f32 1.0, %v3924_v15  ;;  %v3926_v62 = vpop.eup %3925  ;;  %v3905_v13 = vld [vmem:[%s5018_s13 + $0x78] sm:$0xff]   ;;  %v2867_v15 = vld [vmem:[%s5017_s12] sm:$0x3] }
 0xa51   : > { %v2385_v19 = vmul.f32 0.5, %v2381_v4  ;;  %v2382_v0 = vadd.f32 1.0, %v3926_v62  ;;  %3459 = vmatprep.subr.bf16.mxu1 %v3905_v13  ;;  %v2872_v4 = vrot.slane %v2867_v15, %v4257_v24  ;;  %v3417_v24 = vld [vmem:[%s5019_s14] ss:$0 sm:$0xff] }
 0xa52   : > { %v2388_v11 = vmul.f32 %v2384_v17, %v2309_v50  ;;  %v2387_v20 = vmul.f32 0.5, %v2383_v18  ;;  %v3867_v50 = vld [vmem:[%s5016_s11 + $0x180] ss:$8 sps:$4 sm:$0xff]   ;;  %v2876_v17 = vrot.slane %v2867_v15, %v4260_v25 }
 0xa53   : > { %v2389_v21 = vmul.f32 %v2385_v19, %v2311_v53  ;;  %v3870_v53 = vld [vmem:[%s5016_s11 + $0x190] ss:$8 sps:$4 sm:$0xff]   ;;  %v2386_v58 = vmul.f32 0.5, %v2382_v0  ;;  %3460 = vmatpush3.bf16.msra.mxu1 %v3906_v14 }
 0xa54   : > { %v2391_v22 = vmul.f32 %v2387_v20, %v2352_v54  ;;  %v2392_v27 = vpack.c.bf16 %v2388_v11, %v2388_v11  ;;  %v3875_v54 = vld [vmem:[%s5016_s11 + $0x1a4] ss:$8 sps:$4 sm:$0xff]   ;;  %v2877_v20 = vcombine.low %v2872_v4, %v2876_v17 }
 0xa55   : > { %v2393_v23 = vpack.c.bf16 %v2389_v21, %v2389_v21  ;;  %v2390_v5 = vmul.f32 %v2386_v58, %v2350_v37 }
 0xa56   : > { %v2395_v29 = vpack.c.bf16 %v2391_v22, %v2391_v22 }
 0xa57   : > { %2812 = vmatprep.mubr.bf16.mxu0 %v2393_v23  ;;  %v2394_v6 = vpack.c.bf16 %v2390_v5, %v2390_v5 }
 0xa58   : > { %2813 = vmatmul.mubr.bf16.vlgmr.msra.gmra.mrb[12].mxu0 %v2392_v27 }
 0xa59   : > { %2822 = vmatpush1.bf16.msra.mxu0 %v3843_v26  ;;  %2853 = vmatprep.mubr.bf16.mxu0 %v2395_v29 }
 0xa5a   : > { %2823 = vmatprep.subr.bf16.mxu0 %v3848_v28 }
 0xa5d   : > { %2824 = vmatpush1.bf16.msra.mxu0 %v3846_v30 }
 0xa5e   : > { %2825 = vmatprep.subr.bf16.mxu0 %v3851_v31 }
 0xa61   : > { %2826 = vmatpush1.bf16.msra.mxu0 %v3849_v32 }
 0xa62   : > { %2827 = vmatprep.subr.bf16.mxu0 %v3854_v33 }
 0xa65   : > { %2828 = vmatpush1.bf16.msra.mxu0 %v3852_v35 }
 0xa66   : > { %2829 = vmatprep.subr.bf16.mxu0 %v3857_v36 }
 0xa69   : > { %2830 = vmatpush1.bf16.msra.mxu0 %v3855_v38 }
 0xa6a   : > { %2831 = vmatprep.subr.bf16.mxu0 %v3860_v46 }
 0xa6d   : > { %2832 = vmatpush1.bf16.msra.mxu0 %v3858_v39 }
 0xa6e   : > { %2833 = vmatprep.subr.bf16.mxu0 %v3863_v40 }
 0xa71   : > { %2834 = vmatpush1.bf16.msra.mxu0 %v3861_v42 }
 0xa72   : > { %2835 = vmatprep.subr.bf16.mxu0 %v3866_v43 }
 0xa75   : > { %2836 = vmatpush1.bf16.msra.mxu0 %v3864_v45 }
 0xa76   : > { %2837 = vmatprep.subr.bf16.mxu0 %v3869_v48 }
 0xa79   : > { %2838 = vmatpush1.bf16.msra.mxu0 %v3867_v50 }
 0xa7a   : > { %2839 = vmatprep.subr.bf16.mxu0 %v3872_v51 }
 0xa7d   : > { %2840 = vmatpush1.bf16.msra.mxu0 %v3870_v53 }
 0xa7e   : > { %2841 = vmatprep.subr.bf16.mxu0 %v3875_v54 }
 0xa81   : > { %2842 = vmatpush1.bf16.msra.mxu0 %v3873_v55 }
 0xa82   : > { %2843 = vmatprep.subr.bf16.mxu0 %v3878_v56 }
 0xa85   : > { %2844 = vmatpush1.bf16.msra.mxu0 %v3876_v57 }
 0xa86   : > { %2845 = vmatprep.subr.bf16.mxu0 %v3881_v59 }
 0xa89   : > { %2846 = vmatpush1.bf16.msra.mxu0 %v3879_v60 }
 0xa8a   : > { %2847 = vmatprep.subr.bf16.mxu0 %v3884_v61 }
 0xa8d   : > { %2848 = vmatpush1.bf16.msra.mxu0 %v3882_v47 }
 0xa8e   : > { %2849 = vmatprep.subr.bf16.mxu0 %v3887_v63 }
 0xa91   : > { %2850 = vmatpush1.bf16.msra.mxu0 %v3885_v1 }
 0xa92   : > { %2851 = vmatprep.subr.bf16.mxu0 %v3890_v2 }
 0xa95   : > { %2852 = vmatpush1.bf16.msra.mxu0 %v3888_v3 }
 0xa98   : > { %2854 = vmatmul.mubr.bf16.vlgmr.msra.gmra.mrb[12].mxu0 %v2394_v6 }
 0xb6b   : > { %v2855_v18 = vpop.f32.mrb[12].mxu0 }
 0xb6c   : > { %v2857_v19 = vpop.f32.mrb[13].mxu0 }
 0xb6d   : > { %v2864_v11 = vcombine.low %v2855_v18, %v2857_v19  ;;  %v2859_v21 = vpop.f32.mrb[14].mxu0 }
 0xb6e   : > { %v2860_v22 = vpop.f32.mrb[15].mxu0 }
 0xb6f   : > { %v2866_v23 = vadd.f32 %v2864_v11, %v4517_v16 }
 0xb71   : > { %v2879_v26 = vadd.f32 %v2877_v20, %v2866_v23 }
 0xb73   : > { %v2881_v27 = vcombine.high %v2879_v26, %v2879_v26  ;;  %v2883_v29 = vpack.c.bf16 %v2879_v26, %v2879_v26 }
 0xb75   : > { %v2884_v28 = vpack.c.bf16 %v2881_v27, %v2881_v27 }
 0xb77   : > { %3052 = vmatprep.mubr.bf16.mxu1 %v2884_v28 }
 0xb78   : > { %3053 = vmatmul.mubr.bf16.vlgmr.msra.gmra.mrb[28].mxu1 %v2883_v29 }
 0xc4b   : > { %v3461_v30 = vpop.f32.mrb[28].mxu1 }
 0xc4c   : > { %v3462_v25 = vpop.f32.mrb[29].mxu1 }
 0xc4d   : > { %v3463_v31 = vadd.f32 %v3462_v25, %v3461_v30  ;;  %v3464_v32 = vpop.f32.mrb[30].mxu1 }
 0xc4e   : > { %v3465_v16 = vpop.f32.mrb[31].mxu1 }
 0xc4f   : > { %v3055_v33 = vadd.f32 %v3463_v31, %v3417_v24 }
 0xc51   : > { %3061 = vst.msk [vmem:[%s525_s30] sm:$0xf] %vm3060_vm5, %v3055_v33  ;;  %v3062_v34 = vsel %vm3060_vm5, %v3055_v33, 0.0 }
 0xc52   : > { %v3063_v35 = vrot.slane %v3062_v34, 4 }
 0xc54   : > { %v3064_v36 = vadd.f32 %v3063_v35, %v3062_v34 }
 0xc56   : > { %v3065_v37 = vrot.slane %v3064_v36, 2 }
 0xc58   : > { %v3066_v38 = vadd.f32 %v3065_v37, %v3064_v36 }
 0xc5a   : > { %v3067_v46 = vrot.slane %v3066_v38, 1 }
 0xc5c   : > { %v3068_v12 = vadd.f32 %v3067_v46, %v3066_v38 }
 0xc5e   : > { %v3070_v39 = vmul.f32 0.25, %v3068_v12 }
 0xc60   : > { %3072 = vst.msk [vmem:[%s528_s17] sm:$0x1] %vm3071_vm6, %v3070_v39 }
 0xc61 PF: > { %s27_s21 = sadd.s32 1, %s3934_s21  }
 0xc62   : > { %p24_p4 = scmp.ge.s32.totalorder %s27_s21, 4  }
 0xc64   :  { %26 = sbr.rel (!%p24_p4) target bundleno = 2 (0x2), region = 122 }

</bundles_post_ra>
